<compile_context>
chip_gen: v7x
topology: tpu7x:2x2x1
jax: 0.10.0
libtpu: 0.0.40
codegen_flags: <defaults>
</compile_context>

<pallas_src>
import math
import numpy as np
import jax
import jax.numpy as jnp
from jax import lax
from jax.experimental import pallas as pl
from jax.experimental.pallas import tpu as pltpu

NGF = 64
T_SAMPLES = 216

# (name, Cin, Cout, K, stride, pad) for the ConvTranspose1d stack.
CONV_CFGS = (
    ("w1", 50, NGF * 32, 4, 1, 0),
    ("w2", NGF * 32, NGF * 16, 4, 1, 0),
    ("w3", NGF * 16, NGF * 8, 4, 2, 1),
    ("w4", NGF * 8, NGF * 4, 3, 2, 1),
    ("w5", NGF * 4, NGF * 2, 4, 2, 1),
    ("w6", NGF * 2, NGF, 4, 2, 1),
    ("w7", NGF, 1, 4, 2, 1),
)


def _pick_tile(n, t_max):
    """Largest 128-multiple divisor of n that is <= t_max (or n itself if small)."""
    if n <= t_max:
        return n
    for t in range(t_max, 127, -128):
        if n % t == 0:
            return t
    return n  # single full-size block (always an exact divisor)


# ----------------------------------------------------------------------------
# Fused (A @ B) + BatchNorm(batch stats) + (Leaky)ReLU Pallas kernel.
# A: [M, K], B: [K, N]  ->  f32 [M, N].  BN normalizes each column over axis 0
# (== per-channel over batch*length for the conv stack, per-feature for fc1).
# Grid = (N tiles [parallel], K tiles [arbitrary]); the output block is resident
# across the K axis and normalized/activated in the last-K epilogue.
# ----------------------------------------------------------------------------
def matmul_bn_act(a, b, *, neg_slope, tk_max=1024, tn_max=512):
    M, K = a.shape
    K2, N = b.shape
    assert K == K2
    tk = _pick_tile(K, tk_max)
    tn = _pick_tile(N, tn_max)
    kt = K // tk
    nt = N // tn

    def kernel(a_ref, b_ref, o_ref, acc_ref):
        @pl.when(pl.program_id(1) == 0)
        def _():
            acc_ref[...] = jnp.zeros_like(acc_ref)

        acc_ref[...] += jnp.dot(a_ref[...], b_ref[...],
                                preferred_element_type=jnp.float32)

        @pl.when(pl.program_id(1) == pl.num_programs(1) - 1)
        def _():
            y = acc_ref[...]
            mean = jnp.mean(y, axis=0, keepdims=True)
            yc = y - mean
            var = jnp.mean(yc * yc, axis=0, keepdims=True)  # biased var (torch train BN)
            yn = yc * lax.rsqrt(var + 1e-5)
            o_ref[...] = jnp.where(yn > 0, yn, neg_slope * yn)

    return pl.pallas_call(
        kernel,
        out_shape=jax.ShapeDtypeStruct((M, N), jnp.float32),
        grid=(nt, kt),
        in_specs=[pl.BlockSpec((M, tk), lambda j, k: (0, k)),
                  pl.BlockSpec((tk, tn), lambda j, k: (k, j))],
        out_specs=pl.BlockSpec((M, tn), lambda j, k: (0, j)),
        scratch_shapes=[pltpu.VMEM((M, tn), jnp.float32)],
        compiler_params=pltpu.CompilerParams(
            dimension_semantics=("parallel", "arbitrary")),
    )(a, b)


# ----------------------------------------------------------------------------
# Fused fc2 + bias + sigmoid + affine + Euler ODE (closed form) kernel.
# h1: [B, 25] (post fc1+BN+leaky), v0: [B, 1] -> z trajectory [B, 216].
# Euler recurrence z_{n+1} = (1-h) z_n + h g_n is evaluated in closed form:
#   z_n = r^n z0 + h * sum_{j<n} r^{n-1-j} g_j  =  v0 * rpow + h * (g @ Mprop),
# with constant rpow [1,T] and lower-triangular Mprop [T,T] precomputed on host.
# ----------------------------------------------------------------------------
def euler_ode(h1, fc2_w, fc2_b, v0, T=T_SAMPLES):
    B = h1.shape[0]
    h_step = 1.0 / T
    r = 1.0 - h_step
    omega = 2.0 * math.pi
    A0 = 0.005
    f2 = 0.25
    theta0 = math.atan2(-0.9085616622823985, -0.417750770388669)
    two_pi = 2.0 * math.pi

    const = jnp.asarray(
        [[1.2, 0.25, -np.pi / 3.0, -5.0, 0.1, -np.pi / 12.0, 20.0, 0.1, 0.0,
          -7.5, 0.1, np.pi / 12.0, 0.3, 0.4, np.pi / 2.0]], dtype=jnp.float32)

    n_idx = np.arange(T)
    expo = n_idx[None, :] - 1 - n_idx[:, None]                      # [T(j), T(n)]
    mprop = np.where(n_idx[:, None] < n_idx[None, :], r ** expo, 0.0).astype(np.float32)
    rpow = (r ** n_idx).astype(np.float32)[None, :]                 # [1, T]
    mprop = jnp.asarray(mprop)
    rpow = jnp.asarray(rpow)

    def wrap(a):
        return a - two_pi * jnp.floor((a + math.pi) / two_pi)

    def kernel(h_ref, w_ref, b_ref, c_ref, v0_ref, rpow_ref, mprop_ref, z_ref):
        # fc2 + bias + sigmoid + affine -> ODE parameters p [B, 15]
        y = jnp.dot(h_ref[...], w_ref[...],
                    preferred_element_type=jnp.float32) + b_ref[...]
        p = 0.1 * jax.nn.sigmoid(y) + c_ref[...]

        # phase trajectory and baseline forcing            -> [1, T]
        t = lax.broadcasted_iota(jnp.int32, (1, T), 1).astype(jnp.float32) * h_step
        theta = wrap(theta0 + omega * t)
        g = A0 * jnp.sin(2.0 * math.pi * f2 * t)

        # Gaussian forcing terms for the 5 waves (P,Q,R,S,T) -> [B, T]
        for i in range(5):
            a_i = p[:, 3 * i + 0:3 * i + 1]
            b_i = p[:, 3 * i + 1:3 * i + 2]
            th_i = p[:, 3 * i + 2:3 * i + 3]
            dth = wrap(theta - th_i)
            g = g - a_i * dth * jnp.exp(-(dth * dth) / (2.0 * b_i * b_i))

        # closed-form forward Euler, whole trajectory in one matmul
        z_ref[...] = v0_ref[...] * rpow_ref[...] + h_step * jnp.dot(
            g, mprop_ref[...], preferred_element_type=jnp.float32)

    return pl.pallas_call(
        kernel, out_shape=jax.ShapeDtypeStruct((B, T), jnp.float32),
    )(h1, fc2_w, fc2_b, const, v0, rpow, mprop)


# ----------------------------------------------------------------------------
# Fused final ConvTranspose1d (Cout=1) + scale_signal + (z + z_delta) kernel.
# aT: [B, K*Cin, L_out] im2col patches (transposed), w_row: [1, K*Cin],
# z: [B, L_out] -> [B, L_out] lane-dense output.
# ----------------------------------------------------------------------------
def final_scale_add(aT, w_row, z, min_val=-0.01563, max_val=0.042557):
    B = z.shape[0]

    def kernel(aT_ref, w_ref, z_ref, o_ref):
        w = w_ref[...]                                                   # [1, K*Cin]
        for b in range(B):                                               # static unroll
            y = jnp.dot(w, aT_ref[b], preferred_element_type=jnp.float32)  # [1, L]
            zmin = jnp.min(y, axis=1, keepdims=True)
            zmax = jnp.max(y, axis=1, keepdims=True)
            # identical to PyTorch scale_signal: (z - zmin) * max_val / zrange + min_val
            scaled = (y - zmin) * max_val / (zmax - zmin) + min_val
            o_ref[pl.ds(b, 1), :] = scaled + z_ref[pl.ds(b, 1), :]

    return pl.pallas_call(
        kernel, out_shape=jax.ShapeDtypeStruct(z.shape, jnp.float32),
    )(aT, w_row, z)


# ----------------------------------------------------------------------------
# ConvTranspose1d im2col glue (dilate / pad / gather in XLA; tensors are tiny
# at this batch size, weight traffic dominates and lives in the Pallas matmul).
# ----------------------------------------------------------------------------
def _im2col_patches(x_nlc, K, stride, pad):
    """x_nlc: [B, L, Cin] -> patches [B, L_out, K, Cin], L_out."""
    B, L, Cin = x_nlc.shape
    L_out = (L - 1) * stride - 2 * pad + K
    if stride > 1:
        xd = jnp.zeros((B, (L - 1) * stride + 1, Cin), x_nlc.dtype)
        xd = xd.at[:, ::stride, :].set(x_nlc)
    else:
        xd = x_nlc
    p = K - 1 - pad
    xp = jnp.pad(xd, ((0, 0), (p, p), (0, 0)))
    idx = jnp.arange(L_out)[:, None] + jnp.arange(K)[None, :]            # [L_out, K]
    patches = xp[:, idx, :]                                              # [B, L_out, K, Cin]
    return patches, L_out


# ----------------------------------------------------------------------------
# Model forward pass
# ----------------------------------------------------------------------------
def combined_generator(params, x, v0):
    B = x.shape[0]

    # --- ODE branch: fc1 (+fused BN+leaky_relu), then fc2+sigmoid+Euler fused ---
    h1 = matmul_bn_act(x, params["fc1_w"], neg_slope=0.01)               # [B, 25]
    z = euler_ode(h1, params["fc2_w"], params["fc2_b"], v0)              # [B, 216]

    # --- Delta branch: ConvTranspose1d stack as fused (matmul + BN + ReLU) ---
    h = x.reshape(B, 1, 50).astype(jnp.bfloat16)                         # channels-last
    for name, cin, cout, k, s, p in CONV_CFGS[:-1]:
        patches, l_out = _im2col_patches(h, k, s, p)
        a = patches.reshape(B * l_out, k * cin)
        y = matmul_bn_act(a, params[name], neg_slope=0.0)                # conv+BN+ReLU
        h = y.reshape(B, l_out, cout).astype(jnp.bfloat16)

    # --- final ConvTranspose1d (Cout=1) + scale_signal + add z, lane-dense ---
    _, cin, _, k, s, p = CONV_CFGS[-1]
    patches, l_out = _im2col_patches(h, k, s, p)                         # [B, 216, K, Cin]
    aT = jnp.transpose(patches, (0, 2, 3, 1)).reshape(B, k * cin, l_out)  # [B, K*Cin, 216]
    return final_scale_add(aT, params["w7_row"], z)                      # [B, 216]


# ----------------------------------------------------------------------------
# Deterministic parameter init (shapes from the PyTorch __init__, ngf = 64).
# ConvTranspose weights are transformed to matmul layout ONCE here (bf16).
# ----------------------------------------------------------------------------
def _convT_to_matmul_weight(w):
    """PyTorch ConvTranspose1d weight [Cin, Cout, K] -> im2col matmul weight [K*Cin, Cout]."""
    Cin, Cout, K = w.shape
    return jnp.transpose(jnp.flip(w, axis=2), (2, 0, 1)).reshape(K * Cin, Cout)


def init_params(key):
    ks = jax.random.split(key, 10)

    def w(k, shape, fan_in):
        return jax.random.normal(k, shape, jnp.float32) / np.sqrt(float(fan_in))

    ngf = NGF
    raw = {
        "w1": w(ks[0], (50, ngf * 32, 4), 50 * 4),
        "w2": w(ks[1], (ngf * 32, ngf * 16, 4), ngf * 32 * 4),
        "w3": w(ks[2], (ngf * 16, ngf * 8, 4), ngf * 16 * 4),
        "w4": w(ks[3], (ngf * 8, ngf * 4, 3), ngf * 8 * 3),
        "w5": w(ks[4], (ngf * 4, ngf * 2, 4), ngf * 4 * 4),
        "w6": w(ks[5], (ngf * 2, ngf, 4), ngf * 2 * 4),
        "w7": w(ks[6], (ngf, 1, 4), ngf * 4),
    }
    params = {}
    # Pre-transposed bf16 matmul weights (weight-bandwidth bound conv stack).
    for name in ("w1", "w2", "w3", "w4", "w5", "w6"):
        params[name] = _convT_to_matmul_weight(raw[name]).astype(jnp.bfloat16)
    # Final Cout=1 layer stored as a [1, K*Cin] row for the lane-dense fused kernel.
    params["w7_row"] = _convT_to_matmul_weight(raw["w7"]).T.astype(jnp.bfloat16)
    # Linear layers [in, out].  fc1 bias omitted: train-mode BN (beta=0) cancels it.
    params["fc1_w"] = w(ks[7], (50, 25), 50)
    params["fc2_w"] = w(ks[8], (25, 15), 25)
    params["fc2_b"] = 0.01 * jax.random.normal(ks[9], (1, 15), jnp.float32)
    return params


if __name__ == "__main__":
    B = 2
    key = jax.random.PRNGKey(0)
    k_x, k_v = jax.random.split(key)
    x = jax.random.normal(k_x, (B, 50), jnp.float32)          # noise input
    v0 = 0.01 * jax.random.normal(k_v, (B, 1), jnp.float32)   # initial z for Euler

    params = init_params(jax.random.PRNGKey(42))

    fwd = jax.jit(combined_generator)
    out = jax.block_until_ready(fwd(params, x, v0))

    assert out.shape == (B, T_SAMPLES), out.shape
    assert bool(jnp.all(jnp.isfinite(out)))
    print("KERNEL_OK")
</pallas_src>

<mosaic_0001>
module attributes {stable_mosaic.version = 11 : i64} {
  func.func @kernel(%arg0: i32, %arg1: i32, %arg2: memref<8x200xbf16, #tpu.memory_space<vmem>>, %arg3: memref<200x512xbf16, #tpu.memory_space<vmem>>, %arg4: memref<8x512xf32, #tpu.memory_space<vmem>>, %arg5: memref<8x512xf32, #tpu.memory_space<vmem>>) attributes {dimension_semantics = [#tpu.dimension_semantics<parallel>, #tpu.dimension_semantics<arbitrary>], iteration_bounds = array<i64: 4, 1>, scalar_prefetch = 0 : i64, scratch_operands = 1 : i64, tpu.core_type = #tpu.core_type<tc>, window_params = [{transform_indices = @transform_0, window_bounds = array<i64: 8, 200>}, {transform_indices = @transform_1, window_bounds = array<i64: 200, 512>}, {transform_indices = @transform_2, window_bounds = array<i64: 8, 512>}]} {
    %c0_i32 = arith.constant 0 : i32
    %0 = arith.cmpi eq, %arg1, %c0_i32 : i32
    %1 = arith.extui %0 : i1 to i32
    %c0_i32_0 = arith.constant 0 : i32
    %2 = arith.cmpi ne, %1, %c0_i32_0 : i32
    scf.if %2 {
      %cst_10 = arith.constant 0.000000e+00 : f32
      %12 = vector.broadcast %cst_10 : f32 to vector<8x512xf32>
      %c0_11 = arith.constant 0 : index
      %c0_12 = arith.constant 0 : index
      %13 = vector.load %arg5[%c0_11, %c0_12] : memref<8x512xf32, #tpu.memory_space<vmem>>, vector<8x512xf32>
      tpu.vector_store %arg5[%c0_11, %c0_12], %12 {strides = array<i32>} : memref<8x512xf32, #tpu.memory_space<vmem>>, vector<8x512xf32>,
    } else {
    }
    %c0 = arith.constant 0 : index
    %c0_1 = arith.constant 0 : index
    %3 = vector.load %arg5[%c0, %c0_1] : memref<8x512xf32, #tpu.memory_space<vmem>>, vector<8x512xf32>
    %c0_2 = arith.constant 0 : index
    %c0_3 = arith.constant 0 : index
    %4 = vector.load %arg2[%c0_2, %c0_3] : memref<8x200xbf16, #tpu.memory_space<vmem>>, vector<8x200xbf16>
    %c0_4 = arith.constant 0 : index
    %c0_5 = arith.constant 0 : index
    %5 = vector.load %arg3[%c0_4, %c0_5] : memref<200x512xbf16, #tpu.memory_space<vmem>>, vector<200x512xbf16>
    %cst = arith.constant dense<0.000000e+00> : vector<8x512xf32>
    %6 = tpu.matmul %4, %5, %cst {dimension_numbers = #tpu.dot_dimension_numbers<[1], [0], [0], [1], [0, 0, 1, 1], [], []>} : vector<8x200xbf16>, vector<200x512xbf16>, vector<8x512xf32> -> vector<8x512xf32>
    %7 = arith.addf %3, %6 : vector<8x512xf32>
    %c0_6 = arith.constant 0 : index
    %c0_7 = arith.constant 0 : index
    %8 = vector.load %arg5[%c0_6, %c0_7] : memref<8x512xf32, #tpu.memory_space<vmem>>, vector<8x512xf32>
    tpu.vector_store %arg5[%c0_6, %c0_7], %7 {strides = array<i32>} : memref<8x512xf32, #tpu.memory_space<vmem>>, vector<8x512xf32>,
    %c0_i32_8 = arith.constant 0 : i32
    %9 = arith.cmpi eq, %arg1, %c0_i32_8 : i32
    %10 = arith.extui %9 : i1 to i32
    %c0_i32_9 = arith.constant 0 : i32
    %11 = arith.cmpi ne, %10, %c0_i32_9 : i32
    scf.if %11 {
      %c0_10 = arith.constant 0 : index
      %c0_11 = arith.constant 0 : index
      %12 = vector.load %arg5[%c0_10, %c0_11] : memref<8x512xf32, #tpu.memory_space<vmem>>, vector<8x512xf32>
      %cst_12 = arith.constant dense<0.000000e+00> : vector<512xf32>
      %13 = vector.multi_reduction <add>, %12, %cst_12 [0] : vector<8x512xf32> to vector<512xf32>
      %14 = vector.shape_cast %13 : vector<512xf32> to vector<1x512xf32>
      %cst_13 = arith.constant 8.000000e+00 : f32
      %15 = vector.broadcast %cst_13 : f32 to vector<1x512xf32>
      %16 = arith.divf %14, %15 : vector<1x512xf32>
      %17 = vector.broadcast %16 : vector<1x512xf32> to vector<8x512xf32>
      %18 = arith.subf %12, %17 : vector<8x512xf32>
      %19 = arith.mulf %18, %18 : vector<8x512xf32>
      %cst_14 = arith.constant dense<0.000000e+00> : vector<512xf32>
      %20 = vector.multi_reduction <add>, %19, %cst_14 [0] : vector<8x512xf32> to vector<512xf32>
      %21 = vector.shape_cast %20 : vector<512xf32> to vector<1x512xf32>
      %cst_15 = arith.constant 8.000000e+00 : f32
      %22 = vector.broadcast %cst_15 : f32 to vector<1x512xf32>
      %23 = arith.divf %21, %22 : vector<1x512xf32>
      %cst_16 = arith.constant 9.99999974E-6 : f32
      %24 = vector.broadcast %cst_16 : f32 to vector<1x512xf32>
      %25 = arith.addf %23, %24 : vector<1x512xf32>
      %26 = math.rsqrt %25 : vector<1x512xf32>
      %27 = vector.broadcast %26 : vector<1x512xf32> to vector<8x512xf32>
      %28 = arith.mulf %18, %27 : vector<8x512xf32>
      %cst_17 = arith.constant 0.000000e+00 : f32
      %29 = vector.broadcast %cst_17 : f32 to vector<8x512xf32>
      %30 = arith.cmpf ogt, %28, %29 : vector<8x512xf32>
      %cst_18 = arith.constant 0.000000e+00 : f32
      %31 = vector.broadcast %cst_18 : f32 to vector<8x512xf32>
      %32 = arith.mulf %31, %28 : vector<8x512xf32>
      %33 = arith.select %30, %28, %32 : vector<8x512xi1>, vector<8x512xf32>
      %c0_19 = arith.constant 0 : index
      %c0_20 = arith.constant 0 : index
      %34 = vector.load %arg4[%c0_19, %c0_20] : memref<8x512xf32, #tpu.memory_space<vmem>>, vector<8x512xf32>
      tpu.vector_store %arg4[%c0_19, %c0_20], %33 {strides = array<i32>} : memref<8x512xf32, #tpu.memory_space<vmem>>, vector<8x512xf32>,
    } else {
    }
    return
  }
  func.func @transform_0(%arg0: i32, %arg1: i32) -> (i32, i32) {
    %c0_i32 = arith.constant 0 : i32
    %c0_i32_0 = arith.constant 0 : i32
    return %c0_i32, %arg1 : i32, i32
  }
  func.func @transform_1(%arg0: i32, %arg1: i32) -> (i32, i32) {
    %c0_i32 = arith.constant 0 : i32
    return %arg1, %arg0 : i32, i32
  }
  func.func @transform_2(%arg0: i32, %arg1: i32) -> (i32, i32) {
    %c0_i32 = arith.constant 0 : i32
    %c0_i32_0 = arith.constant 0 : i32
    return %c0_i32, %arg0 : i32, i32
  }
}

module attributes {stable_mosaic.version = 11 : i64} {
  func.func @kernel(%arg0: i32, %arg1: i32, %arg2: memref<14x1024xbf16, #tpu.memory_space<vmem>>, %arg3: memref<1024x512xbf16, #tpu.memory_space<vmem>>, %arg4: memref<14x512xf32, #tpu.memory_space<vmem>>, %arg5: memref<14x512xf32, #tpu.memory_space<vmem>>) attributes {dimension_semantics = [#tpu.dimension_semantics<parallel>, #tpu.dimension_semantics<arbitrary>], iteration_bounds = array<i64: 2, 8>, scalar_prefetch = 0 : i64, scratch_operands = 1 : i64, tpu.core_type = #tpu.core_type<tc>, window_params = [{transform_indices = @transform_0, window_bounds = array<i64: 14, 1024>}, {transform_indices = @transform_1, window_bounds = array<i64: 1024, 512>}, {transform_indices = @transform_2, window_bounds = array<i64: 14, 512>}]} {
    %c0_i32 = arith.constant 0 : i32
    %0 = arith.cmpi eq, %arg1, %c0_i32 : i32
    %1 = arith.extui %0 : i1 to i32
    %c0_i32_0 = arith.constant 0 : i32
    %2 = arith.cmpi ne, %1, %c0_i32_0 : i32
    scf.if %2 {
      %cst_9 = arith.constant 0.000000e+00 : f32
      %12 = vector.broadcast %cst_9 : f32 to vector<14x512xf32>
      %c0_10 = arith.constant 0 : index
      %c0_11 = arith.constant 0 : index
      %13 = vector.load %arg5[%c0_10, %c0_11] : memref<14x512xf32, #tpu.memory_space<vmem>>, vector<14x512xf32>
      tpu.vector_store %arg5[%c0_10, %c0_11], %12 {strides = array<i32>} : memref<14x512xf32, #tpu.memory_space<vmem>>, vector<14x512xf32>,
    } else {
    }
    %c0 = arith.constant 0 : index
    %c0_1 = arith.constant 0 : index
    %3 = vector.load %arg5[%c0, %c0_1] : memref<14x512xf32, #tpu.memory_space<vmem>>, vector<14x512xf32>
    %c0_2 = arith.constant 0 : index
    %c0_3 = arith.constant 0 : index
    %4 = vector.load %arg2[%c0_2, %c0_3] : memref<14x1024xbf16, #tpu.memory_space<vmem>>, vector<14x1024xbf16>
    %c0_4 = arith.constant 0 : index
    %c0_5 = arith.constant 0 : index
    %5 = vector.load %arg3[%c0_4, %c0_5] : memref<1024x512xbf16, #tpu.memory_space<vmem>>, vector<1024x512xbf16>
    %cst = arith.constant dense<0.000000e+00> : vector<14x512xf32>
    %6 = tpu.matmul %4, %5, %cst {dimension_numbers = #tpu.dot_dimension_numbers<[1], [0], [0], [1], [0, 0, 1, 1], [], []>} : vector<14x1024xbf16>, vector<1024x512xbf16>, vector<14x512xf32> -> vector<14x512xf32>
    %7 = arith.addf %3, %6 : vector<14x512xf32>
    %c0_6 = arith.constant 0 : index
    %c0_7 = arith.constant 0 : index
    %8 = vector.load %arg5[%c0_6, %c0_7] : memref<14x512xf32, #tpu.memory_space<vmem>>, vector<14x512xf32>
    tpu.vector_store %arg5[%c0_6, %c0_7], %7 {strides = array<i32>} : memref<14x512xf32, #tpu.memory_space<vmem>>, vector<14x512xf32>,
    %c7_i32 = arith.constant 7 : i32
    %9 = arith.cmpi eq, %arg1, %c7_i32 : i32
    %10 = arith.extui %9 : i1 to i32
    %c0_i32_8 = arith.constant 0 : i32
    %11 = arith.cmpi ne, %10, %c0_i32_8 : i32
    scf.if %11 {
      %c0_9 = arith.constant 0 : index
      %c0_10 = arith.constant 0 : index
      %12 = vector.load %arg5[%c0_9, %c0_10] : memref<14x512xf32, #tpu.memory_space<vmem>>, vector<14x512xf32>
      %cst_11 = arith.constant dense<0.000000e+00> : vector<512xf32>
      %13 = vector.multi_reduction <add>, %12, %cst_11 [0] : vector<14x512xf32> to vector<512xf32>
      %14 = vector.shape_cast %13 : vector<512xf32> to vector<1x512xf32>
      %cst_12 = arith.constant 1.400000e+01 : f32
      %15 = vector.broadcast %cst_12 : f32 to vector<1x512xf32>
      %16 = arith.divf %14, %15 : vector<1x512xf32>
      %17 = vector.broadcast %16 : vector<1x512xf32> to vector<14x512xf32>
      %18 = arith.subf %12, %17 : vector<14x512xf32>
      %19 = arith.mulf %18, %18 : vector<14x512xf32>
      %cst_13 = arith.constant dense<0.000000e+00> : vector<512xf32>
      %20 = vector.multi_reduction <add>, %19, %cst_13 [0] : vector<14x512xf32> to vector<512xf32>
      %21 = vector.shape_cast %20 : vector<512xf32> to vector<1x512xf32>
      %cst_14 = arith.constant 1.400000e+01 : f32
      %22 = vector.broadcast %cst_14 : f32 to vector<1x512xf32>
      %23 = arith.divf %21, %22 : vector<1x512xf32>
      %cst_15 = arith.constant 9.99999974E-6 : f32
      %24 = vector.broadcast %cst_15 : f32 to vector<1x512xf32>
      %25 = arith.addf %23, %24 : vector<1x512xf32>
      %26 = math.rsqrt %25 : vector<1x512xf32>
      %27 = vector.broadcast %26 : vector<1x512xf32> to vector<14x512xf32>
      %28 = arith.mulf %18, %27 : vector<14x512xf32>
      %cst_16 = arith.constant 0.000000e+00 : f32
      %29 = vector.broadcast %cst_16 : f32 to vector<14x512xf32>
      %30 = arith.cmpf ogt, %28, %29 : vector<14x512xf32>
      %cst_17 = arith.constant 0.000000e+00 : f32
      %31 = vector.broadcast %cst_17 : f32 to vector<14x512xf32>
      %32 = arith.mulf %31, %28 : vector<14x512xf32>
      %33 = arith.select %30, %28, %32 : vector<14x512xi1>, vector<14x512xf32>
      %c0_18 = arith.constant 0 : index
      %c0_19 = arith.constant 0 : index
      %34 = vector.load %arg4[%c0_18, %c0_19] : memref<14x512xf32, #tpu.memory_space<vmem>>, vector<14x512xf32>
      tpu.vector_store %arg4[%c0_18, %c0_19], %33 {strides = array<i32>} : memref<14x512xf32, #tpu.memory_space<vmem>>, vector<14x512xf32>,
    } else {
    }
    return
  }
  func.func @transform_0(%arg0: i32, %arg1: i32) -> (i32, i32) {
    %c0_i32 = arith.constant 0 : i32
    %c0_i32_0 = arith.constant 0 : i32
    return %c0_i32, %arg1 : i32, i32
  }
  func.func @transform_1(%arg0: i32, %arg1: i32) -> (i32, i32) {
    %c0_i32 = arith.constant 0 : i32
    return %arg1, %arg0 : i32, i32
  }
  func.func @transform_2(%arg0: i32, %arg1: i32) -> (i32, i32) {
    %c0_i32 = arith.constant 0 : i32
    %c0_i32_0 = arith.constant 0 : i32
    return %c0_i32, %arg0 : i32, i32
  }
}

module attributes {stable_mosaic.version = 11 : i64} {
  func.func @kernel(%arg0: i32, %arg1: i32, %arg2: memref<28x1024xbf16, #tpu.memory_space<vmem>>, %arg3: memref<1024x512xbf16, #tpu.memory_space<vmem>>, %arg4: memref<28x512xf32, #tpu.memory_space<vmem>>, %arg5: memref<28x512xf32, #tpu.memory_space<vmem>>) attributes {dimension_semantics = [#tpu.dimension_semantics<parallel>, #tpu.dimension_semantics<arbitrary>], iteration_bounds = array<i64: 1, 4>, scalar_prefetch = 0 : i64, scratch_operands = 1 : i64, tpu.core_type = #tpu.core_type<tc>, window_params = [{transform_indices = @transform_0, window_bounds = array<i64: 28, 1024>}, {transform_indices = @transform_1, window_bounds = array<i64: 1024, 512>}, {transform_indices = @transform_2, window_bounds = array<i64: 28, 512>}]} {
    %c0_i32 = arith.constant 0 : i32
    %0 = arith.cmpi eq, %arg1, %c0_i32 : i32
    %1 = arith.extui %0 : i1 to i32
    %c0_i32_0 = arith.constant 0 : i32
    %2 = arith.cmpi ne, %1, %c0_i32_0 : i32
    scf.if %2 {
      %cst_9 = arith.constant 0.000000e+00 : f32
      %12 = vector.broadcast %cst_9 : f32 to vector<28x512xf32>
      %c0_10 = arith.constant 0 : index
      %c0_11 = arith.constant 0 : index
      %13 = vector.load %arg5[%c0_10, %c0_11] : memref<28x512xf32, #tpu.memory_space<vmem>>, vector<28x512xf32>
      tpu.vector_store %arg5[%c0_10, %c0_11], %12 {strides = array<i32>} : memref<28x512xf32, #tpu.memory_space<vmem>>, vector<28x512xf32>,
    } else {
    }
    %c0 = arith.constant 0 : index
    %c0_1 = arith.constant 0 : index
    %3 = vector.load %arg5[%c0, %c0_1] : memref<28x512xf32, #tpu.memory_space<vmem>>, vector<28x512xf32>
    %c0_2 = arith.constant 0 : index
    %c0_3 = arith.constant 0 : index
    %4 = vector.load %arg2[%c0_2, %c0_3] : memref<28x1024xbf16, #tpu.memory_space<vmem>>, vector<28x1024xbf16>
    %c0_4 = arith.constant 0 : index
    %c0_5 = arith.constant 0 : index
    %5 = vector.load %arg3[%c0_4, %c0_5] : memref<1024x512xbf16, #tpu.memory_space<vmem>>, vector<1024x512xbf16>
    %cst = arith.constant dense<0.000000e+00> : vector<28x512xf32>
    %6 = tpu.matmul %4, %5, %cst {dimension_numbers = #tpu.dot_dimension_numbers<[1], [0], [0], [1], [0, 0, 1, 1], [], []>} : vector<28x1024xbf16>, vector<1024x512xbf16>, vector<28x512xf32> -> vector<28x512xf32>
    %7 = arith.addf %3, %6 : vector<28x512xf32>
    %c0_6 = arith.constant 0 : index
    %c0_7 = arith.constant 0 : index
    %8 = vector.load %arg5[%c0_6, %c0_7] : memref<28x512xf32, #tpu.memory_space<vmem>>, vector<28x512xf32>
    tpu.vector_store %arg5[%c0_6, %c0_7], %7 {strides = array<i32>} : memref<28x512xf32, #tpu.memory_space<vmem>>, vector<28x512xf32>,
    %c3_i32 = arith.constant 3 : i32
    %9 = arith.cmpi eq, %arg1, %c3_i32 : i32
    %10 = arith.extui %9 : i1 to i32
    %c0_i32_8 = arith.constant 0 : i32
    %11 = arith.cmpi ne, %10, %c0_i32_8 : i32
    scf.if %11 {
      %c0_9 = arith.constant 0 : index
      %c0_10 = arith.constant 0 : index
      %12 = vector.load %arg5[%c0_9, %c0_10] : memref<28x512xf32, #tpu.memory_space<vmem>>, vector<28x512xf32>
      %cst_11 = arith.constant dense<0.000000e+00> : vector<512xf32>
      %13 = vector.multi_reduction <add>, %12, %cst_11 [0] : vector<28x512xf32> to vector<512xf32>
      %14 = vector.shape_cast %13 : vector<512xf32> to vector<1x512xf32>
      %cst_12 = arith.constant 2.800000e+01 : f32
      %15 = vector.broadcast %cst_12 : f32 to vector<1x512xf32>
      %16 = arith.divf %14, %15 : vector<1x512xf32>
      %17 = vector.broadcast %16 : vector<1x512xf32> to vector<28x512xf32>
      %18 = arith.subf %12, %17 : vector<28x512xf32>
      %19 = arith.mulf %18, %18 : vector<28x512xf32>
      %cst_13 = arith.constant dense<0.000000e+00> : vector<512xf32>
      %20 = vector.multi_reduction <add>, %19, %cst_13 [0] : vector<28x512xf32> to vector<512xf32>
      %21 = vector.shape_cast %20 : vector<512xf32> to vector<1x512xf32>
      %cst_14 = arith.constant 2.800000e+01 : f32
      %22 = vector.broadcast %cst_14 : f32 to vector<1x512xf32>
      %23 = arith.divf %21, %22 : vector<1x512xf32>
      %cst_15 = arith.constant 9.99999974E-6 : f32
      %24 = vector.broadcast %cst_15 : f32 to vector<1x512xf32>
      %25 = arith.addf %23, %24 : vector<1x512xf32>
      %26 = math.rsqrt %25 : vector<1x512xf32>
      %27 = vector.broadcast %26 : vector<1x512xf32> to vector<28x512xf32>
      %28 = arith.mulf %18, %27 : vector<28x512xf32>
      %cst_16 = arith.constant 0.000000e+00 : f32
      %29 = vector.broadcast %cst_16 : f32 to vector<28x512xf32>
      %30 = arith.cmpf ogt, %28, %29 : vector<28x512xf32>
      %cst_17 = arith.constant 0.000000e+00 : f32
      %31 = vector.broadcast %cst_17 : f32 to vector<28x512xf32>
      %32 = arith.mulf %31, %28 : vector<28x512xf32>
      %33 = arith.select %30, %28, %32 : vector<28x512xi1>, vector<28x512xf32>
      %c0_18 = arith.constant 0 : index
      %c0_19 = arith.constant 0 : index
      %34 = vector.load %arg4[%c0_18, %c0_19] : memref<28x512xf32, #tpu.memory_space<vmem>>, vector<28x512xf32>
      tpu.vector_store %arg4[%c0_18, %c0_19], %33 {strides = array<i32>} : memref<28x512xf32, #tpu.memory_space<vmem>>, vector<28x512xf32>,
    } else {
    }
    return
  }
  func.func @transform_0(%arg0: i32, %arg1: i32) -> (i32, i32) {
    %c0_i32 = arith.constant 0 : i32
    %c0_i32_0 = arith.constant 0 : i32
    return %c0_i32, %arg1 : i32, i32
  }
  func.func @transform_1(%arg0: i32, %arg1: i32) -> (i32, i32) {
    %c0_i32 = arith.constant 0 : i32
    return %arg1, %arg0 : i32, i32
  }
  func.func @transform_2(%arg0: i32, %arg1: i32) -> (i32, i32) {
    %c0_i32 = arith.constant 0 : i32
    %c0_i32_0 = arith.constant 0 : i32
    return %c0_i32, %arg0 : i32, i32
  }
}

module attributes {stable_mosaic.version = 11 : i64} {
  func.func @kernel(%arg0: i32, %arg1: i32, %arg2: memref<54x768xbf16, #tpu.memory_space<vmem>>, %arg3: memref<768x256xbf16, #tpu.memory_space<vmem>>, %arg4: memref<54x256xf32, #tpu.memory_space<vmem>>, %arg5: memref<54x256xf32, #tpu.memory_space<vmem>>) attributes {dimension_semantics = [#tpu.dimension_semantics<parallel>, #tpu.dimension_semantics<arbitrary>], iteration_bounds = array<i64: 1, 2>, scalar_prefetch = 0 : i64, scratch_operands = 1 : i64, tpu.core_type = #tpu.core_type<tc>, window_params = [{transform_indices = @transform_0, window_bounds = array<i64: 54, 768>}, {transform_indices = @transform_1, window_bounds = array<i64: 768, 256>}, {transform_indices = @transform_2, window_bounds = array<i64: 54, 256>}]} {
    %c0_i32 = arith.constant 0 : i32
    %0 = arith.cmpi eq, %arg1, %c0_i32 : i32
    %1 = arith.extui %0 : i1 to i32
    %c0_i32_0 = arith.constant 0 : i32
    %2 = arith.cmpi ne, %1, %c0_i32_0 : i32
    scf.if %2 {
      %cst_9 = arith.constant 0.000000e+00 : f32
      %12 = vector.broadcast %cst_9 : f32 to vector<54x256xf32>
      %c0_10 = arith.constant 0 : index
      %c0_11 = arith.constant 0 : index
      %13 = vector.load %arg5[%c0_10, %c0_11] : memref<54x256xf32, #tpu.memory_space<vmem>>, vector<54x256xf32>
      tpu.vector_store %arg5[%c0_10, %c0_11], %12 {strides = array<i32>} : memref<54x256xf32, #tpu.memory_space<vmem>>, vector<54x256xf32>,
    } else {
    }
    %c0 = arith.constant 0 : index
    %c0_1 = arith.constant 0 : index
    %3 = vector.load %arg5[%c0, %c0_1] : memref<54x256xf32, #tpu.memory_space<vmem>>, vector<54x256xf32>
    %c0_2 = arith.constant 0 : index
    %c0_3 = arith.constant 0 : index
    %4 = vector.load %arg2[%c0_2, %c0_3] : memref<54x768xbf16, #tpu.memory_space<vmem>>, vector<54x768xbf16>
    %c0_4 = arith.constant 0 : index
    %c0_5 = arith.constant 0 : index
    %5 = vector.load %arg3[%c0_4, %c0_5] : memref<768x256xbf16, #tpu.memory_space<vmem>>, vector<768x256xbf16>
    %cst = arith.constant dense<0.000000e+00> : vector<54x256xf32>
    %6 = tpu.matmul %4, %5, %cst {dimension_numbers = #tpu.dot_dimension_numbers<[1], [0], [0], [1], [0, 0, 1, 1], [], []>} : vector<54x768xbf16>, vector<768x256xbf16>, vector<54x256xf32> -> vector<54x256xf32>
    %7 = arith.addf %3, %6 : vector<54x256xf32>
    %c0_6 = arith.constant 0 : index
    %c0_7 = arith.constant 0 : index
    %8 = vector.load %arg5[%c0_6, %c0_7] : memref<54x256xf32, #tpu.memory_space<vmem>>, vector<54x256xf32>
    tpu.vector_store %arg5[%c0_6, %c0_7], %7 {strides = array<i32>} : memref<54x256xf32, #tpu.memory_space<vmem>>, vector<54x256xf32>,
    %c1_i32 = arith.constant 1 : i32
    %9 = arith.cmpi eq, %arg1, %c1_i32 : i32
    %10 = arith.extui %9 : i1 to i32
    %c0_i32_8 = arith.constant 0 : i32
    %11 = arith.cmpi ne, %10, %c0_i32_8 : i32
    scf.if %11 {
      %c0_9 = arith.constant 0 : index
      %c0_10 = arith.constant 0 : index
      %12 = vector.load %arg5[%c0_9, %c0_10] : memref<54x256xf32, #tpu.memory_space<vmem>>, vector<54x256xf32>
      %cst_11 = arith.constant dense<0.000000e+00> : vector<256xf32>
      %13 = vector.multi_reduction <add>, %12, %cst_11 [0] : vector<54x256xf32> to vector<256xf32>
      %14 = vector.shape_cast %13 : vector<256xf32> to vector<1x256xf32>
      %cst_12 = arith.constant 5.400000e+01 : f32
      %15 = vector.broadcast %cst_12 : f32 to vector<1x256xf32>
      %16 = arith.divf %14, %15 : vector<1x256xf32>
      %17 = vector.broadcast %16 : vector<1x256xf32> to vector<54x256xf32>
      %18 = arith.subf %12, %17 : vector<54x256xf32>
      %19 = arith.mulf %18, %18 : vector<54x256xf32>
      %cst_13 = arith.constant dense<0.000000e+00> : vector<256xf32>
      %20 = vector.multi_reduction <add>, %19, %cst_13 [0] : vector<54x256xf32> to vector<256xf32>
      %21 = vector.shape_cast %20 : vector<256xf32> to vector<1x256xf32>
      %cst_14 = arith.constant 5.400000e+01 : f32
      %22 = vector.broadcast %cst_14 : f32 to vector<1x256xf32>
      %23 = arith.divf %21, %22 : vector<1x256xf32>
      %cst_15 = arith.constant 9.99999974E-6 : f32
      %24 = vector.broadcast %cst_15 : f32 to vector<1x256xf32>
      %25 = arith.addf %23, %24 : vector<1x256xf32>
      %26 = math.rsqrt %25 : vector<1x256xf32>
      %27 = vector.broadcast %26 : vector<1x256xf32> to vector<54x256xf32>
      %28 = arith.mulf %18, %27 : vector<54x256xf32>
      %cst_16 = arith.constant 0.000000e+00 : f32
      %29 = vector.broadcast %cst_16 : f32 to vector<54x256xf32>
      %30 = arith.cmpf ogt, %28, %29 : vector<54x256xf32>
      %cst_17 = arith.constant 0.000000e+00 : f32
      %31 = vector.broadcast %cst_17 : f32 to vector<54x256xf32>
      %32 = arith.mulf %31, %28 : vector<54x256xf32>
      %33 = arith.select %30, %28, %32 : vector<54x256xi1>, vector<54x256xf32>
      %c0_18 = arith.constant 0 : index
      %c0_19 = arith.constant 0 : index
      %34 = vector.load %arg4[%c0_18, %c0_19] : memref<54x256xf32, #tpu.memory_space<vmem>>, vector<54x256xf32>
      tpu.vector_store %arg4[%c0_18, %c0_19], %33 {strides = array<i32>} : memref<54x256xf32, #tpu.memory_space<vmem>>, vector<54x256xf32>,
    } else {
    }
    return
  }
  func.func @transform_0(%arg0: i32, %arg1: i32) -> (i32, i32) {
    %c0_i32 = arith.constant 0 : i32
    %c0_i32_0 = arith.constant 0 : i32
    return %c0_i32, %arg1 : i32, i32
  }
  func.func @transform_1(%arg0: i32, %arg1: i32) -> (i32, i32) {
    %c0_i32 = arith.constant 0 : i32
    return %arg1, %arg0 : i32, i32
  }
  func.func @transform_2(%arg0: i32, %arg1: i32) -> (i32, i32) {
    %c0_i32 = arith.constant 0 : i32
    %c0_i32_0 = arith.constant 0 : i32
    return %c0_i32, %arg0 : i32, i32
  }
}

module attributes {stable_mosaic.version = 11 : i64} {
  func.func @kernel(%arg0: i32, %arg1: i32, %arg2: memref<108x1024xbf16, #tpu.memory_space<vmem>>, %arg3: memref<1024x128xbf16, #tpu.memory_space<vmem>>, %arg4: memref<108x128xf32, #tpu.memory_space<vmem>>, %arg5: memref<108x128xf32, #tpu.memory_space<vmem>>) attributes {dimension_semantics = [#tpu.dimension_semantics<parallel>, #tpu.dimension_semantics<arbitrary>], iteration_bounds = array<i64: 1, 1>, scalar_prefetch = 0 : i64, scratch_operands = 1 : i64, tpu.core_type = #tpu.core_type<tc>, window_params = [{transform_indices = @transform_0, window_bounds = array<i64: 108, 1024>}, {transform_indices = @transform_1, window_bounds = array<i64: 1024, 128>}, {transform_indices = @transform_2, window_bounds = array<i64: 108, 128>}]} {
    %c0_i32 = arith.constant 0 : i32
    %0 = arith.cmpi eq, %arg1, %c0_i32 : i32
    %1 = arith.extui %0 : i1 to i32
    %c0_i32_0 = arith.constant 0 : i32
    %2 = arith.cmpi ne, %1, %c0_i32_0 : i32
    scf.if %2 {
      %cst_10 = arith.constant 0.000000e+00 : f32
      %12 = vector.broadcast %cst_10 : f32 to vector<108x128xf32>
      %c0_11 = arith.constant 0 : index
      %c0_12 = arith.constant 0 : index
      %13 = vector.load %arg5[%c0_11, %c0_12] : memref<108x128xf32, #tpu.memory_space<vmem>>, vector<108x128xf32>
      tpu.vector_store %arg5[%c0_11, %c0_12], %12 {strides = array<i32>} : memref<108x128xf32, #tpu.memory_space<vmem>>, vector<108x128xf32>,
    } else {
    }
    %c0 = arith.constant 0 : index
    %c0_1 = arith.constant 0 : index
    %3 = vector.load %arg5[%c0, %c0_1] : memref<108x128xf32, #tpu.memory_space<vmem>>, vector<108x128xf32>
    %c0_2 = arith.constant 0 : index
    %c0_3 = arith.constant 0 : index
    %4 = vector.load %arg2[%c0_2, %c0_3] : memref<108x1024xbf16, #tpu.memory_space<vmem>>, vector<108x1024xbf16>
    %c0_4 = arith.constant 0 : index
    %c0_5 = arith.constant 0 : index
    %5 = vector.load %arg3[%c0_4, %c0_5] : memref<1024x128xbf16, #tpu.memory_space<vmem>>, vector<1024x128xbf16>
    %cst = arith.constant dense<0.000000e+00> : vector<108x128xf32>
    %6 = tpu.matmul %4, %5, %cst {dimension_numbers = #tpu.dot_dimension_numbers<[1], [0], [0], [1], [0, 0, 1, 1], [], []>} : vector<108x1024xbf16>, vector<1024x128xbf16>, vector<108x128xf32> -> vector<108x128xf32>
    %7 = arith.addf %3, %6 : vector<108x128xf32>
    %c0_6 = arith.constant 0 : index
    %c0_7 = arith.constant 0 : index
    %8 = vector.load %arg5[%c0_6, %c0_7] : memref<108x128xf32, #tpu.memory_space<vmem>>, vector<108x128xf32>
    tpu.vector_store %arg5[%c0_6, %c0_7], %7 {strides = array<i32>} : memref<108x128xf32, #tpu.memory_space<vmem>>, vector<108x128xf32>,
    %c0_i32_8 = arith.constant 0 : i32
    %9 = arith.cmpi eq, %arg1, %c0_i32_8 : i32
    %10 = arith.extui %9 : i1 to i32
    %c0_i32_9 = arith.constant 0 : i32
    %11 = arith.cmpi ne, %10, %c0_i32_9 : i32
    scf.if %11 {
      %c0_10 = arith.constant 0 : index
      %c0_11 = arith.constant 0 : index
      %12 = vector.load %arg5[%c0_10, %c0_11] : memref<108x128xf32, #tpu.memory_space<vmem>>, vector<108x128xf32>
      %cst_12 = arith.constant dense<0.000000e+00> : vector<128xf32>
      %13 = vector.multi_reduction <add>, %12, %cst_12 [0] : vector<108x128xf32> to vector<128xf32>
      %14 = vector.shape_cast %13 : vector<128xf32> to vector<1x128xf32>
      %cst_13 = arith.constant 1.080000e+02 : f32
      %15 = vector.broadcast %cst_13 : f32 to vector<1x128xf32>
      %16 = arith.divf %14, %15 : vector<1x128xf32>
      %17 = vector.broadcast %16 : vector<1x128xf32> to vector<108x128xf32>
      %18 = arith.subf %12, %17 : vector<108x128xf32>
      %19 = arith.mulf %18, %18 : vector<108x128xf32>
      %cst_14 = arith.constant dense<0.000000e+00> : vector<128xf32>
      %20 = vector.multi_reduction <add>, %19, %cst_14 [0] : vector<108x128xf32> to vector<128xf32>
      %21 = vector.shape_cast %20 : vector<128xf32> to vector<1x128xf32>
      %cst_15 = arith.constant 1.080000e+02 : f32
      %22 = vector.broadcast %cst_15 : f32 to vector<1x128xf32>
      %23 = arith.divf %21, %22 : vector<1x128xf32>
      %cst_16 = arith.constant 9.99999974E-6 : f32
      %24 = vector.broadcast %cst_16 : f32 to vector<1x128xf32>
      %25 = arith.addf %23, %24 : vector<1x128xf32>
      %26 = math.rsqrt %25 : vector<1x128xf32>
      %27 = vector.broadcast %26 : vector<1x128xf32> to vector<108x128xf32>
      %28 = arith.mulf %18, %27 : vector<108x128xf32>
      %cst_17 = arith.constant 0.000000e+00 : f32
      %29 = vector.broadcast %cst_17 : f32 to vector<108x128xf32>
      %30 = arith.cmpf ogt, %28, %29 : vector<108x128xf32>
      %cst_18 = arith.constant 0.000000e+00 : f32
      %31 = vector.broadcast %cst_18 : f32 to vector<108x128xf32>
      %32 = arith.mulf %31, %28 : vector<108x128xf32>
      %33 = arith.select %30, %28, %32 : vector<108x128xi1>, vector<108x128xf32>
      %c0_19 = arith.constant 0 : index
      %c0_20 = arith.constant 0 : index
      %34 = vector.load %arg4[%c0_19, %c0_20] : memref<108x128xf32, #tpu.memory_space<vmem>>, vector<108x128xf32>
      tpu.vector_store %arg4[%c0_19, %c0_20], %33 {strides = array<i32>} : memref<108x128xf32, #tpu.memory_space<vmem>>, vector<108x128xf32>,
    } else {
    }
    return
  }
  func.func @transform_0(%arg0: i32, %arg1: i32) -> (i32, i32) {
    %c0_i32 = arith.constant 0 : i32
    %c0_i32_0 = arith.constant 0 : i32
    return %c0_i32, %arg1 : i32, i32
  }
  func.func @transform_1(%arg0: i32, %arg1: i32) -> (i32, i32) {
    %c0_i32 = arith.constant 0 : i32
    return %arg1, %arg0 : i32, i32
  }
  func.func @transform_2(%arg0: i32, %arg1: i32) -> (i32, i32) {
    %c0_i32 = arith.constant 0 : i32
    %c0_i32_0 = arith.constant 0 : i32
    return %c0_i32, %arg0 : i32, i32
  }
}

module attributes {stable_mosaic.version = 11 : i64} {
  func.func @kernel(%arg0: i32, %arg1: i32, %arg2: memref<216x512xbf16, #tpu.memory_space<vmem>>, %arg3: memref<512x64xbf16, #tpu.memory_space<vmem>>, %arg4: memref<216x64xf32, #tpu.memory_space<vmem>>, %arg5: memref<216x64xf32, #tpu.memory_space<vmem>>) attributes {dimension_semantics = [#tpu.dimension_semantics<parallel>, #tpu.dimension_semantics<arbitrary>], iteration_bounds = array<i64: 1, 1>, scalar_prefetch = 0 : i64, scratch_operands = 1 : i64, tpu.core_type = #tpu.core_type<tc>, window_params = [{transform_indices = @transform_0, window_bounds = array<i64: 216, 512>}, {transform_indices = @transform_1, window_bounds = array<i64: 512, 64>}, {transform_indices = @transform_2, window_bounds = array<i64: 216, 64>}]} {
    %c0_i32 = arith.constant 0 : i32
    %0 = arith.cmpi eq, %arg1, %c0_i32 : i32
    %1 = arith.extui %0 : i1 to i32
    %c0_i32_0 = arith.constant 0 : i32
    %2 = arith.cmpi ne, %1, %c0_i32_0 : i32
    scf.if %2 {
      %cst_10 = arith.constant 0.000000e+00 : f32
      %12 = vector.broadcast %cst_10 : f32 to vector<216x64xf32>
      %c0_11 = arith.constant 0 : index
      %c0_12 = arith.constant 0 : index
      %13 = vector.load %arg5[%c0_11, %c0_12] : memref<216x64xf32, #tpu.memory_space<vmem>>, vector<216x64xf32>
      tpu.vector_store %arg5[%c0_11, %c0_12], %12 {strides = array<i32>} : memref<216x64xf32, #tpu.memory_space<vmem>>, vector<216x64xf32>,
    } else {
    }
    %c0 = arith.constant 0 : index
    %c0_1 = arith.constant 0 : index
    %3 = vector.load %arg5[%c0, %c0_1] : memref<216x64xf32, #tpu.memory_space<vmem>>, vector<216x64xf32>
    %c0_2 = arith.constant 0 : index
    %c0_3 = arith.constant 0 : index
    %4 = vector.load %arg2[%c0_2, %c0_3] : memref<216x512xbf16, #tpu.memory_space<vmem>>, vector<216x512xbf16>
    %c0_4 = arith.constant 0 : index
    %c0_5 = arith.constant 0 : index
    %5 = vector.load %arg3[%c0_4, %c0_5] : memref<512x64xbf16, #tpu.memory_space<vmem>>, vector<512x64xbf16>
    %cst = arith.constant dense<0.000000e+00> : vector<216x64xf32>
    %6 = tpu.matmul %4, %5, %cst {dimension_numbers = #tpu.dot_dimension_numbers<[1], [0], [0], [1], [0, 0, 1, 1], [], []>} : vector<216x512xbf16>, vector<512x64xbf16>, vector<216x64xf32> -> vector<216x64xf32>
    %7 = arith.addf %3, %6 : vector<216x64xf32>
    %c0_6 = arith.constant 0 : index
    %c0_7 = arith.constant 0 : index
    %8 = vector.load %arg5[%c0_6, %c0_7] : memref<216x64xf32, #tpu.memory_space<vmem>>, vector<216x64xf32>
    tpu.vector_store %arg5[%c0_6, %c0_7], %7 {strides = array<i32>} : memref<216x64xf32, #tpu.memory_space<vmem>>, vector<216x64xf32>,
    %c0_i32_8 = arith.constant 0 : i32
    %9 = arith.cmpi eq, %arg1, %c0_i32_8 : i32
    %10 = arith.extui %9 : i1 to i32
    %c0_i32_9 = arith.constant 0 : i32
    %11 = arith.cmpi ne, %10, %c0_i32_9 : i32
    scf.if %11 {
      %c0_10 = arith.constant 0 : index
      %c0_11 = arith.constant 0 : index
      %12 = vector.load %arg5[%c0_10, %c0_11] : memref<216x64xf32, #tpu.memory_space<vmem>>, vector<216x64xf32>
      %cst_12 = arith.constant dense<0.000000e+00> : vector<64xf32>
      %13 = vector.multi_reduction <add>, %12, %cst_12 [0] : vector<216x64xf32> to vector<64xf32>
      %14 = vector.shape_cast %13 : vector<64xf32> to vector<1x64xf32>
      %cst_13 = arith.constant 2.160000e+02 : f32
      %15 = vector.broadcast %cst_13 : f32 to vector<1x64xf32>
      %16 = arith.divf %14, %15 : vector<1x64xf32>
      %17 = vector.broadcast %16 : vector<1x64xf32> to vector<216x64xf32>
      %18 = arith.subf %12, %17 : vector<216x64xf32>
      %19 = arith.mulf %18, %18 : vector<216x64xf32>
      %cst_14 = arith.constant dense<0.000000e+00> : vector<64xf32>
      %20 = vector.multi_reduction <add>, %19, %cst_14 [0] : vector<216x64xf32> to vector<64xf32>
      %21 = vector.shape_cast %20 : vector<64xf32> to vector<1x64xf32>
      %cst_15 = arith.constant 2.160000e+02 : f32
      %22 = vector.broadcast %cst_15 : f32 to vector<1x64xf32>
      %23 = arith.divf %21, %22 : vector<1x64xf32>
      %cst_16 = arith.constant 9.99999974E-6 : f32
      %24 = vector.broadcast %cst_16 : f32 to vector<1x64xf32>
      %25 = arith.addf %23, %24 : vector<1x64xf32>
      %26 = math.rsqrt %25 : vector<1x64xf32>
      %27 = vector.broadcast %26 : vector<1x64xf32> to vector<216x64xf32>
      %28 = arith.mulf %18, %27 : vector<216x64xf32>
      %cst_17 = arith.constant 0.000000e+00 : f32
      %29 = vector.broadcast %cst_17 : f32 to vector<216x64xf32>
      %30 = arith.cmpf ogt, %28, %29 : vector<216x64xf32>
      %cst_18 = arith.constant 0.000000e+00 : f32
      %31 = vector.broadcast %cst_18 : f32 to vector<216x64xf32>
      %32 = arith.mulf %31, %28 : vector<216x64xf32>
      %33 = arith.select %30, %28, %32 : vector<216x64xi1>, vector<216x64xf32>
      %c0_19 = arith.constant 0 : index
      %c0_20 = arith.constant 0 : index
      %34 = vector.load %arg4[%c0_19, %c0_20] : memref<216x64xf32, #tpu.memory_space<vmem>>, vector<216x64xf32>
      tpu.vector_store %arg4[%c0_19, %c0_20], %33 {strides = array<i32>} : memref<216x64xf32, #tpu.memory_space<vmem>>, vector<216x64xf32>,
    } else {
    }
    return
  }
  func.func @transform_0(%arg0: i32, %arg1: i32) -> (i32, i32) {
    %c0_i32 = arith.constant 0 : i32
    %c0_i32_0 = arith.constant 0 : i32
    return %c0_i32, %arg1 : i32, i32
  }
  func.func @transform_1(%arg0: i32, %arg1: i32) -> (i32, i32) {
    %c0_i32 = arith.constant 0 : i32
    return %arg1, %arg0 : i32, i32
  }
  func.func @transform_2(%arg0: i32, %arg1: i32) -> (i32, i32) {
    %c0_i32 = arith.constant 0 : i32
    %c0_i32_0 = arith.constant 0 : i32
    return %c0_i32, %arg0 : i32, i32
  }
}

module attributes {stable_mosaic.version = 11 : i64} {
  func.func @kernel(%arg0: memref<2x25xf32, #tpu.memory_space<vmem>>, %arg1: memref<25x15xf32, #tpu.memory_space<vmem>>, %arg2: memref<1x15xf32, #tpu.memory_space<vmem>>, %arg3: memref<1x15xf32, #tpu.memory_space<vmem>>, %arg4: memref<2x1xf32, #tpu.memory_space<vmem>>, %arg5: memref<1x216xf32, #tpu.memory_space<vmem>>, %arg6: memref<216x216xf32, #tpu.memory_space<vmem>>, %arg7: memref<2x216xf32, #tpu.memory_space<vmem>>) attributes {dimension_semantics = [], scalar_prefetch = 0 : i64, scratch_operands = 0 : i64, tpu.core_type = #tpu.core_type<tc>} {
    %c0 = arith.constant 0 : index
    %c0_0 = arith.constant 0 : index
    %0 = vector.load %arg0[%c0, %c0_0] : memref<2x25xf32, #tpu.memory_space<vmem>>, vector<2x25xf32>
    %c0_1 = arith.constant 0 : index
    %c0_2 = arith.constant 0 : index
    %1 = vector.load %arg1[%c0_1, %c0_2] : memref<25x15xf32, #tpu.memory_space<vmem>>, vector<25x15xf32>
    %cst = arith.constant dense<0.000000e+00> : vector<2x15xf32>
    %2 = tpu.matmul %0, %1, %cst {dimension_numbers = #tpu.dot_dimension_numbers<[1], [0], [0], [1], [0, 0, 1, 1], [], []>} : vector<2x25xf32>, vector<25x15xf32>, vector<2x15xf32> -> vector<2x15xf32>
    %c0_3 = arith.constant 0 : index
    %c0_4 = arith.constant 0 : index
    %3 = vector.load %arg2[%c0_3, %c0_4] : memref<1x15xf32, #tpu.memory_space<vmem>>, vector<1x15xf32>
    %4 = vector.broadcast %3 : vector<1x15xf32> to vector<2x15xf32>
    %5 = arith.addf %2, %4 : vector<2x15xf32>
    %6 = arith.negf %5 : vector<2x15xf32>
    %7 = math.exp %6 : vector<2x15xf32>
    %cst_5 = arith.constant 1.000000e+00 : f32
    %8 = vector.broadcast %cst_5 : f32 to vector<2x15xf32>
    %9 = arith.addf %8, %7 : vector<2x15xf32>
    %10 = arith.divf %8, %9 : vector<2x15xf32>
    %cst_6 = arith.constant 1.000000e-01 : f32
    %11 = vector.broadcast %cst_6 : f32 to vector<2x15xf32>
    %12 = arith.mulf %11, %10 : vector<2x15xf32>
    %c0_7 = arith.constant 0 : index
    %c0_8 = arith.constant 0 : index
    %13 = vector.load %arg3[%c0_7, %c0_8] : memref<1x15xf32, #tpu.memory_space<vmem>>, vector<1x15xf32>
    %14 = vector.broadcast %13 : vector<1x15xf32> to vector<2x15xf32>
    %15 = arith.addf %12, %14 : vector<2x15xf32>
    %16 = tpu.iota {dimensions = array<i32: 1>} : vector<1x216xi32>
    %17 = arith.sitofp %16 : vector<1x216xi32> to vector<1x216xf32>
    %cst_9 = arith.constant 0.00462962966 : f32
    %18 = vector.broadcast %cst_9 : f32 to vector<1x216xf32>
    %19 = arith.mulf %17, %18 : vector<1x216xf32>
    %cst_10 = arith.constant 6.28318548 : f32
    %20 = vector.broadcast %cst_10 : f32 to vector<1x216xf32>
    %21 = arith.mulf %20, %19 : vector<1x216xf32>
    %cst_11 = arith.constant -2.00176454 : f32
    %22 = vector.broadcast %cst_11 : f32 to vector<1x216xf32>
    %23 = arith.addf %22, %21 : vector<1x216xf32>
    %cst_12 = arith.constant 3.14159274 : f32
    %24 = vector.broadcast %cst_12 : f32 to vector<1x216xf32>
    %25 = arith.addf %23, %24 : vector<1x216xf32>
    %cst_13 = arith.constant 6.28318548 : f32
    %26 = vector.broadcast %cst_13 : f32 to vector<1x216xf32>
    %27 = arith.divf %25, %26 : vector<1x216xf32>
    %28 = math.floor %27 : vector<1x216xf32>
    %cst_14 = arith.constant 6.28318548 : f32
    %29 = vector.broadcast %cst_14 : f32 to vector<1x216xf32>
    %30 = arith.mulf %29, %28 : vector<1x216xf32>
    %31 = arith.subf %23, %30 : vector<1x216xf32>
    %cst_15 = arith.constant 1.57079637 : f32
    %32 = vector.broadcast %cst_15 : f32 to vector<1x216xf32>
    %33 = arith.mulf %32, %19 : vector<1x216xf32>
    %34 = math.sin %33 : vector<1x216xf32>
    %cst_16 = arith.constant 5.000000e-03 : f32
    %35 = vector.broadcast %cst_16 : f32 to vector<1x216xf32>
    %36 = arith.mulf %35, %34 : vector<1x216xf32>
    %37 = vector.extract_strided_slice %15 {offsets = [0, 0], sizes = [2, 1], strides = [1, 1]} : vector<2x15xf32> to vector<2x1xf32>
    %38 = vector.extract_strided_slice %15 {offsets = [0, 1], sizes = [2, 1], strides = [1, 1]} : vector<2x15xf32> to vector<2x1xf32>
    %39 = vector.extract_strided_slice %15 {offsets = [0, 2], sizes = [2, 1], strides = [1, 1]} : vector<2x15xf32> to vector<2x1xf32>
    %40 = vector.broadcast %31 : vector<1x216xf32> to vector<2x216xf32>
    %41 = vector.broadcast %39 : vector<2x1xf32> to vector<2x216xf32>
    %42 = arith.subf %40, %41 : vector<2x216xf32>
    %cst_17 = arith.constant 3.14159274 : f32
    %43 = vector.broadcast %cst_17 : f32 to vector<2x216xf32>
    %44 = arith.addf %42, %43 : vector<2x216xf32>
    %cst_18 = arith.constant 6.28318548 : f32
    %45 = vector.broadcast %cst_18 : f32 to vector<2x216xf32>
    %46 = arith.divf %44, %45 : vector<2x216xf32>
    %47 = math.floor %46 : vector<2x216xf32>
    %cst_19 = arith.constant 6.28318548 : f32
    %48 = vector.broadcast %cst_19 : f32 to vector<2x216xf32>
    %49 = arith.mulf %48, %47 : vector<2x216xf32>
    %50 = arith.subf %42, %49 : vector<2x216xf32>
    %51 = vector.broadcast %37 : vector<2x1xf32> to vector<2x216xf32>
    %52 = arith.mulf %51, %50 : vector<2x216xf32>
    %53 = arith.mulf %50, %50 : vector<2x216xf32>
    %cst_20 = arith.constant 0.000000e+00 : f32
    %54 = vector.broadcast %cst_20 : f32 to vector<2x216xf32>
    %55 = arith.subf %54, %53 : vector<2x216xf32>
    %cst_21 = arith.constant 2.000000e+00 : f32
    %56 = vector.broadcast %cst_21 : f32 to vector<2x1xf32>
    %57 = arith.mulf %56, %38 : vector<2x1xf32>
    %58 = arith.mulf %57, %38 : vector<2x1xf32>
    %59 = vector.broadcast %58 : vector<2x1xf32> to vector<2x216xf32>
    %60 = arith.divf %55, %59 : vector<2x216xf32>
    %61 = math.exp %60 : vector<2x216xf32>
    %62 = arith.mulf %52, %61 : vector<2x216xf32>
    %63 = vector.broadcast %36 : vector<1x216xf32> to vector<2x216xf32>
    %64 = arith.subf %63, %62 : vector<2x216xf32>
    %65 = vector.extract_strided_slice %15 {offsets = [0, 3], sizes = [2, 1], strides = [1, 1]} : vector<2x15xf32> to vector<2x1xf32>
    %66 = vector.extract_strided_slice %15 {offsets = [0, 4], sizes = [2, 1], strides = [1, 1]} : vector<2x15xf32> to vector<2x1xf32>
    %67 = vector.extract_strided_slice %15 {offsets = [0, 5], sizes = [2, 1], strides = [1, 1]} : vector<2x15xf32> to vector<2x1xf32>
    %68 = vector.broadcast %31 : vector<1x216xf32> to vector<2x216xf32>
    %69 = vector.broadcast %67 : vector<2x1xf32> to vector<2x216xf32>
    %70 = arith.subf %68, %69 : vector<2x216xf32>
    %cst_22 = arith.constant 3.14159274 : f32
    %71 = vector.broadcast %cst_22 : f32 to vector<2x216xf32>
    %72 = arith.addf %70, %71 : vector<2x216xf32>
    %cst_23 = arith.constant 6.28318548 : f32
    %73 = vector.broadcast %cst_23 : f32 to vector<2x216xf32>
    %74 = arith.divf %72, %73 : vector<2x216xf32>
    %75 = math.floor %74 : vector<2x216xf32>
    %cst_24 = arith.constant 6.28318548 : f32
    %76 = vector.broadcast %cst_24 : f32 to vector<2x216xf32>
    %77 = arith.mulf %76, %75 : vector<2x216xf32>
    %78 = arith.subf %70, %77 : vector<2x216xf32>
    %79 = vector.broadcast %65 : vector<2x1xf32> to vector<2x216xf32>
    %80 = arith.mulf %79, %78 : vector<2x216xf32>
    %81 = arith.mulf %78, %78 : vector<2x216xf32>
    %cst_25 = arith.constant 0.000000e+00 : f32
    %82 = vector.broadcast %cst_25 : f32 to vector<2x216xf32>
    %83 = arith.subf %82, %81 : vector<2x216xf32>
    %cst_26 = arith.constant 2.000000e+00 : f32
    %84 = vector.broadcast %cst_26 : f32 to vector<2x1xf32>
    %85 = arith.mulf %84, %66 : vector<2x1xf32>
    %86 = arith.mulf %85, %66 : vector<2x1xf32>
    %87 = vector.broadcast %86 : vector<2x1xf32> to vector<2x216xf32>
    %88 = arith.divf %83, %87 : vector<2x216xf32>
    %89 = math.exp %88 : vector<2x216xf32>
    %90 = arith.mulf %80, %89 : vector<2x216xf32>
    %91 = arith.subf %64, %90 : vector<2x216xf32>
    %92 = vector.extract_strided_slice %15 {offsets = [0, 6], sizes = [2, 1], strides = [1, 1]} : vector<2x15xf32> to vector<2x1xf32>
    %93 = vector.extract_strided_slice %15 {offsets = [0, 7], sizes = [2, 1], strides = [1, 1]} : vector<2x15xf32> to vector<2x1xf32>
    %94 = vector.extract_strided_slice %15 {offsets = [0, 8], sizes = [2, 1], strides = [1, 1]} : vector<2x15xf32> to vector<2x1xf32>
    %95 = vector.broadcast %31 : vector<1x216xf32> to vector<2x216xf32>
    %96 = vector.broadcast %94 : vector<2x1xf32> to vector<2x216xf32>
    %97 = arith.subf %95, %96 : vector<2x216xf32>
    %cst_27 = arith.constant 3.14159274 : f32
    %98 = vector.broadcast %cst_27 : f32 to vector<2x216xf32>
    %99 = arith.addf %97, %98 : vector<2x216xf32>
    %cst_28 = arith.constant 6.28318548 : f32
    %100 = vector.broadcast %cst_28 : f32 to vector<2x216xf32>
    %101 = arith.divf %99, %100 : vector<2x216xf32>
    %102 = math.floor %101 : vector<2x216xf32>
    %cst_29 = arith.constant 6.28318548 : f32
    %103 = vector.broadcast %cst_29 : f32 to vector<2x216xf32>
    %104 = arith.mulf %103, %102 : vector<2x216xf32>
    %105 = arith.subf %97, %104 : vector<2x216xf32>
    %106 = vector.broadcast %92 : vector<2x1xf32> to vector<2x216xf32>
    %107 = arith.mulf %106, %105 : vector<2x216xf32>
    %108 = arith.mulf %105, %105 : vector<2x216xf32>
    %cst_30 = arith.constant 0.000000e+00 : f32
    %109 = vector.broadcast %cst_30 : f32 to vector<2x216xf32>
    %110 = arith.subf %109, %108 : vector<2x216xf32>
    %cst_31 = arith.constant 2.000000e+00 : f32
    %111 = vector.broadcast %cst_31 : f32 to vector<2x1xf32>
    %112 = arith.mulf %111, %93 : vector<2x1xf32>
    %113 = arith.mulf %112, %93 : vector<2x1xf32>
    %114 = vector.broadcast %113 : vector<2x1xf32> to vector<2x216xf32>
    %115 = arith.divf %110, %114 : vector<2x216xf32>
    %116 = math.exp %115 : vector<2x216xf32>
    %117 = arith.mulf %107, %116 : vector<2x216xf32>
    %118 = arith.subf %91, %117 : vector<2x216xf32>
    %119 = vector.extract_strided_slice %15 {offsets = [0, 9], sizes = [2, 1], strides = [1, 1]} : vector<2x15xf32> to vector<2x1xf32>
    %120 = vector.extract_strided_slice %15 {offsets = [0, 10], sizes = [2, 1], strides = [1, 1]} : vector<2x15xf32> to vector<2x1xf32>
    %121 = vector.extract_strided_slice %15 {offsets = [0, 11], sizes = [2, 1], strides = [1, 1]} : vector<2x15xf32> to vector<2x1xf32>
    %122 = vector.broadcast %31 : vector<1x216xf32> to vector<2x216xf32>
    %123 = vector.broadcast %121 : vector<2x1xf32> to vector<2x216xf32>
    %124 = arith.subf %122, %123 : vector<2x216xf32>
    %cst_32 = arith.constant 3.14159274 : f32
    %125 = vector.broadcast %cst_32 : f32 to vector<2x216xf32>
    %126 = arith.addf %124, %125 : vector<2x216xf32>
    %cst_33 = arith.constant 6.28318548 : f32
    %127 = vector.broadcast %cst_33 : f32 to vector<2x216xf32>
    %128 = arith.divf %126, %127 : vector<2x216xf32>
    %129 = math.floor %128 : vector<2x216xf32>
    %cst_34 = arith.constant 6.28318548 : f32
    %130 = vector.broadcast %cst_34 : f32 to vector<2x216xf32>
    %131 = arith.mulf %130, %129 : vector<2x216xf32>
    %132 = arith.subf %124, %131 : vector<2x216xf32>
    %133 = vector.broadcast %119 : vector<2x1xf32> to vector<2x216xf32>
    %134 = arith.mulf %133, %132 : vector<2x216xf32>
    %135 = arith.mulf %132, %132 : vector<2x216xf32>
    %cst_35 = arith.constant 0.000000e+00 : f32
    %136 = vector.broadcast %cst_35 : f32 to vector<2x216xf32>
    %137 = arith.subf %136, %135 : vector<2x216xf32>
    %cst_36 = arith.constant 2.000000e+00 : f32
    %138 = vector.broadcast %cst_36 : f32 to vector<2x1xf32>
    %139 = arith.mulf %138, %120 : vector<2x1xf32>
    %140 = arith.mulf %139, %120 : vector<2x1xf32>
    %141 = vector.broadcast %140 : vector<2x1xf32> to vector<2x216xf32>
    %142 = arith.divf %137, %141 : vector<2x216xf32>
    %143 = math.exp %142 : vector<2x216xf32>
    %144 = arith.mulf %134, %143 : vector<2x216xf32>
    %145 = arith.subf %118, %144 : vector<2x216xf32>
    %146 = vector.extract_strided_slice %15 {offsets = [0, 12], sizes = [2, 1], strides = [1, 1]} : vector<2x15xf32> to vector<2x1xf32>
    %147 = vector.extract_strided_slice %15 {offsets = [0, 13], sizes = [2, 1], strides = [1, 1]} : vector<2x15xf32> to vector<2x1xf32>
    %148 = vector.extract_strided_slice %15 {offsets = [0, 14], sizes = [2, 1], strides = [1, 1]} : vector<2x15xf32> to vector<2x1xf32>
    %149 = vector.broadcast %31 : vector<1x216xf32> to vector<2x216xf32>
    %150 = vector.broadcast %148 : vector<2x1xf32> to vector<2x216xf32>
    %151 = arith.subf %149, %150 : vector<2x216xf32>
    %cst_37 = arith.constant 3.14159274 : f32
    %152 = vector.broadcast %cst_37 : f32 to vector<2x216xf32>
    %153 = arith.addf %151, %152 : vector<2x216xf32>
    %cst_38 = arith.constant 6.28318548 : f32
    %154 = vector.broadcast %cst_38 : f32 to vector<2x216xf32>
    %155 = arith.divf %153, %154 : vector<2x216xf32>
    %156 = math.floor %155 : vector<2x216xf32>
    %cst_39 = arith.constant 6.28318548 : f32
    %157 = vector.broadcast %cst_39 : f32 to vector<2x216xf32>
    %158 = arith.mulf %157, %156 : vector<2x216xf32>
    %159 = arith.subf %151, %158 : vector<2x216xf32>
    %160 = vector.broadcast %146 : vector<2x1xf32> to vector<2x216xf32>
    %161 = arith.mulf %160, %159 : vector<2x216xf32>
    %162 = arith.mulf %159, %159 : vector<2x216xf32>
    %cst_40 = arith.constant 0.000000e+00 : f32
    %163 = vector.broadcast %cst_40 : f32 to vector<2x216xf32>
    %164 = arith.subf %163, %162 : vector<2x216xf32>
    %cst_41 = arith.constant 2.000000e+00 : f32
    %165 = vector.broadcast %cst_41 : f32 to vector<2x1xf32>
    %166 = arith.mulf %165, %147 : vector<2x1xf32>
    %167 = arith.mulf %166, %147 : vector<2x1xf32>
    %168 = vector.broadcast %167 : vector<2x1xf32> to vector<2x216xf32>
    %169 = arith.divf %164, %168 : vector<2x216xf32>
    %170 = math.exp %169 : vector<2x216xf32>
    %171 = arith.mulf %161, %170 : vector<2x216xf32>
    %172 = arith.subf %145, %171 : vector<2x216xf32>
    %c0_42 = arith.constant 0 : index
    %c0_43 = arith.constant 0 : index
    %173 = vector.load %arg4[%c0_42, %c0_43] : memref<2x1xf32, #tpu.memory_space<vmem>>, vector<2x1xf32>
    %c0_44 = arith.constant 0 : index
    %c0_45 = arith.constant 0 : index
    %174 = vector.load %arg5[%c0_44, %c0_45] : memref<1x216xf32, #tpu.memory_space<vmem>>, vector<1x216xf32>
    %175 = vector.broadcast %173 : vector<2x1xf32> to vector<2x216xf32>
    %176 = vector.broadcast %174 : vector<1x216xf32> to vector<2x216xf32>
    %177 = arith.mulf %175, %176 : vector<2x216xf32>
    %c0_46 = arith.constant 0 : index
    %c0_47 = arith.constant 0 : index
    %178 = vector.load %arg6[%c0_46, %c0_47] : memref<216x216xf32, #tpu.memory_space<vmem>>, vector<216x216xf32>
    %cst_48 = arith.constant dense<0.000000e+00> : vector<2x216xf32>
    %179 = tpu.matmul %172, %178, %cst_48 {dimension_numbers = #tpu.dot_dimension_numbers<[1], [0], [0], [1], [0, 0, 1, 1], [], []>} : vector<2x216xf32>, vector<216x216xf32>, vector<2x216xf32> -> vector<2x216xf32>
    %cst_49 = arith.constant 0.00462962966 : f32
    %180 = vector.broadcast %cst_49 : f32 to vector<2x216xf32>
    %181 = arith.mulf %180, %179 : vector<2x216xf32>
    %182 = arith.addf %177, %181 : vector<2x216xf32>
    %c0_50 = arith.constant 0 : index
    %c0_51 = arith.constant 0 : index
    %183 = vector.load %arg7[%c0_50, %c0_51] : memref<2x216xf32, #tpu.memory_space<vmem>>, vector<2x216xf32>
    tpu.vector_store %arg7[%c0_50, %c0_51], %182 {strides = array<i32>} : memref<2x216xf32, #tpu.memory_space<vmem>>, vector<2x216xf32>,
    return
  }
}

module attributes {stable_mosaic.version = 11 : i64} {
  func.func @kernel(%arg0: i32, %arg1: i32, %arg2: memref<2x50xf32, #tpu.memory_space<vmem>>, %arg3: memref<50x25xf32, #tpu.memory_space<vmem>>, %arg4: memref<2x25xf32, #tpu.memory_space<vmem>>, %arg5: memref<2x25xf32, #tpu.memory_space<vmem>>) attributes {dimension_semantics = [#tpu.dimension_semantics<parallel>, #tpu.dimension_semantics<arbitrary>], iteration_bounds = array<i64: 1, 1>, scalar_prefetch = 0 : i64, scratch_operands = 1 : i64, tpu.core_type = #tpu.core_type<tc>, window_params = [{transform_indices = @transform_0, window_bounds = array<i64: 2, 50>}, {transform_indices = @transform_1, window_bounds = array<i64: 50, 25>}, {transform_indices = @transform_2, window_bounds = array<i64: 2, 25>}]} {
    %c0_i32 = arith.constant 0 : i32
    %0 = arith.cmpi eq, %arg1, %c0_i32 : i32
    %1 = arith.extui %0 : i1 to i32
    %c0_i32_0 = arith.constant 0 : i32
    %2 = arith.cmpi ne, %1, %c0_i32_0 : i32
    scf.if %2 {
      %cst_10 = arith.constant 0.000000e+00 : f32
      %12 = vector.broadcast %cst_10 : f32 to vector<2x25xf32>
      %c0_11 = arith.constant 0 : index
      %c0_12 = arith.constant 0 : index
      %13 = vector.load %arg5[%c0_11, %c0_12] : memref<2x25xf32, #tpu.memory_space<vmem>>, vector<2x25xf32>
      tpu.vector_store %arg5[%c0_11, %c0_12], %12 {strides = array<i32>} : memref<2x25xf32, #tpu.memory_space<vmem>>, vector<2x25xf32>,
    } else {
    }
    %c0 = arith.constant 0 : index
    %c0_1 = arith.constant 0 : index
    %3 = vector.load %arg5[%c0, %c0_1] : memref<2x25xf32, #tpu.memory_space<vmem>>, vector<2x25xf32>
    %c0_2 = arith.constant 0 : index
    %c0_3 = arith.constant 0 : index
    %4 = vector.load %arg2[%c0_2, %c0_3] : memref<2x50xf32, #tpu.memory_space<vmem>>, vector<2x50xf32>
    %c0_4 = arith.constant 0 : index
    %c0_5 = arith.constant 0 : index
    %5 = vector.load %arg3[%c0_4, %c0_5] : memref<50x25xf32, #tpu.memory_space<vmem>>, vector<50x25xf32>
    %cst = arith.constant dense<0.000000e+00> : vector<2x25xf32>
    %6 = tpu.matmul %4, %5, %cst {dimension_numbers = #tpu.dot_dimension_numbers<[1], [0], [0], [1], [0, 0, 1, 1], [], []>} : vector<2x50xf32>, vector<50x25xf32>, vector<2x25xf32> -> vector<2x25xf32>
    %7 = arith.addf %3, %6 : vector<2x25xf32>
    %c0_6 = arith.constant 0 : index
    %c0_7 = arith.constant 0 : index
    %8 = vector.load %arg5[%c0_6, %c0_7] : memref<2x25xf32, #tpu.memory_space<vmem>>, vector<2x25xf32>
    tpu.vector_store %arg5[%c0_6, %c0_7], %7 {strides = array<i32>} : memref<2x25xf32, #tpu.memory_space<vmem>>, vector<2x25xf32>,
    %c0_i32_8 = arith.constant 0 : i32
    %9 = arith.cmpi eq, %arg1, %c0_i32_8 : i32
    %10 = arith.extui %9 : i1 to i32
    %c0_i32_9 = arith.constant 0 : i32
    %11 = arith.cmpi ne, %10, %c0_i32_9 : i32
    scf.if %11 {
      %c0_10 = arith.constant 0 : index
      %c0_11 = arith.constant 0 : index
      %12 = vector.load %arg5[%c0_10, %c0_11] : memref<2x25xf32, #tpu.memory_space<vmem>>, vector<2x25xf32>
      %cst_12 = arith.constant dense<0.000000e+00> : vector<25xf32>
      %13 = vector.multi_reduction <add>, %12, %cst_12 [0] : vector<2x25xf32> to vector<25xf32>
      %14 = vector.shape_cast %13 : vector<25xf32> to vector<1x25xf32>
      %cst_13 = arith.constant 2.000000e+00 : f32
      %15 = vector.broadcast %cst_13 : f32 to vector<1x25xf32>
      %16 = arith.divf %14, %15 : vector<1x25xf32>
      %17 = vector.broadcast %16 : vector<1x25xf32> to vector<2x25xf32>
      %18 = arith.subf %12, %17 : vector<2x25xf32>
      %19 = arith.mulf %18, %18 : vector<2x25xf32>
      %cst_14 = arith.constant dense<0.000000e+00> : vector<25xf32>
      %20 = vector.multi_reduction <add>, %19, %cst_14 [0] : vector<2x25xf32> to vector<25xf32>
      %21 = vector.shape_cast %20 : vector<25xf32> to vector<1x25xf32>
      %cst_15 = arith.constant 2.000000e+00 : f32
      %22 = vector.broadcast %cst_15 : f32 to vector<1x25xf32>
      %23 = arith.divf %21, %22 : vector<1x25xf32>
      %cst_16 = arith.constant 9.99999974E-6 : f32
      %24 = vector.broadcast %cst_16 : f32 to vector<1x25xf32>
      %25 = arith.addf %23, %24 : vector<1x25xf32>
      %26 = math.rsqrt %25 : vector<1x25xf32>
      %27 = vector.broadcast %26 : vector<1x25xf32> to vector<2x25xf32>
      %28 = arith.mulf %18, %27 : vector<2x25xf32>
      %cst_17 = arith.constant 0.000000e+00 : f32
      %29 = vector.broadcast %cst_17 : f32 to vector<2x25xf32>
      %30 = arith.cmpf ogt, %28, %29 : vector<2x25xf32>
      %cst_18 = arith.constant 0.00999999977 : f32
      %31 = vector.broadcast %cst_18 : f32 to vector<2x25xf32>
      %32 = arith.mulf %31, %28 : vector<2x25xf32>
      %33 = arith.select %30, %28, %32 : vector<2x25xi1>, vector<2x25xf32>
      %c0_19 = arith.constant 0 : index
      %c0_20 = arith.constant 0 : index
      %34 = vector.load %arg4[%c0_19, %c0_20] : memref<2x25xf32, #tpu.memory_space<vmem>>, vector<2x25xf32>
      tpu.vector_store %arg4[%c0_19, %c0_20], %33 {strides = array<i32>} : memref<2x25xf32, #tpu.memory_space<vmem>>, vector<2x25xf32>,
    } else {
    }
    return
  }
  func.func @transform_0(%arg0: i32, %arg1: i32) -> (i32, i32) {
    %c0_i32 = arith.constant 0 : i32
    %c0_i32_0 = arith.constant 0 : i32
    return %c0_i32, %arg1 : i32, i32
  }
  func.func @transform_1(%arg0: i32, %arg1: i32) -> (i32, i32) {
    %c0_i32 = arith.constant 0 : i32
    return %arg1, %arg0 : i32, i32
  }
  func.func @transform_2(%arg0: i32, %arg1: i32) -> (i32, i32) {
    %c0_i32 = arith.constant 0 : i32
    %c0_i32_0 = arith.constant 0 : i32
    return %c0_i32, %arg0 : i32, i32
  }
}

module attributes {stable_mosaic.version = 11 : i64} {
  func.func @kernel(%arg0: memref<2x256x216xbf16, #tpu.memory_space<vmem>>, %arg1: memref<1x256xbf16, #tpu.memory_space<vmem>>, %arg2: memref<2x216xf32, #tpu.memory_space<vmem>>, %arg3: memref<2x216xf32, #tpu.memory_space<vmem>>) attributes {dimension_semantics = [], scalar_prefetch = 0 : i64, scratch_operands = 0 : i64, tpu.core_type = #tpu.core_type<tc>} {
    %c0 = arith.constant 0 : index
    %c0_0 = arith.constant 0 : index
    %0 = vector.load %arg1[%c0, %c0_0] : memref<1x256xbf16, #tpu.memory_space<vmem>>, vector<1x256xbf16>
    %c0_1 = arith.constant 0 : index
    %c0_2 = arith.constant 0 : index
    %c0_3 = arith.constant 0 : index
    %1 = vector.load %arg0[%c0_1, %c0_2, %c0_3] : memref<2x256x216xbf16, #tpu.memory_space<vmem>>, vector<1x256x216xbf16>
    %2 = vector.shape_cast %1 : vector<1x256x216xbf16> to vector<256x216xbf16>
    %cst = arith.constant dense<0.000000e+00> : vector<1x216xf32>
    %3 = tpu.matmul %0, %2, %cst {dimension_numbers = #tpu.dot_dimension_numbers<[1], [0], [0], [1], [0, 0, 1, 1], [], []>} : vector<1x256xbf16>, vector<256x216xbf16>, vector<1x216xf32> -> vector<1x216xf32>
    %cst_4 = arith.constant dense<0x7F800000> : vector<1xf32>
    %4 = vector.multi_reduction <minimumf>, %3, %cst_4 [1] : vector<1x216xf32> to vector<1xf32>
    %5 = vector.shape_cast %4 : vector<1xf32> to vector<1x1xf32>
    %cst_5 = arith.constant dense<0xFF800000> : vector<1xf32>
    %6 = vector.multi_reduction <maximumf>, %3, %cst_5 [1] : vector<1x216xf32> to vector<1xf32>
    %7 = vector.shape_cast %6 : vector<1xf32> to vector<1x1xf32>
    %8 = vector.broadcast %5 : vector<1x1xf32> to vector<1x216xf32>
    %9 = arith.subf %3, %8 : vector<1x216xf32>
    %cst_6 = arith.constant 4.255700e-02 : f32
    %10 = vector.broadcast %cst_6 : f32 to vector<1x216xf32>
    %11 = arith.mulf %9, %10 : vector<1x216xf32>
    %12 = arith.subf %7, %5 : vector<1x1xf32>
    %13 = vector.broadcast %12 : vector<1x1xf32> to vector<1x216xf32>
    %14 = arith.divf %11, %13 : vector<1x216xf32>
    %cst_7 = arith.constant -1.563000e-02 : f32
    %15 = vector.broadcast %cst_7 : f32 to vector<1x216xf32>
    %16 = arith.addf %14, %15 : vector<1x216xf32>
    %c0_8 = arith.constant 0 : index
    %c0_9 = arith.constant 0 : index
    %17 = vector.load %arg2[%c0_8, %c0_9] : memref<2x216xf32, #tpu.memory_space<vmem>>, vector<1x216xf32>
    %18 = arith.addf %16, %17 : vector<1x216xf32>
    %c0_10 = arith.constant 0 : index
    %c0_11 = arith.constant 0 : index
    %19 = vector.load %arg3[%c0_10, %c0_11] : memref<2x216xf32, #tpu.memory_space<vmem>>, vector<1x216xf32>
    tpu.vector_store %arg3[%c0_10, %c0_11], %18 {strides = array<i32>} : memref<2x216xf32, #tpu.memory_space<vmem>>, vector<1x216xf32>,
    %c1 = arith.constant 1 : index
    %c0_12 = arith.constant 0 : index
    %c0_13 = arith.constant 0 : index
    %20 = vector.load %arg0[%c1, %c0_12, %c0_13] : memref<2x256x216xbf16, #tpu.memory_space<vmem>>, vector<1x256x216xbf16>
    %21 = vector.shape_cast %20 : vector<1x256x216xbf16> to vector<256x216xbf16>
    %cst_14 = arith.constant dense<0.000000e+00> : vector<1x216xf32>
    %22 = tpu.matmul %0, %21, %cst_14 {dimension_numbers = #tpu.dot_dimension_numbers<[1], [0], [0], [1], [0, 0, 1, 1], [], []>} : vector<1x256xbf16>, vector<256x216xbf16>, vector<1x216xf32> -> vector<1x216xf32>
    %cst_15 = arith.constant dense<0x7F800000> : vector<1xf32>
    %23 = vector.multi_reduction <minimumf>, %22, %cst_15 [1] : vector<1x216xf32> to vector<1xf32>
    %24 = vector.shape_cast %23 : vector<1xf32> to vector<1x1xf32>
    %cst_16 = arith.constant dense<0xFF800000> : vector<1xf32>
    %25 = vector.multi_reduction <maximumf>, %22, %cst_16 [1] : vector<1x216xf32> to vector<1xf32>
    %26 = vector.shape_cast %25 : vector<1xf32> to vector<1x1xf32>
    %27 = vector.broadcast %24 : vector<1x1xf32> to vector<1x216xf32>
    %28 = arith.subf %22, %27 : vector<1x216xf32>
    %cst_17 = arith.constant 4.255700e-02 : f32
    %29 = vector.broadcast %cst_17 : f32 to vector<1x216xf32>
    %30 = arith.mulf %28, %29 : vector<1x216xf32>
    %31 = arith.subf %26, %24 : vector<1x1xf32>
    %32 = vector.broadcast %31 : vector<1x1xf32> to vector<1x216xf32>
    %33 = arith.divf %30, %32 : vector<1x216xf32>
    %cst_18 = arith.constant -1.563000e-02 : f32
    %34 = vector.broadcast %cst_18 : f32 to vector<1x216xf32>
    %35 = arith.addf %33, %34 : vector<1x216xf32>
    %c1_19 = arith.constant 1 : index
    %c0_20 = arith.constant 0 : index
    %36 = vector.load %arg2[%c1_19, %c0_20] : memref<2x216xf32, #tpu.memory_space<vmem>>, vector<1x216xf32>
    %37 = arith.addf %35, %36 : vector<1x216xf32>
    %c1_21 = arith.constant 1 : index
    %c0_22 = arith.constant 0 : index
    %38 = vector.load %arg3[%c1_21, %c0_22] : memref<2x216xf32, #tpu.memory_space<vmem>>, vector<1x216xf32>
    tpu.vector_store %arg3[%c1_21, %c0_22], %37 {strides = array<i32>} : memref<2x216xf32, #tpu.memory_space<vmem>>, vector<1x216xf32>,
    return
  }
}

</mosaic_0001>

<bundles_post_ra>
// kernel: combined_generator.11
= control target key start
LH: loop header
LB: loop body
LE: loop exit
PB: predicated region body
PF: predicated region fallthrough
CT: control target
= control target key end

     0   :  { %7 = vsyncpa [#allocation4], 0  ;;  %s1319_s0 = inlined_call_operand.vmem [shape: bf16[8,200], index: 0, kind: input, shape index: {}]   ;;  %s1320_s1 = inlined_call_operand.hbm [shape: bf16[200,2048], index: 1, kind: input, shape index: {}]   ;;  %s1321_s2 = inlined_call_operand.vmem [shape: f32[8,2048], index: 2, kind: output, shape index: {}]  }
   0x1   :  { %9 = vsyncpa [#allocation4 + $0x1], 0  ;;  %s1145_s9 = smov 0   ;;  %s1147_s10 = smov 0  }
   0x2   :  { %s1149_s11 = smov 0   ;;  %s1151_s12 = smov 0  }
   0x3   :  { %s1153_s13 = smov 0   ;;  %s1155_s14 = smov 0  }
   0x4 LB: > { %s827_s15 = sadd.s32 4294967295, %s1124_s14   ;;  %s27_s16 = sadd.s32 1, %s1120_s13  ;;  %s1124_s14 = sphi %s1155_s14, %s15_s14   ;;  %s1120_s13 = sphi %s1153_s13, %s1329_s13   ;;  %s1116_s12 = sphi %s1151_s12, %s1328_s12   ;;  %s1112_s11 = sphi %s1149_s11, %s1327_s11   ;;  %s1108_s10 = sphi %s1147_s10, %s1326_s10   ;;  %s1104_s9 = sphi %s1145_s9, %s1325_s9  }
   0x5   : > { %p29_p0 = scmp.ge.s32.totalorder %s27_s16, 4  ;;  %s62_s17 = sadd.s32 1, %s1112_s11 }
   0x6   : > { %p69_p1 = scmp.ne.s32.totalorder %s1112_s11, %s1108_s10  ;;  %p70_p2 = scmp.eq.s32.totalorder %s1124_s14, 0 }
   0x7   : > { %s1331_s16 = smov (%p29_p0, %s27_s16), 0  ;;  %p75_p4 = scmp.ne.s32.totalorder %s1108_s10, %s1104_s9 }
   0x8   : > { %p71_p3 = por %p70_p2, %p69_p1  ;;  %s58_s18 = ssub.s32 %s1120_s13, %s1331_s16 }
   0x9   : > { %p76_p5 = scmp.eq.s32.totalorder %s827_s15, 0  ;;  %p60_p6 = scmp.eq.s32.totalorder %s58_s18, 0 }
   0xa   : > { %p906_p8 = scmp.lt.s32.totalorder %s1124_s14, 4  ;;  %s134_s21 = sand.u32 1, %s1112_s11  }
   0xb   : > { %p1184_p7 = por %p76_p5, %p75_p4  ;;  %s897_s22 = sshll.u32 %s1120_s13, 8 }
   0xc   : > { %s1190_s20 = scalar_select %p60_p6, %s1112_s11, %s62_s17  }
   0xd   : > { %s898_s23 = smul.u32 400, %s134_s21  ;;  %s1197_s26 = scalar_lea.hbm %s1320_s1, %s897_s22 }
   0xe   : > { %p1199_p9 = pnand %p906_p8, %p71_p3  ;;  %s1206_s30 = scalar_lea.sflag [#allocation4], %s134_s21 }
   0xf   : > { %s138_s28 = scalar_lea.vmem [#allocation3], %s898_s23  ;;  %s1044_s3 = scalar_lea.hbm %s1197_s26, 6400 }
  0x10   : > { %s148_s29 = sshll.u32 %s138_s28, 4  ;;  %p1045_p11 = scmp.ne.s32.totalorder %s1197_s26, %s1044_s3  ;;  %s1203_s29 = int_to_ptr.vmem [resolvable:$true] %s148_s29 }
  0x11   : > { %p1046_p12 = pneg %p1199_p9  ;;  %s1049_s6 = scalar_lea.hbm %s1320_s1, 25600 }
  0x12   : > { %p1050_p1 = scmp.lt.u32.totalorder %s1197_s26, %s1320_s1  ;;  %p1051_p2 = scmp.lt.u32.totalorder %s1049_s6, %s1044_s3 }
  0x13   : > { %p1047_p13 = pnand %p1046_p12, %p1045_p11  ;;  %p1053_p4 = scmp.lt.u32.totalorder %s1044_s3, %s1197_s26 }
  0x14   : > { %p1052_p3 = por %p1051_p2, %p1050_p1 }
  0x15   : > { %p1048_p0 = pneg %p1047_p13 }
  0x16   : > { %p1054_p5 = por %p1053_p4, %p1052_p3 }
  0x18   : > { %p1055_p6 = pnand %p1054_p5, %p1048_p0 }
  0x1a   : > { %1058 = shalt.err (!%p1055_p6)
}
  0x1b   : > { %s1059_s9 = scalar_lea.vmem %s1203_s29, 6400  ;;  %s1126_s15 = smov [#allocation3]  }
  0x1c   : > { %p1060_p8 = scmp.ne.s32.totalorder %s1203_s29, %s1059_s9  ;;  %s1064_s17 = sshll.u32 %s1126_s15, 4  ;;  %s1065_s17 = int_to_ptr.vmem [resolvable:$false] %s1064_s17 }
  0x1d   : > { %s1066_s18 = scalar_lea.vmem %s1065_s17, 12800  ;;  %p1067_p10 = scmp.lt.s32.totalorder %s1203_s29, %s1065_s17 }
  0x1e   : > { %p1062_p11 = pnand %p1060_p8, %p1046_p12  ;;  %p1068_p1 = scmp.lt.s32.totalorder %s1066_s18, %s1059_s9 }
  0x20   : > { %p1063_p13 = pneg %p1062_p11  ;;  %p1069_p2 = por %p1068_p1, %p1067_p10 }
  0x22   : > { %p1070_p3 = pnand %p1069_p2, %p1063_p13 }
  0x24   : > { %1073 = shalt.err (!%p1070_p3)
}
  0x25   : > { %s1127_s21 = smov 1024   ;;  %s1128_s22 = smov 256  }
  0x26   : > { %s1129_s23 = smov 16   ;;  %p156_p12 = scmp.lt.s32.totalorder %s1124_s14, 5 }
  0x27   : > { %905 = dma.hbm_to_vmem [thread:$0]  (!%p1199_p9), %s1197_s26, 6400, %s1203_s29, %s1206_s30, %s1127_s21, %s1128_s22, %s1129_s23  }
  0x28   : > { %p1324_p0 = scmp.ge.s32.totalorder %s1124_s14, 1 }
  0x2a   : > { %p157_p4 = pnand %p1324_p0, %p156_p12 }
  0x2b   : > { %s162_s24 = sand.u32 (!%p157_p4), 1, %s1108_s10  }
  0x2c   : > { %160 = sbr.rel (%p157_p4) target bundleno = 371 (0x173), region = 28  ;;  %s163_s28 = scalar_lea.sflag (!%p157_p4), [#allocation4], %s162_s24 }
  0x2d   : > { %s899_s25 = smul.u32 (!%p157_p4), 400, %s162_s24 }
  0x2f   : > { %s1238_s3 = scalar_lea.vmem (!%p157_p4), [#allocation3], %s899_s25 }
  0x33   : > { %1099 = dma.done.wait (%p1184_p7), %s163_s28, 6400  }
  0x34   : > { %1101 = vsyncadd (%p1184_p7), %s163_s28, 4294960896  ;;  %v958_v0 = vld [vmem:[%s1238_s3 + $0x4] ss:$16 sps:$4 sm:$0xff]   ;;  %v960_v1 = vld [vmem:[%s1238_s3 + $0xc] ss:$16 sps:$4 sm:$0xff]   ;;  %vm526_vm0 = vcmask 588800  }
  0x35   : > { %543 = vmatprep.subr.bf16.mxu0 %v958_v0  ;;  %v962_v2 = vld [vmem:[%s1238_s3] ss:$16 sps:$4 sm:$0xff]   ;;  %v963_v3 = vld [vmem:[%s1238_s3 + $0x8] ss:$16 sps:$4 sm:$0xff]   ;;  %584 = vmatprep.subr.bf16.mxu1 %v960_v1  ;;  %v964_v4 = vld [vmem:[%s1238_s3 + $0x24] ss:$16 sps:$4 sm:$0xff]  }
  0x36   : > { %544 = vmatpush1.bf16.msra.mxu0 %v962_v2  ;;  %585 = vmatpush1.bf16.msra.mxu1 %v963_v3  ;;  %v966_v5 = vld [vmem:[%s1238_s3 + $0x2c] ss:$16 sps:$4 sm:$0xff]   ;;  %v968_v6 = vld [vmem:[%s1238_s3 + $0x20] ss:$16 sps:$4 sm:$0xff]   ;;  %v969_v7 = vld [vmem:[%s1238_s3 + $0x28] ss:$16 sps:$4 sm:$0xff]  }
  0x37   : > { %545 = vmatprep.subr.bf16.mxu0 %v964_v4  ;;  %586 = vmatprep.subr.bf16.mxu1 %v966_v5  ;;  %v970_v8 = vld [vmem:[%s1238_s3 + $0x44] ss:$16 sps:$4 sm:$0xff]   ;;  %v972_v9 = vld [vmem:[%s1238_s3 + $0x4c] ss:$16 sps:$4 sm:$0xff]   ;;  %v974_v10 = vld [vmem:[%s1238_s3 + $0x40] ss:$16 sps:$4 sm:$0xff]  }
  0x38   : > { %v975_v11 = vld [vmem:[%s1238_s3 + $0x48] ss:$16 sps:$4 sm:$0xff]   ;;  %v976_v12 = vld [vmem:[%s1238_s3 + $0x64] ss:$16 sps:$4 sm:$0xff]   ;;  %v978_v13 = vld [vmem:[%s1238_s3 + $0x6c] ss:$16 sps:$4 sm:$0xff]  }
  0x39   : > { %v980_v14 = vld [vmem:[%s1238_s3 + $0x60] ss:$16 sps:$4 sm:$0xff]   ;;  %v981_v15 = vld [vmem:[%s1238_s3 + $0x68] ss:$16 sps:$4 sm:$0xff]   ;;  %v982_v16 = vld [vmem:[%s1238_s3 + $0x84] ss:$16 sps:$4 sm:$0xff]  }
  0x3a   : > { %546 = vmatpush1.bf16.msra.mxu0 %v968_v6  ;;  %587 = vmatpush1.bf16.msra.mxu1 %v969_v7  ;;  %v984_v17 = vld [vmem:[%s1238_s3 + $0x8c] ss:$16 sps:$4 sm:$0xff]   ;;  %v986_v18 = vld [vmem:[%s1238_s3 + $0x80] ss:$16 sps:$4 sm:$0xff]   ;;  %v987_v19 = vld [vmem:[%s1238_s3 + $0x88] ss:$16 sps:$4 sm:$0xff]  }
  0x3b   : > { %547 = vmatprep.subr.bf16.mxu0 %v970_v8  ;;  %588 = vmatprep.subr.bf16.mxu1 %v972_v9  ;;  %v988_v20 = vld [vmem:[%s1238_s3 + $0xa4] ss:$16 sps:$4 sm:$0xff]   ;;  %v990_v21 = vld [vmem:[%s1238_s3 + $0xac] ss:$16 sps:$4 sm:$0xff]   ;;  %v992_v22 = vld [vmem:[%s1238_s3 + $0xa0] ss:$16 sps:$4 sm:$0xff]  }
  0x3c   : > { %v993_v23 = vld [vmem:[%s1238_s3 + $0xa8] ss:$16 sps:$4 sm:$0xff]   ;;  %v994_v24 = vld [vmem:[%s1238_s3 + $0xc4] ss:$16 sps:$4 sm:$0xff]   ;;  %v996_v25 = vld [vmem:[%s1238_s3 + $0xcc] ss:$16 sps:$4 sm:$0xff]  }
  0x3d   : > { %v998_v26 = vld [vmem:[%s1238_s3 + $0xc0] ss:$16 sps:$4 sm:$0xff]   ;;  %v999_v27 = vld [vmem:[%s1238_s3 + $0xc8] ss:$16 sps:$4 sm:$0xff]   ;;  %v1000_v28 = vld [vmem:[%s1238_s3 + $0xe4] ss:$16 sps:$4 sm:$0xff]  }
  0x3e   : > { %548 = vmatpush1.bf16.msra.mxu0 %v974_v10  ;;  %589 = vmatpush1.bf16.msra.mxu1 %v975_v11  ;;  %v1002_v29 = vld [vmem:[%s1238_s3 + $0xec] ss:$16 sps:$4 sm:$0xff]   ;;  %v1004_v30 = vld [vmem:[%s1238_s3 + $0xe0] ss:$16 sps:$4 sm:$0xff]   ;;  %v1005_v31 = vld [vmem:[%s1238_s3 + $0xe8] ss:$16 sps:$4 sm:$0xff]  }
  0x3f   : > { %549 = vmatprep.subr.bf16.mxu0 %v976_v12  ;;  %590 = vmatprep.subr.bf16.mxu1 %v978_v13  ;;  %v1006_v32 = vld [vmem:[%s1238_s3 + $0x104] ss:$16 sps:$4 sm:$0xff]   ;;  %v1008_v33 = vld [vmem:[%s1238_s3 + $0x10c] ss:$16 sps:$4 sm:$0xff]   ;;  %v1010_v34 = vld [vmem:[%s1238_s3 + $0x100] ss:$16 sps:$4 sm:$0xff]  }
  0x40   : > { %v1011_v35 = vld [vmem:[%s1238_s3 + $0x108] ss:$16 sps:$4 sm:$0xff]   ;;  %v219_v36 = vld [vmem:[%s1319_s0] sm:$0xff]  ;;  %v1014_v38 = vld [vmem:[%s1238_s3 + $0x12c] ss:$16 sps:$4 sm:$0xff]   ;;  %vm530_vm1 = vcmask 1043456  }
  0x41   : > { %v1012_v37 = vld [vmem:[%s1238_s3 + $0x124] ss:$16 sps:$4 sm:$0xff]   ;;  %v838_v39 = vcombine.high %v219_v36, %v219_v36  ;;  %v1016_v40 = vld [vmem:[%s1238_s3 + $0x120] ss:$16 sps:$4 sm:$0xff]   ;;  %v1017_v41 = vld [vmem:[%s1238_s3 + $0x128] ss:$16 sps:$4 sm:$0xff]   ;;  %v837_v58 = vcombine.low %v219_v36, %v219_v36 }
  0x42   : > { %550 = vmatpush1.bf16.msra.mxu0 %v980_v14  ;;  %591 = vmatpush1.bf16.msra.mxu1 %v981_v15  ;;  %v1018_v42 = vld [vmem:[%s1238_s3 + $0x144] ss:$16 sps:$4 sm:$0xff]   ;;  %v1020_v43 = vld [vmem:[%s1238_s3 + $0x14c] ss:$16 sps:$4 sm:$0xff]   ;;  %v1022_v44 = vld [vmem:[%s1238_s3 + $0x140] ss:$16 sps:$4 sm:$0xff]  }
  0x43   : > { %551 = vmatprep.subr.bf16.mxu0 %v982_v16  ;;  %592 = vmatprep.subr.bf16.mxu1 %v984_v17  ;;  %v1023_v45 = vld [vmem:[%s1238_s3 + $0x148] ss:$16 sps:$4 sm:$0xff]   ;;  %v1024_v46 = vld [vmem:[%s1238_s3 + $0x164] ss:$16 sps:$4 sm:$0xff]   ;;  %v1026_v47 = vld [vmem:[%s1238_s3 + $0x16c] ss:$16 sps:$4 sm:$0xff]  }
  0x44   : > { %892 = vmatprep.mubr.msk.bf16.mxu0 %vm526_vm0, %v838_v39  ;;  %894 = vmatprep.mubr.msk.bf16.mxu1 %vm526_vm0, %v838_v39  ;;  %v268_v48 = vld [vmem:[%s1238_s3 + $0x180] sm:$0xff]  ;;  %v269_v49 = vld [vmem:[%s1238_s3 + $0x188] sm:$0xff]  ;;  %s835_s27 = sshll.u32 %s1116_s12, 2 }
  0x45   : > { %v1028_v50 = vld [vmem:[%s1238_s3 + $0x160] ss:$16 sps:$4 sm:$0xff]   ;;  %v1029_v51 = vld [vmem:[%s1238_s3 + $0x168] ss:$16 sps:$4 sm:$0xff]   ;;  %v888_v52 = vcombine.high %v268_v48, %v268_v48  ;;  %v890_v53 = vcombine.high %v269_v49, %v269_v49  ;;  %v887_v54 = vcombine.low %v268_v48, %v268_v48  ;;  %v889_v55 = vcombine.low %v269_v49, %v269_v49  ;;  %p201_p7 = scmp.lt.s32.totalorder %s835_s27, 15 }
  0x46   : > { %552 = vmatpush1.bf16.msra.mxu0 %v986_v18  ;;  %593 = vmatpush1.bf16.msra.mxu1 %v987_v19 }
  0x47   : > { %553 = vmatprep.subr.bf16.mxu0 %v988_v20  ;;  %594 = vmatprep.subr.bf16.mxu1 %v990_v21  ;;  %v532_v56 = vsel %vm530_vm1, %v887_v54, 0  ;;  %v538_v57 = vsel %vm530_vm1, %v889_v55, 0  ;;  %s1333_s27 = smov (!%p201_p7, %s835_s27), 15 }
  0x48   : > { %s836_s29 = sshll.u32 %s1333_s27, 3 }
  0x49   : > { %s204_s5 = scalar_lea.vmem %s1321_s2, %s836_s29 }
  0x4a   : > { %554 = vmatpush1.bf16.msra.mxu0 %v992_v22  ;;  %595 = vmatpush1.bf16.msra.mxu1 %v993_v23 }
  0x4b   : > { %555 = vmatprep.subr.bf16.mxu0 %v994_v24  ;;  %596 = vmatprep.subr.bf16.mxu1 %v996_v25 }
  0x4e   : > { %556 = vmatpush1.bf16.msra.mxu0 %v998_v26  ;;  %597 = vmatpush1.bf16.msra.mxu1 %v999_v27 }
  0x4f   : > { %557 = vmatprep.subr.bf16.mxu0 %v1000_v28  ;;  %598 = vmatprep.subr.bf16.mxu1 %v1002_v29 }
  0x52   : > { %558 = vmatpush1.bf16.msra.mxu0 %v1004_v30  ;;  %599 = vmatpush1.bf16.msra.mxu1 %v1005_v31 }
  0x53   : > { %559 = vmatprep.subr.bf16.mxu0 %v1006_v32  ;;  %600 = vmatprep.subr.bf16.mxu1 %v1008_v33 }
  0x56   : > { %560 = vmatpush1.bf16.msra.mxu0 %v1010_v34  ;;  %601 = vmatpush1.bf16.msra.mxu1 %v1011_v35 }
  0x57   : > { %561 = vmatprep.subr.bf16.mxu0 %v1012_v37  ;;  %602 = vmatprep.subr.bf16.mxu1 %v1014_v38 }
  0x5a   : > { %562 = vmatpush1.bf16.msra.mxu0 %v1016_v40  ;;  %603 = vmatpush1.bf16.msra.mxu1 %v1017_v41 }
  0x5b   : > { %563 = vmatprep.subr.bf16.mxu0 %v1018_v42  ;;  %604 = vmatprep.subr.bf16.mxu1 %v1020_v43 }
  0x5e   : > { %564 = vmatpush1.bf16.msra.mxu0 %v1022_v44  ;;  %605 = vmatpush1.bf16.msra.mxu1 %v1023_v45 }
  0x5f   : > { %565 = vmatprep.subr.bf16.mxu0 %v1024_v46  ;;  %606 = vmatprep.subr.bf16.mxu1 %v1026_v47 }
  0x62   : > { %566 = vmatpush1.bf16.msra.mxu0 %v1028_v50  ;;  %607 = vmatpush1.bf16.msra.mxu1 %v1029_v51 }
  0x63   : > { %891 = vmatprep.subr.msk.bf16.mxu0 %vm530_vm1, %v888_v52  ;;  %893 = vmatprep.subr.msk.bf16.mxu1 %vm530_vm1, %v890_v53 }
  0x66   : > { %568 = vmatpush1.bf16.msra.mxu0 %v532_v56  ;;  %609 = vmatpush1.bf16.msra.mxu1 %v538_v57 }
  0x69   : > { %576 = vmatmul.mubr.bf16.vlgmr.msra.gmra.mrb[0].mxu0 %v837_v58  ;;  %617 = vmatmul.mubr.bf16.vlgmr.msra.gmra.mrb[0].mxu1 %v837_v58 }
 0x13c   : > { %v577_v59 = vpop.f32.mrb[0].mxu0  ;;  %v618_v60 = vpop.f32.mrb[0].mxu1 }
 0x13d   : > { %v640_v61 = vrot.slane %v577_v59, 4  ;;  %v652_v62 = vrot.slane %v618_v60, 4  ;;  %v579_v63 = vpop.f32.mrb[1].mxu0  ;;  %v620_v0 = vpop.f32.mrb[1].mxu1 }
 0x13e   : > { %v646_v1 = vrot.slane %v579_v63, 4  ;;  %v658_v2 = vrot.slane %v620_v0, 4  ;;  %v581_v3 = vpop.f32.mrb[2].mxu0  ;;  %v622_v4 = vpop.f32.mrb[2].mxu1 }
 0x13f   : > { %v641_v5 = vadd.f32 %v640_v61, %v577_v59  ;;  %v653_v6 = vadd.f32 %v652_v62, %v618_v60  ;;  %v582_v7 = vpop.f32.mrb[3].mxu0  ;;  %v623_v8 = vpop.f32.mrb[3].mxu1 }
 0x140   : > { %v647_v9 = vadd.f32 %v646_v1, %v579_v63  ;;  %v659_v10 = vadd.f32 %v658_v2, %v620_v0 }
 0x141   : > { %v642_v11 = vrot.slane %v641_v5, 2  ;;  %v654_v12 = vrot.slane %v653_v6, 2 }
 0x142   : > { %v648_v13 = vrot.slane %v647_v9, 2  ;;  %v660_v14 = vrot.slane %v659_v10, 2 }
 0x143   : > { %v643_v15 = vadd.f32 %v642_v11, %v641_v5  ;;  %v655_v16 = vadd.f32 %v654_v12, %v653_v6 }
 0x144   : > { %v649_v17 = vadd.f32 %v648_v13, %v647_v9  ;;  %v661_v18 = vadd.f32 %v660_v14, %v659_v10 }
 0x145   : > { %v644_v19 = vrot.slane %v643_v15, 1  ;;  %v656_v20 = vrot.slane %v655_v16, 1 }
 0x146   : > { %v650_v21 = vrot.slane %v649_v17, 1  ;;  %v662_v22 = vrot.slane %v661_v18, 1 }
 0x147   : > { %v645_v23 = vadd.f32 %v644_v19, %v643_v15  ;;  %v657_v24 = vadd.f32 %v656_v20, %v655_v16 }
 0x148   : > { %v651_v25 = vadd.f32 %v650_v21, %v649_v17  ;;  %v663_v26 = vadd.f32 %v662_v22, %v661_v18 }
 0x149   : > { %v665_v27 = vmul.f32 0.125, %v645_v23  ;;  %v667_v28 = vmul.f32 0.125, %v657_v24 }
 0x14a   : > { %v666_v29 = vmul.f32 0.125, %v651_v25  ;;  %v668_v30 = vmul.f32 0.125, %v663_v26 }
 0x14b   : > { %v669_v31 = vsub.f32 %v577_v59, %v665_v27  ;;  %v671_v32 = vsub.f32 %v618_v60, %v667_v28 }
 0x14c   : > { %v670_v33 = vsub.f32 %v579_v63, %v666_v29  ;;  %v672_v34 = vsub.f32 %v620_v0, %v668_v30 }
 0x14d   : > { %v673_v35 = vmul.f32 %v669_v31, %v669_v31  ;;  %v675_v36 = vmul.f32 %v671_v32, %v671_v32 }
 0x14e   : > { %v674_v37 = vmul.f32 %v670_v33, %v670_v33  ;;  %v676_v38 = vmul.f32 %v672_v34, %v672_v34 }
 0x14f   : > { %v677_v39 = vrot.slane %v673_v35, 4  ;;  %v689_v40 = vrot.slane %v675_v36, 4 }
 0x150   : > { %v683_v41 = vrot.slane %v674_v37, 4  ;;  %v695_v42 = vrot.slane %v676_v38, 4 }
 0x151   : > { %v678_v43 = vadd.f32 %v677_v39, %v673_v35  ;;  %v690_v44 = vadd.f32 %v689_v40, %v675_v36 }
 0x152   : > { %v684_v45 = vadd.f32 %v683_v41, %v674_v37  ;;  %v696_v46 = vadd.f32 %v695_v42, %v676_v38 }
 0x153   : > { %v679_v47 = vrot.slane %v678_v43, 2  ;;  %v691_v48 = vrot.slane %v690_v44, 2 }
 0x154   : > { %v685_v49 = vrot.slane %v684_v45, 2  ;;  %v697_v50 = vrot.slane %v696_v46, 2 }
 0x155   : > { %v680_v51 = vadd.f32 %v679_v47, %v678_v43  ;;  %v692_v52 = vadd.f32 %v691_v48, %v690_v44 }
 0x156   : > { %v686_v53 = vadd.f32 %v685_v49, %v684_v45  ;;  %v698_v54 = vadd.f32 %v697_v50, %v696_v46 }
 0x157   : > { %v681_v55 = vrot.slane %v680_v51, 1  ;;  %v693_v56 = vrot.slane %v692_v52, 1 }
 0x158   : > { %v687_v57 = vrot.slane %v686_v53, 1  ;;  %v699_v58 = vrot.slane %v698_v54, 1 }
 0x159   : > { %v682_v59 = vadd.f32 %v681_v55, %v680_v51  ;;  %v694_v60 = vadd.f32 %v693_v56, %v692_v52 }
 0x15a   : > { %v688_v61 = vadd.f32 %v687_v57, %v686_v53  ;;  %v700_v62 = vadd.f32 %v699_v58, %v698_v54 }
 0x15b   : > { %v701_v63 = vmul.f32 0.125, %v682_v59  ;;  %v703_v0 = vmul.f32 0.125, %v694_v60 }
 0x15c   : > { %v702_v1 = vmul.f32 0.125, %v688_v61  ;;  %v704_v2 = vmul.f32 0.125, %v700_v62 }
 0x15d   : > { %v705_v3 = vadd.f32 1e-05, %v701_v63  ;;  %v707_v4 = vadd.f32 1e-05, %v703_v0 }
 0x15e   : > { %v706_v5 = vadd.f32 1e-05, %v702_v1  ;;  %v708_v6 = vadd.f32 1e-05, %v704_v2 }
 0x15f   : > { %1036 = vrsqrt.f32 %v705_v3 }
 0x160   : > { %1038 = vrsqrt.f32 %v707_v4 }
 0x161   : > { %1040 = vrsqrt.f32 %v706_v5 }
 0x162   : > { %1042 = vrsqrt.f32 %v708_v6 }
 0x169   : > { %v1037_v7 = vpop.eup %1036 }
 0x16a   : > { %v1039_v8 = vpop.eup %1038  ;;  %v713_v9 = vmul.f32 %v1037_v7, %v669_v31 }
 0x16b   : > { %v1041_v10 = vpop.eup %1040  ;;  %v715_v11 = vmul.f32 %v1039_v8, %v671_v32 }
 0x16c   : > { %v1043_v12 = vpop.eup %1042  ;;  %vm717_vm2 = vcmp.gt.f32.partialorder %v713_v9, 0.0  ;;  %v721_v13 = vmul.f32 0.0, %v713_v9  ;;  %v714_v14 = vmul.f32 %v1041_v10, %v670_v33 }
 0x16d   : > { %vm719_vm3 = vcmp.gt.f32.partialorder %v715_v11, 0.0  ;;  %v723_v15 = vmul.f32 0.0, %v715_v11  ;;  %v716_v16 = vmul.f32 %v1043_v12, %v672_v34 }
 0x16e   : > { %v725_v17 = vsel %vm717_vm2, %v713_v9, %v721_v13  ;;  %vm718_vm4 = vcmp.gt.f32.partialorder %v714_v14, 0.0  ;;  %v722_v18 = vmul.f32 0.0, %v714_v14 }
 0x16f   : > { %729 = vst [vmem:[%s204_s5] sm:$0xff] %v725_v17  ;;  %v727_v19 = vsel %vm719_vm3, %v715_v11, %v723_v15  ;;  %vm720_vm5 = vcmp.gt.f32.partialorder %v716_v16, 0.0  ;;  %v724_v20 = vmul.f32 0.0, %v716_v16 }
 0x170   : > { %731 = vst [vmem:[%s204_s5 + $0x10] sm:$0xff] %v727_v19  ;;  %v726_v21 = vsel %vm718_vm4, %v714_v14, %v722_v18 }
 0x171   : > { %730 = vst [vmem:[%s204_s5 + $0x8] sm:$0xff] %v726_v21  ;;  %v728_v22 = vsel %vm720_vm5, %v716_v16, %v724_v20 }
 0x172   : > { %732 = vst [vmem:[%s204_s5 + $0x18] sm:$0xff] %v728_v22 }
 0x173 PF: > { %s15_s14 = sadd.s32 1, %s1124_s14   ;;  %s1325_s9 = smov %s1108_s10 }
 0x174   : > { %p12_p9 = scmp.ge.s32.totalorder %s15_s14, 6   ;;  %s1326_s10 = smov %s1112_s11 }
 0x175   : > { %s1327_s11 = smov %s1190_s20  ;;  %s1328_s12 = smov %s1120_s13 }
 0x176   : > { %s1329_s13 = smov %s1331_s16  ;;  %14 = sbr.rel (!%p12_p9) target bundleno = 4 (0x4), region = 79 }
 0x17d   :  { %755 = vsyncpa [#allocation4], 1 }
 0x17e   :  { %757 = vsyncpa [#allocation4 + $0x1], 1 }

// kernel: combined_generator.12
= control target key start
LH: loop header
LB: loop body
LE: loop exit
PB: predicated region body
PF: predicated region fallthrough
CT: control target
= control target key end

     0   :  { %s4004_s0 = inlined_call_operand.vmem [shape: bf16[14,8192], index: 0, kind: input, shape index: {}]   ;;  %s4005_s1 = inlined_call_operand.hbm [shape: bf16[8192,1024], index: 1, kind: input, shape index: {}]   ;;  %s4006_s2 = inlined_call_operand.vmem [shape: f32[14,1024], index: 2, kind: output, shape index: {}]  }
   0x1   :  { %4010 = sst [smem:[#allocation11_spill]] %s4004_s0 }
   0x2   :  { %7 = vsyncpa [#allocation5], 0 }
   0x3   :  { %9 = vsyncpa [#allocation5 + $0x1], 0  ;;  %s3438_s9 = smov 0   ;;  %s3440_s10 = smov 0  }
   0x4   :  { %s3442_s11 = smov 0   ;;  %s3444_s12 = smov 0  }
   0x5   :  { %s3446_s13 = smov 0   ;;  %s3448_s14 = smov 0  }
   0x6   :  { %s3450_s15 = smov 0   ;;  %s3452_s16 = smov 0  }
   0x7   :  { %s3454_s17 = smov 0   ;;  %s3456_s18 = smov 0  }
   0x8   :  { %s3458_s19 = smov 0   ;;  %s3460_s20 = smov 0  }
   0x9 LB: > { %4011 = sst [smem:[#allocation8_spill]] %s3412_s19  ;;  %s2482_s21 = sadd.s32 4294967295, %s3416_s20   ;;  %s3416_s20 = sphi %s3460_s20, %s15_s20   ;;  %s3412_s19 = sphi %s3458_s19, %s4022_s19   ;;  %s3408_s18 = sphi %s3456_s18, %s4031_s18   ;;  %s3404_s17 = sphi %s3454_s17, %s4020_s17   ;;  %s3400_s16 = sphi %s3452_s16, %s4030_s16   ;;  %s3396_s15 = sphi %s3450_s15, %s4029_s15   ;;  %s3392_s14 = sphi %s3448_s14, %s4028_s14   ;;  %s3388_s13 = sphi %s3446_s13, %s4027_s13   ;;  %s3384_s12 = sphi %s3444_s12, %s4026_s12   ;;  %s3380_s11 = sphi %s3442_s11, %s4025_s11   ;;  %s3376_s10 = sphi %s3440_s10, %s4024_s10   ;;  %s3372_s9 = sphi %s3438_s9, %s4023_s9  }
   0xa   : > { %s24_s22 = sadd.s32 1, %s3408_s18  ;;  %s27_s23 = sadd.s32 1, %s3412_s19 }
   0xb   : > { %p25_p0 = scmp.ge.s32.totalorder %s24_s22, 8  ;;  %s34_s24 = sadd.s32 1, %s3396_s15 }
   0xc   : > { %p41_p1 = scmp.ne.s32.totalorder %s3396_s15, %s3392_s14  ;;  %p42_p2 = scmp.eq.s32.totalorder %s3416_s20, 0 }
   0xd   : > { %s4033_s22 = smov (%p25_p0, %s24_s22), 0  ;;  %s4035_s23 = smov (!%p25_p0, %s27_s23), %s3412_s19 }
   0xe   : > { %4012 = sst [smem:[#allocation9_spill]] %s4033_s22  ;;  %s31_s25 = ssub.s32 %s3408_s18, %s4033_s22 }
   0xf   : > { %p29_p3 = scmp.ge.s32.totalorder %s4035_s23, 2  ;;  %p32_p4 = scmp.eq.s32.totalorder %s31_s25, 0 }
  0x10   : > { %p3510_p5 = por %p42_p2, %p41_p1  ;;  %s62_s27 = sadd.s32 1, %s3388_s13 }
  0x11   : > { %s4037_s23 = smov (%p29_p3, %s4035_s23), 0  ;;  %p69_p6 = scmp.ne.s32.totalorder %s3388_s13, %s3384_s12 }
  0x12   : > { %4014 = sst [smem:[#allocation10_spill]] %s4037_s23  ;;  %s58_s29 = ssub.s32 %s3412_s19, %s4037_s23 }
  0x13   : > { %s3518_s28 = scalar_select %p32_p4, %s3396_s15, %s34_s24  }
  0x14   : > { %s59_s30 = sor.u32 %s58_s29, %s31_s25  ;;  %p75_p7 = scmp.ne.s32.totalorder %s3384_s12, %s3380_s11 }
  0x15   : > { %p60_p8 = scmp.eq.s32.totalorder %s59_s30, 0  ;;  %p3526_p9 = por %p69_p6, %p42_p2 }
  0x16   : > { %p76_p10 = scmp.eq.s32.totalorder %s2482_s21, 0  ;;  %p86_p11 = scmp.eq.s32.totalorder %s58_s29, 0 }
  0x17   : > { %s3533_s4 = scalar_select %p60_p8, %s3388_s13, %s62_s27  }
  0x18   : > { %p3535_p12 = por %p76_p10, %p75_p7  ;;  %s88_s6 = sadd.s32 1, %s3376_s10 }
  0x19   : > { %s3541_s7 = scalar_select %p86_p11, %s3376_s10, %s88_s6  }
  0x1a   : > { %p98_p13 = scmp.ne.s32.totalorder %s3376_s10, %s3372_s9  ;;  %p99_p0 = scmp.eq.s32.totalorder %s2482_s21, 15 }
  0x1b   : > { %p2485_p2 = scmp.ge.s32.totalorder %s3416_s20, 16 }
  0x1c   : > { %p3547_p1 = por %p99_p0, %p98_p13 }
  0x1d   : > { %121 = sbr.rel (%p2485_p2) target bundleno = 79 (0x4f), region = 16 }
  0x1e   : > { %s4017_s8 = scalar_select %p3547_p1, 1, 0 }
  0x24   : > { %124 = sbr.rel (!%p3510_p5) target bundleno = 50 (0x32), region = 20  ;;  %s126_s11 = sand.u32 (%p3510_p5), 1, %s3396_s15  }
  0x25   : > { %s2769_s24 = sshll.u32 (%p3510_p5), %s3408_s18, 5  ;;  %s2486_s25 = sshll.u32 (%p3510_p5), %s126_s11, 6 }
  0x26   : > { %s4018_s0 = sld [smem:[#allocation11_spill]] (%p3510_p5)  ;;  %s128_s21 = scalar_lea.vmem (%p3510_p5), [#allocation3], %s2486_s25 }
  0x2c   : > { %s131_s30 = scalar_lea.vmem %s4018_s0, %s2769_s24 }
  0x2d   : > { %v144_v0 = vld [vmem:[%s131_s30] sm:$0xff]  ;;  %v146_v1 = vld [vmem:[%s131_s30 + $0x8] sm:$0xff]  ;;  %v148_v2 = vld [vmem:[%s131_s30 + $0x10] sm:$0xff] }
  0x2e   : > { %145 = vst [vmem:[%s128_s21] sm:$0xff] %v144_v0  ;;  %147 = vst [vmem:[%s128_s21 + $0x8] sm:$0xff] %v146_v1  ;;  %v150_v3 = vld [vmem:[%s131_s30 + $0x18] sm:$0xff]  ;;  %v152_v4 = vld [vmem:[%s131_s30 + $0x100] sm:$0xff] }
  0x2f   : > { %149 = vst [vmem:[%s128_s21 + $0x10] sm:$0xff] %v148_v2  ;;  %v154_v5 = vld [vmem:[%s131_s30 + $0x108] sm:$0xff]  ;;  %151 = vst [vmem:[%s128_s21 + $0x18] sm:$0xff] %v150_v3  ;;  %v156_v6 = vld [vmem:[%s131_s30 + $0x110] sm:$0xff] }
  0x30   : > { %153 = vst [vmem:[%s128_s21 + $0x20] sm:$0xff] %v152_v4  ;;  %155 = vst [vmem:[%s128_s21 + $0x28] sm:$0xff] %v154_v5  ;;  %v158_v7 = vld [vmem:[%s131_s30 + $0x118] sm:$0xff] }
  0x31   : > { %157 = vst [vmem:[%s128_s21 + $0x30] sm:$0xff] %v156_v6  ;;  %159 = vst [vmem:[%s128_s21 + $0x38] sm:$0xff] %v158_v7 }
  0x32 PF: > { %s166_s26 = sand.u32 1, %s3388_s13   ;;  %s2491_s6 = sshll.u32 %s3412_s19, 2 }
  0x33   : > { %s2489_s11 = sshll.u32 %s166_s26, 11  ;;  %s2770_s24 = sshll.u32 %s3408_s18, 10 }
  0x34   : > { %s177_s25 = sadd.s32 %s2770_s24, %s2491_s6  ;;  %s170_s27 = scalar_lea.vmem [#allocation4], %s2489_s11 }
  0x35   : > { %s180_s29 = sshll.u32 %s170_s27, 4  ;;  %s2493_s0 = sshll.u32 %s177_s25, 6  ;;  %s3562_s29 = int_to_ptr.vmem [resolvable:$true] %s180_s29 }
  0x36   : > { %s3567_s30 = scalar_lea.hbm %s4005_s1, %s2493_s0  ;;  %s3569_s21 = scalar_lea.sflag [#allocation5], %s166_s26 }
  0x37   : > { %s3290_s19 = scalar_lea.hbm %s3567_s30, 32768  ;;  %s3294_s24 = scalar_lea.hbm %s4005_s1, 524288 }
  0x38   : > { %p3291_p3 = scmp.ne.s32.totalorder %s3567_s30, %s3290_s19  ;;  %p3295_p6 = scmp.lt.u32.totalorder %s3567_s30, %s4005_s1 }
  0x39   : > { %p3296_p7 = scmp.lt.u32.totalorder %s3294_s24, %s3290_s19  ;;  %p3298_p10 = scmp.lt.u32.totalorder %s3290_s19, %s3567_s30 }
  0x3a   : > { %p3292_p4 = pnand %p3291_p3, %p3526_p9 }
  0x3b   : > { %p3297_p8 = por %p3296_p7, %p3295_p6 }
  0x3c   : > { %p3293_p5 = pneg %p3292_p4 }
  0x3d   : > { %p3299_p11 = por %p3298_p10, %p3297_p8 }
  0x3f   : > { %p3300_p13 = pnand %p3299_p11, %p3293_p5 }
  0x41   : > { %3303 = shalt.err (!%p3300_p13)
}
  0x42   : > { %s3304_s0 = scalar_lea.vmem %s3562_s29, 32768  ;;  %s3418_s22 = smov [#allocation4]  }
  0x43   : > { %p3305_p0 = scmp.ne.s32.totalorder %s3562_s29, %s3304_s0  ;;  %s3308_s23 = sshll.u32 %s3418_s22, 4  ;;  %s3309_s23 = int_to_ptr.vmem [resolvable:$false] %s3308_s23 }
  0x44   : > { %s3310_s26 = scalar_lea.vmem %s3309_s23, 65536  ;;  %p3311_p4 = scmp.lt.s32.totalorder %s3562_s29, %s3309_s23 }
  0x45   : > { %p3306_p2 = pnand %p3305_p0, %p3526_p9  ;;  %p3312_p1 = scmp.lt.s32.totalorder %s3310_s26, %s3304_s0 }
  0x47   : > { %p3307_p3 = pneg %p3306_p2  ;;  %p3313_p6 = por %p3312_p1, %p3311_p4 }
  0x49   : > { %p3314_p7 = pnand %p3313_p6, %p3307_p3 }
  0x4b   : > { %3317 = shalt.err (!%p3314_p7)
}
  0x4c   : > { %s3419_s19 = smov 512   ;;  %s3420_s6 = smov 256  }
  0x4d   : > { %s3421_s11 = smov 16  }
  0x4e   : > { %2796 = dma.hbm_to_vmem [thread:$0]  (%p3526_p9), %s3567_s30, 32768, %s3562_s29, %s3569_s21, %s3419_s19, %s3420_s6, %s3421_s11  }
  0x4f PF: > { %p2494_p5 = scmp.ge.s32.totalorder %s3416_s20, 1  ;;  %p188_p8 = scmp.lt.s32.totalorder %s3416_s20, 17 }
  0x51   : > { %p189_p10 = pnand %p2494_p5, %p188_p8 }
  0x52   : > { %s195_s24 = sand.u32 (!%p189_p10), 1, %s3392_s14   ;;  %s201_s25 = sand.u32 (!%p189_p10), 1, %s3384_s12  }
  0x53   : > { %192 = sbr.rel (%p189_p10) target bundleno = 654 (0x28e), region = 47  ;;  %s2495_s27 = sshll.u32 (!%p189_p10), %s195_s24, 6 }
  0x54   : > { %s2496_s0 = sshll.u32 (!%p189_p10), %s201_s25, 11  ;;  %s3597_s22 = scalar_lea.vmem (!%p189_p10), [#allocation3], %s2495_s27 }
  0x55   : > { %s202_s23 = scalar_lea.sflag (!%p189_p10), [#allocation5], %s201_s25  ;;  %s3599_s26 = scalar_lea.vmem (!%p189_p10), [#allocation4], %s2496_s0 }
  0x5a   : > { %3367 = dma.done.wait (%p3535_p12), %s202_s23, 32768  }
  0x5b   : > { %3369 = vsyncadd (%p3535_p12), %s202_s23, 4294934528  ;;  %s226_s3 = sand.u32 1, %s3372_s9   ;;  %p2498_p9 = scmp.ne.s32.totalorder %s3400_s16, 0 }
  0x5c   : > { %s2497_s29 = sshll.u32 %s226_s3, 6  ;;  %v3422_v8 = vmov (!%p2498_p9), 0.0  }
  0x5d   : > { %s3606_s30 = scalar_lea.vmem [#allocation6], %s2497_s29  ;;  %236 = sbr.rel (%p2498_p9) target bundleno = 100 (0x64), region = 59  ;;  %237 = vst [vmem:[#allocation2] sm:$0xff] (!%p2498_p9), %v3422_v8  ;;  %238 = vst [vmem:[#allocation2 + $0x8] sm:$0xff] (!%p2498_p9), %v3422_v8 }
  0x5e   : > { %239 = vst [vmem:[#allocation2 + $0x10] sm:$0xff] (!%p2498_p9), %v3422_v8  ;;  %240 = vst [vmem:[#allocation2 + $0x18] sm:$0xff] (!%p2498_p9), %v3422_v8 }
  0x5f   : > { %241 = vst [vmem:[#allocation2 + $0x20] sm:$0x3f] (!%p2498_p9), %v3422_v8  ;;  %242 = vst [vmem:[#allocation2 + $0x28] sm:$0x3f] (!%p2498_p9), %v3422_v8 }
  0x60   : > { %243 = vst [vmem:[#allocation2 + $0x30] sm:$0x3f] (!%p2498_p9), %v3422_v8  ;;  %244 = vst [vmem:[#allocation2 + $0x38] sm:$0x3f] (!%p2498_p9), %v3422_v8 }
  0x64 PF: > { %v2898_v9 = vld [vmem:[%s3599_s26 + $0x4] ss:$16 sps:$4 sm:$0xff]   ;;  %v2900_v10 = vld [vmem:[%s3599_s26 + $0xc] ss:$16 sps:$4 sm:$0xff]   ;;  %v2902_v11 = vld [vmem:[%s3599_s26] ss:$16 sps:$4 sm:$0xff]  }
  0x65   : > { %1837 = vmatprep.subr.bf16.mxu0 %v2898_v9  ;;  %v2903_v12 = vld [vmem:[%s3599_s26 + $0x8] ss:$16 sps:$4 sm:$0xff]   ;;  %2009 = vmatprep.subr.bf16.mxu1 %v2900_v10  ;;  %v2904_v13 = vld [vmem:[%s3599_s26 + $0x24] ss:$16 sps:$4 sm:$0xff]   ;;  %v2906_v14 = vld [vmem:[%s3599_s26 + $0x2c] ss:$16 sps:$4 sm:$0xff]  }
  0x66   : > { %1838 = vmatpush1.bf16.msra.mxu0 %v2902_v11  ;;  %2010 = vmatpush1.bf16.msra.mxu1 %v2903_v12  ;;  %v2908_v15 = vld [vmem:[%s3599_s26 + $0x20] ss:$16 sps:$4 sm:$0xff]   ;;  %v2909_v16 = vld [vmem:[%s3599_s26 + $0x28] ss:$16 sps:$4 sm:$0xff]   ;;  %v2910_v17 = vld [vmem:[%s3599_s26 + $0x44] ss:$16 sps:$4 sm:$0xff]  }
  0x67   : > { %1839 = vmatprep.subr.bf16.mxu0 %v2904_v13  ;;  %2011 = vmatprep.subr.bf16.mxu1 %v2906_v14  ;;  %v2912_v18 = vld [vmem:[%s3599_s26 + $0x4c] ss:$16 sps:$4 sm:$0xff]   ;;  %v2914_v19 = vld [vmem:[%s3599_s26 + $0x40] ss:$16 sps:$4 sm:$0xff]   ;;  %v2915_v20 = vld [vmem:[%s3599_s26 + $0x48] ss:$16 sps:$4 sm:$0xff]  }
  0x68   : > { %v2916_v21 = vld [vmem:[%s3599_s26 + $0x64] ss:$16 sps:$4 sm:$0xff]   ;;  %v2918_v22 = vld [vmem:[%s3599_s26 + $0x6c] ss:$16 sps:$4 sm:$0xff]   ;;  %v2920_v23 = vld [vmem:[%s3599_s26 + $0x60] ss:$16 sps:$4 sm:$0xff]  }
  0x69   : > { %v2921_v24 = vld [vmem:[%s3599_s26 + $0x68] ss:$16 sps:$4 sm:$0xff]   ;;  %v2922_v25 = vld [vmem:[%s3599_s26 + $0x84] ss:$16 sps:$4 sm:$0xff]   ;;  %v2924_v26 = vld [vmem:[%s3599_s26 + $0x8c] ss:$16 sps:$4 sm:$0xff]  }
  0x6a   : > { %1840 = vmatpush1.bf16.msra.mxu0 %v2908_v15  ;;  %2012 = vmatpush1.bf16.msra.mxu1 %v2909_v16  ;;  %v2926_v27 = vld [vmem:[%s3599_s26 + $0x80] ss:$16 sps:$4 sm:$0xff]   ;;  %v2927_v28 = vld [vmem:[%s3599_s26 + $0x88] ss:$16 sps:$4 sm:$0xff]   ;;  %v2928_v29 = vld [vmem:[%s3599_s26 + $0xa4] ss:$16 sps:$4 sm:$0xff]  }
  0x6b   : > { %1841 = vmatprep.subr.bf16.mxu0 %v2910_v17  ;;  %2013 = vmatprep.subr.bf16.mxu1 %v2912_v18  ;;  %v2930_v30 = vld [vmem:[%s3599_s26 + $0xac] ss:$16 sps:$4 sm:$0xff]   ;;  %v2932_v31 = vld [vmem:[%s3599_s26 + $0xa0] ss:$16 sps:$4 sm:$0xff]   ;;  %v2933_v32 = vld [vmem:[%s3599_s26 + $0xa8] ss:$16 sps:$4 sm:$0xff]  }
  0x6c   : > { %v2934_v33 = vld [vmem:[%s3599_s26 + $0xc4] ss:$16 sps:$4 sm:$0xff]   ;;  %v2936_v34 = vld [vmem:[%s3599_s26 + $0xcc] ss:$16 sps:$4 sm:$0xff]   ;;  %v2938_v35 = vld [vmem:[%s3599_s26 + $0xc0] ss:$16 sps:$4 sm:$0xff]  }
  0x6d   : > { %v2939_v36 = vld [vmem:[%s3599_s26 + $0xc8] ss:$16 sps:$4 sm:$0xff]   ;;  %v2940_v37 = vld [vmem:[%s3599_s26 + $0xe4] ss:$16 sps:$4 sm:$0xff]   ;;  %v2942_v38 = vld [vmem:[%s3599_s26 + $0xec] ss:$16 sps:$4 sm:$0xff]  }
  0x6e   : > { %1842 = vmatpush1.bf16.msra.mxu0 %v2914_v19  ;;  %2014 = vmatpush1.bf16.msra.mxu1 %v2915_v20  ;;  %v2944_v39 = vld [vmem:[%s3599_s26 + $0xe0] ss:$16 sps:$4 sm:$0xff]   ;;  %v2945_v40 = vld [vmem:[%s3599_s26 + $0xe8] ss:$16 sps:$4 sm:$0xff]   ;;  %v2946_v41 = vld [vmem:[%s3599_s26 + $0x104] ss:$16 sps:$4 sm:$0xff]  }
  0x6f   : > { %1843 = vmatprep.subr.bf16.mxu0 %v2916_v21  ;;  %2015 = vmatprep.subr.bf16.mxu1 %v2918_v22  ;;  %v2948_v42 = vld [vmem:[%s3599_s26 + $0x10c] ss:$16 sps:$4 sm:$0xff]   ;;  %v2950_v43 = vld [vmem:[%s3599_s26 + $0x100] ss:$16 sps:$4 sm:$0xff]   ;;  %v2951_v44 = vld [vmem:[%s3599_s26 + $0x108] ss:$16 sps:$4 sm:$0xff]  }
  0x70   : > { %v2952_v45 = vld [vmem:[%s3599_s26 + $0x124] ss:$16 sps:$4 sm:$0xff]   ;;  %v2954_v46 = vld [vmem:[%s3599_s26 + $0x12c] ss:$16 sps:$4 sm:$0xff]   ;;  %v2956_v47 = vld [vmem:[%s3599_s26 + $0x120] ss:$16 sps:$4 sm:$0xff]  }
  0x71   : > { %v2957_v48 = vld [vmem:[%s3599_s26 + $0x128] ss:$16 sps:$4 sm:$0xff]   ;;  %v2958_v49 = vld [vmem:[%s3599_s26 + $0x144] ss:$16 sps:$4 sm:$0xff]   ;;  %v2960_v50 = vld [vmem:[%s3599_s26 + $0x14c] ss:$16 sps:$4 sm:$0xff]  }
  0x72   : > { %1844 = vmatpush1.bf16.msra.mxu0 %v2920_v23  ;;  %2016 = vmatpush1.bf16.msra.mxu1 %v2921_v24  ;;  %v2962_v51 = vld [vmem:[%s3599_s26 + $0x140] ss:$16 sps:$4 sm:$0xff]   ;;  %v2963_v52 = vld [vmem:[%s3599_s26 + $0x148] ss:$16 sps:$4 sm:$0xff]   ;;  %v2964_v53 = vld [vmem:[%s3599_s26 + $0x164] ss:$16 sps:$4 sm:$0xff]  }
  0x73   : > { %1845 = vmatprep.subr.bf16.mxu0 %v2922_v25  ;;  %2017 = vmatprep.subr.bf16.mxu1 %v2924_v26  ;;  %v2966_v54 = vld [vmem:[%s3599_s26 + $0x16c] ss:$16 sps:$4 sm:$0xff]   ;;  %v253_v55 = vld [vmem:[%s3597_s22] sm:$0xff]  ;;  %v2969_v58 = vld [vmem:[%s3599_s26 + $0x168] ss:$16 sps:$4 sm:$0xff]   ;;  %p2763_p12 = scmp.ne.s32.totalorder %s3400_s16, 7 }
  0x74   : > { %v257_v56 = vld [vmem:[%s3597_s22 + $0x20] sm:$0x77]  ;;  %v2972_v61 = vld [vmem:[%s3599_s26 + $0x18c] ss:$16 sps:$4 sm:$0xff]   ;;  %v2975_v63 = vld [vmem:[%s3599_s26 + $0x188] ss:$16 sps:$4 sm:$0xff]  }
  0x75   : > { %v2968_v57 = vld [vmem:[%s3599_s26 + $0x160] ss:$16 sps:$4 sm:$0xff]   ;;  %v2500_v59 = vcombine.high %v253_v55, %v257_v56  ;;  %v2970_v60 = vld [vmem:[%s3599_s26 + $0x184] ss:$16 sps:$4 sm:$0xff]   ;;  %v2978_v1 = vld [vmem:[%s3599_s26 + $0x1ac] ss:$16 sps:$4 sm:$0xff]   ;;  %v2499_v14 = vcombine.low %v253_v55, %v257_v56 }
  0x76   : > { %1846 = vmatpush1.bf16.msra.mxu0 %v2926_v27  ;;  %2018 = vmatpush1.bf16.msra.mxu1 %v2927_v28  ;;  %v2974_v62 = vld [vmem:[%s3599_s26 + $0x180] ss:$16 sps:$4 sm:$0xff]   ;;  %v2976_v0 = vld [vmem:[%s3599_s26 + $0x1a4] ss:$16 sps:$4 sm:$0xff]   ;;  %v2981_v3 = vld [vmem:[%s3599_s26 + $0x1a8] ss:$16 sps:$4 sm:$0xff]  }
  0x77   : > { %1847 = vmatprep.subr.bf16.mxu0 %v2928_v29  ;;  %2019 = vmatprep.subr.bf16.mxu1 %v2930_v30  ;;  %v2980_v2 = vld [vmem:[%s3599_s26 + $0x1a0] ss:$16 sps:$4 sm:$0xff]   ;;  %v2982_v4 = vld [vmem:[%s3599_s26 + $0x1c4] ss:$16 sps:$4 sm:$0xff]   ;;  %v2984_v5 = vld [vmem:[%s3599_s26 + $0x1cc] ss:$16 sps:$4 sm:$0xff]  }
  0x78   : > { %1869 = vmatprep.mubr.bf16.mxu0 %v2500_v59  ;;  %2041 = vmatprep.mubr.bf16.mxu1 %v2500_v59  ;;  %v2986_v6 = vld [vmem:[%s3599_s26 + $0x1c0] ss:$16 sps:$4 sm:$0xff]   ;;  %v2987_v7 = vld [vmem:[%s3599_s26 + $0x1c8] ss:$16 sps:$4 sm:$0xff]   ;;  %v2988_v8 = vld [vmem:[%s3599_s26 + $0x1e4] ss:$16 sps:$4 sm:$0xff]  }
  0x79   : > { %v2990_v9 = vld [vmem:[%s3599_s26 + $0x1ec] ss:$16 sps:$4 sm:$0xff]   ;;  %v2992_v10 = vld [vmem:[%s3599_s26 + $0x1e0] ss:$16 sps:$4 sm:$0xff]   ;;  %v2993_v11 = vld [vmem:[%s3599_s26 + $0x1e8] ss:$16 sps:$4 sm:$0xff]  }
  0x7a   : > { %1848 = vmatpush1.bf16.msra.mxu0 %v2932_v31  ;;  %2020 = vmatpush1.bf16.msra.mxu1 %v2933_v32  ;;  %v2996_v12 = vld [vmem:[%s3599_s26 + $0x204] ss:$16 sps:$4 sm:$0xff]   ;;  %v2999_v13 = vld [vmem:[%s3599_s26 + $0x20c] ss:$16 sps:$4 sm:$0xff]   ;;  %v2994_v15 = vld [vmem:[%s3599_s26 + $0x200] ss:$16 sps:$4 sm:$0xff]  }
  0x7b   : > { %1849 = vmatprep.subr.bf16.mxu0 %v2934_v33  ;;  %2021 = vmatprep.subr.bf16.mxu1 %v2936_v34  ;;  %v2997_v16 = vld [vmem:[%s3599_s26 + $0x208] ss:$16 sps:$4 sm:$0xff]   ;;  %v3002_v17 = vld [vmem:[%s3599_s26 + $0x224] ss:$16 sps:$4 sm:$0xff]   ;;  %v3005_v18 = vld [vmem:[%s3599_s26 + $0x22c] ss:$16 sps:$4 sm:$0xff]  }
  0x7c   : > { %v3000_v19 = vld [vmem:[%s3599_s26 + $0x220] ss:$16 sps:$4 sm:$0xff]   ;;  %v3003_v20 = vld [vmem:[%s3599_s26 + $0x228] ss:$16 sps:$4 sm:$0xff]   ;;  %v3008_v21 = vld [vmem:[%s3599_s26 + $0x244] ss:$16 sps:$4 sm:$0xff]  }
  0x7d   : > { %v3011_v22 = vld [vmem:[%s3599_s26 + $0x24c] ss:$16 sps:$4 sm:$0xff]   ;;  %v3006_v23 = vld [vmem:[%s3599_s26 + $0x240] ss:$16 sps:$4 sm:$0xff]   ;;  %v3009_v24 = vld [vmem:[%s3599_s26 + $0x248] ss:$16 sps:$4 sm:$0xff]  }
  0x7e   : > { %1850 = vmatpush1.bf16.msra.mxu0 %v2938_v35  ;;  %2022 = vmatpush1.bf16.msra.mxu1 %v2939_v36  ;;  %v3014_v25 = vld [vmem:[%s3599_s26 + $0x264] ss:$16 sps:$4 sm:$0xff]   ;;  %v3017_v26 = vld [vmem:[%s3599_s26 + $0x26c] ss:$16 sps:$4 sm:$0xff]   ;;  %v3012_v27 = vld [vmem:[%s3599_s26 + $0x260] ss:$16 sps:$4 sm:$0xff]  }
  0x7f   : > { %1851 = vmatprep.subr.bf16.mxu0 %v2940_v37  ;;  %2023 = vmatprep.subr.bf16.mxu1 %v2942_v38  ;;  %v3015_v28 = vld [vmem:[%s3599_s26 + $0x268] ss:$16 sps:$4 sm:$0xff]   ;;  %v3020_v29 = vld [vmem:[%s3599_s26 + $0x284] ss:$16 sps:$4 sm:$0xff]   ;;  %v3023_v30 = vld [vmem:[%s3599_s26 + $0x28c] ss:$16 sps:$4 sm:$0xff]  }
  0x80   : > { %v3018_v31 = vld [vmem:[%s3599_s26 + $0x280] ss:$16 sps:$4 sm:$0xff]   ;;  %v3021_v32 = vld [vmem:[%s3599_s26 + $0x288] ss:$16 sps:$4 sm:$0xff]   ;;  %v3026_v33 = vld [vmem:[%s3599_s26 + $0x2a4] ss:$16 sps:$4 sm:$0xff]  }
  0x81   : > { %v3029_v34 = vld [vmem:[%s3599_s26 + $0x2ac] ss:$16 sps:$4 sm:$0xff]   ;;  %v3024_v35 = vld [vmem:[%s3599_s26 + $0x2a0] ss:$16 sps:$4 sm:$0xff]   ;;  %v3027_v36 = vld [vmem:[%s3599_s26 + $0x2a8] ss:$16 sps:$4 sm:$0xff]  }
  0x82   : > { %1852 = vmatpush1.bf16.msra.mxu0 %v2944_v39  ;;  %2024 = vmatpush1.bf16.msra.mxu1 %v2945_v40  ;;  %v3032_v37 = vld [vmem:[%s3599_s26 + $0x2c4] ss:$16 sps:$4 sm:$0xff]   ;;  %v3035_v38 = vld [vmem:[%s3599_s26 + $0x2cc] ss:$16 sps:$4 sm:$0xff]   ;;  %v3051_v55 = vld [vmem:[%s3599_s26 + $0x328] ss:$16 sps:$4 sm:$0xff]  }
  0x83   : > { %1853 = vmatprep.subr.bf16.mxu0 %v2946_v41  ;;  %2025 = vmatprep.subr.bf16.mxu1 %v2948_v42  ;;  %v3702_v39 = vld [vmem:[%s3597_s22 + $0x8] sm:$0xff]  ;;  %v3030_v41 = vld [vmem:[%s3599_s26 + $0x2c0] ss:$16 sps:$4 sm:$0xff]   ;;  %v3056_v56 = vld [vmem:[%s3599_s26 + $0x344] ss:$16 sps:$4 sm:$0xff]   ;;  %vm2209_vm0 = vcmask (!%p2763_p12), 1045504  }
  0x84   : > { %v3705_v40 = vld [vmem:[%s3597_s22 + $0x28] sm:$0x77] }
  0x85   : > { %v3033_v42 = vld [vmem:[%s3599_s26 + $0x2c8] ss:$16 sps:$4 sm:$0xff]  }
  0x86   : > { %1854 = vmatpush1.bf16.msra.mxu0 %v2950_v43  ;;  %2026 = vmatpush1.bf16.msra.mxu1 %v2951_v44  ;;  %v2502_v43 = vcombine.high %v3702_v39, %v3705_v40  ;;  %v3038_v44 = vld [vmem:[%s3599_s26 + $0x2e4] ss:$16 sps:$4 sm:$0xff]   ;;  %v3057_v59 = vld [vmem:[%s3599_s26 + $0x348] ss:$16 sps:$4 sm:$0xff]  }
  0x87   : > { %1855 = vmatprep.subr.bf16.mxu0 %v2952_v45  ;;  %2027 = vmatprep.subr.bf16.mxu1 %v2954_v46  ;;  %v3041_v45 = vld [vmem:[%s3599_s26 + $0x2ec] ss:$16 sps:$4 sm:$0xff]   ;;  %v3036_v46 = vld [vmem:[%s3599_s26 + $0x2e0] ss:$16 sps:$4 sm:$0xff]  }
  0x8a   : > { %1856 = vmatpush1.bf16.msra.mxu0 %v2956_v47  ;;  %2028 = vmatpush1.bf16.msra.mxu1 %v2957_v48  ;;  %v3039_v47 = vld [vmem:[%s3599_s26 + $0x2e8] ss:$16 sps:$4 sm:$0xff]   ;;  %v3044_v48 = vld [vmem:[%s3599_s26 + $0x304] ss:$16 sps:$4 sm:$0xff]  }
  0x8b   : > { %1857 = vmatprep.subr.bf16.mxu0 %v2958_v49  ;;  %2029 = vmatprep.subr.bf16.mxu1 %v2960_v50  ;;  %v3047_v49 = vld [vmem:[%s3599_s26 + $0x30c] ss:$16 sps:$4 sm:$0xff]   ;;  %v3042_v50 = vld [vmem:[%s3599_s26 + $0x300] ss:$16 sps:$4 sm:$0xff]  }
  0x8e   : > { %1858 = vmatpush1.bf16.msra.mxu0 %v2962_v51  ;;  %2030 = vmatpush1.bf16.msra.mxu1 %v2963_v52  ;;  %v3045_v51 = vld [vmem:[%s3599_s26 + $0x308] ss:$16 sps:$4 sm:$0xff]   ;;  %v3050_v52 = vld [vmem:[%s3599_s26 + $0x324] ss:$16 sps:$4 sm:$0xff]  }
  0x8f   : > { %1859 = vmatprep.subr.bf16.mxu0 %v2964_v53  ;;  %2031 = vmatprep.subr.bf16.mxu1 %v2966_v54  ;;  %v3053_v53 = vld [vmem:[%s3599_s26 + $0x32c] ss:$16 sps:$4 sm:$0xff]   ;;  %v3048_v54 = vld [vmem:[%s3599_s26 + $0x320] ss:$16 sps:$4 sm:$0xff]  }
  0x92   : > { %1860 = vmatpush1.bf16.msra.mxu0 %v2968_v57  ;;  %2032 = vmatpush1.bf16.msra.mxu1 %v2969_v58  ;;  %v3059_v57 = vld [vmem:[%s3599_s26 + $0x34c] ss:$16 sps:$4 sm:$0xff]   ;;  %v3054_v58 = vld [vmem:[%s3599_s26 + $0x340] ss:$16 sps:$4 sm:$0xff]  }
  0x93   : > { %1861 = vmatprep.subr.bf16.mxu0 %v2970_v60  ;;  %2033 = vmatprep.subr.bf16.mxu1 %v2972_v61  ;;  %v3062_v60 = vld [vmem:[%s3599_s26 + $0x364] ss:$16 sps:$4 sm:$0xff]   ;;  %v3065_v61 = vld [vmem:[%s3599_s26 + $0x36c] ss:$16 sps:$4 sm:$0xff]  }
  0x96   : > { %1862 = vmatpush1.bf16.msra.mxu0 %v2974_v62  ;;  %2034 = vmatpush1.bf16.msra.mxu1 %v2975_v63  ;;  %v3060_v62 = vld [vmem:[%s3599_s26 + $0x360] ss:$16 sps:$4 sm:$0xff]   ;;  %v3063_v63 = vld [vmem:[%s3599_s26 + $0x368] ss:$16 sps:$4 sm:$0xff]  }
  0x97   : > { %1863 = vmatprep.subr.bf16.mxu0 %v2976_v0  ;;  %2035 = vmatprep.subr.bf16.mxu1 %v2978_v1  ;;  %v3068_v0 = vld [vmem:[%s3599_s26 + $0x384] ss:$16 sps:$4 sm:$0xff]   ;;  %v3071_v1 = vld [vmem:[%s3599_s26 + $0x38c] ss:$16 sps:$4 sm:$0xff]  }
  0x9a   : > { %1864 = vmatpush1.bf16.msra.mxu0 %v2980_v2  ;;  %2036 = vmatpush1.bf16.msra.mxu1 %v2981_v3  ;;  %v3066_v2 = vld [vmem:[%s3599_s26 + $0x380] ss:$16 sps:$4 sm:$0xff]   ;;  %v3069_v3 = vld [vmem:[%s3599_s26 + $0x388] ss:$16 sps:$4 sm:$0xff]  }
  0x9b   : > { %1865 = vmatprep.subr.bf16.mxu0 %v2982_v4  ;;  %2037 = vmatprep.subr.bf16.mxu1 %v2984_v5  ;;  %v3074_v4 = vld [vmem:[%s3599_s26 + $0x3a4] ss:$16 sps:$4 sm:$0xff]   ;;  %v3077_v5 = vld [vmem:[%s3599_s26 + $0x3ac] ss:$16 sps:$4 sm:$0xff]  }
  0x9e   : > { %1866 = vmatpush1.bf16.msra.mxu0 %v2986_v6  ;;  %2038 = vmatpush1.bf16.msra.mxu1 %v2987_v7  ;;  %v3072_v6 = vld [vmem:[%s3599_s26 + $0x3a0] ss:$16 sps:$4 sm:$0xff]   ;;  %v3075_v7 = vld [vmem:[%s3599_s26 + $0x3a8] ss:$16 sps:$4 sm:$0xff]  }
  0x9f   : > { %1867 = vmatprep.subr.bf16.mxu0 %v2988_v8  ;;  %2039 = vmatprep.subr.bf16.mxu1 %v2990_v9  ;;  %v3080_v8 = vld [vmem:[%s3599_s26 + $0x3c4] ss:$16 sps:$4 sm:$0xff]   ;;  %v3083_v9 = vld [vmem:[%s3599_s26 + $0x3cc] ss:$16 sps:$4 sm:$0xff]  }
  0xa2   : > { %1868 = vmatpush1.bf16.msra.mxu0 %v2992_v10  ;;  %2040 = vmatpush1.bf16.msra.mxu1 %v2993_v11  ;;  %v3078_v10 = vld [vmem:[%s3599_s26 + $0x3c0] ss:$16 sps:$4 sm:$0xff]   ;;  %v3081_v11 = vld [vmem:[%s3599_s26 + $0x3c8] ss:$16 sps:$4 sm:$0xff]  }
  0xa3   : > { %1880 = vmatprep.subr.bf16.mxu0 %v2996_v12  ;;  %2052 = vmatprep.subr.bf16.mxu1 %v2999_v13  ;;  %v3086_v12 = vld [vmem:[%s3599_s26 + $0x3e4] ss:$16 sps:$4 sm:$0xff]   ;;  %v3089_v13 = vld [vmem:[%s3599_s26 + $0x3ec] ss:$16 sps:$4 sm:$0xff]  }
  0xa5   : > { %1870 = vmatmul.mubr.bf16.vlgmr.msra.gmra.mrb[0].mxu0 %v2499_v14  ;;  %2042 = vmatmul.mubr.bf16.vlgmr.msra.gmra.mrb[0].mxu1 %v2499_v14  ;;  %v3084_v14 = vld [vmem:[%s3599_s26 + $0x3e0] ss:$16 sps:$4 sm:$0xff]  }
  0xa6   : > { %1881 = vmatpush1.bf16.msra.mxu0 %v2994_v15  ;;  %2053 = vmatpush1.bf16.msra.mxu1 %v2997_v16  ;;  %v3087_v15 = vld [vmem:[%s3599_s26 + $0x3e8] ss:$16 sps:$4 sm:$0xff]   ;;  %v3092_v16 = vld [vmem:[%s3599_s26 + $0x404] ss:$16 sps:$4 sm:$0xff]  }
  0xa7   : > { %1882 = vmatprep.subr.bf16.mxu0 %v3002_v17  ;;  %2054 = vmatprep.subr.bf16.mxu1 %v3005_v18  ;;  %v3095_v17 = vld [vmem:[%s3599_s26 + $0x40c] ss:$16 sps:$4 sm:$0xff]   ;;  %v2501_v18 = vcombine.low %v3702_v39, %v3705_v40  ;;  %v3117_v39 = vld [vmem:[%s3599_s26 + $0x488] ss:$16 sps:$4 sm:$0xff]   ;;  %v3122_v40 = vld [vmem:[%s3599_s26 + $0x4a4] ss:$16 sps:$4 sm:$0xff]  }
  0xa8   : > { %1912 = vmatprep.mubr.bf16.mxu0 %v2502_v43  ;;  %2084 = vmatprep.mubr.bf16.mxu1 %v2502_v43  ;;  %v3123_v43 = vld [vmem:[%s3599_s26 + $0x4a8] ss:$16 sps:$4 sm:$0xff]  }
  0xaa   : > { %1883 = vmatpush1.bf16.msra.mxu0 %v3000_v19  ;;  %2055 = vmatpush1.bf16.msra.mxu1 %v3003_v20  ;;  %v3090_v19 = vld [vmem:[%s3599_s26 + $0x400] ss:$16 sps:$4 sm:$0xff]   ;;  %v3093_v20 = vld [vmem:[%s3599_s26 + $0x408] ss:$16 sps:$4 sm:$0xff]  }
  0xab   : > { %1884 = vmatprep.subr.bf16.mxu0 %v3008_v21  ;;  %2056 = vmatprep.subr.bf16.mxu1 %v3011_v22  ;;  %v3098_v21 = vld [vmem:[%s3599_s26 + $0x424] ss:$16 sps:$4 sm:$0xff]   ;;  %v3101_v22 = vld [vmem:[%s3599_s26 + $0x42c] ss:$16 sps:$4 sm:$0xff]  }
  0xae   : > { %1885 = vmatpush1.bf16.msra.mxu0 %v3006_v23  ;;  %2057 = vmatpush1.bf16.msra.mxu1 %v3009_v24  ;;  %v3756_v23 = vld [vmem:[%s3597_s22 + $0x10] sm:$0xff] }
  0xaf   : > { %1886 = vmatprep.subr.bf16.mxu0 %v3014_v25  ;;  %2058 = vmatprep.subr.bf16.mxu1 %v3017_v26  ;;  %v3759_v24 = vld [vmem:[%s3597_s22 + $0x30] sm:$0x77] }
  0xb0   : > { %v2504_v25 = vcombine.high %v3756_v23, %v3759_v24  ;;  %v3096_v26 = vld [vmem:[%s3599_s26 + $0x420] ss:$16 sps:$4 sm:$0xff]  }
  0xb2   : > { %1887 = vmatpush1.bf16.msra.mxu0 %v3012_v27  ;;  %2059 = vmatpush1.bf16.msra.mxu1 %v3015_v28  ;;  %v3099_v27 = vld [vmem:[%s3599_s26 + $0x428] ss:$16 sps:$4 sm:$0xff]   ;;  %v3104_v28 = vld [vmem:[%s3599_s26 + $0x444] ss:$16 sps:$4 sm:$0xff]  }
  0xb3   : > { %1888 = vmatprep.subr.bf16.mxu0 %v3020_v29  ;;  %2060 = vmatprep.subr.bf16.mxu1 %v3023_v30  ;;  %v3107_v29 = vld [vmem:[%s3599_s26 + $0x44c] ss:$16 sps:$4 sm:$0xff]   ;;  %v3102_v30 = vld [vmem:[%s3599_s26 + $0x440] ss:$16 sps:$4 sm:$0xff]  }
  0xb6   : > { %1889 = vmatpush1.bf16.msra.mxu0 %v3018_v31  ;;  %2061 = vmatpush1.bf16.msra.mxu1 %v3021_v32  ;;  %v3105_v31 = vld [vmem:[%s3599_s26 + $0x448] ss:$16 sps:$4 sm:$0xff]   ;;  %v3110_v32 = vld [vmem:[%s3599_s26 + $0x464] ss:$16 sps:$4 sm:$0xff]  }
  0xb7   : > { %1890 = vmatprep.subr.bf16.mxu0 %v3026_v33  ;;  %2062 = vmatprep.subr.bf16.mxu1 %v3029_v34  ;;  %v3113_v33 = vld [vmem:[%s3599_s26 + $0x46c] ss:$16 sps:$4 sm:$0xff]   ;;  %v3108_v34 = vld [vmem:[%s3599_s26 + $0x460] ss:$16 sps:$4 sm:$0xff]  }
  0xba   : > { %1891 = vmatpush1.bf16.msra.mxu0 %v3024_v35  ;;  %2063 = vmatpush1.bf16.msra.mxu1 %v3027_v36  ;;  %v3111_v35 = vld [vmem:[%s3599_s26 + $0x468] ss:$16 sps:$4 sm:$0xff]   ;;  %v3116_v36 = vld [vmem:[%s3599_s26 + $0x484] ss:$16 sps:$4 sm:$0xff]  }
  0xbb   : > { %1892 = vmatprep.subr.bf16.mxu0 %v3032_v37  ;;  %2064 = vmatprep.subr.bf16.mxu1 %v3035_v38  ;;  %v3119_v37 = vld [vmem:[%s3599_s26 + $0x48c] ss:$16 sps:$4 sm:$0xff]   ;;  %v3114_v38 = vld [vmem:[%s3599_s26 + $0x480] ss:$16 sps:$4 sm:$0xff]  }
  0xbe   : > { %1893 = vmatpush1.bf16.msra.mxu0 %v3030_v41  ;;  %2065 = vmatpush1.bf16.msra.mxu1 %v3033_v42  ;;  %v3125_v41 = vld [vmem:[%s3599_s26 + $0x4ac] ss:$16 sps:$4 sm:$0xff]   ;;  %v3120_v42 = vld [vmem:[%s3599_s26 + $0x4a0] ss:$16 sps:$4 sm:$0xff]  }
  0xbf   : > { %1894 = vmatprep.subr.bf16.mxu0 %v3038_v44  ;;  %2066 = vmatprep.subr.bf16.mxu1 %v3041_v45  ;;  %v3128_v44 = vld [vmem:[%s3599_s26 + $0x4c4] ss:$16 sps:$4 sm:$0xff]   ;;  %v3131_v45 = vld [vmem:[%s3599_s26 + $0x4cc] ss:$16 sps:$4 sm:$0xff]  }
  0xc2   : > { %1895 = vmatpush1.bf16.msra.mxu0 %v3036_v46  ;;  %2067 = vmatpush1.bf16.msra.mxu1 %v3039_v47  ;;  %v3126_v46 = vld [vmem:[%s3599_s26 + $0x4c0] ss:$16 sps:$4 sm:$0xff]   ;;  %v3129_v47 = vld [vmem:[%s3599_s26 + $0x4c8] ss:$16 sps:$4 sm:$0xff]  }
  0xc3   : > { %1896 = vmatprep.subr.bf16.mxu0 %v3044_v48  ;;  %2068 = vmatprep.subr.bf16.mxu1 %v3047_v49  ;;  %v3134_v48 = vld [vmem:[%s3599_s26 + $0x4e4] ss:$16 sps:$4 sm:$0xff]   ;;  %v3137_v49 = vld [vmem:[%s3599_s26 + $0x4ec] ss:$16 sps:$4 sm:$0xff]  }
  0xc6   : > { %1897 = vmatpush1.bf16.msra.mxu0 %v3042_v50  ;;  %2069 = vmatpush1.bf16.msra.mxu1 %v3045_v51  ;;  %v3132_v50 = vld [vmem:[%s3599_s26 + $0x4e0] ss:$16 sps:$4 sm:$0xff]   ;;  %v3135_v51 = vld [vmem:[%s3599_s26 + $0x4e8] ss:$16 sps:$4 sm:$0xff]  }
  0xc7   : > { %1898 = vmatprep.subr.bf16.mxu0 %v3050_v52  ;;  %2070 = vmatprep.subr.bf16.mxu1 %v3053_v53  ;;  %v3140_v52 = vld [vmem:[%s3599_s26 + $0x504] ss:$16 sps:$4 sm:$0xff]   ;;  %v3143_v53 = vld [vmem:[%s3599_s26 + $0x50c] ss:$16 sps:$4 sm:$0xff]  }
  0xca   : > { %1899 = vmatpush1.bf16.msra.mxu0 %v3048_v54  ;;  %2071 = vmatpush1.bf16.msra.mxu1 %v3051_v55  ;;  %v3138_v54 = vld [vmem:[%s3599_s26 + $0x500] ss:$16 sps:$4 sm:$0xff]   ;;  %v3141_v55 = vld [vmem:[%s3599_s26 + $0x508] ss:$16 sps:$4 sm:$0xff]  }
  0xcb   : > { %1900 = vmatprep.subr.bf16.mxu0 %v3056_v56  ;;  %2072 = vmatprep.subr.bf16.mxu1 %v3059_v57  ;;  %v3146_v56 = vld [vmem:[%s3599_s26 + $0x524] ss:$16 sps:$4 sm:$0xff]   ;;  %v3149_v57 = vld [vmem:[%s3599_s26 + $0x52c] ss:$16 sps:$4 sm:$0xff]  }
  0xce   : > { %1901 = vmatpush1.bf16.msra.mxu0 %v3054_v58  ;;  %2073 = vmatpush1.bf16.msra.mxu1 %v3057_v59  ;;  %v3144_v58 = vld [vmem:[%s3599_s26 + $0x520] ss:$16 sps:$4 sm:$0xff]   ;;  %v3147_v59 = vld [vmem:[%s3599_s26 + $0x528] ss:$16 sps:$4 sm:$0xff]  }
  0xcf   : > { %1902 = vmatprep.subr.bf16.mxu0 %v3062_v60  ;;  %2074 = vmatprep.subr.bf16.mxu1 %v3065_v61  ;;  %v3152_v60 = vld [vmem:[%s3599_s26 + $0x544] ss:$16 sps:$4 sm:$0xff]   ;;  %v3155_v61 = vld [vmem:[%s3599_s26 + $0x54c] ss:$16 sps:$4 sm:$0xff]  }
  0xd2   : > { %1903 = vmatpush1.bf16.msra.mxu0 %v3060_v62  ;;  %2075 = vmatpush1.bf16.msra.mxu1 %v3063_v63  ;;  %v3150_v62 = vld [vmem:[%s3599_s26 + $0x540] ss:$16 sps:$4 sm:$0xff]   ;;  %v3153_v63 = vld [vmem:[%s3599_s26 + $0x548] ss:$16 sps:$4 sm:$0xff]  }
  0xd3   : > { %1904 = vmatprep.subr.bf16.mxu0 %v3068_v0  ;;  %2076 = vmatprep.subr.bf16.mxu1 %v3071_v1  ;;  %v3158_v0 = vld [vmem:[%s3599_s26 + $0x564] ss:$16 sps:$4 sm:$0xff]   ;;  %v3161_v1 = vld [vmem:[%s3599_s26 + $0x56c] ss:$16 sps:$4 sm:$0xff]  }
  0xd6   : > { %1905 = vmatpush1.bf16.msra.mxu0 %v3066_v2  ;;  %2077 = vmatpush1.bf16.msra.mxu1 %v3069_v3  ;;  %v3156_v2 = vld [vmem:[%s3599_s26 + $0x560] ss:$16 sps:$4 sm:$0xff]   ;;  %v3159_v3 = vld [vmem:[%s3599_s26 + $0x568] ss:$16 sps:$4 sm:$0xff]  }
  0xd7   : > { %1906 = vmatprep.subr.bf16.mxu0 %v3074_v4  ;;  %2078 = vmatprep.subr.bf16.mxu1 %v3077_v5  ;;  %v3164_v4 = vld [vmem:[%s3599_s26 + $0x584] ss:$16 sps:$4 sm:$0xff]   ;;  %v3167_v5 = vld [vmem:[%s3599_s26 + $0x58c] ss:$16 sps:$4 sm:$0xff]  }
  0xda   : > { %1907 = vmatpush1.bf16.msra.mxu0 %v3072_v6  ;;  %2079 = vmatpush1.bf16.msra.mxu1 %v3075_v7  ;;  %v3162_v6 = vld [vmem:[%s3599_s26 + $0x580] ss:$16 sps:$4 sm:$0xff]   ;;  %v3165_v7 = vld [vmem:[%s3599_s26 + $0x588] ss:$16 sps:$4 sm:$0xff]  }
  0xdb   : > { %1908 = vmatprep.subr.bf16.mxu0 %v3080_v8  ;;  %2080 = vmatprep.subr.bf16.mxu1 %v3083_v9  ;;  %v3170_v8 = vld [vmem:[%s3599_s26 + $0x5a4] ss:$16 sps:$4 sm:$0xff]   ;;  %v3173_v9 = vld [vmem:[%s3599_s26 + $0x5ac] ss:$16 sps:$4 sm:$0xff]  }
  0xde   : > { %1909 = vmatpush1.bf16.msra.mxu0 %v3078_v10  ;;  %2081 = vmatpush1.bf16.msra.mxu1 %v3081_v11  ;;  %v3168_v10 = vld [vmem:[%s3599_s26 + $0x5a0] ss:$16 sps:$4 sm:$0xff]   ;;  %v3171_v11 = vld [vmem:[%s3599_s26 + $0x5a8] ss:$16 sps:$4 sm:$0xff]  }
  0xdf   : > { %1910 = vmatprep.subr.bf16.mxu0 %v3086_v12  ;;  %2082 = vmatprep.subr.bf16.mxu1 %v3089_v13  ;;  %v3176_v12 = vld [vmem:[%s3599_s26 + $0x5c4] ss:$16 sps:$4 sm:$0xff]   ;;  %v3179_v13 = vld [vmem:[%s3599_s26 + $0x5cc] ss:$16 sps:$4 sm:$0xff]  }
  0xe2   : > { %1911 = vmatpush1.bf16.msra.mxu0 %v3084_v14  ;;  %2083 = vmatpush1.bf16.msra.mxu1 %v3087_v15  ;;  %v3174_v14 = vld [vmem:[%s3599_s26 + $0x5c0] ss:$16 sps:$4 sm:$0xff]   ;;  %v3177_v15 = vld [vmem:[%s3599_s26 + $0x5c8] ss:$16 sps:$4 sm:$0xff]  }
  0xe3   : > { %1923 = vmatprep.subr.bf16.mxu0 %v3092_v16  ;;  %2095 = vmatprep.subr.bf16.mxu1 %v3095_v17  ;;  %v3182_v16 = vld [vmem:[%s3599_s26 + $0x5e4] ss:$16 sps:$4 sm:$0xff]   ;;  %v3185_v17 = vld [vmem:[%s3599_s26 + $0x5ec] ss:$16 sps:$4 sm:$0xff]  }
  0xe5   : > { %1913 = vmatmul.mubr.bf16.vlgmr.msra.gmra.mrb[0].mxu0 %v2501_v18  ;;  %2085 = vmatmul.mubr.bf16.vlgmr.msra.gmra.mrb[0].mxu1 %v2501_v18  ;;  %v3180_v18 = vld [vmem:[%s3599_s26 + $0x5e0] ss:$16 sps:$4 sm:$0xff]  }
  0xe6   : > { %1924 = vmatpush1.bf16.msra.mxu0 %v3090_v19  ;;  %2096 = vmatpush1.bf16.msra.mxu1 %v3093_v20  ;;  %v3183_v19 = vld [vmem:[%s3599_s26 + $0x5e8] ss:$16 sps:$4 sm:$0xff]   ;;  %v3188_v20 = vld [vmem:[%s3599_s26 + $0x604] ss:$16 sps:$4 sm:$0xff]  }
  0xe7   : > { %1925 = vmatprep.subr.bf16.mxu0 %v3098_v21  ;;  %2097 = vmatprep.subr.bf16.mxu1 %v3101_v22  ;;  %v3191_v21 = vld [vmem:[%s3599_s26 + $0x60c] ss:$16 sps:$4 sm:$0xff]   ;;  %v2503_v22 = vcombine.low %v3756_v23, %v3759_v24  ;;  %v3192_v24 = vld [vmem:[%s3599_s26 + $0x620] ss:$16 sps:$4 sm:$0xff]  }
  0xe8   : > { %1955 = vmatprep.mubr.bf16.mxu0 %v2504_v25  ;;  %2127 = vmatprep.mubr.bf16.mxu1 %v2504_v25  ;;  %v3826_v25 = vld [vmem:[%s3597_s22 + $0x18] sm:$0xff] }
  0xea   : > { %1926 = vmatpush1.bf16.msra.mxu0 %v3096_v26  ;;  %2098 = vmatpush1.bf16.msra.mxu1 %v3099_v27  ;;  %v3829_v26 = vld [vmem:[%s3597_s22 + $0x38] sm:$0x77]  ;;  %v3186_v27 = vld [vmem:[%s3599_s26 + $0x600] ss:$16 sps:$4 sm:$0xff]  }
  0xeb   : > { %1927 = vmatprep.subr.bf16.mxu0 %v3104_v28  ;;  %2099 = vmatprep.subr.bf16.mxu1 %v3107_v29  ;;  %v3189_v28 = vld [vmem:[%s3599_s26 + $0x608] ss:$16 sps:$4 sm:$0xff]   ;;  %v3194_v29 = vld [vmem:[%s3599_s26 + $0x624] ss:$16 sps:$4 sm:$0xff]   ;;  %v2506_v23 = vcombine.high %v3826_v25, %v3829_v26 }
  0xee   : > { %1928 = vmatpush1.bf16.msra.mxu0 %v3102_v30  ;;  %2100 = vmatpush1.bf16.msra.mxu1 %v3105_v31  ;;  %v3197_v30 = vld [vmem:[%s3599_s26 + $0x62c] ss:$16 sps:$4 sm:$0xff]   ;;  %v3195_v31 = vld [vmem:[%s3599_s26 + $0x628] ss:$16 sps:$4 sm:$0xff]  }
  0xef   : > { %1929 = vmatprep.subr.bf16.mxu0 %v3110_v32  ;;  %2101 = vmatprep.subr.bf16.mxu1 %v3113_v33  ;;  %v3200_v32 = vld [vmem:[%s3599_s26 + $0x644] ss:$16 sps:$4 sm:$0xff]   ;;  %v3203_v33 = vld [vmem:[%s3599_s26 + $0x64c] ss:$16 sps:$4 sm:$0xff]  }
  0xf2   : > { %1930 = vmatpush1.bf16.msra.mxu0 %v3108_v34  ;;  %2102 = vmatpush1.bf16.msra.mxu1 %v3111_v35  ;;  %v3198_v34 = vld [vmem:[%s3599_s26 + $0x640] ss:$16 sps:$4 sm:$0xff]   ;;  %v3201_v35 = vld [vmem:[%s3599_s26 + $0x648] ss:$16 sps:$4 sm:$0xff]  }
  0xf3   : > { %1931 = vmatprep.subr.bf16.mxu0 %v3116_v36  ;;  %2103 = vmatprep.subr.bf16.mxu1 %v3119_v37  ;;  %v3206_v36 = vld [vmem:[%s3599_s26 + $0x664] ss:$16 sps:$4 sm:$0xff]   ;;  %v3209_v37 = vld [vmem:[%s3599_s26 + $0x66c] ss:$16 sps:$4 sm:$0xff]  }
  0xf6   : > { %1932 = vmatpush1.bf16.msra.mxu0 %v3114_v38  ;;  %2104 = vmatpush1.bf16.msra.mxu1 %v3117_v39  ;;  %v3204_v38 = vld [vmem:[%s3599_s26 + $0x660] ss:$16 sps:$4 sm:$0xff]   ;;  %v3207_v39 = vld [vmem:[%s3599_s26 + $0x668] ss:$16 sps:$4 sm:$0xff]  }
  0xf7   : > { %1933 = vmatprep.subr.bf16.mxu0 %v3122_v40  ;;  %2105 = vmatprep.subr.bf16.mxu1 %v3125_v41  ;;  %v3212_v40 = vld [vmem:[%s3599_s26 + $0x684] ss:$16 sps:$4 sm:$0xff]   ;;  %v3215_v41 = vld [vmem:[%s3599_s26 + $0x68c] ss:$16 sps:$4 sm:$0xff]  }
  0xfa   : > { %1934 = vmatpush1.bf16.msra.mxu0 %v3120_v42  ;;  %2106 = vmatpush1.bf16.msra.mxu1 %v3123_v43  ;;  %v3210_v42 = vld [vmem:[%s3599_s26 + $0x680] ss:$16 sps:$4 sm:$0xff]   ;;  %v3213_v43 = vld [vmem:[%s3599_s26 + $0x688] ss:$16 sps:$4 sm:$0xff]  }
  0xfb   : > { %1935 = vmatprep.subr.bf16.mxu0 %v3128_v44  ;;  %2107 = vmatprep.subr.bf16.mxu1 %v3131_v45  ;;  %v3218_v44 = vld [vmem:[%s3599_s26 + $0x6a4] ss:$16 sps:$4 sm:$0xff]   ;;  %v3221_v45 = vld [vmem:[%s3599_s26 + $0x6ac] ss:$16 sps:$4 sm:$0xff]  }
  0xfe   : > { %1936 = vmatpush1.bf16.msra.mxu0 %v3126_v46  ;;  %2108 = vmatpush1.bf16.msra.mxu1 %v3129_v47  ;;  %v3216_v46 = vld [vmem:[%s3599_s26 + $0x6a0] ss:$16 sps:$4 sm:$0xff]   ;;  %v3219_v47 = vld [vmem:[%s3599_s26 + $0x6a8] ss:$16 sps:$4 sm:$0xff]  }
  0xff   : > { %1937 = vmatprep.subr.bf16.mxu0 %v3134_v48  ;;  %2109 = vmatprep.subr.bf16.mxu1 %v3137_v49  ;;  %v3224_v48 = vld [vmem:[%s3599_s26 + $0x6c4] ss:$16 sps:$4 sm:$0xff]   ;;  %v3227_v49 = vld [vmem:[%s3599_s26 + $0x6cc] ss:$16 sps:$4 sm:$0xff]  }
 0x102   : > { %1938 = vmatpush1.bf16.msra.mxu0 %v3132_v50  ;;  %2110 = vmatpush1.bf16.msra.mxu1 %v3135_v51  ;;  %v3222_v50 = vld [vmem:[%s3599_s26 + $0x6c0] ss:$16 sps:$4 sm:$0xff]   ;;  %v3225_v51 = vld [vmem:[%s3599_s26 + $0x6c8] ss:$16 sps:$4 sm:$0xff]  }
 0x103   : > { %1939 = vmatprep.subr.bf16.mxu0 %v3140_v52  ;;  %2111 = vmatprep.subr.bf16.mxu1 %v3143_v53  ;;  %v3230_v52 = vld [vmem:[%s3599_s26 + $0x6e4] ss:$16 sps:$4 sm:$0xff]   ;;  %v3233_v53 = vld [vmem:[%s3599_s26 + $0x6ec] ss:$16 sps:$4 sm:$0xff]  }
 0x106   : > { %1940 = vmatpush1.bf16.msra.mxu0 %v3138_v54  ;;  %2112 = vmatpush1.bf16.msra.mxu1 %v3141_v55  ;;  %v3228_v54 = vld [vmem:[%s3599_s26 + $0x6e0] ss:$16 sps:$4 sm:$0xff]   ;;  %v3231_v55 = vld [vmem:[%s3599_s26 + $0x6e8] ss:$16 sps:$4 sm:$0xff]  }
 0x107   : > { %1941 = vmatprep.subr.bf16.mxu0 %v3146_v56  ;;  %2113 = vmatprep.subr.bf16.mxu1 %v3149_v57  ;;  %v3236_v56 = vld [vmem:[%s3599_s26 + $0x704] ss:$16 sps:$4 sm:$0xff]   ;;  %v3239_v57 = vld [vmem:[%s3599_s26 + $0x70c] ss:$16 sps:$4 sm:$0xff]  }
 0x10a   : > { %1942 = vmatpush1.bf16.msra.mxu0 %v3144_v58  ;;  %2114 = vmatpush1.bf16.msra.mxu1 %v3147_v59  ;;  %v3234_v58 = vld [vmem:[%s3599_s26 + $0x700] ss:$16 sps:$4 sm:$0xff]   ;;  %v3237_v59 = vld [vmem:[%s3599_s26 + $0x708] ss:$16 sps:$4 sm:$0xff]  }
 0x10b   : > { %1943 = vmatprep.subr.bf16.mxu0 %v3152_v60  ;;  %2115 = vmatprep.subr.bf16.mxu1 %v3155_v61  ;;  %v3242_v60 = vld [vmem:[%s3599_s26 + $0x724] ss:$16 sps:$4 sm:$0xff]   ;;  %v3245_v61 = vld [vmem:[%s3599_s26 + $0x72c] ss:$16 sps:$4 sm:$0xff]  }
 0x10e   : > { %1944 = vmatpush1.bf16.msra.mxu0 %v3150_v62  ;;  %2116 = vmatpush1.bf16.msra.mxu1 %v3153_v63  ;;  %v3240_v62 = vld [vmem:[%s3599_s26 + $0x720] ss:$16 sps:$4 sm:$0xff]   ;;  %v3243_v63 = vld [vmem:[%s3599_s26 + $0x728] ss:$16 sps:$4 sm:$0xff]  }
 0x10f   : > { %1945 = vmatprep.subr.bf16.mxu0 %v3158_v0  ;;  %2117 = vmatprep.subr.bf16.mxu1 %v3161_v1  ;;  %v3248_v0 = vld [vmem:[%s3599_s26 + $0x744] ss:$16 sps:$4 sm:$0xff]   ;;  %v3251_v1 = vld [vmem:[%s3599_s26 + $0x74c] ss:$16 sps:$4 sm:$0xff]  }
 0x112   : > { %1946 = vmatpush1.bf16.msra.mxu0 %v3156_v2  ;;  %2118 = vmatpush1.bf16.msra.mxu1 %v3159_v3  ;;  %v3246_v2 = vld [vmem:[%s3599_s26 + $0x740] ss:$16 sps:$4 sm:$0xff]   ;;  %v3249_v3 = vld [vmem:[%s3599_s26 + $0x748] ss:$16 sps:$4 sm:$0xff]  }
 0x113   : > { %1947 = vmatprep.subr.bf16.mxu0 %v3164_v4  ;;  %2119 = vmatprep.subr.bf16.mxu1 %v3167_v5  ;;  %v3254_v4 = vld [vmem:[%s3599_s26 + $0x764] ss:$16 sps:$4 sm:$0xff]   ;;  %v3257_v5 = vld [vmem:[%s3599_s26 + $0x76c] ss:$16 sps:$4 sm:$0xff]  }
 0x116   : > { %1948 = vmatpush1.bf16.msra.mxu0 %v3162_v6  ;;  %2120 = vmatpush1.bf16.msra.mxu1 %v3165_v7  ;;  %v3252_v6 = vld [vmem:[%s3599_s26 + $0x760] ss:$16 sps:$4 sm:$0xff]   ;;  %v3255_v7 = vld [vmem:[%s3599_s26 + $0x768] ss:$16 sps:$4 sm:$0xff]  }
 0x117   : > { %1949 = vmatprep.subr.bf16.mxu0 %v3170_v8  ;;  %2121 = vmatprep.subr.bf16.mxu1 %v3173_v9  ;;  %v3260_v8 = vld [vmem:[%s3599_s26 + $0x784] ss:$16 sps:$4 sm:$0xff]   ;;  %v3263_v9 = vld [vmem:[%s3599_s26 + $0x78c] ss:$16 sps:$4 sm:$0xff]  }
 0x11a   : > { %1950 = vmatpush1.bf16.msra.mxu0 %v3168_v10  ;;  %2122 = vmatpush1.bf16.msra.mxu1 %v3171_v11  ;;  %v3258_v10 = vld [vmem:[%s3599_s26 + $0x780] ss:$16 sps:$4 sm:$0xff]   ;;  %v3261_v11 = vld [vmem:[%s3599_s26 + $0x788] ss:$16 sps:$4 sm:$0xff]  }
 0x11b   : > { %1951 = vmatprep.subr.bf16.mxu0 %v3176_v12  ;;  %2123 = vmatprep.subr.bf16.mxu1 %v3179_v13  ;;  %v3266_v12 = vld [vmem:[%s3599_s26 + $0x7a4] ss:$16 sps:$4 sm:$0xff]   ;;  %v3269_v13 = vld [vmem:[%s3599_s26 + $0x7ac] ss:$16 sps:$4 sm:$0xff]  }
 0x11e   : > { %1952 = vmatpush1.bf16.msra.mxu0 %v3174_v14  ;;  %2124 = vmatpush1.bf16.msra.mxu1 %v3177_v15  ;;  %v3264_v14 = vld [vmem:[%s3599_s26 + $0x7a0] ss:$16 sps:$4 sm:$0xff]   ;;  %v3267_v15 = vld [vmem:[%s3599_s26 + $0x7a8] ss:$16 sps:$4 sm:$0xff]  }
 0x11f   : > { %1953 = vmatprep.subr.bf16.mxu0 %v3182_v16  ;;  %2125 = vmatprep.subr.bf16.mxu1 %v3185_v17  ;;  %v3272_v16 = vld [vmem:[%s3599_s26 + $0x7c4] ss:$16 sps:$4 sm:$0xff]   ;;  %v3275_v17 = vld [vmem:[%s3599_s26 + $0x7cc] ss:$16 sps:$4 sm:$0xff]  }
 0x122   : > { %1954 = vmatpush1.bf16.msra.mxu0 %v3180_v18  ;;  %2126 = vmatpush1.bf16.msra.mxu1 %v3183_v19  ;;  %v3270_v18 = vld [vmem:[%s3599_s26 + $0x7c0] ss:$16 sps:$4 sm:$0xff]   ;;  %v3273_v19 = vld [vmem:[%s3599_s26 + $0x7c8] ss:$16 sps:$4 sm:$0xff]  }
 0x123   : > { %1966 = vmatprep.subr.bf16.mxu0 %v3188_v20  ;;  %2138 = vmatprep.subr.bf16.mxu1 %v3191_v21  ;;  %v3278_v20 = vld [vmem:[%s3599_s26 + $0x7e4] ss:$16 sps:$4 sm:$0xff]   ;;  %v3281_v21 = vld [vmem:[%s3599_s26 + $0x7ec] ss:$16 sps:$4 sm:$0xff]  }
 0x125   : > { %1956 = vmatmul.mubr.bf16.vlgmr.msra.gmra.mrb[0].mxu0 %v2503_v22  ;;  %2128 = vmatmul.mubr.bf16.vlgmr.msra.gmra.mrb[0].mxu1 %v2503_v22  ;;  %v3276_v22 = vld [vmem:[%s3599_s26 + $0x7e0] ss:$16 sps:$4 sm:$0xff]  }
 0x126   : > { %1967 = vmatpush1.bf16.msra.mxu0 %v3186_v27  ;;  %2139 = vmatpush1.bf16.msra.mxu1 %v3189_v28  ;;  %v3279_v27 = vld [vmem:[%s3599_s26 + $0x7e8] ss:$16 sps:$4 sm:$0xff]   ;;  %v2505_v28 = vcombine.low %v3826_v25, %v3829_v26 }
 0x127   : > { %1968 = vmatprep.subr.bf16.mxu0 %v3194_v29  ;;  %2140 = vmatprep.subr.bf16.mxu1 %v3197_v30  ;;  %v245_v29 = vld [vmem:[#allocation2] sm:$0xff]  ;;  %v247_v30 = vld [vmem:[#allocation2 + $0x10] sm:$0xff] }
 0x128   : > { %1998 = vmatprep.mubr.bf16.mxu0 %v2506_v23  ;;  %2170 = vmatprep.mubr.bf16.mxu1 %v2506_v23  ;;  %v246_v23 = vld [vmem:[#allocation2 + $0x8] sm:$0xff] }
 0x12a   : > { %1969 = vmatpush1.bf16.msra.mxu0 %v3192_v24  ;;  %2141 = vmatpush1.bf16.msra.mxu1 %v3195_v31  ;;  %v248_v24 = vld [vmem:[#allocation2 + $0x18] sm:$0xff] }
 0x12b   : > { %1970 = vmatprep.subr.bf16.mxu0 %v3200_v32  ;;  %2142 = vmatprep.subr.bf16.mxu1 %v3203_v33  ;;  %v249_v33 = vld [vmem:[#allocation2 + $0x20] sm:$0x3f] }
 0x12e   : > { %1971 = vmatpush1.bf16.msra.mxu0 %v3198_v34  ;;  %2143 = vmatpush1.bf16.msra.mxu1 %v3201_v35  ;;  %v251_v34 = vld [vmem:[#allocation2 + $0x30] sm:$0x3f] }
 0x12f   : > { %1972 = vmatprep.subr.bf16.mxu0 %v3206_v36  ;;  %2144 = vmatprep.subr.bf16.mxu1 %v3209_v37 }
 0x132   : > { %1973 = vmatpush1.bf16.msra.mxu0 %v3204_v38  ;;  %2145 = vmatpush1.bf16.msra.mxu1 %v3207_v39  ;;  %v250_v39 = vld [vmem:[#allocation2 + $0x28] sm:$0x3f] }
 0x133   : > { %1974 = vmatprep.subr.bf16.mxu0 %v3212_v40  ;;  %2146 = vmatprep.subr.bf16.mxu1 %v3215_v41  ;;  %v252_v40 = vld [vmem:[#allocation2 + $0x38] sm:$0x3f] }
 0x136   : > { %1975 = vmatpush1.bf16.msra.mxu0 %v3210_v42  ;;  %2147 = vmatpush1.bf16.msra.mxu1 %v3213_v43 }
 0x137   : > { %1976 = vmatprep.subr.bf16.mxu0 %v3218_v44  ;;  %2148 = vmatprep.subr.bf16.mxu1 %v3221_v45 }
 0x13a   : > { %1977 = vmatpush1.bf16.msra.mxu0 %v3216_v46  ;;  %2149 = vmatpush1.bf16.msra.mxu1 %v3219_v47 }
 0x13b   : > { %1978 = vmatprep.subr.bf16.mxu0 %v3224_v48  ;;  %2150 = vmatprep.subr.bf16.mxu1 %v3227_v49 }
 0x13e   : > { %1979 = vmatpush1.bf16.msra.mxu0 %v3222_v50  ;;  %2151 = vmatpush1.bf16.msra.mxu1 %v3225_v51 }
 0x13f   : > { %1980 = vmatprep.subr.bf16.mxu0 %v3230_v52  ;;  %2152 = vmatprep.subr.bf16.mxu1 %v3233_v53 }
 0x142   : > { %1981 = vmatpush1.bf16.msra.mxu0 %v3228_v54  ;;  %2153 = vmatpush1.bf16.msra.mxu1 %v3231_v55 }
 0x143   : > { %1982 = vmatprep.subr.bf16.mxu0 %v3236_v56  ;;  %2154 = vmatprep.subr.bf16.mxu1 %v3239_v57 }
 0x146   : > { %1983 = vmatpush1.bf16.msra.mxu0 %v3234_v58  ;;  %2155 = vmatpush1.bf16.msra.mxu1 %v3237_v59 }
 0x147   : > { %1984 = vmatprep.subr.bf16.mxu0 %v3242_v60  ;;  %2156 = vmatprep.subr.bf16.mxu1 %v3245_v61 }
 0x14a   : > { %1985 = vmatpush1.bf16.msra.mxu0 %v3240_v62  ;;  %2157 = vmatpush1.bf16.msra.mxu1 %v3243_v63 }
 0x14b   : > { %1986 = vmatprep.subr.bf16.mxu0 %v3248_v0  ;;  %2158 = vmatprep.subr.bf16.mxu1 %v3251_v1 }
 0x14e   : > { %1987 = vmatpush1.bf16.msra.mxu0 %v3246_v2  ;;  %2159 = vmatpush1.bf16.msra.mxu1 %v3249_v3 }
 0x14f   : > { %1988 = vmatprep.subr.bf16.mxu0 %v3254_v4  ;;  %2160 = vmatprep.subr.bf16.mxu1 %v3257_v5 }
 0x152   : > { %1989 = vmatpush1.bf16.msra.mxu0 %v3252_v6  ;;  %2161 = vmatpush1.bf16.msra.mxu1 %v3255_v7 }
 0x153   : > { %1990 = vmatprep.subr.bf16.mxu0 %v3260_v8  ;;  %2162 = vmatprep.subr.bf16.mxu1 %v3263_v9 }
 0x156   : > { %1991 = vmatpush1.bf16.msra.mxu0 %v3258_v10  ;;  %2163 = vmatpush1.bf16.msra.mxu1 %v3261_v11 }
 0x157   : > { %1992 = vmatprep.subr.bf16.mxu0 %v3266_v12  ;;  %2164 = vmatprep.subr.bf16.mxu1 %v3269_v13 }
 0x15a   : > { %1993 = vmatpush1.bf16.msra.mxu0 %v3264_v14  ;;  %2165 = vmatpush1.bf16.msra.mxu1 %v3267_v15 }
 0x15b   : > { %1994 = vmatprep.subr.bf16.mxu0 %v3272_v16  ;;  %2166 = vmatprep.subr.bf16.mxu1 %v3275_v17 }
 0x15e   : > { %1995 = vmatpush1.bf16.msra.mxu0 %v3270_v18  ;;  %2167 = vmatpush1.bf16.msra.mxu1 %v3273_v19 }
 0x15f   : > { %1996 = vmatprep.subr.bf16.mxu0 %v3278_v20  ;;  %2168 = vmatprep.subr.bf16.mxu1 %v3281_v21 }
 0x162   : > { %1997 = vmatpush1.bf16.msra.mxu0 %v3276_v22  ;;  %2169 = vmatpush1.bf16.msra.mxu1 %v3279_v27 }
 0x165   : > { %1999 = vmatmul.mubr.bf16.vlgmr.msra.gmra.mrb[0].mxu0 %v2505_v28  ;;  %2171 = vmatmul.mubr.bf16.vlgmr.msra.gmra.mrb[0].mxu1 %v2505_v28 }
 0x238   : > { %v2000_v31 = vpop.f32.mrb[0].mxu0  ;;  %v2172_v32 = vpop.f32.mrb[0].mxu1  ;;  %2200 = sbr.rel (%p2763_p12) target bundleno = 645 (0x285), region = 63 }
 0x239   : > { %v2181_v35 = vadd.f32 %v2000_v31, %v245_v29  ;;  %v2183_v36 = vadd.f32 %v2172_v32, %v247_v30  ;;  %v2002_v37 = vpop.f32.mrb[1].mxu0  ;;  %v2174_v38 = vpop.f32.mrb[1].mxu1 }
 0x23a   : > { %v2182_v41 = vadd.f32 %v2002_v37, %v246_v23  ;;  %v2184_v25 = vadd.f32 %v2174_v38, %v248_v24  ;;  %v2004_v26 = vpop.f32.mrb[2].mxu0  ;;  %v2176_v42 = vpop.f32.mrb[2].mxu1 }
 0x23b   : > { %2189 = vst [vmem:[#allocation2] sm:$0xff] %v2181_v35  ;;  %2191 = vst [vmem:[#allocation2 + $0x10] sm:$0xff] %v2183_v36  ;;  %v2185_v43 = vadd.f32 %v2004_v26, %v249_v33  ;;  %v2187_v44 = vadd.f32 %v2176_v42, %v251_v34  ;;  %v2006_v45 = vpop.f32.mrb[3].mxu0  ;;  %v2178_v46 = vpop.f32.mrb[3].mxu1 }
 0x23c   : > { %2190 = vst [vmem:[#allocation2 + $0x8] sm:$0xff] %v2182_v41  ;;  %2192 = vst [vmem:[#allocation2 + $0x18] sm:$0xff] %v2184_v25  ;;  %v2186_v47 = vadd.f32 %v2006_v45, %v250_v39  ;;  %v2188_v48 = vadd.f32 %v2178_v46, %v252_v40 }
 0x23d   : > { %2193 = vst [vmem:[#allocation2 + $0x20] sm:$0x3f] %v2185_v43  ;;  %2195 = vst [vmem:[#allocation2 + $0x30] sm:$0x3f] %v2187_v44 }
 0x23e   : > { %2194 = vst [vmem:[#allocation2 + $0x28] sm:$0x3f] %v2186_v47  ;;  %2196 = vst [vmem:[#allocation2 + $0x38] sm:$0x3f] %v2188_v48 }
 0x242   : > { %v2201_v49 = vld [vmem:[#allocation2] sm:$0xff]  ;;  %v2203_v54 = vld [vmem:[#allocation2 + $0x10] sm:$0xff] }
 0x243   : > { %v2202_v51 = vld [vmem:[#allocation2 + $0x8] sm:$0xff]  ;;  %v2204_v59 = vld [vmem:[#allocation2 + $0x18] sm:$0xff] }
 0x244   : > { %v2205_v50 = vld [vmem:[#allocation2 + $0x20] sm:$0x3f]  ;;  %v2207_v55 = vld [vmem:[#allocation2 + $0x30] sm:$0x3f] }
 0x245   : > { %v2210_v52 = vsel %vm2209_vm0, %v2205_v50, 0.0  ;;  %v2206_v53 = vld [vmem:[#allocation2 + $0x28] sm:$0x3f]  ;;  %v2226_v58 = vsel %vm2209_vm0, %v2207_v55, 0.0  ;;  %v2208_v60 = vld [vmem:[#allocation2 + $0x38] sm:$0x3f] }
 0x246   : > { %v2211_v56 = vadd.f32 %v2210_v52, %v2201_v49  ;;  %v2218_v57 = vsel %vm2209_vm0, %v2206_v53, 0.0  ;;  %v2227_v62 = vadd.f32 %v2226_v58, %v2203_v54  ;;  %v2234_v63 = vsel %vm2209_vm0, %v2208_v60, 0.0 }
 0x247   : > { %v2219_v61 = vadd.f32 %v2218_v57, %v2202_v51  ;;  %v2235_v1 = vadd.f32 %v2234_v63, %v2204_v59 }
 0x248   : > { %v2212_v0 = vrot.slane %v2211_v56, 4  ;;  %v2228_v3 = vrot.slane %v2227_v62, 4 }
 0x249   : > { %v2220_v2 = vrot.slane %v2219_v61, 4  ;;  %v2236_v5 = vrot.slane %v2235_v1, 4 }
 0x24a   : > { %v2213_v4 = vadd.f32 %v2212_v0, %v2211_v56  ;;  %v2229_v7 = vadd.f32 %v2228_v3, %v2227_v62 }
 0x24b   : > { %v2221_v6 = vadd.f32 %v2220_v2, %v2219_v61  ;;  %v2237_v9 = vadd.f32 %v2236_v5, %v2235_v1 }
 0x24c   : > { %v2214_v8 = vrot.slane %v2213_v4, 2  ;;  %v2230_v11 = vrot.slane %v2229_v7, 2 }
 0x24d   : > { %v2222_v10 = vrot.slane %v2221_v6, 2  ;;  %v2238_v13 = vrot.slane %v2237_v9, 2 }
 0x24e   : > { %v2215_v12 = vadd.f32 %v2214_v8, %v2213_v4  ;;  %v2231_v15 = vadd.f32 %v2230_v11, %v2229_v7 }
 0x24f   : > { %v2223_v14 = vadd.f32 %v2222_v10, %v2221_v6  ;;  %v2239_v17 = vadd.f32 %v2238_v13, %v2237_v9 }
 0x250   : > { %v2216_v16 = vrot.slane %v2215_v12, 1  ;;  %v2232_v19 = vrot.slane %v2231_v15, 1 }
 0x251   : > { %v2224_v18 = vrot.slane %v2223_v14, 1  ;;  %v2240_v21 = vrot.slane %v2239_v17, 1 }
 0x252   : > { %v2217_v20 = vadd.f32 %v2216_v16, %v2215_v12  ;;  %v2233_v27 = vadd.f32 %v2232_v19, %v2231_v15 }
 0x253   : > { %v2225_v22 = vadd.f32 %v2224_v18, %v2223_v14  ;;  %v2241_v29 = vadd.f32 %v2240_v21, %v2239_v17 }
 0x254   : > { %v2243_v28 = vmul.f32 0.071428575, %v2217_v20  ;;  %v2245_v23 = vmul.f32 0.071428575, %v2233_v27 }
 0x255   : > { %v2244_v30 = vmul.f32 0.071428575, %v2225_v22  ;;  %v2246_v32 = vmul.f32 0.071428575, %v2241_v29 }
 0x256   : > { %v3902_v24 = vsub.f32 %v2201_v49, %v2243_v28  ;;  %v3904_v31 = vsub.f32 %v2205_v50, %v2243_v28  ;;  %v3910_v35 = vsub.f32 %v2203_v54, %v2245_v23  ;;  %v3912_v36 = vsub.f32 %v2207_v55, %v2245_v23 }
 0x257   : > { %v3906_v33 = vsub.f32 %v2202_v51, %v2244_v30  ;;  %v3908_v34 = vsub.f32 %v2206_v53, %v2244_v30  ;;  %v3918_v39 = vsub.f32 %v2204_v59, %v2246_v32  ;;  %v3920_v40 = vsub.f32 %v2208_v60, %v2246_v32 }
 0x258   : > { %v2255_v37 = vmul.f32 %v3902_v24, %v3902_v24  ;;  %v2259_v38 = vmul.f32 %v3904_v31, %v3904_v31  ;;  %v2257_v26 = vmul.f32 %v3910_v35, %v3910_v35  ;;  %v2261_v42 = vmul.f32 %v3912_v36, %v3912_v36 }
 0x259   : > { %v2256_v41 = vmul.f32 %v3906_v33, %v3906_v33  ;;  %v2260_v25 = vmul.f32 %v3908_v34, %v3908_v34  ;;  %v2258_v44 = vmul.f32 %v3918_v39, %v3918_v39  ;;  %v2262_v45 = vmul.f32 %v3920_v40, %v3920_v40 }
 0x25a   : > { %v2263_v43 = vsel %vm2209_vm0, %v2259_v38, 0.0  ;;  %v2279_v48 = vsel %vm2209_vm0, %v2261_v42, 0.0 }
 0x25b   : > { %v2264_v46 = vadd.f32 %v2263_v43, %v2255_v37  ;;  %v2271_v47 = vsel %vm2209_vm0, %v2260_v25, 0.0  ;;  %v2280_v50 = vadd.f32 %v2279_v48, %v2257_v26  ;;  %v2287_v51 = vsel %vm2209_vm0, %v2262_v45, 0.0 }
 0x25c   : > { %v2272_v49 = vadd.f32 %v2271_v47, %v2256_v41  ;;  %v2288_v53 = vadd.f32 %v2287_v51, %v2258_v44 }
 0x25d   : > { %v2265_v52 = vrot.slane %v2264_v46, 4  ;;  %v2281_v55 = vrot.slane %v2280_v50, 4 }
 0x25e   : > { %v2273_v54 = vrot.slane %v2272_v49, 4  ;;  %v2289_v57 = vrot.slane %v2288_v53, 4 }
 0x25f   : > { %v2266_v56 = vadd.f32 %v2265_v52, %v2264_v46  ;;  %v2282_v59 = vadd.f32 %v2281_v55, %v2280_v50 }
 0x260   : > { %v2274_v58 = vadd.f32 %v2273_v54, %v2272_v49  ;;  %v2290_v61 = vadd.f32 %v2289_v57, %v2288_v53 }
 0x261   : > { %v2267_v60 = vrot.slane %v2266_v56, 2  ;;  %v2283_v63 = vrot.slane %v2282_v59, 2 }
 0x262   : > { %v2275_v62 = vrot.slane %v2274_v58, 2  ;;  %v2291_v1 = vrot.slane %v2290_v61, 2 }
 0x263   : > { %v2268_v0 = vadd.f32 %v2267_v60, %v2266_v56  ;;  %v2284_v3 = vadd.f32 %v2283_v63, %v2282_v59 }
 0x264   : > { %v2276_v2 = vadd.f32 %v2275_v62, %v2274_v58  ;;  %v2292_v5 = vadd.f32 %v2291_v1, %v2290_v61 }
 0x265   : > { %v2269_v4 = vrot.slane %v2268_v0, 1  ;;  %v2285_v7 = vrot.slane %v2284_v3, 1 }
 0x266   : > { %v2277_v6 = vrot.slane %v2276_v2, 1  ;;  %v2293_v9 = vrot.slane %v2292_v5, 1 }
 0x267   : > { %v2270_v8 = vadd.f32 %v2269_v4, %v2268_v0  ;;  %v2286_v11 = vadd.f32 %v2285_v7, %v2284_v3 }
 0x268   : > { %v2278_v10 = vadd.f32 %v2277_v6, %v2276_v2  ;;  %v2294_v13 = vadd.f32 %v2293_v9, %v2292_v5 }
 0x269   : > { %v2295_v12 = vmul.f32 0.071428575, %v2270_v8  ;;  %v2297_v15 = vmul.f32 0.071428575, %v2286_v11 }
 0x26a   : > { %v2296_v14 = vmul.f32 0.071428575, %v2278_v10  ;;  %v2298_v17 = vmul.f32 0.071428575, %v2294_v13 }
 0x26b   : > { %v2299_v16 = vadd.f32 1e-05, %v2295_v12  ;;  %v2301_v19 = vadd.f32 1e-05, %v2297_v15 }
 0x26c   : > { %v2300_v18 = vadd.f32 1e-05, %v2296_v14  ;;  %v2302_v20 = vadd.f32 1e-05, %v2298_v17 }
 0x26d   : > { %3282 = vrsqrt.f32 %v2299_v16 }
 0x26e   : > { %3284 = vrsqrt.f32 %v2300_v18 }
 0x26f   : > { %3286 = vrsqrt.f32 %v2301_v19 }
 0x270   : > { %3288 = vrsqrt.f32 %v2302_v20 }
 0x277   : > { %v3283_v21 = vpop.eup %3282 }
 0x278   : > { %v3285_v22 = vpop.eup %3284  ;;  %v2307_v27 = vmul.f32 %v3283_v21, %v3902_v24  ;;  %v2311_v28 = vmul.f32 %v3283_v21, %v3904_v31 }
 0x279   : > { %v3287_v29 = vpop.eup %3286  ;;  %v2308_v30 = vmul.f32 %v3285_v22, %v3906_v33  ;;  %v2312_v23 = vmul.f32 %v3285_v22, %v3908_v34 }
 0x27a   : > { %v3289_v32 = vpop.eup %3288  ;;  %vm2315_vm1 = vcmp.gt.f32.partialorder %v2307_v27, 0.0  ;;  %v2323_v37 = vmul.f32 0.0, %v2307_v27  ;;  %v2309_v38 = vmul.f32 %v3287_v29, %v3910_v35  ;;  %vm2319_vm2 = vcmp.gt.f32.partialorder %v2311_v28, 0.0 }
 0x27b   : > { %vm2316_vm3 = vcmp.gt.f32.partialorder %v2308_v30, 0.0  ;;  %v2324_v41 = vmul.f32 0.0, %v2308_v30  ;;  %v2310_v24 = vmul.f32 %v3289_v32, %v3918_v39  ;;  %v2327_v25 = vmul.f32 0.0, %v2311_v28 }
 0x27c   : > { %v2331_v31 = vsel %vm2315_vm1, %v2307_v27, %v2323_v37  ;;  %vm2317_vm4 = vcmp.gt.f32.partialorder %v2309_v38, 0.0  ;;  %v2325_v33 = vmul.f32 0.0, %v2309_v38  ;;  %vm2320_vm5 = vcmp.gt.f32.partialorder %v2312_v23, 0.0 }
 0x27d   : > { %2339 = vst [vmem:[%s3606_s30] sm:$0xff] %v2331_v31  ;;  %v2332_v34 = vsel %vm2316_vm3, %v2308_v30, %v2324_v41  ;;  %vm2318_vm6 = vcmp.gt.f32.partialorder %v2310_v24, 0.0  ;;  %v2326_v26 = vmul.f32 0.0, %v2310_v24  ;;  %v2335_v42 = vsel %vm2319_vm2, %v2311_v28, %v2327_v25 }
 0x27e   : > { %2340 = vst [vmem:[%s3606_s30 + $0x8] sm:$0xff] %v2332_v34  ;;  %v2333_v35 = vsel %vm2317_vm4, %v2309_v38, %v2325_v33  ;;  %2343 = vst [vmem:[%s3606_s30 + $0x20] sm:$0x3f] %v2335_v42  ;;  %v2328_v43 = vmul.f32 0.0, %v2312_v23  ;;  %v2313_v39 = vmul.f32 %v3287_v29, %v3912_v36  ;;  %v2314_v44 = vmul.f32 %v3289_v32, %v3920_v40 }
 0x27f   : > { %2341 = vst [vmem:[%s3606_s30 + $0x10] sm:$0xff] %v2333_v35  ;;  %v2334_v45 = vsel %vm2318_vm6, %v2310_v24, %v2326_v26 }
 0x280   : > { %2342 = vst [vmem:[%s3606_s30 + $0x18] sm:$0xff] %v2334_v45  ;;  %v2336_v46 = vsel %vm2320_vm5, %v2312_v23, %v2328_v43  ;;  %vm2321_vm7 = vcmp.gt.f32.partialorder %v2313_v39, 0.0  ;;  %v2329_v47 = vmul.f32 0.0, %v2313_v39  ;;  %vm2322_vm8 = vcmp.gt.f32.partialorder %v2314_v44, 0.0 }
 0x281   : > { %2344 = vst [vmem:[%s3606_s30 + $0x28] sm:$0x3f] %v2336_v46  ;;  %v2330_v48 = vmul.f32 0.0, %v2314_v44 }
 0x282   : > { %v2337_v49 = vsel %vm2321_vm7, %v2313_v39, %v2329_v47 }
 0x283   : > { %2345 = vst [vmem:[%s3606_s30 + $0x30] sm:$0x3f] %v2337_v49  ;;  %v2338_v50 = vsel %vm2322_vm8, %v2314_v44, %v2330_v48 }
 0x284   : > { %2346 = vst [vmem:[%s3606_s30 + $0x38] sm:$0x3f] %v2338_v50 }
 0x285 PF: > { %p4019_p1 = scmp.ne.s32.totalorder %s4017_s8, 0 }
 0x286   : > { %s2771_s9 = sshll.u32 (%p4019_p1), %s3404_s17, 5  ;;  %v2369_v36 = vld [vmem:[%s3606_s30] sm:$0xff] (%p4019_p1)  ;;  %v2371_v40 = vld [vmem:[%s3606_s30 + $0x8] sm:$0xff] (%p4019_p1)  ;;  %v2373_v51 = vld [vmem:[%s3606_s30 + $0x10] sm:$0xff] (%p4019_p1) }
 0x287   : > { %2353 = sbr.rel (!%p4019_p1) target bundleno = 654 (0x28e), region = 67  ;;  %s2356_s5 = scalar_lea.vmem (%p4019_p1), %s4006_s2, %s2771_s9  ;;  %v2375_v52 = vld [vmem:[%s3606_s30 + $0x18] sm:$0xff] (%p4019_p1)  ;;  %v2377_v53 = vld [vmem:[%s3606_s30 + $0x20] sm:$0xff] (%p4019_p1) }
 0x288   : > { %v2379_v54 = vld [vmem:[%s3606_s30 + $0x28] sm:$0xff] (%p4019_p1)  ;;  %2370 = vst [vmem:[%s2356_s5] sm:$0xff] (%p4019_p1), %v2369_v36  ;;  %2372 = vst [vmem:[%s2356_s5 + $0x8] sm:$0xff] (%p4019_p1), %v2371_v40 }
 0x289   : > { %2374 = vst [vmem:[%s2356_s5 + $0x10] sm:$0xff] (%p4019_p1), %v2373_v51  ;;  %2376 = vst [vmem:[%s2356_s5 + $0x18] sm:$0xff] (%p4019_p1), %v2375_v52 }
 0x28a   : > { %2378 = vst [vmem:[%s2356_s5 + $0x40] sm:$0xff] (%p4019_p1), %v2377_v53  ;;  %2380 = vst [vmem:[%s2356_s5 + $0x48] sm:$0xff] (%p4019_p1), %v2379_v54  ;;  %v2381_v55 = vld [vmem:[%s3606_s30 + $0x30] sm:$0xff] (%p4019_p1) }
 0x28b   : > { %v2383_v56 = vld [vmem:[%s3606_s30 + $0x38] sm:$0xff] (%p4019_p1)  ;;  %2382 = vst [vmem:[%s2356_s5 + $0x50] sm:$0xff] (%p4019_p1), %v2381_v55 }
 0x28c   : > { %2384 = vst [vmem:[%s2356_s5 + $0x58] sm:$0xff] (%p4019_p1), %v2383_v56 }
 0x28e PF: > { %s15_s20 = sadd.s32 1, %s3416_s20   ;;  %s4020_s17 = sld [smem:[#allocation8_spill]] }
 0x28f   : > { %p12_p11 = scmp.ge.s32.totalorder %s15_s20, 18   ;;  %s4021_s8 = sld [smem:[#allocation9_spill]] }
 0x290   : > { %s4022_s19 = sld [smem:[#allocation10_spill]]  ;;  %s4023_s9 = smov %s3376_s10 }
 0x291   : > { %s4024_s10 = smov %s3541_s7  ;;  %s4025_s11 = smov %s3384_s12 }
 0x292   : > { %s4026_s12 = smov %s3388_s13  ;;  %s4027_s13 = smov %s3533_s4 }
 0x293   : > { %s4028_s14 = smov %s3396_s15  ;;  %s4029_s15 = smov %s3518_s28 }
 0x294   : > { %s4030_s16 = smov %s3408_s18  ;;  %14 = sbr.rel (!%p12_p11) target bundleno = 9 (0x9), region = 130 }
 0x295   : > { %s4031_s18 = smov %s4021_s8 }
 0x29b   :  { %2400 = vsyncpa [#allocation5], 1 }
 0x29c   :  { %2402 = vsyncpa [#allocation5 + $0x1], 1 }

// kernel: combined_generator.13
= control target key start
LH: loop header
LB: loop body
LE: loop exit
PB: predicated region body
PF: predicated region fallthrough
CT: control target
= control target key end

     0   :  { %s3517_s9 = smov 0   ;;  %s3519_s10 = smov 0   ;;  %s4078_s0 = inlined_call_operand.vmem [shape: bf16[28,4096], index: 0, kind: input, shape index: {}]   ;;  %s4079_s1 = inlined_call_operand.vmem [shape: bf16[4096,512], index: 1, kind: input, shape index: {}]   ;;  %s4080_s2 = inlined_call_operand.vmem [shape: f32[28,512], index: 2, kind: output, shape index: {}]  }
   0x1   :  { %s3521_s11 = smov 0   ;;  %s3523_s12 = smov 0  }
   0x2   :  { %s3525_s13 = smov 0  }
   0x3 LB: > { %s21_s14 = sadd.s32 1, %s3495_s12  ;;  %p38_p1 = scmp.ne.s32.totalorder %s3487_s10, %s3483_s9  ;;  %s3499_s13 = sphi %s3525_s13, %s12_s13   ;;  %s3495_s12 = sphi %s3523_s12, %s4084_s12   ;;  %s3491_s11 = sphi %s3521_s11, %s4083_s11   ;;  %s3487_s10 = sphi %s3519_s10, %s4082_s10   ;;  %s3483_s9 = sphi %s3517_s9, %s4081_s9  }
   0x4   : > { %p22_p0 = scmp.ge.s32.totalorder %s21_s14, 4  ;;  %p39_p2 = scmp.eq.s32.totalorder %s3499_s13, 0 }
   0x5   : > { %s31_s16 = sadd.s32 1, %s3487_s10  ;;  %p2691_p5 = scmp.ge.s32.totalorder %s3499_s13, 4 }
   0x6   : > { %s4086_s14 = smov (%p22_p0, %s21_s14), 0  ;;  %p40_p3 = por %p39_p2, %p38_p1 }
   0x7   : > { %s28_s15 = ssub.s32 %s3495_s12, %s4086_s14  ;;  %118 = sbr.rel (%p2691_p5) target bundleno = 26 (0x1a), region = 16 }
   0x8   : > { %p29_p4 = scmp.eq.s32.totalorder %s28_s15, 0 }
   0xa   : > { %s3552_s17 = scalar_select %p29_p4, %s3487_s10, %s31_s16  }
   0xe   : > { %121 = sbr.rel (!%p40_p3) target bundleno = 26 (0x1a), region = 20  ;;  %s123_s18 = sand.u32 (%p40_p3), 1, %s3487_s10  }
   0xf   : > { %s2978_s19 = sshll.u32 (%p40_p3), %s3495_s12, 5  ;;  %s2692_s20 = sshll.u32 (%p40_p3), %s123_s18, 7 }
  0x10   : > { %s3560_s23 = scalar_lea.vmem (%p40_p3), %s4078_s0, %s2978_s19  ;;  %s125_s24 = scalar_lea.vmem (%p40_p3), [#allocation3], %s2692_s20 }
  0x11   : > { %v141_v0 = vld [vmem:[%s3560_s23] sm:$0xff] (%p40_p3)  ;;  %v143_v1 = vld [vmem:[%s3560_s23 + $0x8] sm:$0xff] (%p40_p3)  ;;  %v145_v2 = vld [vmem:[%s3560_s23 + $0x10] sm:$0xff] (%p40_p3) }
  0x12   : > { %142 = vst [vmem:[%s125_s24] sm:$0xff] (%p40_p3), %v141_v0  ;;  %144 = vst [vmem:[%s125_s24 + $0x8] sm:$0xff] (%p40_p3), %v143_v1  ;;  %v147_v3 = vld [vmem:[%s3560_s23 + $0x18] sm:$0xff] (%p40_p3)  ;;  %v149_v4 = vld [vmem:[%s3560_s23 + $0x80] sm:$0xff] (%p40_p3) }
  0x13   : > { %146 = vst [vmem:[%s125_s24 + $0x10] sm:$0xff] (%p40_p3), %v145_v2  ;;  %v151_v5 = vld [vmem:[%s3560_s23 + $0x88] sm:$0xff] (%p40_p3)  ;;  %148 = vst [vmem:[%s125_s24 + $0x18] sm:$0xff] (%p40_p3), %v147_v3  ;;  %v153_v6 = vld [vmem:[%s3560_s23 + $0x90] sm:$0xff] (%p40_p3) }
  0x14   : > { %150 = vst [vmem:[%s125_s24 + $0x20] sm:$0xff] (%p40_p3), %v149_v4  ;;  %152 = vst [vmem:[%s125_s24 + $0x28] sm:$0xff] (%p40_p3), %v151_v5  ;;  %v155_v7 = vld [vmem:[%s3560_s23 + $0x98] sm:$0xff] (%p40_p3)  ;;  %v157_v8 = vld [vmem:[%s3560_s23 + $0x100] sm:$0xff] (%p40_p3) }
  0x15   : > { %154 = vst [vmem:[%s125_s24 + $0x30] sm:$0xff] %v153_v6  ;;  %156 = vst [vmem:[%s125_s24 + $0x38] sm:$0xff] %v155_v7  ;;  %v159_v9 = vld [vmem:[%s3560_s23 + $0x108] sm:$0xff]  ;;  %v161_v10 = vld [vmem:[%s3560_s23 + $0x110] sm:$0xff] }
  0x16   : > { %158 = vst [vmem:[%s125_s24 + $0x40] sm:$0xff] %v157_v8  ;;  %v163_v11 = vld [vmem:[%s3560_s23 + $0x118] sm:$0xff]  ;;  %160 = vst [vmem:[%s125_s24 + $0x48] sm:$0xff] %v159_v9  ;;  %v165_v12 = vld [vmem:[%s3560_s23 + $0x180] sm:$0xff] }
  0x17   : > { %162 = vst [vmem:[%s125_s24 + $0x50] sm:$0xff] %v161_v10  ;;  %164 = vst [vmem:[%s125_s24 + $0x58] sm:$0xff] %v163_v11  ;;  %v167_v13 = vld [vmem:[%s3560_s23 + $0x188] sm:$0xff]  ;;  %v169_v14 = vld [vmem:[%s3560_s23 + $0x190] sm:$0xff] }
  0x18   : > { %166 = vst [vmem:[%s125_s24 + $0x60] sm:$0xff] %v165_v12  ;;  %168 = vst [vmem:[%s125_s24 + $0x68] sm:$0xff] %v167_v13  ;;  %v171_v15 = vld [vmem:[%s3560_s23 + $0x198] sm:$0xff] }
  0x19   : > { %170 = vst [vmem:[%s125_s24 + $0x70] sm:$0xff] %v169_v14  ;;  %172 = vst [vmem:[%s125_s24 + $0x78] sm:$0xff] %v171_v15 }
  0x1a PF: > { %p2695_p6 = scmp.ge.s32.totalorder %s3499_s13, 1  ;;  %p192_p7 = scmp.lt.s32.totalorder %s3499_s13, 5 }
  0x1c   : > { %p193_p8 = pnand %p2695_p6, %p192_p7 }
  0x1d   : > { %s199_s25 = sand.u32 (!%p193_p8), 1, %s3483_s9   ;;  %s2697_s26 = sshll.u32 (!%p193_p8), %s3491_s11, 7 }
  0x1e   : > { %196 = sbr.rel (%p193_p8) target bundleno = 610 (0x262), region = 47  ;;  %s2696_s27 = sshll.u32 (!%p193_p8), %s199_s25, 7 }
  0x1f   : > { %p233_p9 = scmp.lt.s32.totalorder (!%p193_p8), %s2697_s26, 511  ;;  %s3587_s4 = scalar_lea.vmem (!%p193_p8), [#allocation3], %s2696_s27 }
  0x20   : > { %p2700_p10 = scmp.ne.s32.totalorder (!%p193_p8), %s3491_s11, 0 }
  0x25   : > { %s4088_s26 = smov (!%p233_p9, %s2697_s26), 511  ;;  %252 = sbr.rel (%p2700_p10) target bundleno = 47 (0x2f), region = 55 }
  0x26   : > { %s2979_s28 = sshll.u32 %s4088_s26, 4  ;;  %v3501_v16 = vmov (!%p2700_p10), 0.0  }
  0x27   : > { %s3585_s3 = scalar_lea.vmem %s4079_s1, %s2979_s28  ;;  %253 = vst [vmem:[#allocation2] sm:$0xff] (!%p2700_p10), %v3501_v16  ;;  %254 = vst [vmem:[#allocation2 + $0x8] sm:$0xff] (!%p2700_p10), %v3501_v16 }
  0x28   : > { %255 = vst [vmem:[#allocation2 + $0x10] sm:$0xff] (!%p2700_p10), %v3501_v16  ;;  %256 = vst [vmem:[#allocation2 + $0x18] sm:$0xff] (!%p2700_p10), %v3501_v16 }
  0x29   : > { %257 = vst [vmem:[#allocation2 + $0x20] sm:$0xff] (!%p2700_p10), %v3501_v16  ;;  %258 = vst [vmem:[#allocation2 + $0x28] sm:$0xff] (!%p2700_p10), %v3501_v16 }
  0x2a   : > { %259 = vst [vmem:[#allocation2 + $0x30] sm:$0xff] (!%p2700_p10), %v3501_v16  ;;  %260 = vst [vmem:[#allocation2 + $0x38] sm:$0xff] (!%p2700_p10), %v3501_v16 }
  0x2b   : > { %261 = vst [vmem:[#allocation2 + $0x40] sm:$0xff] (!%p2700_p10), %v3501_v16  ;;  %262 = vst [vmem:[#allocation2 + $0x48] sm:$0xff] (!%p2700_p10), %v3501_v16 }
  0x2c   : > { %263 = vst [vmem:[#allocation2 + $0x50] sm:$0xff] %v3501_v16  ;;  %264 = vst [vmem:[#allocation2 + $0x58] sm:$0xff] %v3501_v16 }
  0x2d   : > { %265 = vst [vmem:[#allocation2 + $0x60] sm:$0xf] %v3501_v16  ;;  %266 = vst [vmem:[#allocation2 + $0x68] sm:$0xf] %v3501_v16 }
  0x2e   : > { %267 = vst [vmem:[#allocation2 + $0x70] sm:$0xf] %v3501_v16  ;;  %268 = vst [vmem:[#allocation2 + $0x78] sm:$0xf] %v3501_v16 }
  0x2f PF: > { %v3069_v17 = vld [vmem:[%s3585_s3 + $0x4] ss:$16 sps:$4 sm:$0xff]   ;;  %v3071_v18 = vld [vmem:[%s3585_s3 + $0xc] ss:$16 sps:$4 sm:$0xff]   ;;  %v3073_v19 = vld [vmem:[%s3585_s3] ss:$16 sps:$4 sm:$0xff]  }
  0x30   : > { %1917 = vmatprep.subr.bf16.mxu0 %v3069_v17  ;;  %v3074_v20 = vld [vmem:[%s3585_s3 + $0x8] ss:$16 sps:$4 sm:$0xff]   ;;  %2129 = vmatprep.subr.bf16.mxu1 %v3071_v18  ;;  %v3075_v21 = vld [vmem:[%s3585_s3 + $0x24] ss:$16 sps:$4 sm:$0xff]   ;;  %v3077_v22 = vld [vmem:[%s3585_s3 + $0x2c] ss:$16 sps:$4 sm:$0xff]  }
  0x31   : > { %1918 = vmatpush1.bf16.msra.mxu0 %v3073_v19  ;;  %2130 = vmatpush1.bf16.msra.mxu1 %v3074_v20  ;;  %v3079_v23 = vld [vmem:[%s3585_s3 + $0x20] ss:$16 sps:$4 sm:$0xff]   ;;  %v3080_v24 = vld [vmem:[%s3585_s3 + $0x28] ss:$16 sps:$4 sm:$0xff]   ;;  %v3081_v25 = vld [vmem:[%s3585_s3 + $0x44] ss:$16 sps:$4 sm:$0xff]  }
  0x32   : > { %1919 = vmatprep.subr.bf16.mxu0 %v3075_v21  ;;  %2131 = vmatprep.subr.bf16.mxu1 %v3077_v22  ;;  %v3083_v26 = vld [vmem:[%s3585_s3 + $0x4c] ss:$16 sps:$4 sm:$0xff]   ;;  %v3085_v27 = vld [vmem:[%s3585_s3 + $0x40] ss:$16 sps:$4 sm:$0xff]   ;;  %v3086_v28 = vld [vmem:[%s3585_s3 + $0x48] ss:$16 sps:$4 sm:$0xff]  }
  0x33   : > { %v3087_v29 = vld [vmem:[%s3585_s3 + $0x64] ss:$16 sps:$4 sm:$0xff]   ;;  %v3089_v30 = vld [vmem:[%s3585_s3 + $0x6c] ss:$16 sps:$4 sm:$0xff]   ;;  %v3091_v31 = vld [vmem:[%s3585_s3 + $0x60] ss:$16 sps:$4 sm:$0xff]  }
  0x34   : > { %v3092_v32 = vld [vmem:[%s3585_s3 + $0x68] ss:$16 sps:$4 sm:$0xff]   ;;  %v3093_v33 = vld [vmem:[%s3585_s3 + $0x84] ss:$16 sps:$4 sm:$0xff]   ;;  %v3095_v34 = vld [vmem:[%s3585_s3 + $0x8c] ss:$16 sps:$4 sm:$0xff]  }
  0x35   : > { %1920 = vmatpush1.bf16.msra.mxu0 %v3079_v23  ;;  %2132 = vmatpush1.bf16.msra.mxu1 %v3080_v24  ;;  %v3097_v35 = vld [vmem:[%s3585_s3 + $0x80] ss:$16 sps:$4 sm:$0xff]   ;;  %v3098_v36 = vld [vmem:[%s3585_s3 + $0x88] ss:$16 sps:$4 sm:$0xff]   ;;  %v3099_v37 = vld [vmem:[%s3585_s3 + $0xa4] ss:$16 sps:$4 sm:$0xff]  }
  0x36   : > { %1921 = vmatprep.subr.bf16.mxu0 %v3081_v25  ;;  %2133 = vmatprep.subr.bf16.mxu1 %v3083_v26  ;;  %v3101_v38 = vld [vmem:[%s3585_s3 + $0xac] ss:$16 sps:$4 sm:$0xff]   ;;  %v3103_v39 = vld [vmem:[%s3585_s3 + $0xa0] ss:$16 sps:$4 sm:$0xff]   ;;  %v3104_v40 = vld [vmem:[%s3585_s3 + $0xa8] ss:$16 sps:$4 sm:$0xff]  }
  0x37   : > { %v3105_v41 = vld [vmem:[%s3585_s3 + $0xc4] ss:$16 sps:$4 sm:$0xff]   ;;  %v3107_v42 = vld [vmem:[%s3585_s3 + $0xcc] ss:$16 sps:$4 sm:$0xff]   ;;  %v3109_v43 = vld [vmem:[%s3585_s3 + $0xc0] ss:$16 sps:$4 sm:$0xff]  }
  0x38   : > { %v3110_v44 = vld [vmem:[%s3585_s3 + $0xc8] ss:$16 sps:$4 sm:$0xff]   ;;  %v3111_v45 = vld [vmem:[%s3585_s3 + $0xe4] ss:$16 sps:$4 sm:$0xff]   ;;  %v3113_v46 = vld [vmem:[%s3585_s3 + $0xec] ss:$16 sps:$4 sm:$0xff]  }
  0x39   : > { %1922 = vmatpush1.bf16.msra.mxu0 %v3085_v27  ;;  %2134 = vmatpush1.bf16.msra.mxu1 %v3086_v28  ;;  %v3115_v47 = vld [vmem:[%s3585_s3 + $0xe0] ss:$16 sps:$4 sm:$0xff]   ;;  %v3116_v48 = vld [vmem:[%s3585_s3 + $0xe8] ss:$16 sps:$4 sm:$0xff]   ;;  %v3117_v49 = vld [vmem:[%s3585_s3 + $0x104] ss:$16 sps:$4 sm:$0xff]  }
  0x3a   : > { %1923 = vmatprep.subr.bf16.mxu0 %v3087_v29  ;;  %2135 = vmatprep.subr.bf16.mxu1 %v3089_v30  ;;  %v3119_v50 = vld [vmem:[%s3585_s3 + $0x10c] ss:$16 sps:$4 sm:$0xff]   ;;  %v3121_v51 = vld [vmem:[%s3585_s3 + $0x100] ss:$16 sps:$4 sm:$0xff]   ;;  %v3122_v52 = vld [vmem:[%s3585_s3 + $0x108] ss:$16 sps:$4 sm:$0xff]  }
  0x3b   : > { %v3123_v53 = vld [vmem:[%s3585_s3 + $0x124] ss:$16 sps:$4 sm:$0xff]   ;;  %v3125_v54 = vld [vmem:[%s3585_s3 + $0x12c] ss:$16 sps:$4 sm:$0xff]   ;;  %v3127_v55 = vld [vmem:[%s3585_s3 + $0x120] ss:$16 sps:$4 sm:$0xff]  }
  0x3c   : > { %v3128_v56 = vld [vmem:[%s3585_s3 + $0x128] ss:$16 sps:$4 sm:$0xff]   ;;  %v3129_v57 = vld [vmem:[%s3585_s3 + $0x144] ss:$16 sps:$4 sm:$0xff]   ;;  %v3131_v58 = vld [vmem:[%s3585_s3 + $0x14c] ss:$16 sps:$4 sm:$0xff]  }
  0x3d   : > { %1924 = vmatpush1.bf16.msra.mxu0 %v3091_v31  ;;  %2136 = vmatpush1.bf16.msra.mxu1 %v3092_v32  ;;  %v3133_v59 = vld [vmem:[%s3585_s3 + $0x140] ss:$16 sps:$4 sm:$0xff]   ;;  %v3134_v60 = vld [vmem:[%s3585_s3 + $0x148] ss:$16 sps:$4 sm:$0xff]   ;;  %v3135_v61 = vld [vmem:[%s3585_s3 + $0x164] ss:$16 sps:$4 sm:$0xff]  }
  0x3e   : > { %1925 = vmatprep.subr.bf16.mxu0 %v3093_v33  ;;  %2137 = vmatprep.subr.bf16.mxu1 %v3095_v34  ;;  %v3137_v62 = vld [vmem:[%s3585_s3 + $0x16c] ss:$16 sps:$4 sm:$0xff]   ;;  %v285_v63 = vld [vmem:[%s3587_s4] sm:$0xff]  ;;  %v3140_v2 = vld [vmem:[%s3585_s3 + $0x168] ss:$16 sps:$4 sm:$0xff]   ;;  %p2973_p11 = scmp.ne.s32.totalorder %s3491_s11, 3 }
  0x3f   : > { %v289_v0 = vld [vmem:[%s3587_s4 + $0x20] sm:$0xff]  ;;  %v3143_v5 = vld [vmem:[%s3585_s3 + $0x18c] ss:$16 sps:$4 sm:$0xff]   ;;  %v3146_v7 = vld [vmem:[%s3585_s3 + $0x188] ss:$16 sps:$4 sm:$0xff]   ;;  %vm2395_vm0 = vcmask (!%p2973_p11), 1043456  }
  0x40   : > { %v3139_v1 = vld [vmem:[%s3585_s3 + $0x160] ss:$16 sps:$4 sm:$0xff]   ;;  %v2702_v3 = vcombine.high %v285_v63, %v289_v0  ;;  %v3141_v4 = vld [vmem:[%s3585_s3 + $0x184] ss:$16 sps:$4 sm:$0xff]   ;;  %v3149_v9 = vld [vmem:[%s3585_s3 + $0x1ac] ss:$16 sps:$4 sm:$0xff]   ;;  %v2701_v22 = vcombine.low %v285_v63, %v289_v0 }
  0x41   : > { %1926 = vmatpush1.bf16.msra.mxu0 %v3097_v35  ;;  %2138 = vmatpush1.bf16.msra.mxu1 %v3098_v36  ;;  %v3145_v6 = vld [vmem:[%s3585_s3 + $0x180] ss:$16 sps:$4 sm:$0xff]   ;;  %v3147_v8 = vld [vmem:[%s3585_s3 + $0x1a4] ss:$16 sps:$4 sm:$0xff]   ;;  %v3152_v11 = vld [vmem:[%s3585_s3 + $0x1a8] ss:$16 sps:$4 sm:$0xff]  }
  0x42   : > { %1927 = vmatprep.subr.bf16.mxu0 %v3099_v37  ;;  %2139 = vmatprep.subr.bf16.mxu1 %v3101_v38  ;;  %v3151_v10 = vld [vmem:[%s3585_s3 + $0x1a0] ss:$16 sps:$4 sm:$0xff]   ;;  %v3153_v12 = vld [vmem:[%s3585_s3 + $0x1c4] ss:$16 sps:$4 sm:$0xff]   ;;  %v3155_v13 = vld [vmem:[%s3585_s3 + $0x1cc] ss:$16 sps:$4 sm:$0xff]  }
  0x43   : > { %1949 = vmatprep.mubr.bf16.mxu0 %v2702_v3  ;;  %2161 = vmatprep.mubr.bf16.mxu1 %v2702_v3  ;;  %v3157_v14 = vld [vmem:[%s3585_s3 + $0x1c0] ss:$16 sps:$4 sm:$0xff]   ;;  %v3158_v15 = vld [vmem:[%s3585_s3 + $0x1c8] ss:$16 sps:$4 sm:$0xff]   ;;  %v3159_v16 = vld [vmem:[%s3585_s3 + $0x1e4] ss:$16 sps:$4 sm:$0xff]  }
  0x44   : > { %v3161_v17 = vld [vmem:[%s3585_s3 + $0x1ec] ss:$16 sps:$4 sm:$0xff]   ;;  %v3163_v18 = vld [vmem:[%s3585_s3 + $0x1e0] ss:$16 sps:$4 sm:$0xff]   ;;  %v3164_v19 = vld [vmem:[%s3585_s3 + $0x1e8] ss:$16 sps:$4 sm:$0xff]  }
  0x45   : > { %1928 = vmatpush1.bf16.msra.mxu0 %v3103_v39  ;;  %2140 = vmatpush1.bf16.msra.mxu1 %v3104_v40  ;;  %v3167_v20 = vld [vmem:[%s3585_s3 + $0x204] ss:$16 sps:$4 sm:$0xff]   ;;  %v3170_v21 = vld [vmem:[%s3585_s3 + $0x20c] ss:$16 sps:$4 sm:$0xff]   ;;  %v3165_v23 = vld [vmem:[%s3585_s3 + $0x200] ss:$16 sps:$4 sm:$0xff]  }
  0x46   : > { %1929 = vmatprep.subr.bf16.mxu0 %v3105_v41  ;;  %2141 = vmatprep.subr.bf16.mxu1 %v3107_v42  ;;  %v3168_v24 = vld [vmem:[%s3585_s3 + $0x208] ss:$16 sps:$4 sm:$0xff]   ;;  %v3173_v25 = vld [vmem:[%s3585_s3 + $0x224] ss:$16 sps:$4 sm:$0xff]   ;;  %v3176_v26 = vld [vmem:[%s3585_s3 + $0x22c] ss:$16 sps:$4 sm:$0xff]  }
  0x47   : > { %v3171_v27 = vld [vmem:[%s3585_s3 + $0x220] ss:$16 sps:$4 sm:$0xff]   ;;  %v3174_v28 = vld [vmem:[%s3585_s3 + $0x228] ss:$16 sps:$4 sm:$0xff]   ;;  %v3179_v29 = vld [vmem:[%s3585_s3 + $0x244] ss:$16 sps:$4 sm:$0xff]  }
  0x48   : > { %v3182_v30 = vld [vmem:[%s3585_s3 + $0x24c] ss:$16 sps:$4 sm:$0xff]   ;;  %v3177_v31 = vld [vmem:[%s3585_s3 + $0x240] ss:$16 sps:$4 sm:$0xff]   ;;  %v3180_v32 = vld [vmem:[%s3585_s3 + $0x248] ss:$16 sps:$4 sm:$0xff]  }
  0x49   : > { %1930 = vmatpush1.bf16.msra.mxu0 %v3109_v43  ;;  %2142 = vmatpush1.bf16.msra.mxu1 %v3110_v44  ;;  %v3185_v33 = vld [vmem:[%s3585_s3 + $0x264] ss:$16 sps:$4 sm:$0xff]   ;;  %v3188_v34 = vld [vmem:[%s3585_s3 + $0x26c] ss:$16 sps:$4 sm:$0xff]   ;;  %v3183_v35 = vld [vmem:[%s3585_s3 + $0x260] ss:$16 sps:$4 sm:$0xff]  }
  0x4a   : > { %1931 = vmatprep.subr.bf16.mxu0 %v3111_v45  ;;  %2143 = vmatprep.subr.bf16.mxu1 %v3113_v46  ;;  %v3186_v36 = vld [vmem:[%s3585_s3 + $0x268] ss:$16 sps:$4 sm:$0xff]   ;;  %v3191_v37 = vld [vmem:[%s3585_s3 + $0x284] ss:$16 sps:$4 sm:$0xff]   ;;  %v3194_v38 = vld [vmem:[%s3585_s3 + $0x28c] ss:$16 sps:$4 sm:$0xff]  }
  0x4b   : > { %v3189_v39 = vld [vmem:[%s3585_s3 + $0x280] ss:$16 sps:$4 sm:$0xff]   ;;  %v3192_v40 = vld [vmem:[%s3585_s3 + $0x288] ss:$16 sps:$4 sm:$0xff]   ;;  %v3197_v41 = vld [vmem:[%s3585_s3 + $0x2a4] ss:$16 sps:$4 sm:$0xff]  }
  0x4c   : > { %v3200_v42 = vld [vmem:[%s3585_s3 + $0x2ac] ss:$16 sps:$4 sm:$0xff]   ;;  %v293_v43 = vld [vmem:[%s3587_s4 + $0x40] sm:$0xff]  ;;  %v3216_v63 = vld [vmem:[%s3585_s3 + $0x308] ss:$16 sps:$4 sm:$0xff]  }
  0x4d   : > { %1932 = vmatpush1.bf16.msra.mxu0 %v3115_v47  ;;  %2144 = vmatpush1.bf16.msra.mxu1 %v3116_v48  ;;  %v297_v44 = vld [vmem:[%s3587_s4 + $0x60] sm:$0x33]  ;;  %v3198_v47 = vld [vmem:[%s3585_s3 + $0x2a8] ss:$16 sps:$4 sm:$0xff]  }
  0x4e   : > { %1933 = vmatprep.subr.bf16.mxu0 %v3117_v49  ;;  %2145 = vmatprep.subr.bf16.mxu1 %v3119_v50  ;;  %v2710_v45 = vcombine.high %v293_v43, %v297_v44  ;;  %v3195_v46 = vld [vmem:[%s3585_s3 + $0x2a0] ss:$16 sps:$4 sm:$0xff]   ;;  %v2709_v48 = vcombine.low %v293_v43, %v297_v44  ;;  %v3203_v49 = vld [vmem:[%s3585_s3 + $0x2c4] ss:$16 sps:$4 sm:$0xff]   ;;  %v3206_v50 = vld [vmem:[%s3585_s3 + $0x2cc] ss:$16 sps:$4 sm:$0xff]  }
  0x4f   : > { %v3221_v0 = vld [vmem:[%s3585_s3 + $0x324] ss:$16 sps:$4 sm:$0xff]   ;;  %v3222_v3 = vld [vmem:[%s3585_s3 + $0x328] ss:$16 sps:$4 sm:$0xff]  }
  0x50   : > { %v3748_v44 = vld [vmem:[%s3587_s4 + $0x30] sm:$0xff] }
  0x51   : > { %1934 = vmatpush1.bf16.msra.mxu0 %v3121_v51  ;;  %2146 = vmatpush1.bf16.msra.mxu1 %v3122_v52  ;;  %v3685_v51 = vld [vmem:[%s3587_s4 + $0x8] sm:$0xff] }
  0x52   : > { %1935 = vmatprep.subr.bf16.mxu0 %v3123_v53  ;;  %2147 = vmatprep.subr.bf16.mxu1 %v3125_v54  ;;  %v3688_v52 = vld [vmem:[%s3587_s4 + $0x28] sm:$0xff]  ;;  %v3201_v53 = vld [vmem:[%s3585_s3 + $0x2c0] ss:$16 sps:$4 sm:$0xff]  }
  0x53   : > { %v3204_v54 = vld [vmem:[%s3585_s3 + $0x2c8] ss:$16 sps:$4 sm:$0xff]  }
  0x55   : > { %1936 = vmatpush1.bf16.msra.mxu0 %v3127_v55  ;;  %2148 = vmatpush1.bf16.msra.mxu1 %v3128_v56  ;;  %v2704_v55 = vcombine.high %v3685_v51, %v3688_v52  ;;  %v3209_v56 = vld [vmem:[%s3585_s3 + $0x2e4] ss:$16 sps:$4 sm:$0xff]  }
  0x56   : > { %1937 = vmatprep.subr.bf16.mxu0 %v3129_v57  ;;  %2149 = vmatprep.subr.bf16.mxu1 %v3131_v58  ;;  %v3212_v57 = vld [vmem:[%s3585_s3 + $0x2ec] ss:$16 sps:$4 sm:$0xff]   ;;  %v3207_v58 = vld [vmem:[%s3585_s3 + $0x2e0] ss:$16 sps:$4 sm:$0xff]  }
  0x59   : > { %1938 = vmatpush1.bf16.msra.mxu0 %v3133_v59  ;;  %2150 = vmatpush1.bf16.msra.mxu1 %v3134_v60  ;;  %v3210_v59 = vld [vmem:[%s3585_s3 + $0x2e8] ss:$16 sps:$4 sm:$0xff]   ;;  %v3215_v60 = vld [vmem:[%s3585_s3 + $0x304] ss:$16 sps:$4 sm:$0xff]  }
  0x5a   : > { %1939 = vmatprep.subr.bf16.mxu0 %v3135_v61  ;;  %2151 = vmatprep.subr.bf16.mxu1 %v3137_v62  ;;  %v3218_v61 = vld [vmem:[%s3585_s3 + $0x30c] ss:$16 sps:$4 sm:$0xff]   ;;  %v3213_v62 = vld [vmem:[%s3585_s3 + $0x300] ss:$16 sps:$4 sm:$0xff]  }
  0x5d   : > { %1940 = vmatpush1.bf16.msra.mxu0 %v3139_v1  ;;  %2152 = vmatpush1.bf16.msra.mxu1 %v3140_v2  ;;  %v3224_v1 = vld [vmem:[%s3585_s3 + $0x32c] ss:$16 sps:$4 sm:$0xff]   ;;  %v3219_v2 = vld [vmem:[%s3585_s3 + $0x320] ss:$16 sps:$4 sm:$0xff]  }
  0x5e   : > { %1941 = vmatprep.subr.bf16.mxu0 %v3141_v4  ;;  %2153 = vmatprep.subr.bf16.mxu1 %v3143_v5  ;;  %v3227_v4 = vld [vmem:[%s3585_s3 + $0x344] ss:$16 sps:$4 sm:$0xff]   ;;  %v3230_v5 = vld [vmem:[%s3585_s3 + $0x34c] ss:$16 sps:$4 sm:$0xff]  }
  0x61   : > { %1942 = vmatpush1.bf16.msra.mxu0 %v3145_v6  ;;  %2154 = vmatpush1.bf16.msra.mxu1 %v3146_v7  ;;  %v3225_v6 = vld [vmem:[%s3585_s3 + $0x340] ss:$16 sps:$4 sm:$0xff]   ;;  %v3228_v7 = vld [vmem:[%s3585_s3 + $0x348] ss:$16 sps:$4 sm:$0xff]  }
  0x62   : > { %1943 = vmatprep.subr.bf16.mxu0 %v3147_v8  ;;  %2155 = vmatprep.subr.bf16.mxu1 %v3149_v9  ;;  %v3233_v8 = vld [vmem:[%s3585_s3 + $0x364] ss:$16 sps:$4 sm:$0xff]   ;;  %v3236_v9 = vld [vmem:[%s3585_s3 + $0x36c] ss:$16 sps:$4 sm:$0xff]  }
  0x65   : > { %1944 = vmatpush1.bf16.msra.mxu0 %v3151_v10  ;;  %2156 = vmatpush1.bf16.msra.mxu1 %v3152_v11  ;;  %v3231_v10 = vld [vmem:[%s3585_s3 + $0x360] ss:$16 sps:$4 sm:$0xff]   ;;  %v3234_v11 = vld [vmem:[%s3585_s3 + $0x368] ss:$16 sps:$4 sm:$0xff]  }
  0x66   : > { %1945 = vmatprep.subr.bf16.mxu0 %v3153_v12  ;;  %2157 = vmatprep.subr.bf16.mxu1 %v3155_v13  ;;  %v3239_v12 = vld [vmem:[%s3585_s3 + $0x384] ss:$16 sps:$4 sm:$0xff]   ;;  %v3242_v13 = vld [vmem:[%s3585_s3 + $0x38c] ss:$16 sps:$4 sm:$0xff]  }
  0x69   : > { %1946 = vmatpush1.bf16.msra.mxu0 %v3157_v14  ;;  %2158 = vmatpush1.bf16.msra.mxu1 %v3158_v15  ;;  %v3237_v14 = vld [vmem:[%s3585_s3 + $0x380] ss:$16 sps:$4 sm:$0xff]   ;;  %v3240_v15 = vld [vmem:[%s3585_s3 + $0x388] ss:$16 sps:$4 sm:$0xff]  }
  0x6a   : > { %1947 = vmatprep.subr.bf16.mxu0 %v3159_v16  ;;  %2159 = vmatprep.subr.bf16.mxu1 %v3161_v17  ;;  %v3245_v16 = vld [vmem:[%s3585_s3 + $0x3a4] ss:$16 sps:$4 sm:$0xff]   ;;  %v3248_v17 = vld [vmem:[%s3585_s3 + $0x3ac] ss:$16 sps:$4 sm:$0xff]  }
  0x6d   : > { %1948 = vmatpush1.bf16.msra.mxu0 %v3163_v18  ;;  %2160 = vmatpush1.bf16.msra.mxu1 %v3164_v19  ;;  %v3243_v18 = vld [vmem:[%s3585_s3 + $0x3a0] ss:$16 sps:$4 sm:$0xff]   ;;  %v3246_v19 = vld [vmem:[%s3585_s3 + $0x3a8] ss:$16 sps:$4 sm:$0xff]  }
  0x6e   : > { %1970 = vmatprep.subr.bf16.mxu0 %v3167_v20  ;;  %2182 = vmatprep.subr.bf16.mxu1 %v3170_v21  ;;  %v3251_v20 = vld [vmem:[%s3585_s3 + $0x3c4] ss:$16 sps:$4 sm:$0xff]   ;;  %v3254_v21 = vld [vmem:[%s3585_s3 + $0x3cc] ss:$16 sps:$4 sm:$0xff]  }
  0x70   : > { %1950 = vmatmul.mubr.bf16.vlgmr.msra.gmra.mrb[0].mxu0 %v2701_v22  ;;  %2162 = vmatmul.mubr.bf16.vlgmr.msra.gmra.mrb[0].mxu1 %v2701_v22  ;;  %v3249_v22 = vld [vmem:[%s3585_s3 + $0x3c0] ss:$16 sps:$4 sm:$0xff]  }
  0x71   : > { %1971 = vmatpush1.bf16.msra.mxu0 %v3165_v23  ;;  %2183 = vmatpush1.bf16.msra.mxu1 %v3168_v24  ;;  %v3252_v23 = vld [vmem:[%s3585_s3 + $0x3c8] ss:$16 sps:$4 sm:$0xff]   ;;  %v3257_v24 = vld [vmem:[%s3585_s3 + $0x3e4] ss:$16 sps:$4 sm:$0xff]  }
  0x72   : > { %1972 = vmatprep.subr.bf16.mxu0 %v3173_v25  ;;  %2184 = vmatprep.subr.bf16.mxu1 %v3176_v26  ;;  %v3260_v25 = vld [vmem:[%s3585_s3 + $0x3ec] ss:$16 sps:$4 sm:$0xff]   ;;  %v3255_v26 = vld [vmem:[%s3585_s3 + $0x3e0] ss:$16 sps:$4 sm:$0xff]  }
  0x73   : > { %1959 = vmatprep.mubr.bf16.mxu0 %v2710_v45  ;;  %2171 = vmatprep.mubr.bf16.mxu1 %v2710_v45  ;;  %v3273_v45 = vld [vmem:[%s3585_s3 + $0x440] ss:$16 sps:$4 sm:$0xff]  }
  0x75   : > { %1973 = vmatpush1.bf16.msra.mxu0 %v3171_v27  ;;  %2185 = vmatpush1.bf16.msra.mxu1 %v3174_v28  ;;  %v3258_v27 = vld [vmem:[%s3585_s3 + $0x3e8] ss:$16 sps:$4 sm:$0xff]   ;;  %v3263_v28 = vld [vmem:[%s3585_s3 + $0x404] ss:$16 sps:$4 sm:$0xff]  }
  0x76   : > { %1974 = vmatprep.subr.bf16.mxu0 %v3179_v29  ;;  %2186 = vmatprep.subr.bf16.mxu1 %v3182_v30  ;;  %v3266_v29 = vld [vmem:[%s3585_s3 + $0x40c] ss:$16 sps:$4 sm:$0xff]   ;;  %v3261_v30 = vld [vmem:[%s3585_s3 + $0x400] ss:$16 sps:$4 sm:$0xff]  }
  0x78   : > { %1960 = vmatmul.mubr.bf16.gmra.mrb[4].mxu0 %v2709_v48  ;;  %2172 = vmatmul.mubr.bf16.gmra.mrb[4].mxu1 %v2709_v48  ;;  %v3284_v48 = vld [vmem:[%s3585_s3 + $0x46c] ss:$16 sps:$4 sm:$0xff]  }
  0x79   : > { %1975 = vmatpush1.bf16.msra.mxu0 %v3177_v31  ;;  %2187 = vmatpush1.bf16.msra.mxu1 %v3180_v32  ;;  %v3264_v31 = vld [vmem:[%s3585_s3 + $0x408] ss:$16 sps:$4 sm:$0xff]   ;;  %v2703_v32 = vcombine.low %v3685_v51, %v3688_v52  ;;  %v3287_v52 = vld [vmem:[%s3585_s3 + $0x484] ss:$16 sps:$4 sm:$0xff]  }
  0x7a   : > { %1976 = vmatprep.subr.bf16.mxu0 %v3185_v33  ;;  %2188 = vmatprep.subr.bf16.mxu1 %v3188_v34  ;;  %v294_v33 = vld [vmem:[%s3587_s4 + $0x48] sm:$0xff] }
  0x7b   : > { %2002 = vmatprep.mubr.bf16.mxu0 %v2704_v55  ;;  %2214 = vmatprep.mubr.bf16.mxu1 %v2704_v55  ;;  %v298_v34 = vld [vmem:[%s3587_s4 + $0x68] sm:$0x33] }
  0x7c   : > { %v2711_v43 = vcombine.low %v294_v33, %v298_v34  ;;  %v3282_v51 = vld [vmem:[%s3585_s3 + $0x468] ss:$16 sps:$4 sm:$0xff]  }
  0x7d   : > { %1977 = vmatpush1.bf16.msra.mxu0 %v3183_v35  ;;  %2189 = vmatpush1.bf16.msra.mxu1 %v3186_v36  ;;  %v3269_v35 = vld [vmem:[%s3585_s3 + $0x424] ss:$16 sps:$4 sm:$0xff]   ;;  %v3272_v36 = vld [vmem:[%s3585_s3 + $0x42c] ss:$16 sps:$4 sm:$0xff]   ;;  %v3288_v55 = vld [vmem:[%s3585_s3 + $0x488] ss:$16 sps:$4 sm:$0xff]  }
  0x7e   : > { %1978 = vmatprep.subr.bf16.mxu0 %v3191_v37  ;;  %2190 = vmatprep.subr.bf16.mxu1 %v3194_v38  ;;  %v2712_v37 = vcombine.high %v294_v33, %v298_v34  ;;  %v3267_v38 = vld [vmem:[%s3585_s3 + $0x420] ss:$16 sps:$4 sm:$0xff]   ;;  %v3356_v33 = vld [vmem:[%s3585_s3 + $0x5ec] ss:$16 sps:$4 sm:$0xff]  }
  0x7f   : > { %v3351_v34 = vld [vmem:[%s3585_s3 + $0x5e0] ss:$16 sps:$4 sm:$0xff]  }
  0x81   : > { %1979 = vmatpush1.bf16.msra.mxu0 %v3189_v39  ;;  %2191 = vmatpush1.bf16.msra.mxu1 %v3192_v40  ;;  %v3270_v39 = vld [vmem:[%s3585_s3 + $0x428] ss:$16 sps:$4 sm:$0xff]   ;;  %v3275_v40 = vld [vmem:[%s3585_s3 + $0x444] ss:$16 sps:$4 sm:$0xff]  }
  0x82   : > { %1980 = vmatprep.subr.bf16.mxu0 %v3197_v41  ;;  %2192 = vmatprep.subr.bf16.mxu1 %v3200_v42  ;;  %v3278_v41 = vld [vmem:[%s3585_s3 + $0x44c] ss:$16 sps:$4 sm:$0xff]   ;;  %v3745_v42 = vld [vmem:[%s3587_s4 + $0x10] sm:$0xff] }
  0x85   : > { %1981 = vmatpush1.bf16.msra.mxu0 %v3195_v46  ;;  %2193 = vmatpush1.bf16.msra.mxu1 %v3198_v47  ;;  %v3276_v46 = vld [vmem:[%s3585_s3 + $0x448] ss:$16 sps:$4 sm:$0xff]   ;;  %v3281_v47 = vld [vmem:[%s3585_s3 + $0x464] ss:$16 sps:$4 sm:$0xff]  }
  0x86   : > { %1982 = vmatprep.subr.bf16.mxu0 %v3203_v49  ;;  %2194 = vmatprep.subr.bf16.mxu1 %v3206_v50  ;;  %v2706_v49 = vcombine.high %v3745_v42, %v3748_v44  ;;  %v3279_v50 = vld [vmem:[%s3585_s3 + $0x460] ss:$16 sps:$4 sm:$0xff]  }
  0x89   : > { %1983 = vmatpush1.bf16.msra.mxu0 %v3201_v53  ;;  %2195 = vmatpush1.bf16.msra.mxu1 %v3204_v54  ;;  %v3290_v53 = vld [vmem:[%s3585_s3 + $0x48c] ss:$16 sps:$4 sm:$0xff]   ;;  %v3285_v54 = vld [vmem:[%s3585_s3 + $0x480] ss:$16 sps:$4 sm:$0xff]  }
  0x8a   : > { %1984 = vmatprep.subr.bf16.mxu0 %v3209_v56  ;;  %2196 = vmatprep.subr.bf16.mxu1 %v3212_v57  ;;  %v3293_v56 = vld [vmem:[%s3585_s3 + $0x4a4] ss:$16 sps:$4 sm:$0xff]   ;;  %v3296_v57 = vld [vmem:[%s3585_s3 + $0x4ac] ss:$16 sps:$4 sm:$0xff]  }
  0x8d   : > { %1985 = vmatpush1.bf16.msra.mxu0 %v3207_v58  ;;  %2197 = vmatpush1.bf16.msra.mxu1 %v3210_v59  ;;  %v3291_v58 = vld [vmem:[%s3585_s3 + $0x4a0] ss:$16 sps:$4 sm:$0xff]   ;;  %v3294_v59 = vld [vmem:[%s3585_s3 + $0x4a8] ss:$16 sps:$4 sm:$0xff]  }
  0x8e   : > { %1986 = vmatprep.subr.bf16.mxu0 %v3215_v60  ;;  %2198 = vmatprep.subr.bf16.mxu1 %v3218_v61  ;;  %v3299_v60 = vld [vmem:[%s3585_s3 + $0x4c4] ss:$16 sps:$4 sm:$0xff]   ;;  %v3302_v61 = vld [vmem:[%s3585_s3 + $0x4cc] ss:$16 sps:$4 sm:$0xff]  }
  0x91   : > { %1987 = vmatpush1.bf16.msra.mxu0 %v3213_v62  ;;  %2199 = vmatpush1.bf16.msra.mxu1 %v3216_v63  ;;  %v3297_v62 = vld [vmem:[%s3585_s3 + $0x4c0] ss:$16 sps:$4 sm:$0xff]   ;;  %v3300_v63 = vld [vmem:[%s3585_s3 + $0x4c8] ss:$16 sps:$4 sm:$0xff]  }
  0x92   : > { %1988 = vmatprep.subr.bf16.mxu0 %v3221_v0  ;;  %2200 = vmatprep.subr.bf16.mxu1 %v3224_v1  ;;  %v3305_v0 = vld [vmem:[%s3585_s3 + $0x4e4] ss:$16 sps:$4 sm:$0xff]   ;;  %v3308_v1 = vld [vmem:[%s3585_s3 + $0x4ec] ss:$16 sps:$4 sm:$0xff]  }
  0x95   : > { %1989 = vmatpush1.bf16.msra.mxu0 %v3219_v2  ;;  %2201 = vmatpush1.bf16.msra.mxu1 %v3222_v3  ;;  %v3303_v2 = vld [vmem:[%s3585_s3 + $0x4e0] ss:$16 sps:$4 sm:$0xff]   ;;  %v3306_v3 = vld [vmem:[%s3585_s3 + $0x4e8] ss:$16 sps:$4 sm:$0xff]  }
  0x96   : > { %1990 = vmatprep.subr.bf16.mxu0 %v3227_v4  ;;  %2202 = vmatprep.subr.bf16.mxu1 %v3230_v5  ;;  %v3311_v4 = vld [vmem:[%s3585_s3 + $0x504] ss:$16 sps:$4 sm:$0xff]   ;;  %v3314_v5 = vld [vmem:[%s3585_s3 + $0x50c] ss:$16 sps:$4 sm:$0xff]  }
  0x99   : > { %1991 = vmatpush1.bf16.msra.mxu0 %v3225_v6  ;;  %2203 = vmatpush1.bf16.msra.mxu1 %v3228_v7  ;;  %v3309_v6 = vld [vmem:[%s3585_s3 + $0x500] ss:$16 sps:$4 sm:$0xff]   ;;  %v3312_v7 = vld [vmem:[%s3585_s3 + $0x508] ss:$16 sps:$4 sm:$0xff]  }
  0x9a   : > { %1992 = vmatprep.subr.bf16.mxu0 %v3233_v8  ;;  %2204 = vmatprep.subr.bf16.mxu1 %v3236_v9  ;;  %v3317_v8 = vld [vmem:[%s3585_s3 + $0x524] ss:$16 sps:$4 sm:$0xff]   ;;  %v3320_v9 = vld [vmem:[%s3585_s3 + $0x52c] ss:$16 sps:$4 sm:$0xff]  }
  0x9d   : > { %1993 = vmatpush1.bf16.msra.mxu0 %v3231_v10  ;;  %2205 = vmatpush1.bf16.msra.mxu1 %v3234_v11  ;;  %v3315_v10 = vld [vmem:[%s3585_s3 + $0x520] ss:$16 sps:$4 sm:$0xff]   ;;  %v3318_v11 = vld [vmem:[%s3585_s3 + $0x528] ss:$16 sps:$4 sm:$0xff]  }
  0x9e   : > { %1994 = vmatprep.subr.bf16.mxu0 %v3239_v12  ;;  %2206 = vmatprep.subr.bf16.mxu1 %v3242_v13  ;;  %v3323_v12 = vld [vmem:[%s3585_s3 + $0x544] ss:$16 sps:$4 sm:$0xff]   ;;  %v3326_v13 = vld [vmem:[%s3585_s3 + $0x54c] ss:$16 sps:$4 sm:$0xff]  }
  0xa1   : > { %1995 = vmatpush1.bf16.msra.mxu0 %v3237_v14  ;;  %2207 = vmatpush1.bf16.msra.mxu1 %v3240_v15  ;;  %v3321_v14 = vld [vmem:[%s3585_s3 + $0x540] ss:$16 sps:$4 sm:$0xff]   ;;  %v3324_v15 = vld [vmem:[%s3585_s3 + $0x548] ss:$16 sps:$4 sm:$0xff]  }
  0xa2   : > { %1996 = vmatprep.subr.bf16.mxu0 %v3245_v16  ;;  %2208 = vmatprep.subr.bf16.mxu1 %v3248_v17  ;;  %v3329_v16 = vld [vmem:[%s3585_s3 + $0x564] ss:$16 sps:$4 sm:$0xff]   ;;  %v3332_v17 = vld [vmem:[%s3585_s3 + $0x56c] ss:$16 sps:$4 sm:$0xff]  }
  0xa5   : > { %1997 = vmatpush1.bf16.msra.mxu0 %v3243_v18  ;;  %2209 = vmatpush1.bf16.msra.mxu1 %v3246_v19  ;;  %v3327_v18 = vld [vmem:[%s3585_s3 + $0x560] ss:$16 sps:$4 sm:$0xff]   ;;  %v3330_v19 = vld [vmem:[%s3585_s3 + $0x568] ss:$16 sps:$4 sm:$0xff]  }
  0xa6   : > { %1998 = vmatprep.subr.bf16.mxu0 %v3251_v20  ;;  %2210 = vmatprep.subr.bf16.mxu1 %v3254_v21  ;;  %v3335_v20 = vld [vmem:[%s3585_s3 + $0x584] ss:$16 sps:$4 sm:$0xff]   ;;  %v3338_v21 = vld [vmem:[%s3585_s3 + $0x58c] ss:$16 sps:$4 sm:$0xff]  }
  0xa9   : > { %1999 = vmatpush1.bf16.msra.mxu0 %v3249_v22  ;;  %2211 = vmatpush1.bf16.msra.mxu1 %v3252_v23  ;;  %v3333_v22 = vld [vmem:[%s3585_s3 + $0x580] ss:$16 sps:$4 sm:$0xff]   ;;  %v3336_v23 = vld [vmem:[%s3585_s3 + $0x588] ss:$16 sps:$4 sm:$0xff]  }
  0xaa   : > { %2000 = vmatprep.subr.bf16.mxu0 %v3257_v24  ;;  %2212 = vmatprep.subr.bf16.mxu1 %v3260_v25  ;;  %v3341_v24 = vld [vmem:[%s3585_s3 + $0x5a4] ss:$16 sps:$4 sm:$0xff]   ;;  %v3344_v25 = vld [vmem:[%s3585_s3 + $0x5ac] ss:$16 sps:$4 sm:$0xff]  }
  0xad   : > { %2001 = vmatpush1.bf16.msra.mxu0 %v3255_v26  ;;  %2213 = vmatpush1.bf16.msra.mxu1 %v3258_v27  ;;  %v3339_v26 = vld [vmem:[%s3585_s3 + $0x5a0] ss:$16 sps:$4 sm:$0xff]   ;;  %v3342_v27 = vld [vmem:[%s3585_s3 + $0x5a8] ss:$16 sps:$4 sm:$0xff]  }
  0xae   : > { %2023 = vmatprep.subr.bf16.mxu0 %v3263_v28  ;;  %2235 = vmatprep.subr.bf16.mxu1 %v3266_v29  ;;  %v3347_v28 = vld [vmem:[%s3585_s3 + $0x5c4] ss:$16 sps:$4 sm:$0xff]   ;;  %v3350_v29 = vld [vmem:[%s3585_s3 + $0x5cc] ss:$16 sps:$4 sm:$0xff]  }
  0xb0   : > { %2003 = vmatmul.mubr.bf16.vlgmr.msra.gmra.mrb[0].mxu0 %v2703_v32  ;;  %2215 = vmatmul.mubr.bf16.vlgmr.msra.gmra.mrb[0].mxu1 %v2703_v32  ;;  %v3353_v32 = vld [vmem:[%s3585_s3 + $0x5e4] ss:$16 sps:$4 sm:$0xff]  }
  0xb1   : > { %2024 = vmatpush1.bf16.msra.mxu0 %v3261_v30  ;;  %2236 = vmatpush1.bf16.msra.mxu1 %v3264_v31  ;;  %v3345_v30 = vld [vmem:[%s3585_s3 + $0x5c0] ss:$16 sps:$4 sm:$0xff]   ;;  %v3348_v31 = vld [vmem:[%s3585_s3 + $0x5c8] ss:$16 sps:$4 sm:$0xff]  }
  0xb2   : > { %2025 = vmatprep.subr.bf16.mxu0 %v3269_v35  ;;  %2237 = vmatprep.subr.bf16.mxu1 %v3272_v36  ;;  %v3354_v35 = vld [vmem:[%s3585_s3 + $0x5e8] ss:$16 sps:$4 sm:$0xff]   ;;  %v3359_v36 = vld [vmem:[%s3585_s3 + $0x604] ss:$16 sps:$4 sm:$0xff]  }
  0xb3   : > { %2012 = vmatprep.mubr.bf16.mxu0 %v2712_v37  ;;  %2224 = vmatprep.mubr.bf16.mxu1 %v2712_v37  ;;  %v3362_v37 = vld [vmem:[%s3585_s3 + $0x60c] ss:$16 sps:$4 sm:$0xff]  }
  0xb5   : > { %2026 = vmatpush1.bf16.msra.mxu0 %v3267_v38  ;;  %2238 = vmatpush1.bf16.msra.mxu1 %v3270_v39  ;;  %v2705_v38 = vcombine.low %v3745_v42, %v3748_v44  ;;  %v295_v39 = vld [vmem:[%s3587_s4 + $0x50] sm:$0xff]  ;;  %v3366_v44 = vld [vmem:[%s3585_s3 + $0x628] ss:$16 sps:$4 sm:$0xff]  }
  0xb6   : > { %2027 = vmatprep.subr.bf16.mxu0 %v3275_v40  ;;  %2239 = vmatprep.subr.bf16.mxu1 %v3278_v41  ;;  %v299_v40 = vld [vmem:[%s3587_s4 + $0x70] sm:$0x33] }
  0xb7   : > { %v3357_v41 = vld [vmem:[%s3585_s3 + $0x600] ss:$16 sps:$4 sm:$0xff]  }
  0xb8   : > { %2013 = vmatmul.mubr.bf16.gmra.mrb[4].mxu0 %v2711_v43  ;;  %2225 = vmatmul.mubr.bf16.gmra.mrb[4].mxu1 %v2711_v43  ;;  %v3360_v43 = vld [vmem:[%s3585_s3 + $0x608] ss:$16 sps:$4 sm:$0xff]   ;;  %v3363_v42 = vld [vmem:[%s3585_s3 + $0x620] ss:$16 sps:$4 sm:$0xff]  }
  0xb9   : > { %2028 = vmatpush1.bf16.msra.mxu0 %v3273_v45  ;;  %2240 = vmatpush1.bf16.msra.mxu1 %v3276_v46  ;;  %v3365_v45 = vld [vmem:[%s3585_s3 + $0x624] ss:$16 sps:$4 sm:$0xff]   ;;  %v3368_v46 = vld [vmem:[%s3585_s3 + $0x62c] ss:$16 sps:$4 sm:$0xff]  }
  0xba   : > { %2029 = vmatprep.subr.bf16.mxu0 %v3281_v47  ;;  %2241 = vmatprep.subr.bf16.mxu1 %v3284_v48  ;;  %v2714_v47 = vcombine.high %v295_v39, %v299_v40  ;;  %v3371_v48 = vld [vmem:[%s3585_s3 + $0x644] ss:$16 sps:$4 sm:$0xff]  }
  0xbb   : > { %2055 = vmatprep.mubr.bf16.mxu0 %v2706_v49  ;;  %2267 = vmatprep.mubr.bf16.mxu1 %v2706_v49  ;;  %v3374_v49 = vld [vmem:[%s3585_s3 + $0x64c] ss:$16 sps:$4 sm:$0xff]  }
  0xbd   : > { %2030 = vmatpush1.bf16.msra.mxu0 %v3279_v50  ;;  %2242 = vmatpush1.bf16.msra.mxu1 %v3282_v51  ;;  %v2713_v50 = vcombine.low %v295_v39, %v299_v40  ;;  %v3821_v51 = vld [vmem:[%s3587_s4 + $0x18] sm:$0xff]  ;;  %v3449_v40 = vld [vmem:[%s3585_s3 + $0x7e4] ss:$16 sps:$4 sm:$0xff]  }
  0xbe   : > { %2031 = vmatprep.subr.bf16.mxu0 %v3287_v52  ;;  %2243 = vmatprep.subr.bf16.mxu1 %v3290_v53  ;;  %v3824_v52 = vld [vmem:[%s3587_s4 + $0x38] sm:$0xff]  ;;  %v3369_v53 = vld [vmem:[%s3585_s3 + $0x640] ss:$16 sps:$4 sm:$0xff]  }
  0xbf   : > { %v3444_v39 = vld [vmem:[%s3585_s3 + $0x7c8] ss:$16 sps:$4 sm:$0xff]  }
  0xc1   : > { %2032 = vmatpush1.bf16.msra.mxu0 %v3285_v54  ;;  %2244 = vmatpush1.bf16.msra.mxu1 %v3288_v55  ;;  %v3372_v54 = vld [vmem:[%s3585_s3 + $0x648] ss:$16 sps:$4 sm:$0xff]   ;;  %v3377_v55 = vld [vmem:[%s3585_s3 + $0x664] ss:$16 sps:$4 sm:$0xff]  }
  0xc2   : > { %2033 = vmatprep.subr.bf16.mxu0 %v3293_v56  ;;  %2245 = vmatprep.subr.bf16.mxu1 %v3296_v57  ;;  %v3380_v56 = vld [vmem:[%s3585_s3 + $0x66c] ss:$16 sps:$4 sm:$0xff]   ;;  %v2708_v57 = vcombine.high %v3821_v51, %v3824_v52 }
  0xc5   : > { %2034 = vmatpush1.bf16.msra.mxu0 %v3291_v58  ;;  %2246 = vmatpush1.bf16.msra.mxu1 %v3294_v59  ;;  %v3375_v58 = vld [vmem:[%s3585_s3 + $0x660] ss:$16 sps:$4 sm:$0xff]   ;;  %v3378_v59 = vld [vmem:[%s3585_s3 + $0x668] ss:$16 sps:$4 sm:$0xff]  }
  0xc6   : > { %2035 = vmatprep.subr.bf16.mxu0 %v3299_v60  ;;  %2247 = vmatprep.subr.bf16.mxu1 %v3302_v61  ;;  %v3383_v60 = vld [vmem:[%s3585_s3 + $0x684] ss:$16 sps:$4 sm:$0xff]   ;;  %v3386_v61 = vld [vmem:[%s3585_s3 + $0x68c] ss:$16 sps:$4 sm:$0xff]  }
  0xc9   : > { %2036 = vmatpush1.bf16.msra.mxu0 %v3297_v62  ;;  %2248 = vmatpush1.bf16.msra.mxu1 %v3300_v63  ;;  %v3381_v62 = vld [vmem:[%s3585_s3 + $0x680] ss:$16 sps:$4 sm:$0xff]   ;;  %v3384_v63 = vld [vmem:[%s3585_s3 + $0x688] ss:$16 sps:$4 sm:$0xff]  }
  0xca   : > { %2037 = vmatprep.subr.bf16.mxu0 %v3305_v0  ;;  %2249 = vmatprep.subr.bf16.mxu1 %v3308_v1  ;;  %v3389_v0 = vld [vmem:[%s3585_s3 + $0x6a4] ss:$16 sps:$4 sm:$0xff]   ;;  %v3392_v1 = vld [vmem:[%s3585_s3 + $0x6ac] ss:$16 sps:$4 sm:$0xff]  }
  0xcd   : > { %2038 = vmatpush1.bf16.msra.mxu0 %v3303_v2  ;;  %2250 = vmatpush1.bf16.msra.mxu1 %v3306_v3  ;;  %v3387_v2 = vld [vmem:[%s3585_s3 + $0x6a0] ss:$16 sps:$4 sm:$0xff]   ;;  %v3390_v3 = vld [vmem:[%s3585_s3 + $0x6a8] ss:$16 sps:$4 sm:$0xff]  }
  0xce   : > { %2039 = vmatprep.subr.bf16.mxu0 %v3311_v4  ;;  %2251 = vmatprep.subr.bf16.mxu1 %v3314_v5  ;;  %v3395_v4 = vld [vmem:[%s3585_s3 + $0x6c4] ss:$16 sps:$4 sm:$0xff]   ;;  %v3398_v5 = vld [vmem:[%s3585_s3 + $0x6cc] ss:$16 sps:$4 sm:$0xff]  }
  0xd1   : > { %2040 = vmatpush1.bf16.msra.mxu0 %v3309_v6  ;;  %2252 = vmatpush1.bf16.msra.mxu1 %v3312_v7  ;;  %v3393_v6 = vld [vmem:[%s3585_s3 + $0x6c0] ss:$16 sps:$4 sm:$0xff]   ;;  %v3396_v7 = vld [vmem:[%s3585_s3 + $0x6c8] ss:$16 sps:$4 sm:$0xff]  }
  0xd2   : > { %2041 = vmatprep.subr.bf16.mxu0 %v3317_v8  ;;  %2253 = vmatprep.subr.bf16.mxu1 %v3320_v9  ;;  %v3401_v8 = vld [vmem:[%s3585_s3 + $0x6e4] ss:$16 sps:$4 sm:$0xff]   ;;  %v3404_v9 = vld [vmem:[%s3585_s3 + $0x6ec] ss:$16 sps:$4 sm:$0xff]  }
  0xd5   : > { %2042 = vmatpush1.bf16.msra.mxu0 %v3315_v10  ;;  %2254 = vmatpush1.bf16.msra.mxu1 %v3318_v11  ;;  %v3399_v10 = vld [vmem:[%s3585_s3 + $0x6e0] ss:$16 sps:$4 sm:$0xff]   ;;  %v3402_v11 = vld [vmem:[%s3585_s3 + $0x6e8] ss:$16 sps:$4 sm:$0xff]  }
  0xd6   : > { %2043 = vmatprep.subr.bf16.mxu0 %v3323_v12  ;;  %2255 = vmatprep.subr.bf16.mxu1 %v3326_v13  ;;  %v3407_v12 = vld [vmem:[%s3585_s3 + $0x704] ss:$16 sps:$4 sm:$0xff]   ;;  %v3410_v13 = vld [vmem:[%s3585_s3 + $0x70c] ss:$16 sps:$4 sm:$0xff]  }
  0xd9   : > { %2044 = vmatpush1.bf16.msra.mxu0 %v3321_v14  ;;  %2256 = vmatpush1.bf16.msra.mxu1 %v3324_v15  ;;  %v3405_v14 = vld [vmem:[%s3585_s3 + $0x700] ss:$16 sps:$4 sm:$0xff]   ;;  %v3408_v15 = vld [vmem:[%s3585_s3 + $0x708] ss:$16 sps:$4 sm:$0xff]  }
  0xda   : > { %2045 = vmatprep.subr.bf16.mxu0 %v3329_v16  ;;  %2257 = vmatprep.subr.bf16.mxu1 %v3332_v17  ;;  %v3413_v16 = vld [vmem:[%s3585_s3 + $0x724] ss:$16 sps:$4 sm:$0xff]   ;;  %v3416_v17 = vld [vmem:[%s3585_s3 + $0x72c] ss:$16 sps:$4 sm:$0xff]  }
  0xdd   : > { %2046 = vmatpush1.bf16.msra.mxu0 %v3327_v18  ;;  %2258 = vmatpush1.bf16.msra.mxu1 %v3330_v19  ;;  %v3411_v18 = vld [vmem:[%s3585_s3 + $0x720] ss:$16 sps:$4 sm:$0xff]   ;;  %v3414_v19 = vld [vmem:[%s3585_s3 + $0x728] ss:$16 sps:$4 sm:$0xff]  }
  0xde   : > { %2047 = vmatprep.subr.bf16.mxu0 %v3335_v20  ;;  %2259 = vmatprep.subr.bf16.mxu1 %v3338_v21  ;;  %v3419_v20 = vld [vmem:[%s3585_s3 + $0x744] ss:$16 sps:$4 sm:$0xff]   ;;  %v3422_v21 = vld [vmem:[%s3585_s3 + $0x74c] ss:$16 sps:$4 sm:$0xff]  }
  0xe1   : > { %2048 = vmatpush1.bf16.msra.mxu0 %v3333_v22  ;;  %2260 = vmatpush1.bf16.msra.mxu1 %v3336_v23  ;;  %v3417_v22 = vld [vmem:[%s3585_s3 + $0x740] ss:$16 sps:$4 sm:$0xff]   ;;  %v3420_v23 = vld [vmem:[%s3585_s3 + $0x748] ss:$16 sps:$4 sm:$0xff]  }
  0xe2   : > { %2049 = vmatprep.subr.bf16.mxu0 %v3341_v24  ;;  %2261 = vmatprep.subr.bf16.mxu1 %v3344_v25  ;;  %v3425_v24 = vld [vmem:[%s3585_s3 + $0x764] ss:$16 sps:$4 sm:$0xff]   ;;  %v3428_v25 = vld [vmem:[%s3585_s3 + $0x76c] ss:$16 sps:$4 sm:$0xff]  }
  0xe5   : > { %2050 = vmatpush1.bf16.msra.mxu0 %v3339_v26  ;;  %2262 = vmatpush1.bf16.msra.mxu1 %v3342_v27  ;;  %v3423_v26 = vld [vmem:[%s3585_s3 + $0x760] ss:$16 sps:$4 sm:$0xff]   ;;  %v3426_v27 = vld [vmem:[%s3585_s3 + $0x768] ss:$16 sps:$4 sm:$0xff]  }
  0xe6   : > { %2051 = vmatprep.subr.bf16.mxu0 %v3347_v28  ;;  %2263 = vmatprep.subr.bf16.mxu1 %v3350_v29  ;;  %v3431_v28 = vld [vmem:[%s3585_s3 + $0x784] ss:$16 sps:$4 sm:$0xff]   ;;  %v3434_v29 = vld [vmem:[%s3585_s3 + $0x78c] ss:$16 sps:$4 sm:$0xff]  }
  0xe9   : > { %2052 = vmatpush1.bf16.msra.mxu0 %v3345_v30  ;;  %2264 = vmatpush1.bf16.msra.mxu1 %v3348_v31  ;;  %v3429_v30 = vld [vmem:[%s3585_s3 + $0x780] ss:$16 sps:$4 sm:$0xff]   ;;  %v3432_v31 = vld [vmem:[%s3585_s3 + $0x788] ss:$16 sps:$4 sm:$0xff]  }
  0xea   : > { %2053 = vmatprep.subr.bf16.mxu0 %v3353_v32  ;;  %2265 = vmatprep.subr.bf16.mxu1 %v3356_v33  ;;  %v3437_v32 = vld [vmem:[%s3585_s3 + $0x7a4] ss:$16 sps:$4 sm:$0xff]   ;;  %v3440_v33 = vld [vmem:[%s3585_s3 + $0x7ac] ss:$16 sps:$4 sm:$0xff]  }
  0xed   : > { %2054 = vmatpush1.bf16.msra.mxu0 %v3351_v34  ;;  %2266 = vmatpush1.bf16.msra.mxu1 %v3354_v35  ;;  %v3435_v34 = vld [vmem:[%s3585_s3 + $0x7a0] ss:$16 sps:$4 sm:$0xff]   ;;  %v3438_v35 = vld [vmem:[%s3585_s3 + $0x7a8] ss:$16 sps:$4 sm:$0xff]  }
  0xee   : > { %2076 = vmatprep.subr.bf16.mxu0 %v3359_v36  ;;  %2288 = vmatprep.subr.bf16.mxu1 %v3362_v37  ;;  %v3443_v36 = vld [vmem:[%s3585_s3 + $0x7c4] ss:$16 sps:$4 sm:$0xff]   ;;  %v3446_v37 = vld [vmem:[%s3585_s3 + $0x7cc] ss:$16 sps:$4 sm:$0xff]  }
  0xf0   : > { %2056 = vmatmul.mubr.bf16.vlgmr.msra.gmra.mrb[0].mxu0 %v2705_v38  ;;  %2268 = vmatmul.mubr.bf16.vlgmr.msra.gmra.mrb[0].mxu1 %v2705_v38  ;;  %v3441_v38 = vld [vmem:[%s3585_s3 + $0x7c0] ss:$16 sps:$4 sm:$0xff]  }
  0xf1   : > { %2077 = vmatpush1.bf16.msra.mxu0 %v3357_v41  ;;  %2289 = vmatpush1.bf16.msra.mxu1 %v3360_v43  ;;  %v3452_v41 = vld [vmem:[%s3585_s3 + $0x7ec] ss:$16 sps:$4 sm:$0xff]   ;;  %v3447_v43 = vld [vmem:[%s3585_s3 + $0x7e0] ss:$16 sps:$4 sm:$0xff]  }
  0xf2   : > { %2078 = vmatprep.subr.bf16.mxu0 %v3365_v45  ;;  %2290 = vmatprep.subr.bf16.mxu1 %v3368_v46  ;;  %v3450_v45 = vld [vmem:[%s3585_s3 + $0x7e8] ss:$16 sps:$4 sm:$0xff]  }
  0xf3   : > { %2065 = vmatprep.mubr.bf16.mxu0 %v2714_v47  ;;  %2277 = vmatprep.mubr.bf16.mxu1 %v2714_v47  ;;  %v296_v46 = vld [vmem:[%s3587_s4 + $0x58] sm:$0xff] }
  0xf4   : > { %v300_v47 = vld [vmem:[%s3587_s4 + $0x78] sm:$0x33] }
  0xf5   : > { %2079 = vmatpush1.bf16.msra.mxu0 %v3363_v42  ;;  %2291 = vmatpush1.bf16.msra.mxu1 %v3366_v44  ;;  %v2707_v42 = vcombine.low %v3821_v51, %v3824_v52  ;;  %v2716_v44 = vcombine.high %v296_v46, %v300_v47 }
  0xf6   : > { %2080 = vmatprep.subr.bf16.mxu0 %v3371_v48  ;;  %2292 = vmatprep.subr.bf16.mxu1 %v3374_v49  ;;  %v2715_v48 = vcombine.low %v296_v46, %v300_v47  ;;  %v269_v49 = vld [vmem:[#allocation2] sm:$0xff] }
  0xf8   : > { %2066 = vmatmul.mubr.bf16.gmra.mrb[4].mxu0 %v2713_v50  ;;  %2278 = vmatmul.mubr.bf16.gmra.mrb[4].mxu1 %v2713_v50  ;;  %v271_v50 = vld [vmem:[#allocation2 + $0x10] sm:$0xff] }
  0xf9   : > { %2081 = vmatpush1.bf16.msra.mxu0 %v3369_v53  ;;  %2293 = vmatpush1.bf16.msra.mxu1 %v3372_v54  ;;  %v270_v53 = vld [vmem:[#allocation2 + $0x8] sm:$0xff]  ;;  %v272_v54 = vld [vmem:[#allocation2 + $0x18] sm:$0xff] }
  0xfa   : > { %2082 = vmatprep.subr.bf16.mxu0 %v3377_v55  ;;  %2294 = vmatprep.subr.bf16.mxu1 %v3380_v56 }
  0xfb   : > { %2108 = vmatprep.mubr.bf16.mxu0 %v2708_v57  ;;  %2320 = vmatprep.mubr.bf16.mxu1 %v2708_v57  ;;  %v273_v57 = vld [vmem:[#allocation2 + $0x20] sm:$0xff] }
  0xfd   : > { %2083 = vmatpush1.bf16.msra.mxu0 %v3375_v58  ;;  %2295 = vmatpush1.bf16.msra.mxu1 %v3378_v59  ;;  %v275_v58 = vld [vmem:[#allocation2 + $0x30] sm:$0xff] }
  0xfe   : > { %2084 = vmatprep.subr.bf16.mxu0 %v3383_v60  ;;  %2296 = vmatprep.subr.bf16.mxu1 %v3386_v61  ;;  %v274_v61 = vld [vmem:[#allocation2 + $0x28] sm:$0xff] }
 0x101   : > { %2085 = vmatpush1.bf16.msra.mxu0 %v3381_v62  ;;  %2297 = vmatpush1.bf16.msra.mxu1 %v3384_v63  ;;  %v276_v62 = vld [vmem:[#allocation2 + $0x38] sm:$0xff] }
 0x102   : > { %2086 = vmatprep.subr.bf16.mxu0 %v3389_v0  ;;  %2298 = vmatprep.subr.bf16.mxu1 %v3392_v1 }
 0x105   : > { %2087 = vmatpush1.bf16.msra.mxu0 %v3387_v2  ;;  %2299 = vmatpush1.bf16.msra.mxu1 %v3390_v3 }
 0x106   : > { %2088 = vmatprep.subr.bf16.mxu0 %v3395_v4  ;;  %2300 = vmatprep.subr.bf16.mxu1 %v3398_v5 }
 0x109   : > { %2089 = vmatpush1.bf16.msra.mxu0 %v3393_v6  ;;  %2301 = vmatpush1.bf16.msra.mxu1 %v3396_v7 }
 0x10a   : > { %2090 = vmatprep.subr.bf16.mxu0 %v3401_v8  ;;  %2302 = vmatprep.subr.bf16.mxu1 %v3404_v9  ;;  %v277_v9 = vld [vmem:[#allocation2 + $0x40] sm:$0xff] }
 0x10d   : > { %2091 = vmatpush1.bf16.msra.mxu0 %v3399_v10  ;;  %2303 = vmatpush1.bf16.msra.mxu1 %v3402_v11  ;;  %v279_v10 = vld [vmem:[#allocation2 + $0x50] sm:$0xff]  ;;  %v278_v11 = vld [vmem:[#allocation2 + $0x48] sm:$0xff] }
 0x10e   : > { %2092 = vmatprep.subr.bf16.mxu0 %v3407_v12  ;;  %2304 = vmatprep.subr.bf16.mxu1 %v3410_v13  ;;  %v280_v12 = vld [vmem:[#allocation2 + $0x58] sm:$0xff] }
 0x111   : > { %2093 = vmatpush1.bf16.msra.mxu0 %v3405_v14  ;;  %2305 = vmatpush1.bf16.msra.mxu1 %v3408_v15  ;;  %v281_v15 = vld [vmem:[#allocation2 + $0x60] sm:$0xf] }
 0x112   : > { %2094 = vmatprep.subr.bf16.mxu0 %v3413_v16  ;;  %2306 = vmatprep.subr.bf16.mxu1 %v3416_v17  ;;  %v283_v16 = vld [vmem:[#allocation2 + $0x70] sm:$0xf] }
 0x115   : > { %2095 = vmatpush1.bf16.msra.mxu0 %v3411_v18  ;;  %2307 = vmatpush1.bf16.msra.mxu1 %v3414_v19 }
 0x116   : > { %2096 = vmatprep.subr.bf16.mxu0 %v3419_v20  ;;  %2308 = vmatprep.subr.bf16.mxu1 %v3422_v21  ;;  %v282_v21 = vld [vmem:[#allocation2 + $0x68] sm:$0xf] }
 0x119   : > { %2097 = vmatpush1.bf16.msra.mxu0 %v3417_v22  ;;  %2309 = vmatpush1.bf16.msra.mxu1 %v3420_v23  ;;  %v284_v22 = vld [vmem:[#allocation2 + $0x78] sm:$0xf] }
 0x11a   : > { %2098 = vmatprep.subr.bf16.mxu0 %v3425_v24  ;;  %2310 = vmatprep.subr.bf16.mxu1 %v3428_v25 }
 0x11d   : > { %2099 = vmatpush1.bf16.msra.mxu0 %v3423_v26  ;;  %2311 = vmatpush1.bf16.msra.mxu1 %v3426_v27 }
 0x11e   : > { %2100 = vmatprep.subr.bf16.mxu0 %v3431_v28  ;;  %2312 = vmatprep.subr.bf16.mxu1 %v3434_v29 }
 0x121   : > { %2101 = vmatpush1.bf16.msra.mxu0 %v3429_v30  ;;  %2313 = vmatpush1.bf16.msra.mxu1 %v3432_v31 }
 0x122   : > { %2102 = vmatprep.subr.bf16.mxu0 %v3437_v32  ;;  %2314 = vmatprep.subr.bf16.mxu1 %v3440_v33 }
 0x125   : > { %2103 = vmatpush1.bf16.msra.mxu0 %v3435_v34  ;;  %2315 = vmatpush1.bf16.msra.mxu1 %v3438_v35 }
 0x126   : > { %2104 = vmatprep.subr.bf16.mxu0 %v3443_v36  ;;  %2316 = vmatprep.subr.bf16.mxu1 %v3446_v37 }
 0x129   : > { %2105 = vmatpush1.bf16.msra.mxu0 %v3441_v38  ;;  %2317 = vmatpush1.bf16.msra.mxu1 %v3444_v39 }
 0x12a   : > { %2106 = vmatprep.subr.bf16.mxu0 %v3449_v40  ;;  %2318 = vmatprep.subr.bf16.mxu1 %v3452_v41 }
 0x12d   : > { %2107 = vmatpush1.bf16.msra.mxu0 %v3447_v43  ;;  %2319 = vmatpush1.bf16.msra.mxu1 %v3450_v45 }
 0x130   : > { %2109 = vmatmul.mubr.bf16.vlgmr.msra.gmra.mrb[0].mxu0 %v2707_v42  ;;  %2321 = vmatmul.mubr.bf16.vlgmr.msra.gmra.mrb[0].mxu1 %v2707_v42 }
 0x131   : > { %2118 = vmatprep.mubr.bf16.mxu0 %v2716_v44  ;;  %2330 = vmatprep.mubr.bf16.mxu1 %v2716_v44 }
 0x138   : > { %2119 = vmatmul.mubr.bf16.gmra.mrb[4].mxu0 %v2715_v48  ;;  %2331 = vmatmul.mubr.bf16.gmra.mrb[4].mxu1 %v2715_v48 }
 0x203   : > { %v2110_v55 = vpop.f32.mrb[0].mxu0  ;;  %v2322_v56 = vpop.f32.mrb[0].mxu1 }
 0x204   : > { %v2341_v59 = vadd.f32 %v2110_v55, %v269_v49  ;;  %v2343_v51 = vadd.f32 %v2322_v56, %v271_v50  ;;  %v2112_v52 = vpop.f32.mrb[1].mxu0  ;;  %v2324_v60 = vpop.f32.mrb[1].mxu1 }
 0x205   : > { %v2342_v63 = vadd.f32 %v2112_v52, %v270_v53  ;;  %v2344_v0 = vadd.f32 %v2324_v60, %v272_v54  ;;  %v2114_v1 = vpop.f32.mrb[2].mxu0  ;;  %v2326_v2 = vpop.f32.mrb[2].mxu1 }
 0x206   : > { %2357 = vst [vmem:[#allocation2] sm:$0xff] %v2341_v59  ;;  %2359 = vst [vmem:[#allocation2 + $0x10] sm:$0xff] %v2343_v51  ;;  %v2345_v3 = vadd.f32 %v2114_v1, %v273_v57  ;;  %v2347_v4 = vadd.f32 %v2326_v2, %v275_v58  ;;  %v2116_v5 = vpop.f32.mrb[3].mxu0  ;;  %v2328_v6 = vpop.f32.mrb[3].mxu1 }
 0x207   : > { %2358 = vst [vmem:[#allocation2 + $0x8] sm:$0xff] %v2342_v63  ;;  %2360 = vst [vmem:[#allocation2 + $0x18] sm:$0xff] %v2344_v0  ;;  %v2346_v7 = vadd.f32 %v2116_v5, %v274_v61  ;;  %v2348_v8 = vadd.f32 %v2328_v6, %v276_v62 }
 0x208   : > { %2361 = vst [vmem:[#allocation2 + $0x20] sm:$0xff] %v2345_v3  ;;  %2363 = vst [vmem:[#allocation2 + $0x30] sm:$0xff] %v2347_v4 }
 0x209   : > { %2362 = vst [vmem:[#allocation2 + $0x28] sm:$0xff] %v2346_v7  ;;  %2364 = vst [vmem:[#allocation2 + $0x38] sm:$0xff] %v2348_v8 }
 0x20b   : > { %v2120_v13 = vpop.f32.mrb[4].mxu0  ;;  %v2332_v14 = vpop.f32.mrb[4].mxu1  ;;  %2376 = sbr.rel (%p2973_p11) target bundleno = 610 (0x262), region = 59 }
 0x20c   : > { %v2349_v17 = vadd.f32 %v2120_v13, %v277_v9  ;;  %v2351_v18 = vadd.f32 %v2332_v14, %v279_v10  ;;  %v2122_v19 = vpop.f32.mrb[5].mxu0  ;;  %v2334_v20 = vpop.f32.mrb[5].mxu1 }
 0x20d   : > { %v2350_v23 = vadd.f32 %v2122_v19, %v278_v11  ;;  %v2352_v24 = vadd.f32 %v2334_v20, %v280_v12  ;;  %v2124_v25 = vpop.f32.mrb[6].mxu0  ;;  %v2336_v26 = vpop.f32.mrb[6].mxu1  ;;  %v2377_v33 = vld [vmem:[#allocation2] sm:$0xff] (!%p2973_p11)  ;;  %v3888_v46 = vld [vmem:[#allocation2 + $0x10] sm:$0xff] (!%p2973_p11) }
 0x20e   : > { %2365 = vst [vmem:[#allocation2 + $0x40] sm:$0xff] %v2349_v17  ;;  %2367 = vst [vmem:[#allocation2 + $0x50] sm:$0xff] %v2351_v18  ;;  %v2353_v27 = vadd.f32 %v2124_v25, %v281_v15  ;;  %v2355_v28 = vadd.f32 %v2336_v26, %v283_v16  ;;  %v2126_v29 = vpop.f32.mrb[7].mxu0  ;;  %v2338_v30 = vpop.f32.mrb[7].mxu1  ;;  %v2378_v38 = vld [vmem:[#allocation2 + $0x8] sm:$0xff] (!%p2973_p11)  ;;  %v3899_v54 = vld [vmem:[#allocation2 + $0x18] sm:$0xff] (!%p2973_p11) }
 0x20f   : > { %2366 = vst [vmem:[#allocation2 + $0x48] sm:$0xff] %v2350_v23  ;;  %2368 = vst [vmem:[#allocation2 + $0x58] sm:$0xff] %v2352_v24  ;;  %v2354_v31 = vadd.f32 %v2126_v29, %v282_v21  ;;  %v2356_v32 = vadd.f32 %v2338_v30, %v284_v22  ;;  %v2381_v34 = vld [vmem:[#allocation2 + $0x20] sm:$0xff] (!%p2973_p11)  ;;  %v3891_v44 = vld [vmem:[#allocation2 + $0x30] sm:$0xff] (!%p2973_p11) }
 0x210   : > { %2369 = vst [vmem:[#allocation2 + $0x60] sm:$0xf] %v2353_v27  ;;  %2371 = vst [vmem:[#allocation2 + $0x70] sm:$0xf] %v2355_v28  ;;  %v2393_v37 = vadd.f32 (!%p2973_p11), %v2381_v34, %v2377_v33  ;;  %v2382_v39 = vld [vmem:[#allocation2 + $0x28] sm:$0xff] (!%p2973_p11)  ;;  %v2414_v53 = vadd.f32 (!%p2973_p11), %v3891_v44, %v3888_v46  ;;  %v3901_v55 = vld [vmem:[#allocation2 + $0x38] sm:$0xff] (!%p2973_p11) }
 0x211   : > { %2370 = vst [vmem:[#allocation2 + $0x68] sm:$0xf] %v2354_v31  ;;  %2372 = vst [vmem:[#allocation2 + $0x78] sm:$0xf] %v2356_v32  ;;  %v2404_v45 = vadd.f32 (!%p2973_p11), %v2382_v39, %v2378_v38  ;;  %v2424_v51 = vadd.f32 (!%p2973_p11), %v3901_v55, %v3899_v54 }
 0x215   : > { %v2385_v35 = vld [vmem:[#allocation2 + $0x40] sm:$0xff]  ;;  %v3893_v48 = vld [vmem:[#allocation2 + $0x50] sm:$0xff] }
 0x216   : > { %v2386_v41 = vld [vmem:[#allocation2 + $0x48] sm:$0xff]  ;;  %v2394_v47 = vadd.f32 %v2393_v37, %v2385_v35  ;;  %v3903_v56 = vld [vmem:[#allocation2 + $0x58] sm:$0xff]  ;;  %v2415_v60 = vadd.f32 %v2414_v53, %v3893_v48 }
 0x217   : > { %v2389_v36 = vld [vmem:[#allocation2 + $0x60] sm:$0xf]  ;;  %v3895_v49 = vld [vmem:[#allocation2 + $0x70] sm:$0xf]  ;;  %v2405_v50 = vadd.f32 %v2404_v45, %v2386_v41  ;;  %v2425_v63 = vadd.f32 %v2424_v51, %v3903_v56 }
 0x218   : > { %v2396_v40 = vsel %vm2395_vm0, %v2389_v36, 0.0  ;;  %v2390_v43 = vld [vmem:[#allocation2 + $0x68] sm:$0xf]  ;;  %v2416_v58 = vsel %vm2395_vm0, %v3895_v49, 0.0  ;;  %v3907_v59 = vld [vmem:[#allocation2 + $0x78] sm:$0xf] }
 0x219   : > { %v2406_v42 = vsel %vm2395_vm0, %v2390_v43, 0.0  ;;  %v2397_v57 = vadd.f32 %v2396_v40, %v2394_v47  ;;  %v2426_v61 = vsel %vm2395_vm0, %v3907_v59, 0.0  ;;  %v2417_v1 = vadd.f32 %v2416_v58, %v2415_v60 }
 0x21a   : > { %v2407_v52 = vadd.f32 %v2406_v42, %v2405_v50  ;;  %v2427_v3 = vadd.f32 %v2426_v61, %v2425_v63 }
 0x21b   : > { %v2398_v62 = vrot.slane %v2397_v57, 4  ;;  %v2418_v5 = vrot.slane %v2417_v1, 4 }
 0x21c   : > { %v2408_v0 = vrot.slane %v2407_v52, 4  ;;  %v2428_v7 = vrot.slane %v2427_v3, 4 }
 0x21d   : > { %v2399_v2 = vadd.f32 %v2398_v62, %v2397_v57  ;;  %v2419_v9 = vadd.f32 %v2418_v5, %v2417_v1 }
 0x21e   : > { %v2409_v4 = vadd.f32 %v2408_v0, %v2407_v52  ;;  %v2429_v11 = vadd.f32 %v2428_v7, %v2427_v3 }
 0x21f   : > { %v2400_v6 = vrot.slane %v2399_v2, 2  ;;  %v2420_v13 = vrot.slane %v2419_v9, 2 }
 0x220   : > { %v2410_v8 = vrot.slane %v2409_v4, 2  ;;  %v2430_v15 = vrot.slane %v2429_v11, 2 }
 0x221   : > { %v2401_v10 = vadd.f32 %v2400_v6, %v2399_v2  ;;  %v2421_v17 = vadd.f32 %v2420_v13, %v2419_v9 }
 0x222   : > { %v2411_v12 = vadd.f32 %v2410_v8, %v2409_v4  ;;  %v2431_v19 = vadd.f32 %v2430_v15, %v2429_v11 }
 0x223   : > { %v2402_v14 = vrot.slane %v2401_v10, 1  ;;  %v2422_v21 = vrot.slane %v2421_v17, 1 }
 0x224   : > { %v2412_v16 = vrot.slane %v2411_v12, 1  ;;  %v2432_v25 = vrot.slane %v2431_v19, 1 }
 0x225   : > { %v2403_v18 = vadd.f32 %v2402_v14, %v2401_v10  ;;  %v2423_v24 = vadd.f32 %v2422_v21, %v2421_v17 }
 0x226   : > { %v2413_v20 = vadd.f32 %v2412_v16, %v2411_v12  ;;  %v2433_v47 = vadd.f32 %v2432_v25, %v2431_v19 }
 0x227   : > { %v2435_v22 = vmul.f32 0.035714287, %v2403_v18  ;;  %v2437_v45 = vmul.f32 0.035714287, %v2423_v24 }
 0x228   : > { %v2436_v23 = vmul.f32 0.035714287, %v2413_v20  ;;  %v2438_v62 = vmul.f32 0.035714287, %v2433_v47 }
 0x229   : > { %v3915_v26 = vsub.f32 %v2377_v33, %v2435_v22  ;;  %v3917_v27 = vsub.f32 %v2381_v34, %v2435_v22  ;;  %v3919_v28 = vsub.f32 %v2385_v35, %v2435_v22  ;;  %v3921_v29 = vsub.f32 %v2389_v36, %v2435_v22 }
 0x22a   : > { %v3923_v30 = vsub.f32 %v2378_v38, %v2436_v23  ;;  %v3925_v31 = vsub.f32 %v2382_v39, %v2436_v23  ;;  %v3927_v32 = vsub.f32 %v2386_v41, %v2436_v23  ;;  %v3929_v37 = vsub.f32 %v2390_v43, %v2436_v23 }
 0x22b   : > { %v2455_v40 = vmul.f32 %v3915_v26, %v3915_v26  ;;  %v2459_v33 = vmul.f32 %v3917_v27, %v3917_v27  ;;  %v2463_v34 = vmul.f32 %v3919_v28, %v3919_v28  ;;  %v2467_v35 = vmul.f32 %v3921_v29, %v3921_v29 }
 0x22c   : > { %v2456_v36 = vmul.f32 %v3923_v30, %v3923_v30  ;;  %v2460_v38 = vmul.f32 %v3925_v31, %v3925_v31  ;;  %v2464_v39 = vmul.f32 %v3927_v32, %v3927_v32  ;;  %v2468_v41 = vmul.f32 %v3929_v37, %v3929_v37 }
 0x22d   : > { %v2471_v43 = vadd.f32 %v2459_v33, %v2455_v40  ;;  %v2473_v42 = vsel %vm2395_vm0, %v2467_v35, 0.0  ;;  %v3950_v58 = vsub.f32 %v3888_v46, %v2437_v45  ;;  %v3953_v51 = vsub.f32 %v3891_v44, %v2437_v45 }
 0x22e   : > { %v2481_v50 = vadd.f32 %v2460_v38, %v2456_v36  ;;  %v2483_v53 = vsel %vm2395_vm0, %v2468_v41, 0.0  ;;  %v3956_v52 = vsub.f32 %v3893_v48, %v2437_v45  ;;  %v3959_v61 = vsub.f32 %v3895_v49, %v2437_v45 }
 0x22f   : > { %v2472_v57 = vadd.f32 %v2471_v43, %v2463_v34  ;;  %v2457_v0 = vmul.f32 %v3950_v58, %v3950_v58  ;;  %v2461_v1 = vmul.f32 %v3953_v51, %v3953_v51  ;;  %v3970_v2 = vsub.f32 %v3899_v54, %v2438_v62 }
 0x230   : > { %v2482_v60 = vadd.f32 %v2481_v50, %v2464_v39  ;;  %v2465_v46 = vmul.f32 %v3956_v52, %v3956_v52  ;;  %v2469_v48 = vmul.f32 %v3959_v61, %v3959_v61  ;;  %v3973_v49 = vsub.f32 %v3901_v55, %v2438_v62 }
 0x231   : > { %v2474_v63 = vadd.f32 %v2473_v42, %v2472_v57  ;;  %v2491_v4 = vadd.f32 %v2461_v1, %v2457_v0  ;;  %v3976_v5 = vsub.f32 %v3903_v56, %v2438_v62  ;;  %v3979_v6 = vsub.f32 %v3907_v59, %v2438_v62 }
 0x232   : > { %v2484_v44 = vadd.f32 %v2483_v53, %v2482_v60  ;;  %v2493_v8 = vsel %vm2395_vm0, %v2469_v48, 0.0  ;;  %v2458_v9 = vmul.f32 %v3970_v2, %v3970_v2  ;;  %v2462_v54 = vmul.f32 %v3973_v49, %v3973_v49 }
 0x233   : > { %v2475_v3 = vrot.slane %v2474_v63, 4  ;;  %v2492_v55 = vadd.f32 %v2491_v4, %v2465_v46  ;;  %v2466_v11 = vmul.f32 %v3976_v5, %v3976_v5  ;;  %v2470_v56 = vmul.f32 %v3979_v6, %v3979_v6 }
 0x234   : > { %v2485_v7 = vrot.slane %v2484_v44, 4  ;;  %v2501_v59 = vadd.f32 %v2462_v54, %v2458_v9 }
 0x235   : > { %v2476_v10 = vadd.f32 %v2475_v3, %v2474_v63  ;;  %v2494_v14 = vadd.f32 %v2493_v8, %v2492_v55  ;;  %v2503_v15 = vsel %vm2395_vm0, %v2470_v56, 0.0 }
 0x236   : > { %v2486_v12 = vadd.f32 %v2485_v7, %v2484_v44  ;;  %v2502_v17 = vadd.f32 %v2501_v59, %v2466_v11 }
 0x237   : > { %v2477_v13 = vrot.slane %v2476_v10, 2  ;;  %v2495_v19 = vrot.slane %v2494_v14, 4 }
 0x238   : > { %v2487_v16 = vrot.slane %v2486_v12, 2  ;;  %v2504_v21 = vadd.f32 %v2503_v15, %v2502_v17 }
 0x239   : > { %v2478_v18 = vadd.f32 %v2477_v13, %v2476_v10  ;;  %v2496_v23 = vadd.f32 %v2495_v19, %v2494_v14 }
 0x23a   : > { %v2488_v20 = vadd.f32 %v2487_v16, %v2486_v12  ;;  %v2505_v25 = vrot.slane %v2504_v21, 4 }
 0x23b   : > { %v2479_v22 = vrot.slane %v2478_v18, 1  ;;  %v2497_v33 = vrot.slane %v2496_v23, 2 }
 0x23c   : > { %v2489_v24 = vrot.slane %v2488_v20, 1  ;;  %v2506_v35 = vadd.f32 %v2505_v25, %v2504_v21 }
 0x23d   : > { %v2480_v40 = vadd.f32 %v2479_v22, %v2478_v18  ;;  %v2498_v38 = vadd.f32 %v2497_v33, %v2496_v23 }
 0x23e   : > { %v2490_v34 = vadd.f32 %v2489_v24, %v2488_v20  ;;  %v2507_v41 = vrot.slane %v2506_v35, 2 }
 0x23f   : > { %v2511_v36 = vmul.f32 0.035714287, %v2480_v40  ;;  %v2499_v45 = vrot.slane %v2498_v38, 1 }
 0x240   : > { %v2512_v39 = vmul.f32 0.035714287, %v2490_v34  ;;  %v2508_v42 = vadd.f32 %v2507_v41, %v2506_v35 }
 0x241   : > { %v2515_v43 = vadd.f32 1e-05, %v2511_v36  ;;  %v2500_v50 = vadd.f32 %v2499_v45, %v2498_v38 }
 0x242   : > { %v2516_v47 = vadd.f32 1e-05, %v2512_v39  ;;  %v2509_v53 = vrot.slane %v2508_v42, 1 }
 0x243   : > { %3453 = vrsqrt.f32 %v2515_v43  ;;  %v2513_v57 = vmul.f32 0.035714287, %v2500_v50 }
 0x244   : > { %3455 = vrsqrt.f32 %v2516_v47  ;;  %v2510_v60 = vadd.f32 %v2509_v53, %v2508_v42 }
 0x245   : > { %v2517_v62 = vadd.f32 1e-05, %v2513_v57 }
 0x246   : > { %v2514_v63 = vmul.f32 0.035714287, %v2510_v60 }
 0x247   : > { %3457 = vrsqrt.f32 %v2517_v62 }
 0x248   : > { %v2518_v0 = vadd.f32 1e-05, %v2514_v63 }
 0x24a   : > { %3459 = vrsqrt.f32 %v2518_v0 }
 0x24d   : > { %v3454_v1 = vpop.eup %3453 }
 0x24e   : > { %v3456_v46 = vpop.eup %3455  ;;  %v2523_v44 = vmul.f32 %v3454_v1, %v3915_v26  ;;  %v2527_v48 = vmul.f32 %v3454_v1, %v3917_v27  ;;  %v2531_v3 = vmul.f32 %v3454_v1, %v3919_v28  ;;  %v2535_v4 = vmul.f32 %v3454_v1, %v3921_v29 }
 0x24f   : > { %v2524_v7 = vmul.f32 %v3456_v46, %v3923_v30  ;;  %v2528_v8 = vmul.f32 %v3456_v46, %v3925_v31  ;;  %v2532_v9 = vmul.f32 %v3456_v46, %v3927_v32  ;;  %v3999_v54 = vmul.f32 %v3456_v46, %v3929_v37 }
 0x250   : > { %vm2539_vm1 = vcmp.gt.f32.partialorder %v2523_v44, 0.0  ;;  %v2555_v10 = vmul.f32 0.0, %v2523_v44  ;;  %vm2543_vm2 = vcmp.gt.f32.partialorder %v2527_v48, 0.0  ;;  %v2559_v55 = vmul.f32 0.0, %v2527_v48 }
 0x251   : > { %vm2540_vm3 = vcmp.gt.f32.partialorder %v2524_v7, 0.0  ;;  %v2556_v26 = vmul.f32 0.0, %v2524_v7  ;;  %vm2544_vm4 = vcmp.gt.f32.partialorder %v2528_v8, 0.0  ;;  %v2560_v27 = vmul.f32 0.0, %v2528_v8  ;;  %v3458_v30 = vpop.eup %3457 }
 0x252   : > { %v2571_v28 = vsel %vm2539_vm1, %v2523_v44, %v2555_v10  ;;  %v2575_v11 = vsel %vm2543_vm2, %v2527_v48, %v2559_v55  ;;  %vm2547_vm5 = vcmp.gt.f32.partialorder %v2531_v3, 0.0  ;;  %v2563_v29 = vmul.f32 0.0, %v2531_v3 }
 0x253   : > { %2587 = vst [vmem:[%s4080_s2] sm:$0xff] %v2571_v28  ;;  %v2572_v31 = vsel %vm2540_vm3, %v2524_v7, %v2556_v26  ;;  %2591 = vst [vmem:[%s4080_s2 + $0x20] sm:$0xff] %v2575_v11  ;;  %v2576_v32 = vsel %vm2544_vm4, %v2528_v8, %v2560_v27  ;;  %vm2548_vm6 = vcmp.gt.f32.partialorder %v2532_v9, 0.0  ;;  %v2564_v37 = vmul.f32 0.0, %v2532_v9 }
 0x254   : > { %2588 = vst [vmem:[%s4080_s2 + $0x8] sm:$0xff] %v2572_v31  ;;  %v2525_v56 = vmul.f32 %v3458_v30, %v3950_v58  ;;  %2592 = vst [vmem:[%s4080_s2 + $0x28] sm:$0xff] %v2576_v32  ;;  %v2529_v12 = vmul.f32 %v3458_v30, %v3953_v51  ;;  %v2579_v59 = vsel %vm2547_vm5, %v2531_v3, %v2563_v29  ;;  %vm2551_vm7 = vcmp.gt.f32.partialorder %v2535_v4, 0.0  ;;  %v3460_v16 = vpop.eup %3459 }
 0x255   : > { %v2533_v13 = vmul.f32 %v3458_v30, %v3956_v52  ;;  %2595 = vst [vmem:[%s4080_s2 + $0x40] sm:$0xff] %v2579_v59  ;;  %v2580_v14 = vsel %vm2548_vm6, %v2532_v9, %v2564_v37  ;;  %v2567_v15 = vmul.f32 0.0, %v2535_v4  ;;  %vm2552_vm8 = vcmp.gt.f32.partialorder %v3999_v54, 0.0 }
 0x256   : > { %vm2541_vm9 = vcmp.gt.f32.partialorder %v2525_v56, 0.0  ;;  %v2557_v58 = vmul.f32 0.0, %v2525_v56  ;;  %vm2545_vm10 = vcmp.gt.f32.partialorder %v2529_v12, 0.0  ;;  %v2561_v17 = vmul.f32 0.0, %v2529_v12  ;;  %2596 = vst [vmem:[%s4080_s2 + $0x48] sm:$0xff] %v2580_v14 }
 0x257   : > { %v2526_v51 = vmul.f32 %v3460_v16, %v3970_v2  ;;  %v2530_v52 = vmul.f32 %v3460_v16, %v3973_v49  ;;  %vm2549_vm11 = vcmp.gt.f32.partialorder %v2533_v13, 0.0  ;;  %v2565_v18 = vmul.f32 0.0, %v2533_v13 }
 0x258   : > { %v2573_v19 = vsel %vm2541_vm9, %v2525_v56, %v2557_v58  ;;  %v2577_v20 = vsel %vm2545_vm10, %v2529_v12, %v2561_v17  ;;  %v2534_v21 = vmul.f32 %v3460_v16, %v3976_v5  ;;  %v2583_v22 = vsel %vm2551_vm7, %v2535_v4, %v2567_v15 }
 0x259   : > { %2589 = vst [vmem:[%s4080_s2 + $0x10] sm:$0xff] %v2573_v19  ;;  %vm2542_vm12 = vcmp.gt.f32.partialorder %v2526_v51, 0.0  ;;  %v2558_v23 = vmul.f32 0.0, %v2526_v51  ;;  %2593 = vst [vmem:[%s4080_s2 + $0x30] sm:$0xff] %v2577_v20  ;;  %vm2546_vm13 = vcmp.gt.f32.partialorder %v2530_v52, 0.0  ;;  %v2562_v2 = vmul.f32 0.0, %v2530_v52 }
 0x25a   : > { %2599 = vst [vmem:[%s4080_s2 + $0x60] sm:$0xf] %v2583_v22  ;;  %v2581_v49 = vsel %vm2549_vm11, %v2533_v13, %v2565_v18  ;;  %vm2550_vm14 = vcmp.gt.f32.partialorder %v2534_v21, 0.0  ;;  %v2566_v5 = vmul.f32 0.0, %v2534_v21  ;;  %v2568_v24 = vmul.f32 0.0, %v3999_v54 }
 0x25b   : > { %v2574_v25 = vsel %vm2542_vm12, %v2526_v51, %v2558_v23  ;;  %v2578_v40 = vsel %vm2546_vm13, %v2530_v52, %v2562_v2  ;;  %2597 = vst [vmem:[%s4080_s2 + $0x50] sm:$0xff] %v2581_v49  ;;  %v2537_v33 = vmul.f32 %v3458_v30, %v3959_v61  ;;  %v2538_v34 = vmul.f32 %v3460_v16, %v3979_v6 }
 0x25c   : > { %2590 = vst [vmem:[%s4080_s2 + $0x18] sm:$0xff] %v2574_v25  ;;  %2594 = vst [vmem:[%s4080_s2 + $0x38] sm:$0xff] %v2578_v40  ;;  %v2582_v35 = vsel %vm2550_vm14, %v2534_v21, %v2566_v5  ;;  %v2584_v36 = vsel %vm2552_vm8, %v3999_v54, %v2568_v24 }
 0x25d   : > { %2598 = vst [vmem:[%s4080_s2 + $0x58] sm:$0xff] %v2582_v35  ;;  %2600 = vst [vmem:[%s4080_s2 + $0x68] sm:$0xf] %v2584_v36  ;;  %vm2553_vm15 = vcmp.gt.f32.partialorder %v2537_v33, 0.0  ;;  %v2569_v61 = vmul.f32 0.0, %v2537_v33  ;;  %vm2554_vm0 = vcmp.gt.f32.partialorder %v2538_v34, 0.0 }
 0x25e   : > { %v2570_v6 = vmul.f32 0.0, %v2538_v34 }
 0x25f   : > { %v2585_v38 = vsel %vm2553_vm15, %v2537_v33, %v2569_v61 }
 0x260   : > { %v2586_v39 = vsel %vm2554_vm0, %v2538_v34, %v2570_v6  ;;  %2601 = vst [vmem:[%s4080_s2 + $0x70] sm:$0xf] %v2585_v38 }
 0x261   : > { %2602 = vst [vmem:[%s4080_s2 + $0x78] sm:$0xf] %v2586_v39 }
 0x262 PF: > { %s12_s13 = sadd.s32 1, %s3499_s13   ;;  %s4081_s9 = smov %s3487_s10 }
 0x263   : > { %p9_p12 = scmp.ge.s32.totalorder %s12_s13, 6   ;;  %s4082_s10 = smov %s3552_s17 }
 0x264   : > { %s4083_s11 = smov %s3495_s12  ;;  %s4084_s12 = smov %s4086_s14 }
 0x265   :  { %11 = sbr.rel (!%p9_p12) target bundleno = 3 (0x3), region = 97 }

// kernel: combined_generator.14
= control target key start
LH: loop header
LB: loop body
LE: loop exit
PB: predicated region body
PF: predicated region fallthrough
CT: control target
= control target key end

     0   :  { %s1975_s9 = smov 0   ;;  %s1977_s10 = smov 0   ;;  %s2302_s0 = inlined_call_operand.vmem [shape: bf16[54,1536], index: 0, kind: input, shape index: {}]   ;;  %s2303_s1 = inlined_call_operand.vmem [shape: bf16[1536,256], index: 1, kind: input, shape index: {}]   ;;  %s2304_s2 = inlined_call_operand.vmem [shape: f32[54,256], index: 2, kind: output, shape index: {}]  }
   0x1   :  { %s1979_s11 = smov 0   ;;  %s1981_s12 = smov 0  }
   0x2   :  { %s1983_s13 = smov 0  }
   0x3 LB: > { %s21_s14 = sadd.s32 1, %s1953_s12  ;;  %p38_p1 = scmp.ne.s32.totalorder %s1945_s10, %s1941_s9  ;;  %s1957_s13 = sphi %s1983_s13, %s12_s13   ;;  %s1953_s12 = sphi %s1981_s12, %s2308_s12   ;;  %s1949_s11 = sphi %s1979_s11, %s2307_s11   ;;  %s1945_s10 = sphi %s1977_s10, %s2306_s10   ;;  %s1941_s9 = sphi %s1975_s9, %s2305_s9  }
   0x4   : > { %p22_p0 = scmp.ge.s32.totalorder %s21_s14, 2  ;;  %p39_p2 = scmp.eq.s32.totalorder %s1957_s13, 0 }
   0x5   : > { %s31_s16 = sadd.s32 1, %s1945_s10  ;;  %p1506_p5 = scmp.ge.s32.totalorder %s1957_s13, 2 }
   0x6   : > { %s2310_s14 = smov (%p22_p0, %s21_s14), 0  ;;  %p40_p3 = por %p39_p2, %p38_p1 }
   0x7   : > { %s28_s15 = ssub.s32 %s1953_s12, %s2310_s14  ;;  %118 = sbr.rel (%p1506_p5) target bundleno = 30 (0x1e), region = 16 }
   0x8   : > { %p29_p4 = scmp.eq.s32.totalorder %s28_s15, 0 }
   0xa   : > { %s2010_s17 = scalar_select %p29_p4, %s1945_s10, %s31_s16  }
   0xe   : > { %121 = sbr.rel (!%p40_p3) target bundleno = 30 (0x1e), region = 20  ;;  %s123_s18 = sand.u32 (%p40_p3), 1, %s1945_s10  }
   0xf   : > { %s1637_s19 = smul.u32 (%p40_p3), 24, %s1953_s12 }
  0x10   : > { %s1695_s20 = smul.u32 (%p40_p3), 168, %s123_s18 }
  0x11   : > { %s2018_s23 = scalar_lea.vmem (%p40_p3), %s2302_s0, %s1637_s19 }
  0x12   : > { %v141_v0 = vld [vmem:[%s2018_s23] sm:$0xff] (%p40_p3)  ;;  %v143_v1 = vld [vmem:[%s2018_s23 + $0x8] sm:$0xff] (%p40_p3)  ;;  %v145_v2 = vld [vmem:[%s2018_s23 + $0x10] sm:$0xff] (%p40_p3)  ;;  %s2023_s24 = scalar_lea.vmem (%p40_p3), [#allocation3], %s1695_s20 }
  0x13   : > { %142 = vst [vmem:[%s2023_s24] sm:$0xff] (%p40_p3), %v141_v0  ;;  %144 = vst [vmem:[%s2023_s24 + $0x8] sm:$0xff] (%p40_p3), %v143_v1  ;;  %v147_v3 = vld [vmem:[%s2018_s23 + $0x30] sm:$0xff] (%p40_p3)  ;;  %v149_v4 = vld [vmem:[%s2018_s23 + $0x38] sm:$0xff] (%p40_p3) }
  0x14   : > { %146 = vst [vmem:[%s2023_s24 + $0x10] sm:$0xff] (%p40_p3), %v145_v2  ;;  %v151_v5 = vld [vmem:[%s2018_s23 + $0x40] sm:$0xff] (%p40_p3)  ;;  %148 = vst [vmem:[%s2023_s24 + $0x18] sm:$0xff] (%p40_p3), %v147_v3  ;;  %v155_v7 = vld [vmem:[%s2018_s23 + $0x68] sm:$0xff] (%p40_p3) }
  0x15   : > { %150 = vst [vmem:[%s2023_s24 + $0x20] sm:$0xff] %v149_v4  ;;  %152 = vst [vmem:[%s2023_s24 + $0x28] sm:$0xff] %v151_v5  ;;  %v153_v6 = vld [vmem:[%s2018_s23 + $0x60] sm:$0xff]  ;;  %v157_v8 = vld [vmem:[%s2018_s23 + $0x70] sm:$0xff] }
  0x16   : > { %154 = vst [vmem:[%s2023_s24 + $0x30] sm:$0xff] %v153_v6  ;;  %156 = vst [vmem:[%s2023_s24 + $0x38] sm:$0xff] %v155_v7  ;;  %v159_v9 = vld [vmem:[%s2018_s23 + $0x90] sm:$0xff]  ;;  %v161_v10 = vld [vmem:[%s2018_s23 + $0x98] sm:$0xff] }
  0x17   : > { %158 = vst [vmem:[%s2023_s24 + $0x40] sm:$0xff] %v157_v8  ;;  %v163_v11 = vld [vmem:[%s2018_s23 + $0xa0] sm:$0xff]  ;;  %160 = vst [vmem:[%s2023_s24 + $0x48] sm:$0xff] %v159_v9  ;;  %v167_v13 = vld [vmem:[%s2018_s23 + $0xc8] sm:$0xff] }
  0x18   : > { %162 = vst [vmem:[%s2023_s24 + $0x50] sm:$0xff] %v161_v10  ;;  %164 = vst [vmem:[%s2023_s24 + $0x58] sm:$0xff] %v163_v11  ;;  %v165_v12 = vld [vmem:[%s2018_s23 + $0xc0] sm:$0xff]  ;;  %v169_v14 = vld [vmem:[%s2018_s23 + $0xd0] sm:$0xff] }
  0x19   : > { %166 = vst [vmem:[%s2023_s24 + $0x60] sm:$0xff] %v165_v12  ;;  %168 = vst [vmem:[%s2023_s24 + $0x68] sm:$0xff] %v167_v13  ;;  %v171_v15 = vld [vmem:[%s2018_s23 + $0xf0] sm:$0xff]  ;;  %v173_v16 = vld [vmem:[%s2018_s23 + $0xf8] sm:$0xff] }
  0x1a   : > { %170 = vst [vmem:[%s2023_s24 + $0x70] sm:$0xff] %v169_v14  ;;  %v175_v17 = vld [vmem:[%s2018_s23 + $0x100] sm:$0xff]  ;;  %172 = vst [vmem:[%s2023_s24 + $0x78] sm:$0xff] %v171_v15  ;;  %v179_v19 = vld [vmem:[%s2018_s23 + $0x128] sm:$0xff] }
  0x1b   : > { %174 = vst [vmem:[%s2023_s24 + $0x80] sm:$0xff] %v173_v16  ;;  %176 = vst [vmem:[%s2023_s24 + $0x88] sm:$0xff] %v175_v17  ;;  %v177_v18 = vld [vmem:[%s2018_s23 + $0x120] sm:$0xff]  ;;  %v181_v20 = vld [vmem:[%s2018_s23 + $0x130] sm:$0xff] }
  0x1c   : > { %178 = vst [vmem:[%s2023_s24 + $0x90] sm:$0xff] %v177_v18  ;;  %180 = vst [vmem:[%s2023_s24 + $0x98] sm:$0xff] %v179_v19 }
  0x1d   : > { %182 = vst [vmem:[%s2023_s24 + $0xa0] sm:$0xff] %v181_v20 }
  0x1e PF: > { %p1508_p6 = scmp.ge.s32.totalorder %s1957_s13, 1  ;;  %p202_p7 = scmp.lt.s32.totalorder %s1957_s13, 3 }
  0x20   : > { %p203_p8 = pnand %p1508_p6, %p202_p7 }
  0x21   : > { %s209_s25 = sand.u32 (!%p203_p8), 1, %s1941_s9   ;;  %s241_s26 = smul.u32 (!%p203_p8), 96, %s1949_s11 }
  0x22   : > { %206 = sbr.rel (%p203_p8) target bundleno = 496 (0x1f0), region = 47  ;;  %p1511_p10 = scmp.ne.s32.totalorder (!%p203_p8), %s1949_s11, 0 }
  0x23   : > { %s1696_s27 = smul.u32 (!%p203_p8), 168, %s209_s25  ;;  %p243_p9 = scmp.lt.s32.totalorder (!%p203_p8), %s241_s26, 191 }
  0x25   : > { %s2073_s4 = scalar_lea.vmem (!%p203_p8), [#allocation3], %s1696_s27 }
  0x29   : > { %s2312_s26 = smov (!%p243_p9, %s241_s26), 191  ;;  %262 = sbr.rel (%p1511_p10) target bundleno = 50 (0x32), region = 55 }
  0x2a   : > { %s1638_s28 = sshll.u32 %s2312_s26, 3  ;;  %v1959_v21 = vmov (!%p1511_p10), 0.0  }
  0x2b   : > { %s2071_s3 = scalar_lea.vmem %s2303_s1, %s1638_s28  ;;  %263 = vst [vmem:[#allocation2] sm:$0xff] (!%p1511_p10), %v1959_v21  ;;  %264 = vst [vmem:[#allocation2 + $0x8] sm:$0xff] (!%p1511_p10), %v1959_v21 }
  0x2c   : > { %265 = vst [vmem:[#allocation2 + $0x10] sm:$0xff] (!%p1511_p10), %v1959_v21  ;;  %266 = vst [vmem:[#allocation2 + $0x18] sm:$0xff] (!%p1511_p10), %v1959_v21 }
  0x2d   : > { %267 = vst [vmem:[#allocation2 + $0x20] sm:$0xff] (!%p1511_p10), %v1959_v21  ;;  %268 = vst [vmem:[#allocation2 + $0x28] sm:$0xff] (!%p1511_p10), %v1959_v21 }
  0x2e   : > { %269 = vst [vmem:[#allocation2 + $0x30] sm:$0xff] (!%p1511_p10), %v1959_v21  ;;  %270 = vst [vmem:[#allocation2 + $0x38] sm:$0xff] (!%p1511_p10), %v1959_v21 }
  0x2f   : > { %271 = vst [vmem:[#allocation2 + $0x40] sm:$0xff] (!%p1511_p10), %v1959_v21  ;;  %272 = vst [vmem:[#allocation2 + $0x48] sm:$0xff] (!%p1511_p10), %v1959_v21 }
  0x30   : > { %273 = vst [vmem:[#allocation2 + $0x50] sm:$0xff] %v1959_v21  ;;  %274 = vst [vmem:[#allocation2 + $0x58] sm:$0xff] %v1959_v21 }
  0x31   : > { %275 = vst [vmem:[#allocation2 + $0x60] sm:$0x3f] %v1959_v21  ;;  %276 = vst [vmem:[#allocation2 + $0x68] sm:$0x3f] %v1959_v21 }
  0x32 PF: > { %v1738_v22 = vld [vmem:[%s2071_s3 + $0x4] ss:$8 sps:$4 sm:$0xff]   ;;  %v1742_v24 = vld [vmem:[%s2071_s3] ss:$8 sps:$4 sm:$0xff]   ;;  %v1744_v26 = vld [vmem:[%s2071_s3 + $0x14] ss:$8 sps:$4 sm:$0xff]  }
  0x33   : > { %v1740_v23 = vld [vmem:[%s2071_s3 + $0x104] ss:$8 sps:$4 sm:$0xff]   ;;  %999 = vmatprep.subr.bf16.mxu1 %v1738_v22  ;;  %v1743_v25 = vld [vmem:[%s2071_s3 + $0x100] ss:$8 sps:$4 sm:$0xff]   ;;  %v1746_v27 = vld [vmem:[%s2071_s3 + $0x114] ss:$8 sps:$4 sm:$0xff]  }
  0x34   : > { %1070 = vmatprep.subr.bf16.mxu0 %v1740_v23  ;;  %1000 = vmatpush1.bf16.msra.mxu1 %v1742_v24  ;;  %v1748_v28 = vld [vmem:[%s2071_s3 + $0x10] ss:$8 sps:$4 sm:$0xff]   ;;  %v1750_v30 = vld [vmem:[%s2071_s3 + $0x24] ss:$8 sps:$4 sm:$0xff]   ;;  %v1754_v32 = vld [vmem:[%s2071_s3 + $0x20] ss:$8 sps:$4 sm:$0xff]  }
  0x35   : > { %1071 = vmatpush1.bf16.msra.mxu0 %v1743_v25  ;;  %1001 = vmatprep.subr.bf16.mxu1 %v1744_v26  ;;  %v1749_v29 = vld [vmem:[%s2071_s3 + $0x110] ss:$8 sps:$4 sm:$0xff]   ;;  %v1752_v31 = vld [vmem:[%s2071_s3 + $0x124] ss:$8 sps:$4 sm:$0xff]   ;;  %v1755_v33 = vld [vmem:[%s2071_s3 + $0x120] ss:$8 sps:$4 sm:$0xff]  }
  0x36   : > { %1072 = vmatprep.subr.bf16.mxu0 %v1746_v27  ;;  %v1756_v34 = vld [vmem:[%s2071_s3 + $0x34] ss:$8 sps:$4 sm:$0xff]   ;;  %v1760_v36 = vld [vmem:[%s2071_s3 + $0x30] ss:$8 sps:$4 sm:$0xff]   ;;  %v1762_v38 = vld [vmem:[%s2071_s3 + $0x44] ss:$8 sps:$4 sm:$0xff]  }
  0x37   : > { %v1758_v35 = vld [vmem:[%s2071_s3 + $0x134] ss:$8 sps:$4 sm:$0xff]   ;;  %v1761_v37 = vld [vmem:[%s2071_s3 + $0x130] ss:$8 sps:$4 sm:$0xff]   ;;  %v1764_v39 = vld [vmem:[%s2071_s3 + $0x144] ss:$8 sps:$4 sm:$0xff]  }
  0x38   : > { %1002 = vmatpush1.bf16.msra.mxu1 %v1748_v28  ;;  %v1766_v40 = vld [vmem:[%s2071_s3 + $0x40] ss:$8 sps:$4 sm:$0xff]   ;;  %v1768_v42 = vld [vmem:[%s2071_s3 + $0x54] ss:$8 sps:$4 sm:$0xff]   ;;  %v1772_v44 = vld [vmem:[%s2071_s3 + $0x50] ss:$8 sps:$4 sm:$0xff]  }
  0x39   : > { %1073 = vmatpush1.bf16.msra.mxu0 %v1749_v29  ;;  %1003 = vmatprep.subr.bf16.mxu1 %v1750_v30  ;;  %v1767_v41 = vld [vmem:[%s2071_s3 + $0x140] ss:$8 sps:$4 sm:$0xff]   ;;  %v1770_v43 = vld [vmem:[%s2071_s3 + $0x154] ss:$8 sps:$4 sm:$0xff]   ;;  %v1773_v45 = vld [vmem:[%s2071_s3 + $0x150] ss:$8 sps:$4 sm:$0xff]  }
  0x3a   : > { %1074 = vmatprep.subr.bf16.mxu0 %v1752_v31  ;;  %v1774_v46 = vld [vmem:[%s2071_s3 + $0x64] ss:$8 sps:$4 sm:$0xff]   ;;  %v1778_v48 = vld [vmem:[%s2071_s3 + $0x60] ss:$8 sps:$4 sm:$0xff]   ;;  %v1780_v50 = vld [vmem:[%s2071_s3 + $0x74] ss:$8 sps:$4 sm:$0xff]  }
  0x3b   : > { %v1776_v47 = vld [vmem:[%s2071_s3 + $0x164] ss:$8 sps:$4 sm:$0xff]   ;;  %v1779_v49 = vld [vmem:[%s2071_s3 + $0x160] ss:$8 sps:$4 sm:$0xff]   ;;  %v1782_v51 = vld [vmem:[%s2071_s3 + $0x174] ss:$8 sps:$4 sm:$0xff]  }
  0x3c   : > { %1004 = vmatpush1.bf16.msra.mxu1 %v1754_v32  ;;  %v1784_v52 = vld [vmem:[%s2071_s3 + $0x70] ss:$8 sps:$4 sm:$0xff]   ;;  %v1786_v54 = vld [vmem:[%s2071_s3 + $0x84] ss:$8 sps:$4 sm:$0xff]   ;;  %v1790_v56 = vld [vmem:[%s2071_s3 + $0x80] ss:$8 sps:$4 sm:$0xff]  }
  0x3d   : > { %1075 = vmatpush1.bf16.msra.mxu0 %v1755_v33  ;;  %1005 = vmatprep.subr.bf16.mxu1 %v1756_v34  ;;  %v1785_v53 = vld [vmem:[%s2071_s3 + $0x170] ss:$8 sps:$4 sm:$0xff]   ;;  %v1788_v55 = vld [vmem:[%s2071_s3 + $0x184] ss:$8 sps:$4 sm:$0xff]   ;;  %v1791_v57 = vld [vmem:[%s2071_s3 + $0x180] ss:$8 sps:$4 sm:$0xff]  }
  0x3e   : > { %1076 = vmatprep.subr.bf16.mxu0 %v1758_v35  ;;  %v1792_v58 = vld [vmem:[%s2071_s3 + $0x94] ss:$8 sps:$4 sm:$0xff]   ;;  %v1796_v60 = vld [vmem:[%s2071_s3 + $0x90] ss:$8 sps:$4 sm:$0xff]   ;;  %v1798_v62 = vld [vmem:[%s2071_s3 + $0xa4] ss:$8 sps:$4 sm:$0xff]  }
  0x3f   : > { %v1794_v59 = vld [vmem:[%s2071_s3 + $0x194] ss:$8 sps:$4 sm:$0xff]   ;;  %v1797_v61 = vld [vmem:[%s2071_s3 + $0x190] ss:$8 sps:$4 sm:$0xff]   ;;  %v1800_v63 = vld [vmem:[%s2071_s3 + $0x1a4] ss:$8 sps:$4 sm:$0xff]  }
  0x40   : > { %1006 = vmatpush1.bf16.msra.mxu1 %v1760_v36  ;;  %v1802_v0 = vld [vmem:[%s2071_s3 + $0xa0] ss:$8 sps:$4 sm:$0xff]   ;;  %v1804_v2 = vld [vmem:[%s2071_s3 + $0xb4] ss:$8 sps:$4 sm:$0xff]   ;;  %v1808_v4 = vld [vmem:[%s2071_s3 + $0xb0] ss:$8 sps:$4 sm:$0xff]  }
  0x41   : > { %1077 = vmatpush1.bf16.msra.mxu0 %v1761_v37  ;;  %1007 = vmatprep.subr.bf16.mxu1 %v1762_v38  ;;  %v1803_v1 = vld [vmem:[%s2071_s3 + $0x1a0] ss:$8 sps:$4 sm:$0xff]   ;;  %v1806_v3 = vld [vmem:[%s2071_s3 + $0x1b4] ss:$8 sps:$4 sm:$0xff]   ;;  %v1809_v5 = vld [vmem:[%s2071_s3 + $0x1b0] ss:$8 sps:$4 sm:$0xff]  }
  0x42   : > { %1078 = vmatprep.subr.bf16.mxu0 %v1764_v39  ;;  %v1810_v6 = vld [vmem:[%s2071_s3 + $0xc4] ss:$8 sps:$4 sm:$0xff]   ;;  %v1814_v10 = vld [vmem:[%s2071_s3 + $0xc0] ss:$8 sps:$4 sm:$0xff]   ;;  %v1816_v12 = vld [vmem:[%s2071_s3 + $0xd4] ss:$8 sps:$4 sm:$0xff]  }
  0x43   : > { %v1836_v7 = vld [vmem:[%s2073_s4 + $0x4] ss:$24 sps:$4 sm:$0xff]   ;;  %v1815_v11 = vld [vmem:[%s2071_s3 + $0x1c0] ss:$8 sps:$4 sm:$0xff]   ;;  %v1820_v14 = vld [vmem:[%s2071_s3 + $0xd0] ss:$8 sps:$4 sm:$0xff]  }
  0x44   : > { %1008 = vmatpush1.bf16.msra.mxu1 %v1766_v40  ;;  %v1812_v8 = vld [vmem:[%s2071_s3 + $0x1c4] ss:$8 sps:$4 sm:$0xff]   ;;  %1031 = vmatprep.mubr.bf16.mxu1 %v1836_v7  ;;  %v1818_v13 = vld [vmem:[%s2071_s3 + $0x1d4] ss:$8 sps:$4 sm:$0xff]   ;;  %v1821_v15 = vld [vmem:[%s2071_s3 + $0x1d0] ss:$8 sps:$4 sm:$0xff]  }
  0x45   : > { %1079 = vmatpush1.bf16.msra.mxu0 %v1767_v41  ;;  %1009 = vmatprep.subr.bf16.mxu1 %v1768_v42  ;;  %v1839_v9 = vld [vmem:[%s2073_s4 + $0xc] ss:$24 sps:$4 sm:$0xff]   ;;  %v1826_v18 = vld [vmem:[%s2071_s3 + $0xe0] ss:$8 sps:$4 sm:$0xff]   ;;  %v1832_v22 = vld [vmem:[%s2071_s3 + $0xf0] ss:$8 sps:$4 sm:$0xff]  }
  0x46   : > { %1080 = vmatprep.subr.bf16.mxu0 %v1770_v43  ;;  %1102 = vmatprep.mubr.bf16.mxu0 %v1839_v9  ;;  %v1822_v16 = vld [vmem:[%s2071_s3 + $0xe4] ss:$8 sps:$4 sm:$0xff]   ;;  %v1827_v19 = vld [vmem:[%s2071_s3 + $0x1e0] ss:$8 sps:$4 sm:$0xff]   ;;  %v1828_v20 = vld [vmem:[%s2071_s3 + $0xf4] ss:$8 sps:$4 sm:$0xff]  }
  0x47   : > { %v1824_v17 = vld [vmem:[%s2071_s3 + $0x1e4] ss:$8 sps:$4 sm:$0xff]   ;;  %v1830_v21 = vld [vmem:[%s2071_s3 + $0x1f4] ss:$8 sps:$4 sm:$0xff]   ;;  %v1833_v23 = vld [vmem:[%s2071_s3 + $0x1f0] ss:$8 sps:$4 sm:$0xff]  }
  0x48   : > { %1010 = vmatpush1.bf16.msra.mxu1 %v1772_v44  ;;  %v1842_v24 = vld [vmem:[%s2071_s3 + $0x204] ss:$8 sps:$4 sm:$0xff]   ;;  %v1834_v25 = vld [vmem:[%s2073_s4] ss:$24 sps:$4 sm:$0xff]   ;;  %v1845_v28 = vld [vmem:[%s2071_s3 + $0x214] ss:$8 sps:$4 sm:$0xff]  }
  0x49   : > { %1081 = vmatpush1.bf16.msra.mxu0 %v1773_v45  ;;  %1011 = vmatprep.subr.bf16.mxu1 %v1774_v46  ;;  %v1837_v26 = vld [vmem:[%s2073_s4 + $0x8] ss:$24 sps:$4 sm:$0xff]   ;;  %v1867_v29 = vld [vmem:[%s2073_s4 + $0x34] ss:$24 sps:$4 sm:$0xff]   ;;  %v1875_v34 = vld [vmem:[%s2073_s4 + $0x38] ss:$24 sps:$4 sm:$0xff]  }
  0x4a   : > { %1082 = vmatprep.subr.bf16.mxu0 %v1776_v47  ;;  %v1840_v27 = vld [vmem:[%s2071_s3 + $0x200] ss:$8 sps:$4 sm:$0xff]   ;;  %v1869_v30 = vld [vmem:[%s2073_s4 + $0x3c] ss:$24 sps:$4 sm:$0xff]   ;;  %v1843_v31 = vld [vmem:[%s2071_s3 + $0x210] ss:$8 sps:$4 sm:$0xff]  }
  0x4b   : > { %v1848_v32 = vld [vmem:[%s2071_s3 + $0x224] ss:$8 sps:$4 sm:$0xff]   ;;  %v1874_v33 = vld [vmem:[%s2073_s4 + $0x30] ss:$24 sps:$4 sm:$0xff]   ;;  %v1851_v36 = vld [vmem:[%s2071_s3 + $0x234] ss:$8 sps:$4 sm:$0xff]  }
  0x4c   : > { %1012 = vmatpush1.bf16.msra.mxu1 %v1778_v48  ;;  %v1846_v35 = vld [vmem:[%s2071_s3 + $0x220] ss:$8 sps:$4 sm:$0xff]   ;;  %v1879_v37 = vld [vmem:[%s2073_s4 + $0x64] ss:$24 sps:$4 sm:$0xff]   ;;  %v1849_v39 = vld [vmem:[%s2071_s3 + $0x230] ss:$8 sps:$4 sm:$0xff]  }
  0x4d   : > { %1083 = vmatpush1.bf16.msra.mxu0 %v1779_v49  ;;  %1013 = vmatprep.subr.bf16.mxu1 %v1780_v50  ;;  %v1881_v38 = vld [vmem:[%s2073_s4 + $0x6c] ss:$24 sps:$4 sm:$0xff]   ;;  %v1886_v41 = vld [vmem:[%s2073_s4 + $0x60] ss:$24 sps:$4 sm:$0xff]   ;;  %v309_v44 = vld [vmem:[%s2073_s4 + $0x90] sm:$0x77] }
  0x4e   : > { %1084 = vmatprep.subr.bf16.mxu0 %v1782_v51  ;;  %v1854_v40 = vld [vmem:[%s2071_s3 + $0x244] ss:$8 sps:$4 sm:$0xff]   ;;  %v1887_v42 = vld [vmem:[%s2073_s4 + $0x68] ss:$24 sps:$4 sm:$0xff]   ;;  %v1857_v46 = vld [vmem:[%s2071_s3 + $0x254] ss:$8 sps:$4 sm:$0xff]   ;;  %v1531_v48 = vcombine.high %v309_v44, %v309_v44 }
  0x4f   : > { %v310_v43 = vld [vmem:[%s2073_s4 + $0x98] sm:$0x77]  ;;  %p1632_p11 = scmp.ne.s32.totalorder %s1949_s11, 1 }
  0x50   : > { %1014 = vmatpush1.bf16.msra.mxu1 %v1784_v52  ;;  %v1852_v45 = vld [vmem:[%s2071_s3 + $0x240] ss:$8 sps:$4 sm:$0xff]   ;;  %v1533_v47 = vcombine.high %v310_v43, %v310_v43  ;;  %v1855_v49 = vld [vmem:[%s2071_s3 + $0x250] ss:$8 sps:$4 sm:$0xff]   ;;  %v1860_v50 = vld [vmem:[%s2071_s3 + $0x264] ss:$8 sps:$4 sm:$0xff]   ;;  %v1532_v51 = vcombine.low %v310_v43, %v310_v43  ;;  %v1530_v52 = vcombine.low %v309_v44, %v309_v44 }
  0x51   : > { %1085 = vmatpush1.bf16.msra.mxu0 %v1785_v53  ;;  %1015 = vmatprep.subr.bf16.mxu1 %v1786_v54  ;;  %v1858_v53 = vld [vmem:[%s2071_s3 + $0x260] ss:$8 sps:$4 sm:$0xff]   ;;  %v1863_v54 = vld [vmem:[%s2071_s3 + $0x274] ss:$8 sps:$4 sm:$0xff]   ;;  %v1901_v9 = vld [vmem:[%s2071_s3 + $0x2f0] ss:$8 sps:$4 sm:$0xff]  }
  0x52   : > { %1086 = vmatprep.subr.bf16.mxu0 %v1788_v55  ;;  %v1906_v55 = vld [vmem:[%s2073_s4 + $0x14] ss:$24 sps:$4 sm:$0xff]   ;;  %v1898_v7 = vld [vmem:[%s2071_s3 + $0x2e0] ss:$8 sps:$4 sm:$0xff]   ;;  %vm1263_vm0 = vcmask (!%p1632_p11), 1045504  }
  0x54   : > { %1016 = vmatpush1.bf16.msra.mxu1 %v1790_v56  ;;  %v1909_v56 = vld [vmem:[%s2073_s4 + $0x74] ss:$24 sps:$4 sm:$0xff]  }
  0x55   : > { %1087 = vmatpush1.bf16.msra.mxu0 %v1791_v57  ;;  %1017 = vmatprep.subr.bf16.mxu1 %v1792_v58  ;;  %v1861_v57 = vld [vmem:[%s2071_s3 + $0x270] ss:$8 sps:$4 sm:$0xff]   ;;  %v1866_v58 = vld [vmem:[%s2071_s3 + $0x284] ss:$8 sps:$4 sm:$0xff]  }
  0x56   : > { %1088 = vmatprep.subr.bf16.mxu0 %v1794_v59  ;;  %v1864_v59 = vld [vmem:[%s2071_s3 + $0x280] ss:$8 sps:$4 sm:$0xff]  }
  0x58   : > { %1018 = vmatpush1.bf16.msra.mxu1 %v1796_v60  ;;  %v1873_v60 = vld [vmem:[%s2071_s3 + $0x294] ss:$8 sps:$4 sm:$0xff]  }
  0x59   : > { %1089 = vmatpush1.bf16.msra.mxu0 %v1797_v61  ;;  %1019 = vmatprep.subr.bf16.mxu1 %v1798_v62  ;;  %v1871_v61 = vld [vmem:[%s2071_s3 + $0x290] ss:$8 sps:$4 sm:$0xff]   ;;  %v1878_v62 = vld [vmem:[%s2071_s3 + $0x2a4] ss:$8 sps:$4 sm:$0xff]  }
  0x5a   : > { %1090 = vmatprep.subr.bf16.mxu0 %v1800_v63  ;;  %v1876_v63 = vld [vmem:[%s2071_s3 + $0x2a0] ss:$8 sps:$4 sm:$0xff]  }
  0x5c   : > { %1020 = vmatpush1.bf16.msra.mxu1 %v1802_v0  ;;  %v1885_v0 = vld [vmem:[%s2071_s3 + $0x2b4] ss:$8 sps:$4 sm:$0xff]  }
  0x5d   : > { %1091 = vmatpush1.bf16.msra.mxu0 %v1803_v1  ;;  %1021 = vmatprep.subr.bf16.mxu1 %v1804_v2  ;;  %v1883_v1 = vld [vmem:[%s2071_s3 + $0x2b0] ss:$8 sps:$4 sm:$0xff]   ;;  %v1890_v2 = vld [vmem:[%s2071_s3 + $0x2c4] ss:$8 sps:$4 sm:$0xff]  }
  0x5e   : > { %1092 = vmatprep.subr.bf16.mxu0 %v1806_v3  ;;  %v1888_v3 = vld [vmem:[%s2071_s3 + $0x2c0] ss:$8 sps:$4 sm:$0xff]  }
  0x60   : > { %1022 = vmatpush1.bf16.msra.mxu1 %v1808_v4  ;;  %v1894_v4 = vld [vmem:[%s2071_s3 + $0x2d4] ss:$8 sps:$4 sm:$0xff]  }
  0x61   : > { %1093 = vmatpush1.bf16.msra.mxu0 %v1809_v5  ;;  %1023 = vmatprep.subr.bf16.mxu1 %v1810_v6  ;;  %v1892_v5 = vld [vmem:[%s2071_s3 + $0x2d0] ss:$8 sps:$4 sm:$0xff]   ;;  %v1900_v6 = vld [vmem:[%s2071_s3 + $0x2e4] ss:$8 sps:$4 sm:$0xff]  }
  0x62   : > { %1094 = vmatprep.subr.bf16.mxu0 %v1812_v8  ;;  %v1903_v8 = vld [vmem:[%s2071_s3 + $0x2f4] ss:$8 sps:$4 sm:$0xff]  }
  0x64   : > { %1024 = vmatpush1.bf16.msra.mxu1 %v1814_v10  ;;  %v311_v10 = vld [vmem:[%s2073_s4 + $0xa0] sm:$0x77] }
  0x65   : > { %1095 = vmatpush1.bf16.msra.mxu0 %v1815_v11  ;;  %1025 = vmatprep.subr.bf16.mxu1 %v1816_v12  ;;  %v1904_v11 = vld [vmem:[%s2073_s4 + $0x10] ss:$24 sps:$4 sm:$0xff]  }
  0x66   : > { %1096 = vmatprep.subr.bf16.mxu0 %v1818_v13  ;;  %v1907_v12 = vld [vmem:[%s2073_s4 + $0x70] ss:$24 sps:$4 sm:$0xff]   ;;  %v1910_v13 = vld [vmem:[%s2073_s4 + $0x44] ss:$24 sps:$4 sm:$0xff]  }
  0x68   : > { %1026 = vmatpush1.bf16.msra.mxu1 %v1820_v14  ;;  %v1535_v14 = vcombine.high %v311_v10, %v311_v10 }
  0x69   : > { %1097 = vmatpush1.bf16.msra.mxu0 %v1821_v15  ;;  %1027 = vmatprep.subr.bf16.mxu1 %v1822_v16  ;;  %v1913_v15 = vld [vmem:[%s2073_s4 + $0x40] ss:$24 sps:$4 sm:$0xff]   ;;  %v1534_v16 = vcombine.low %v311_v10, %v311_v10 }
  0x6a   : > { %1098 = vmatprep.subr.bf16.mxu0 %v1824_v17 }
  0x6c   : > { %1028 = vmatpush1.bf16.msra.mxu1 %v1826_v18 }
  0x6d   : > { %1099 = vmatpush1.bf16.msra.mxu0 %v1827_v19  ;;  %1029 = vmatprep.subr.bf16.mxu1 %v1828_v20 }
  0x6e   : > { %1100 = vmatprep.subr.bf16.mxu0 %v1830_v21 }
  0x70   : > { %1030 = vmatpush1.bf16.msra.mxu1 %v1832_v22 }
  0x71   : > { %1101 = vmatpush1.bf16.msra.mxu0 %v1833_v23  ;;  %1639 = vmatprep.subr.bf16.mxu1 %v1842_v24 }
  0x72   : > { %1141 = vmatprep.subr.bf16.mxu0 %v1842_v24 }
  0x73   : > { %1032 = vmatmul.mubr.bf16.vlgmr.msra.gmra.mrb[0].mxu1 %v1834_v25 }
  0x74   : > { %1103 = vmatmul.mubr.bf16.vlgmr.msra.gmra.mrb[0].mxu0 %v1837_v26  ;;  %1655 = vmatpush1.bf16.msra.mxu1 %v1840_v27 }
  0x75   : > { %1142 = vmatpush1.bf16.msra.mxu0 %v1840_v27  ;;  %1640 = vmatprep.subr.bf16.mxu1 %v1845_v28 }
  0x76   : > { %1143 = vmatprep.subr.bf16.mxu0 %v1845_v28  ;;  %1041 = vmatprep.mubr.bf16.mxu1 %v1867_v29 }
  0x77   : > { %1112 = vmatprep.mubr.bf16.mxu0 %v1869_v30 }
  0x78   : > { %1656 = vmatpush1.bf16.msra.mxu1 %v1843_v31 }
  0x79   : > { %1144 = vmatpush1.bf16.msra.mxu0 %v1843_v31  ;;  %1641 = vmatprep.subr.bf16.mxu1 %v1848_v32 }
  0x7a   : > { %1145 = vmatprep.subr.bf16.mxu0 %v1848_v32 }
  0x7b   : > { %1042 = vmatmul.mubr.bf16.gmra.mrb[4].mxu1 %v1874_v33 }
  0x7c   : > { %1113 = vmatmul.mubr.bf16.gmra.mrb[4].mxu0 %v1875_v34  ;;  %1657 = vmatpush1.bf16.msra.mxu1 %v1846_v35 }
  0x7d   : > { %1146 = vmatpush1.bf16.msra.mxu0 %v1846_v35  ;;  %1642 = vmatprep.subr.bf16.mxu1 %v1851_v36 }
  0x7e   : > { %1147 = vmatprep.subr.bf16.mxu0 %v1851_v36  ;;  %1051 = vmatprep.mubr.bf16.mxu1 %v1879_v37 }
  0x7f   : > { %1122 = vmatprep.mubr.bf16.mxu0 %v1881_v38 }
  0x80   : > { %1658 = vmatpush1.bf16.msra.mxu1 %v1849_v39 }
  0x81   : > { %1148 = vmatpush1.bf16.msra.mxu0 %v1849_v39  ;;  %1643 = vmatprep.subr.bf16.mxu1 %v1854_v40 }
  0x82   : > { %1149 = vmatprep.subr.bf16.mxu0 %v1854_v40 }
  0x83   : > { %1052 = vmatmul.mubr.bf16.gmra.mrb[8].mxu1 %v1886_v41 }
  0x84   : > { %1123 = vmatmul.mubr.bf16.gmra.mrb[8].mxu0 %v1887_v42  ;;  %1659 = vmatpush1.bf16.msra.mxu1 %v1852_v45 }
  0x85   : > { %1150 = vmatpush1.bf16.msra.mxu0 %v1852_v45  ;;  %1644 = vmatprep.subr.bf16.mxu1 %v1857_v46 }
  0x86   : > { %1151 = vmatprep.subr.bf16.mxu0 %v1857_v46  ;;  %1132 = vmatprep.mubr.bf16.mxu0 %v1533_v47  ;;  %v277_v47 = vld [vmem:[#allocation2] sm:$0xff] }
  0x87   : > { %1061 = vmatprep.mubr.bf16.mxu1 %v1531_v48 }
  0x88   : > { %1660 = vmatpush1.bf16.msra.mxu1 %v1855_v49 }
  0x89   : > { %1152 = vmatpush1.bf16.msra.mxu0 %v1855_v49  ;;  %1645 = vmatprep.subr.bf16.mxu1 %v1860_v50  ;;  %v285_v49 = vld [vmem:[#allocation2 + $0x40] sm:$0xff] }
  0x8a   : > { %1153 = vmatprep.subr.bf16.mxu0 %v1860_v50 }
  0x8b   : > { %1062 = vmatmul.mubr.bf16.gmra.mrb[12].mxu1 %v1530_v52 }
  0x8c   : > { %1133 = vmatmul.mubr.bf16.gmra.mrb[12].mxu0 %v1532_v51  ;;  %1661 = vmatpush1.bf16.msra.mxu1 %v1858_v53 }
  0x8d   : > { %1154 = vmatpush1.bf16.msra.mxu0 %v1858_v53  ;;  %1646 = vmatprep.subr.bf16.mxu1 %v1863_v54  ;;  %v278_v53 = vld [vmem:[#allocation2 + $0x8] sm:$0xff] }
  0x8e   : > { %1155 = vmatprep.subr.bf16.mxu0 %v1863_v54  ;;  %1173 = vmatprep.mubr.bf16.mxu0 %v1906_v55  ;;  %v286_v55 = vld [vmem:[#allocation2 + $0x48] sm:$0xff] }
  0x8f   : > { %1193 = vmatprep.mubr.bf16.mxu1 %v1909_v56 }
  0x90   : > { %1662 = vmatpush1.bf16.msra.mxu1 %v1861_v57 }
  0x91   : > { %1156 = vmatpush1.bf16.msra.mxu0 %v1861_v57  ;;  %1647 = vmatprep.subr.bf16.mxu1 %v1866_v58 }
  0x92   : > { %1157 = vmatprep.subr.bf16.mxu0 %v1866_v58 }
  0x94   : > { %1663 = vmatpush1.bf16.msra.mxu1 %v1864_v59 }
  0x95   : > { %1158 = vmatpush1.bf16.msra.mxu0 %v1864_v59  ;;  %1648 = vmatprep.subr.bf16.mxu1 %v1873_v60  ;;  %v279_v59 = vld [vmem:[#allocation2 + $0x10] sm:$0xff] }
  0x96   : > { %1159 = vmatprep.subr.bf16.mxu0 %v1873_v60 }
  0x98   : > { %1664 = vmatpush1.bf16.msra.mxu1 %v1871_v61 }
  0x99   : > { %1160 = vmatpush1.bf16.msra.mxu0 %v1871_v61  ;;  %1649 = vmatprep.subr.bf16.mxu1 %v1878_v62  ;;  %v287_v61 = vld [vmem:[#allocation2 + $0x50] sm:$0xff] }
  0x9a   : > { %1161 = vmatprep.subr.bf16.mxu0 %v1878_v62 }
  0x9c   : > { %1665 = vmatpush1.bf16.msra.mxu1 %v1876_v63 }
  0x9d   : > { %1162 = vmatpush1.bf16.msra.mxu0 %v1876_v63  ;;  %1650 = vmatprep.subr.bf16.mxu1 %v1885_v0 }
  0x9e   : > { %1163 = vmatprep.subr.bf16.mxu0 %v1885_v0 }
  0xa0   : > { %1666 = vmatpush1.bf16.msra.mxu1 %v1883_v1 }
  0xa1   : > { %1164 = vmatpush1.bf16.msra.mxu0 %v1883_v1  ;;  %1651 = vmatprep.subr.bf16.mxu1 %v1890_v2 }
  0xa2   : > { %1165 = vmatprep.subr.bf16.mxu0 %v1890_v2 }
  0xa4   : > { %1667 = vmatpush1.bf16.msra.mxu1 %v1888_v3 }
  0xa5   : > { %1166 = vmatpush1.bf16.msra.mxu0 %v1888_v3  ;;  %1652 = vmatprep.subr.bf16.mxu1 %v1894_v4  ;;  %v280_v3 = vld [vmem:[#allocation2 + $0x18] sm:$0xff] }
  0xa6   : > { %1167 = vmatprep.subr.bf16.mxu0 %v1894_v4 }
  0xa8   : > { %1668 = vmatpush1.bf16.msra.mxu1 %v1892_v5 }
  0xa9   : > { %1168 = vmatpush1.bf16.msra.mxu0 %v1892_v5  ;;  %1653 = vmatprep.subr.bf16.mxu1 %v1900_v6  ;;  %v288_v5 = vld [vmem:[#allocation2 + $0x58] sm:$0xff] }
  0xaa   : > { %1169 = vmatprep.subr.bf16.mxu0 %v1900_v6 }
  0xac   : > { %1669 = vmatpush1.bf16.msra.mxu1 %v1898_v7 }
  0xad   : > { %1170 = vmatpush1.bf16.msra.mxu0 %v1898_v7  ;;  %1654 = vmatprep.subr.bf16.mxu1 %v1903_v8 }
  0xae   : > { %1171 = vmatprep.subr.bf16.mxu0 %v1903_v8 }
  0xb0   : > { %1670 = vmatpush1.bf16.msra.mxu1 %v1901_v9 }
  0xb1   : > { %1172 = vmatpush1.bf16.msra.mxu0 %v1901_v9 }
  0xb3   : > { %1194 = vmatmul.mubr.bf16.vlgmr.msra.gmra.mrb[16].mxu1 %v1907_v12 }
  0xb4   : > { %1174 = vmatmul.mubr.bf16.vlgmr.msra.gmra.mrb[0].mxu0 %v1904_v11  ;;  %1203 = vmatprep.mubr.bf16.mxu1 %v1535_v14 }
  0xb5   : > { %1183 = vmatprep.mubr.bf16.mxu0 %v1910_v13 }
  0xbb   : > { %1204 = vmatmul.mubr.bf16.gmra.mrb[20].mxu1 %v1534_v16 }
  0xbc   : > { %1184 = vmatmul.mubr.bf16.gmra.mrb[4].mxu0 %v1913_v15  ;;  %v281_v15 = vld [vmem:[#allocation2 + $0x20] sm:$0xff] }
 0x146   : > { %v1033_v17 = vpop.f32.mrb[0].mxu1 }
 0x147   : > { %v1035_v18 = vpop.f32.mrb[1].mxu1 }
 0x148   : > { %v1037_v19 = vpop.f32.mrb[2].mxu1 }
 0x149   : > { %v1039_v20 = vpop.f32.mrb[3].mxu1 }
 0x14e   : > { %v2193_v21 = vpop.f32.mrb[4].mxu1 }
 0x14f   : > { %v2195_v22 = vpop.f32.mrb[5].mxu1 }
 0x150   : > { %v2197_v23 = vpop.f32.mrb[6].mxu1 }
 0x151   : > { %v2199_v24 = vpop.f32.mrb[7].mxu1 }
 0x156   : > { %v1053_v25 = vpop.f32.mrb[8].mxu1 }
 0x157   : > { %v1124_v26 = vpop.f32.mrb[8].mxu0  ;;  %v1055_v28 = vpop.f32.mrb[9].mxu1 }
 0x158   : > { %v1125_v27 = vadd.f32 %v1124_v26, %v1053_v25  ;;  %v1126_v29 = vpop.f32.mrb[9].mxu0  ;;  %v1057_v31 = vpop.f32.mrb[10].mxu1  ;;  %v282_v25 = vld [vmem:[#allocation2 + $0x28] sm:$0xff] }
 0x159   : > { %v1127_v30 = vadd.f32 %v1126_v29, %v1055_v28  ;;  %v1128_v32 = vpop.f32.mrb[10].mxu0  ;;  %v1059_v34 = vpop.f32.mrb[11].mxu1 }
 0x15a   : > { %v1129_v33 = vadd.f32 %v1128_v32, %v1057_v31  ;;  %v1130_v35 = vpop.f32.mrb[11].mxu0  ;;  %v283_v31 = vld [vmem:[#allocation2 + $0x30] sm:$0xff] }
 0x15b   : > { %v1131_v36 = vadd.f32 %v1130_v35, %v1059_v34 }
 0x15e   : > { %v1063_v38 = vpop.f32.mrb[12].mxu1 }
 0x15f   : > { %v1134_v37 = vpop.f32.mrb[12].mxu0  ;;  %v1065_v41 = vpop.f32.mrb[13].mxu1 }
 0x160   : > { %v1136_v39 = vpop.f32.mrb[13].mxu0  ;;  %v1135_v40 = vadd.f32 %v1134_v37, %v1063_v38  ;;  %v1067_v44 = vpop.f32.mrb[14].mxu1  ;;  %v284_v37 = vld [vmem:[#allocation2 + $0x38] sm:$0xff] }
 0x161   : > { %v1138_v42 = vpop.f32.mrb[14].mxu0  ;;  %v1137_v43 = vadd.f32 %v1136_v39, %v1065_v41  ;;  %v1068_v46 = vpop.f32.mrb[15].mxu1 }
 0x162   : > { %v1139_v45 = vpop.f32.mrb[15].mxu0 }
 0x186   : > { %v1195_v50 = vpop.f32.mrb[16].mxu1 }
 0x187   : > { %v1175_v48 = vpop.f32.mrb[0].mxu0  ;;  %v1196_v52 = vadd.f32 %v1195_v50, %v1125_v27  ;;  %v1197_v56 = vpop.f32.mrb[17].mxu1  ;;  %v290_v27 = vld [vmem:[#allocation2 + $0x68] sm:$0x3f] }
 0x188   : > { %v1671_v51 = vadd.f32 %v1175_v48, %v1033_v17  ;;  %v1177_v54 = vpop.f32.mrb[1].mxu0  ;;  %v1198_v58 = vadd.f32 %v1197_v56, %v1127_v30  ;;  %v1199_v62 = vpop.f32.mrb[18].mxu1  ;;  %v289_v17 = vld [vmem:[#allocation2 + $0x60] sm:$0x3f] }
 0x189   : > { %v1672_v57 = vadd.f32 %v1177_v54, %v1035_v18  ;;  %v1179_v60 = vpop.f32.mrb[2].mxu0  ;;  %v1220_v0 = vadd.f32 %v1196_v52, %v285_v49  ;;  %v1200_v2 = vadd.f32 %v1199_v62, %v1129_v33  ;;  %v1201_v6 = vpop.f32.mrb[19].mxu1 }
 0x18a   : > { %v1212_v63 = vadd.f32 %v1671_v51, %v277_v47  ;;  %v1673_v1 = vadd.f32 %v1179_v60, %v1037_v19  ;;  %v1181_v4 = vpop.f32.mrb[3].mxu0  ;;  %v1221_v8 = vadd.f32 %v1198_v58, %v286_v55  ;;  %v1202_v10 = vadd.f32 %v1201_v6, %v1131_v36 }
 0x18b   : > { %v1213_v7 = vadd.f32 %v1672_v57, %v278_v53  ;;  %v1674_v9 = vadd.f32 %v1181_v4, %v1039_v20  ;;  %1234 = vst [vmem:[#allocation2 + $0x40] sm:$0xff] %v1220_v0  ;;  %v1222_v12 = vadd.f32 %v1200_v2, %v287_v61 }
 0x18c   : > { %1226 = vst [vmem:[#allocation2] sm:$0xff] %v1212_v63  ;;  %v1214_v11 = vadd.f32 %v1673_v1, %v279_v59  ;;  %1235 = vst [vmem:[#allocation2 + $0x48] sm:$0xff] %v1221_v8  ;;  %v1223_v14 = vadd.f32 %v1202_v10, %v288_v5 }
 0x18d   : > { %1227 = vst [vmem:[#allocation2 + $0x8] sm:$0xff] %v1213_v7  ;;  %v1215_v13 = vadd.f32 %v1674_v9, %v280_v3  ;;  %1236 = vst [vmem:[#allocation2 + $0x50] sm:$0xff] %v1222_v12 }
 0x18e   : > { %1228 = vst [vmem:[#allocation2 + $0x10] sm:$0xff] %v1214_v11  ;;  %1237 = vst [vmem:[#allocation2 + $0x58] sm:$0xff] %v1223_v14  ;;  %v1205_v18 = vpop.f32.mrb[20].mxu1 }
 0x18f   : > { %1229 = vst [vmem:[#allocation2 + $0x18] sm:$0xff] %v1215_v13  ;;  %v1185_v16 = vpop.f32.mrb[4].mxu0  ;;  %v1206_v20 = vadd.f32 %v1205_v18, %v1135_v40  ;;  %v1207_v28 = vpop.f32.mrb[21].mxu1 }
 0x190   : > { %v1675_v19 = vadd.f32 %v1185_v16, %v2193_v21  ;;  %v1187_v26 = vpop.f32.mrb[5].mxu0  ;;  %v1208_v30 = vadd.f32 %v1207_v28, %v1137_v43  ;;  %v1209_v33 = vpop.f32.mrb[22].mxu1 }
 0x191   : > { %v1676_v29 = vadd.f32 %v1187_v26, %v2195_v22  ;;  %v1189_v32 = vpop.f32.mrb[6].mxu0  ;;  %v1224_v35 = vadd.f32 %v1206_v20, %v289_v17  ;;  %v1210_v39 = vpop.f32.mrb[23].mxu1  ;;  %1243 = sbr.rel (%p1632_p11) target bundleno = 496 (0x1f0), region = 59 }
 0x192   : > { %v1216_v34 = vadd.f32 %v1675_v19, %v281_v15  ;;  %v1677_v36 = vadd.f32 %v1189_v32, %v2197_v23  ;;  %v1191_v38 = vpop.f32.mrb[7].mxu0  ;;  %v1225_v21 = vadd.f32 %v1208_v30, %v290_v27  ;;  %v1252_v51 = vld [vmem:[#allocation2 + $0x40] sm:$0xff] (!%p1632_p11) }
 0x193   : > { %v1217_v41 = vadd.f32 %v1676_v29, %v282_v25  ;;  %v1678_v40 = vadd.f32 %v1191_v38, %v2199_v24  ;;  %1238 = vst [vmem:[#allocation2 + $0x60] sm:$0x3f] %v1224_v35  ;;  %v1244_v43 = vld [vmem:[#allocation2] sm:$0xff] (!%p1632_p11)  ;;  %v1253_v57 = vld [vmem:[#allocation2 + $0x48] sm:$0xff] (!%p1632_p11) }
 0x194   : > { %1230 = vst [vmem:[#allocation2 + $0x20] sm:$0xff] %v1216_v34  ;;  %v1218_v42 = vadd.f32 %v1677_v36, %v283_v31  ;;  %1239 = vst [vmem:[#allocation2 + $0x68] sm:$0x3f] %v1225_v21  ;;  %v1245_v47 = vld [vmem:[#allocation2 + $0x8] sm:$0xff] (!%p1632_p11)  ;;  %v1254_v56 = vld [vmem:[#allocation2 + $0x50] sm:$0xff] (!%p1632_p11) }
 0x195   : > { %1231 = vst [vmem:[#allocation2 + $0x28] sm:$0xff] %v1217_v41  ;;  %v1219_v22 = vadd.f32 %v1678_v40, %v284_v37  ;;  %v1246_v23 = vld [vmem:[#allocation2 + $0x10] sm:$0xff] (!%p1632_p11)  ;;  %v1255_v62 = vld [vmem:[#allocation2 + $0x58] sm:$0xff] (!%p1632_p11) }
 0x196   : > { %1232 = vst [vmem:[#allocation2 + $0x30] sm:$0xff] %v1218_v42  ;;  %v1258_v45 = vadd.f32 (!%p1632_p11), %v1246_v23, %v1244_v43  ;;  %v1247_v48 = vld [vmem:[#allocation2 + $0x18] sm:$0xff] (!%p1632_p11) }
 0x197   : > { %1233 = vst [vmem:[#allocation2 + $0x38] sm:$0xff] %v1219_v22  ;;  %v1272_v50 = vadd.f32 (!%p1632_p11), %v1247_v48, %v1245_v47 }
 0x19a   : > { %v1256_v53 = vld [vmem:[#allocation2 + $0x60] sm:$0x3f] }
 0x19b   : > { %v1248_v44 = vld [vmem:[#allocation2 + $0x20] sm:$0xff]  ;;  %v1257_v59 = vld [vmem:[#allocation2 + $0x68] sm:$0x3f]  ;;  %v1264_v61 = vsel %vm1263_vm0, %v1256_v53, 0.0 }
 0x19c   : > { %v1259_v49 = vadd.f32 %v1258_v45, %v1248_v44  ;;  %v1249_v24 = vld [vmem:[#allocation2 + $0x28] sm:$0xff]  ;;  %v1277_v1 = vsel %vm1263_vm0, %v1257_v59, 0.0 }
 0x19d   : > { %v1250_v46 = vld [vmem:[#allocation2 + $0x30] sm:$0xff]  ;;  %v1273_v55 = vadd.f32 %v1272_v50, %v1249_v24 }
 0x19e   : > { %v1251_v52 = vld [vmem:[#allocation2 + $0x38] sm:$0xff]  ;;  %v1260_v54 = vadd.f32 %v1259_v49, %v1250_v46 }
 0x19f   : > { %v1274_v60 = vadd.f32 %v1273_v55, %v1251_v52 }
 0x1a0   : > { %v1261_v58 = vadd.f32 %v1260_v54, %v1252_v51 }
 0x1a1   : > { %v1275_v0 = vadd.f32 %v1274_v60, %v1253_v57 }
 0x1a2   : > { %v1262_v63 = vadd.f32 %v1261_v58, %v1254_v56 }
 0x1a3   : > { %v1276_v3 = vadd.f32 %v1275_v0, %v1255_v62 }
 0x1a4   : > { %v1265_v2 = vadd.f32 %v1264_v61, %v1262_v63 }
 0x1a5   : > { %v1278_v5 = vadd.f32 %v1277_v1, %v1276_v3 }
 0x1a6   : > { %v1266_v4 = vrot.slane %v1265_v2, 4 }
 0x1a7   : > { %v1279_v7 = vrot.slane %v1278_v5, 4 }
 0x1a8   : > { %v1267_v6 = vadd.f32 %v1266_v4, %v1265_v2 }
 0x1a9   : > { %v1280_v9 = vadd.f32 %v1279_v7, %v1278_v5 }
 0x1aa   : > { %v1268_v8 = vrot.slane %v1267_v6, 2 }
 0x1ab   : > { %v1281_v11 = vrot.slane %v1280_v9, 2 }
 0x1ac   : > { %v1269_v10 = vadd.f32 %v1268_v8, %v1267_v6 }
 0x1ad   : > { %v1282_v13 = vadd.f32 %v1281_v11, %v1280_v9 }
 0x1ae   : > { %v1270_v12 = vrot.slane %v1269_v10, 1 }
 0x1af   : > { %v1283_v15 = vrot.slane %v1282_v13, 1 }
 0x1b0   : > { %v1271_v14 = vadd.f32 %v1270_v12, %v1269_v10 }
 0x1b1   : > { %v1284_v17 = vadd.f32 %v1283_v15, %v1282_v13 }
 0x1b2   : > { %v1286_v16 = vmul.f32 0.018518519, %v1271_v14 }
 0x1b3   : > { %v1287_v27 = vmul.f32 0.018518519, %v1284_v17 }
 0x1b4   : > { %v1288_v18 = vsub.f32 %v1244_v43, %v1286_v16  ;;  %v1290_v19 = vsub.f32 %v1246_v23, %v1286_v16  ;;  %v1292_v20 = vsub.f32 %v1248_v44, %v1286_v16  ;;  %v1294_v25 = vsub.f32 %v1250_v46, %v1286_v16 }
 0x1b5   : > { %v1296_v26 = vsub.f32 %v1252_v51, %v1286_v16  ;;  %v1298_v31 = vsub.f32 %v1254_v56, %v1286_v16  ;;  %v1300_v32 = vsub.f32 %v1256_v53, %v1286_v16  ;;  %v2208_v34 = vsub.f32 %v1245_v47, %v1287_v27 }
 0x1b6   : > { %v1302_v28 = vmul.f32 %v1288_v18, %v1288_v18  ;;  %v1304_v29 = vmul.f32 %v1290_v19, %v1290_v19  ;;  %v1306_v30 = vmul.f32 %v1292_v20, %v1292_v20  ;;  %v1308_v33 = vmul.f32 %v1294_v25, %v1294_v25 }
 0x1b7   : > { %v2210_v36 = vsub.f32 %v1247_v48, %v1287_v27  ;;  %v2212_v37 = vsub.f32 %v1249_v24, %v1287_v27  ;;  %v2214_v38 = vsub.f32 %v1251_v52, %v1287_v27  ;;  %v1310_v39 = vmul.f32 %v1296_v26, %v1296_v26 }
 0x1b8   : > { %v1316_v35 = vadd.f32 %v1304_v29, %v1302_v28  ;;  %v2216_v41 = vsub.f32 %v1253_v57, %v1287_v27  ;;  %v1303_v40 = vmul.f32 %v2208_v34, %v2208_v34  ;;  %v1312_v43 = vmul.f32 %v1298_v31, %v1298_v31 }
 0x1b9   : > { %v1305_v42 = vmul.f32 %v2210_v36, %v2210_v36  ;;  %v1307_v22 = vmul.f32 %v2212_v37, %v2212_v37  ;;  %v1314_v23 = vmul.f32 %v1300_v32, %v1300_v32  ;;  %v2224_v44 = vsub.f32 %v1257_v59, %v1287_v27 }
 0x1ba   : > { %v1317_v21 = vadd.f32 %v1316_v35, %v1306_v30  ;;  %v2226_v46 = vsub.f32 %v1255_v62, %v1287_v27  ;;  %v1309_v47 = vmul.f32 %v2214_v38, %v2214_v38  ;;  %v1311_v24 = vmul.f32 %v2216_v41, %v2216_v41 }
 0x1bb   : > { %v1329_v48 = vadd.f32 %v1305_v42, %v1303_v40  ;;  %v1321_v51 = vsel %vm1263_vm0, %v1314_v23, 0.0  ;;  %v1315_v52 = vmul.f32 %v2224_v44, %v2224_v44 }
 0x1bc   : > { %v1318_v45 = vadd.f32 %v1317_v21, %v1308_v33  ;;  %v1313_v54 = vmul.f32 %v2226_v46, %v2226_v46 }
 0x1bd   : > { %v1330_v50 = vadd.f32 %v1329_v48, %v1307_v22  ;;  %v1334_v58 = vsel %vm1263_vm0, %v1315_v52, 0.0 }
 0x1be   : > { %v1319_v49 = vadd.f32 %v1318_v45, %v1310_v39 }
 0x1bf   : > { %v1331_v55 = vadd.f32 %v1330_v50, %v1309_v47 }
 0x1c0   : > { %v1320_v53 = vadd.f32 %v1319_v49, %v1312_v43 }
 0x1c1   : > { %v1332_v57 = vadd.f32 %v1331_v55, %v1311_v24 }
 0x1c2   : > { %v1322_v56 = vadd.f32 %v1321_v51, %v1320_v53 }
 0x1c3   : > { %v1333_v60 = vadd.f32 %v1332_v57, %v1313_v54 }
 0x1c4   : > { %v1323_v59 = vrot.slane %v1322_v56, 4 }
 0x1c5   : > { %v1335_v62 = vadd.f32 %v1334_v58, %v1333_v60 }
 0x1c6   : > { %v1324_v61 = vadd.f32 %v1323_v59, %v1322_v56 }
 0x1c7   : > { %v1336_v0 = vrot.slane %v1335_v62, 4 }
 0x1c8   : > { %v1325_v63 = vrot.slane %v1324_v61, 2 }
 0x1c9   : > { %v1337_v2 = vadd.f32 %v1336_v0, %v1335_v62 }
 0x1ca   : > { %v1326_v1 = vadd.f32 %v1325_v63, %v1324_v61 }
 0x1cb   : > { %v1338_v4 = vrot.slane %v1337_v2, 2 }
 0x1cc   : > { %v1327_v3 = vrot.slane %v1326_v1, 1 }
 0x1cd   : > { %v1339_v6 = vadd.f32 %v1338_v4, %v1337_v2 }
 0x1ce   : > { %v1328_v5 = vadd.f32 %v1327_v3, %v1326_v1 }
 0x1cf   : > { %v1340_v8 = vrot.slane %v1339_v6, 1 }
 0x1d0   : > { %v1342_v7 = vmul.f32 0.018518519, %v1328_v5 }
 0x1d1   : > { %v1341_v10 = vadd.f32 %v1340_v8, %v1339_v6 }
 0x1d2   : > { %v1344_v9 = vadd.f32 1e-05, %v1342_v7 }
 0x1d3   : > { %v1343_v11 = vmul.f32 0.018518519, %v1341_v10 }
 0x1d4   : > { %1915 = vrsqrt.f32 %v1344_v9 }
 0x1d5   : > { %v1345_v12 = vadd.f32 1e-05, %v1343_v11 }
 0x1d7   : > { %1917 = vrsqrt.f32 %v1345_v12 }
 0x1de   : > { %v1916_v13 = vpop.eup %1915 }
 0x1df   : > { %v1348_v14 = vmul.f32 %v1916_v13, %v1288_v18  ;;  %v1350_v15 = vmul.f32 %v1916_v13, %v1290_v19  ;;  %v1352_v16 = vmul.f32 %v1916_v13, %v1292_v20  ;;  %v1354_v17 = vmul.f32 %v1916_v13, %v1294_v25 }
 0x1e0   : > { %v1356_v27 = vmul.f32 %v1916_v13, %v1296_v26  ;;  %v1358_v28 = vmul.f32 %v1916_v13, %v1298_v31  ;;  %v1360_v29 = vmul.f32 %v1916_v13, %v1300_v32 }
 0x1e1   : > { %vm1362_vm1 = vcmp.gt.f32.partialorder %v1348_v14, 0.0  ;;  %v1376_v30 = vmul.f32 0.0, %v1348_v14  ;;  %vm1364_vm2 = vcmp.gt.f32.partialorder %v1350_v15, 0.0  ;;  %v1378_v33 = vmul.f32 0.0, %v1350_v15  ;;  %v1918_v35 = vpop.eup %1917 }
 0x1e2   : > { %vm1366_vm3 = vcmp.gt.f32.partialorder %v1352_v16, 0.0  ;;  %v1380_v39 = vmul.f32 0.0, %v1352_v16  ;;  %vm1368_vm4 = vcmp.gt.f32.partialorder %v1354_v17, 0.0  ;;  %v1382_v21 = vmul.f32 0.0, %v1354_v17 }
 0x1e3   : > { %v1390_v40 = vsel %vm1362_vm1, %v1348_v14, %v1376_v30  ;;  %v1349_v42 = vmul.f32 %v1918_v35, %v2208_v34  ;;  %v1392_v22 = vsel %vm1364_vm2, %v1350_v15, %v1378_v33  ;;  %v1351_v18 = vmul.f32 %v1918_v35, %v2210_v36 }
 0x1e4   : > { %1404 = vst [vmem:[%s2304_s2] sm:$0xff] %v1390_v40  ;;  %1406 = vst [vmem:[%s2304_s2 + $0x10] sm:$0xff] %v1392_v22  ;;  %v1394_v19 = vsel %vm1366_vm3, %v1352_v16, %v1380_v39  ;;  %v1353_v20 = vmul.f32 %v1918_v35, %v2212_v37  ;;  %v1396_v25 = vsel %vm1368_vm4, %v1354_v17, %v1382_v21  ;;  %vm1370_vm9 = vcmp.gt.f32.partialorder %v1356_v27, 0.0 }
 0x1e5   : > { %v1355_v26 = vmul.f32 %v1918_v35, %v2214_v38  ;;  %vm1363_vm5 = vcmp.gt.f32.partialorder %v1349_v42, 0.0  ;;  %v1377_v31 = vmul.f32 0.0, %v1349_v42  ;;  %vm1365_vm6 = vcmp.gt.f32.partialorder %v1351_v18, 0.0  ;;  %1408 = vst [vmem:[%s2304_s2 + $0x20] sm:$0xff] %v1394_v19  ;;  %1410 = vst [vmem:[%s2304_s2 + $0x30] sm:$0xff] %v1396_v25 }
 0x1e6   : > { %v1379_v32 = vmul.f32 0.0, %v1351_v18  ;;  %vm1367_vm7 = vcmp.gt.f32.partialorder %v1353_v20, 0.0  ;;  %v1381_v34 = vmul.f32 0.0, %v1353_v20  ;;  %v1384_v38 = vmul.f32 0.0, %v1356_v27 }
 0x1e7   : > { %vm1369_vm8 = vcmp.gt.f32.partialorder %v1355_v26, 0.0  ;;  %v1383_v36 = vmul.f32 0.0, %v1355_v26  ;;  %v1391_v37 = vsel %vm1363_vm5, %v1349_v42, %v1377_v31  ;;  %v1357_v47 = vmul.f32 %v1918_v35, %v2216_v41 }
 0x1e8   : > { %v1393_v43 = vsel %vm1365_vm6, %v1351_v18, %v1379_v32  ;;  %1405 = vst [vmem:[%s2304_s2 + $0x8] sm:$0xff] %v1391_v37  ;;  %v1395_v23 = vsel %vm1367_vm7, %v1353_v20, %v1381_v34  ;;  %vm1372_vm10 = vcmp.gt.f32.partialorder %v1358_v28, 0.0  ;;  %v1398_v48 = vsel %vm1370_vm9, %v1356_v27, %v1384_v38 }
 0x1e9   : > { %1407 = vst [vmem:[%s2304_s2 + $0x18] sm:$0xff] %v1393_v43  ;;  %v1397_v45 = vsel %vm1369_vm8, %v1355_v26, %v1383_v36  ;;  %1409 = vst [vmem:[%s2304_s2 + $0x28] sm:$0xff] %v1395_v23  ;;  %v1386_v49 = vmul.f32 0.0, %v1358_v28  ;;  %v1359_v24 = vmul.f32 %v1918_v35, %v2226_v46  ;;  %vm1374_vm11 = vcmp.gt.f32.partialorder %v1360_v29, 0.0 }
 0x1ea   : > { %1411 = vst [vmem:[%s2304_s2 + $0x38] sm:$0xff] %v1397_v45  ;;  %1412 = vst [vmem:[%s2304_s2 + $0x40] sm:$0xff] %v1398_v48  ;;  %vm1371_vm12 = vcmp.gt.f32.partialorder %v1357_v47, 0.0  ;;  %v1385_v41 = vmul.f32 0.0, %v1357_v47  ;;  %v1388_v50 = vmul.f32 0.0, %v1360_v29  ;;  %v1361_v51 = vmul.f32 %v1918_v35, %v2224_v44 }
 0x1eb   : > { %v1400_v52 = vsel %vm1372_vm10, %v1358_v28, %v1386_v49  ;;  %vm1373_vm13 = vcmp.gt.f32.partialorder %v1359_v24, 0.0  ;;  %v1387_v53 = vmul.f32 0.0, %v1359_v24 }
 0x1ec   : > { %v1399_v54 = vsel %vm1371_vm12, %v1357_v47, %v1385_v41  ;;  %1414 = vst [vmem:[%s2304_s2 + $0x50] sm:$0xff] %v1400_v52  ;;  %v1402_v55 = vsel %vm1374_vm11, %v1360_v29, %v1388_v50  ;;  %vm1375_vm14 = vcmp.gt.f32.partialorder %v1361_v51, 0.0  ;;  %v1389_v46 = vmul.f32 0.0, %v1361_v51 }
 0x1ed   : > { %1413 = vst [vmem:[%s2304_s2 + $0x48] sm:$0xff] %v1399_v54  ;;  %v1401_v56 = vsel %vm1373_vm13, %v1359_v24, %v1387_v53  ;;  %1416 = vst [vmem:[%s2304_s2 + $0x60] sm:$0x3f] %v1402_v55 }
 0x1ee   : > { %1415 = vst [vmem:[%s2304_s2 + $0x58] sm:$0xff] %v1401_v56  ;;  %v1403_v44 = vsel %vm1375_vm14, %v1361_v51, %v1389_v46 }
 0x1ef   : > { %1417 = vst [vmem:[%s2304_s2 + $0x68] sm:$0x3f] %v1403_v44 }
 0x1f0 PF: > { %s12_s13 = sadd.s32 1, %s1957_s13   ;;  %s2305_s9 = smov %s1945_s10 }
 0x1f1   : > { %p9_p12 = scmp.ge.s32.totalorder %s12_s13, 4   ;;  %s2306_s10 = smov %s2010_s17 }
 0x1f2   : > { %s2307_s11 = smov %s1953_s12  ;;  %s2308_s12 = smov %s2310_s14 }
 0x1f3   :  { %11 = sbr.rel (!%p9_p12) target bundleno = 3 (0x3), region = 97 }

// kernel: combined_generator.15
= control target key start
LH: loop header
LB: loop body
LE: loop exit
PB: predicated region body
PF: predicated region fallthrough
CT: control target
= control target key end

     0   :  { %vm1305_vm0 = vcmask 1043456   ;;  %s2368_s1 = inlined_call_operand.vmem [shape: bf16[1024,128], index: 1, kind: input, shape index: {}]   ;;  %s2369_s0 = inlined_call_operand.vmem [shape: bf16[108,1024], index: 0, kind: input, shape index: {}]   ;;  %s2370_s2 = inlined_call_operand.vmem [shape: f32[108,128], index: 2, kind: output, shape index: {}]  }
   0x1   :  { %v1794_v0 = vld [vmem:[%s2368_s1 + $0x40] sm:$0xff]   ;;  %v1798_v4 = vld [vmem:[%s2368_s1 + $0x48] sm:$0xff]   ;;  %v1802_v8 = vld [vmem:[%s2368_s1 + $0x50] sm:$0xff]  }
   0x2   :  { %v1795_v1 = vld [vmem:[%s2368_s1 + $0xc0] sm:$0xff]   ;;  %1561 = vmatprep.subr.bf16.mxu0 %v1794_v0  ;;  %v1799_v5 = vld [vmem:[%s2368_s1 + $0xc8] sm:$0xff]   ;;  %v1803_v9 = vld [vmem:[%s2368_s1 + $0xd0] sm:$0xff]  }
   0x3   :  { %v1796_v2 = vld [vmem:[%s2368_s1] sm:$0xff]   ;;  %1619 = vmatprep.subr.bf16.mxu1 %v1795_v1  ;;  %v1800_v6 = vld [vmem:[%s2368_s1 + $0x8] sm:$0xff]   ;;  %v1804_v10 = vld [vmem:[%s2368_s1 + $0x10] sm:$0xff]  }
   0x4   :  { %v1797_v3 = vld [vmem:[%s2368_s1 + $0x80] sm:$0xff]   ;;  %1562 = vmatpush3.bf16.msra.mxu0 %v1796_v2  ;;  %v1801_v7 = vld [vmem:[%s2368_s1 + $0x88] sm:$0xff]   ;;  %v1805_v11 = vld [vmem:[%s2368_s1 + $0x90] sm:$0xff]  }
   0x5   :  { %1620 = vmatpush3.bf16.msra.mxu1 %v1797_v3  ;;  %1563 = vmatprep.subr.bf16.mxu0 %v1798_v4  ;;  %v1806_v12 = vld [vmem:[%s2368_s1 + $0x58] sm:$0xff]   ;;  %v1810_v16 = vld [vmem:[%s2368_s1 + $0x60] sm:$0xff]   ;;  %v1814_v20 = vld [vmem:[%s2368_s1 + $0x68] sm:$0xff]  }
   0x6   :  { %1621 = vmatprep.subr.bf16.mxu1 %v1799_v5  ;;  %v1807_v13 = vld [vmem:[%s2368_s1 + $0xd8] sm:$0xff]   ;;  %v1811_v17 = vld [vmem:[%s2368_s1 + $0xe0] sm:$0xff]   ;;  %v1815_v21 = vld [vmem:[%s2368_s1 + $0xe8] sm:$0xff]  }
   0x7   :  { %v1808_v14 = vld [vmem:[%s2368_s1 + $0x18] sm:$0xff]   ;;  %v1812_v18 = vld [vmem:[%s2368_s1 + $0x20] sm:$0xff]   ;;  %v1816_v22 = vld [vmem:[%s2368_s1 + $0x28] sm:$0xff]  }
   0x8   :  { %1564 = vmatpush3.bf16.msra.mxu0 %v1800_v6  ;;  %v1809_v15 = vld [vmem:[%s2368_s1 + $0x98] sm:$0xff]   ;;  %v1813_v19 = vld [vmem:[%s2368_s1 + $0xa0] sm:$0xff]   ;;  %v1817_v23 = vld [vmem:[%s2368_s1 + $0xa8] sm:$0xff]  }
   0x9   :  { %1622 = vmatpush3.bf16.msra.mxu1 %v1801_v7  ;;  %1565 = vmatprep.subr.bf16.mxu0 %v1802_v8  ;;  %v1818_v24 = vld [vmem:[%s2368_s1 + $0x70] sm:$0xff]   ;;  %v1822_v28 = vld [vmem:[%s2368_s1 + $0x78] sm:$0xff]   ;;  %v44_v32 = vld [vmem:[%s2369_s0] sm:$0xff] }
   0xa   :  { %1623 = vmatprep.subr.bf16.mxu1 %v1803_v9  ;;  %v1819_v25 = vld [vmem:[%s2368_s1 + $0xf0] sm:$0xff]   ;;  %v1823_v29 = vld [vmem:[%s2368_s1 + $0xf8] sm:$0xff]   ;;  %v48_v33 = vld [vmem:[%s2369_s0 + $0x20] sm:$0xff] }
   0xb   :  { %v1820_v26 = vld [vmem:[%s2368_s1 + $0x30] sm:$0xff]   ;;  %v1824_v30 = vld [vmem:[%s2368_s1 + $0x38] sm:$0xff]   ;;  %v45_v34 = vld [vmem:[%s2369_s0 + $0x8] sm:$0xff]  ;;  %v1441_v35 = vcombine.low %v44_v32, %v48_v33  ;;  %v1442_v36 = vcombine.high %v44_v32, %v48_v33 }
   0xc   :  { %1566 = vmatpush3.bf16.msra.mxu0 %v1804_v10  ;;  %v1821_v27 = vld [vmem:[%s2368_s1 + $0xb0] sm:$0xff]   ;;  %v1825_v31 = vld [vmem:[%s2368_s1 + $0xb8] sm:$0xff]   ;;  %v49_v37 = vld [vmem:[%s2369_s0 + $0x28] sm:$0xff] }
   0xd   :  { %1624 = vmatpush3.bf16.msra.mxu1 %v1805_v11  ;;  %1567 = vmatprep.subr.bf16.mxu0 %v1806_v12  ;;  %v1443_v38 = vcombine.low %v45_v34, %v49_v37  ;;  %v1444_v39 = vcombine.high %v45_v34, %v49_v37  ;;  %v1826_v40 = vld [vmem:[%s2368_s1 + $0x140] sm:$0xff]   ;;  %v53_v47 = vld [vmem:[%s2369_s0 + $0x48] sm:$0xff]  ;;  %v1834_v56 = vld [vmem:[%s2368_s1 + $0x150] sm:$0xff]  }
   0xe   :  { %1625 = vmatprep.subr.bf16.mxu1 %v1807_v13  ;;  %924 = vmatprep.mubr.bf16.mxu0 %v1442_v36  ;;  %v1827_v41 = vld [vmem:[%s2368_s1 + $0x100] sm:$0xff]   ;;  %v57_v48 = vld [vmem:[%s2369_s0 + $0x68] sm:$0xff]  ;;  %v1835_v63 = vld [vmem:[%s2368_s1 + $0x110] sm:$0xff]  }
   0xf   :  { %1013 = vmatprep.mubr.bf16.mxu1 %v1444_v39  ;;  %v1828_v42 = vld [vmem:[%s2368_s1 + $0x1c0] sm:$0xff]   ;;  %v1452_v49 = vcombine.high %v53_v47, %v57_v48  ;;  %v1830_v50 = vld [vmem:[%s2368_s1 + $0x148] sm:$0xff]   ;;  %v1451_v53 = vcombine.low %v53_v47, %v57_v48  ;;  %v1836_v0 = vld [vmem:[%s2368_s1 + $0x1d0] sm:$0xff]  }
  0x10   :  { %1568 = vmatpush3.bf16.msra.mxu0 %v1808_v14  ;;  %v1829_v43 = vld [vmem:[%s2368_s1 + $0x180] sm:$0xff]   ;;  %v1831_v52 = vld [vmem:[%s2368_s1 + $0x108] sm:$0xff]   ;;  %v1837_v1 = vld [vmem:[%s2368_s1 + $0x190] sm:$0xff]  }
  0x11   :  { %1626 = vmatpush3.bf16.msra.mxu1 %v1809_v15  ;;  %1569 = vmatprep.subr.bf16.mxu0 %v1810_v16  ;;  %v52_v44 = vld [vmem:[%s2369_s0 + $0x40] sm:$0xff]  ;;  %v1832_v54 = vld [vmem:[%s2368_s1 + $0x1c8] sm:$0xff]   ;;  %v1838_v3 = vld [vmem:[%s2368_s1 + $0x158] sm:$0xff]  }
  0x12   :  { %1627 = vmatprep.subr.bf16.mxu1 %v1811_v17  ;;  %v56_v45 = vld [vmem:[%s2369_s0 + $0x60] sm:$0xff]  ;;  %v1833_v55 = vld [vmem:[%s2368_s1 + $0x188] sm:$0xff]   ;;  %v1839_v5 = vld [vmem:[%s2368_s1 + $0x118] sm:$0xff]  }
  0x13   :  { %v1450_v46 = vcombine.high %v52_v44, %v56_v45  ;;  %v1449_v51 = vcombine.low %v52_v44, %v56_v45  ;;  %v60_v57 = vld [vmem:[%s2369_s0 + $0x80] sm:$0xff]  ;;  %v61_v59 = vld [vmem:[%s2369_s0 + $0x88] sm:$0xff]  ;;  %v1840_v12 = vld [vmem:[%s2368_s1 + $0x1d8] sm:$0xff]  }
  0x14   :  { %1570 = vmatpush3.bf16.msra.mxu0 %v1812_v18  ;;  %v64_v58 = vld [vmem:[%s2369_s0 + $0xa0] sm:$0xff]  ;;  %v65_v60 = vld [vmem:[%s2369_s0 + $0xa8] sm:$0xff]  ;;  %v1841_v13 = vld [vmem:[%s2368_s1 + $0x198] sm:$0xff]  }
  0x15   :  { %1628 = vmatpush3.bf16.msra.mxu1 %v1813_v19  ;;  %1571 = vmatprep.subr.bf16.mxu0 %v1814_v20  ;;  %v1458_v61 = vcombine.high %v60_v57, %v64_v58  ;;  %v1460_v62 = vcombine.high %v61_v59, %v65_v60  ;;  %v1457_v2 = vcombine.low %v60_v57, %v64_v58  ;;  %v68_v6 = vld [vmem:[%s2369_s0 + $0xc0] sm:$0xff]  ;;  %v69_v8 = vld [vmem:[%s2369_s0 + $0xc8] sm:$0xff]  ;;  %v1855_v47 = vld [vmem:[%s2368_s1 + $0x138] sm:$0xff]  }
  0x16   :  { %1629 = vmatprep.subr.bf16.mxu1 %v1815_v21  ;;  %v1459_v4 = vcombine.low %v61_v59, %v65_v60  ;;  %v72_v7 = vld [vmem:[%s2369_s0 + $0xe0] sm:$0xff]  ;;  %v73_v10 = vld [vmem:[%s2369_s0 + $0xe8] sm:$0xff]  ;;  %v51_v57 = vld [vmem:[%s2369_s0 + $0x38] sm:$0xff] }
  0x17   :  { %v1466_v9 = vcombine.high %v68_v6, %v72_v7  ;;  %v1468_v11 = vcombine.high %v69_v8, %v73_v10  ;;  %v1842_v14 = vld [vmem:[%s2368_s1 + $0x160] sm:$0xff]   ;;  %v1465_v16 = vcombine.low %v68_v6, %v72_v7  ;;  %v1467_v20 = vcombine.low %v69_v8, %v73_v10  ;;  %v85_v32 = vld [vmem:[%s2369_s0 + $0x148] sm:$0xff]  ;;  %v62_v6 = vld [vmem:[%s2369_s0 + $0x90] sm:$0xff] }
  0x18   :  { %1572 = vmatpush3.bf16.msra.mxu0 %v1816_v22  ;;  %v1843_v15 = vld [vmem:[%s2368_s1 + $0x120] sm:$0xff]   ;;  %v77_v22 = vld [vmem:[%s2369_s0 + $0x108] sm:$0xff]  ;;  %v66_v7 = vld [vmem:[%s2369_s0 + $0xb0] sm:$0xff] }
  0x19   :  { %1630 = vmatpush3.bf16.msra.mxu1 %v1817_v23  ;;  %1573 = vmatprep.subr.bf16.mxu0 %v1818_v24  ;;  %v1844_v17 = vld [vmem:[%s2368_s1 + $0x1e0] sm:$0xff]   ;;  %v81_v23 = vld [vmem:[%s2369_s0 + $0x128] sm:$0xff]  ;;  %v63_v8 = vld [vmem:[%s2369_s0 + $0x98] sm:$0xff] }
  0x1a   :  { %1631 = vmatprep.subr.bf16.mxu1 %v1819_v25  ;;  %v76_v18 = vld [vmem:[%s2369_s0 + $0x100] sm:$0xff]  ;;  %v1476_v24 = vcombine.high %v77_v22, %v81_v23  ;;  %v89_v33 = vld [vmem:[%s2369_s0 + $0x168] sm:$0xff]  ;;  %v1475_v36 = vcombine.low %v77_v22, %v81_v23  ;;  %v78_v22 = vld [vmem:[%s2369_s0 + $0x110] sm:$0xff] }
  0x1b   :  { %v80_v19 = vld [vmem:[%s2369_s0 + $0x120] sm:$0xff]  ;;  %v1484_v39 = vcombine.high %v85_v32, %v89_v33  ;;  %v93_v44 = vld [vmem:[%s2369_s0 + $0x188] sm:$0xff]  ;;  %v82_v23 = vld [vmem:[%s2369_s0 + $0x130] sm:$0xff] }
  0x1c   :  { %1574 = vmatpush3.bf16.msra.mxu0 %v1820_v26  ;;  %v1474_v21 = vcombine.high %v76_v18, %v80_v19  ;;  %v1845_v25 = vld [vmem:[%s2368_s1 + $0x1a0] sm:$0xff]   ;;  %v1846_v26 = vld [vmem:[%s2368_s1 + $0x168] sm:$0xff]   ;;  %v1473_v34 = vcombine.low %v76_v18, %v80_v19  ;;  %v1461_v18 = vcombine.low %v62_v6, %v66_v7 }
  0x1d   :  { %1632 = vmatpush3.bf16.msra.mxu1 %v1821_v27  ;;  %1575 = vmatprep.subr.bf16.mxu0 %v1822_v28  ;;  %v1847_v27 = vld [vmem:[%s2368_s1 + $0x128] sm:$0xff]  }
  0x1e   :  { %1633 = vmatprep.subr.bf16.mxu1 %v1823_v29  ;;  %v1848_v28 = vld [vmem:[%s2368_s1 + $0x1e8] sm:$0xff]  }
  0x1f   :  { %v1849_v29 = vld [vmem:[%s2368_s1 + $0x1a8] sm:$0xff]  }
  0x20   :  { %1576 = vmatpush3.bf16.msra.mxu0 %v1824_v30  ;;  %v84_v30 = vld [vmem:[%s2369_s0 + $0x140] sm:$0xff]  ;;  %v97_v45 = vld [vmem:[%s2369_s0 + $0x1a8] sm:$0x33] }
  0x21   :  { %1634 = vmatpush3.bf16.msra.mxu1 %v1825_v31  ;;  %1677 = vmatprep.subr.bf16.mxu0 %v1826_v40  ;;  %v88_v31 = vld [vmem:[%s2369_s0 + $0x160] sm:$0xff]  ;;  %v1852_v40 = vld [vmem:[%s2368_s1 + $0x1f0] sm:$0xff]   ;;  %v1491_v59 = vcombine.low %v93_v44, %v97_v45 }
  0x22   :  { %1735 = vmatprep.subr.bf16.mxu1 %v1828_v42  ;;  %v1482_v37 = vcombine.high %v84_v30, %v88_v31  ;;  %v92_v42 = vld [vmem:[%s2369_s0 + $0x180] sm:$0xff]  ;;  %v1481_v48 = vcombine.low %v84_v30, %v88_v31  ;;  %v86_v30 = vld [vmem:[%s2369_s0 + $0x150] sm:$0xff] }
  0x23   :  { %925 = vmatmul.mubr.bf16.vlgmr.msra.gmra.mrb[0].mxu0 %v1441_v35  ;;  %v1850_v35 = vld [vmem:[%s2368_s1 + $0x170] sm:$0xff]  }
  0x24   :  { %1014 = vmatmul.mubr.bf16.vlgmr.msra.gmra.mrb[0].mxu1 %v1443_v38  ;;  %1678 = vmatpush3.bf16.msra.mxu0 %v1827_v41  ;;  %v1851_v38 = vld [vmem:[%s2368_s1 + $0x130] sm:$0xff]  }
  0x25   :  { %1736 = vmatpush3.bf16.msra.mxu1 %v1829_v43  ;;  %932 = vmatprep.mubr.bf16.mxu0 %v1450_v46  ;;  %v1853_v41 = vld [vmem:[%s2368_s1 + $0x1b0] sm:$0xff]   ;;  %v96_v43 = vld [vmem:[%s2369_s0 + $0x1a0] sm:$0x33]  ;;  %v1854_v46 = vld [vmem:[%s2368_s1 + $0x178] sm:$0xff]  }
  0x26   :  { %1021 = vmatprep.mubr.bf16.mxu1 %v1452_v49  ;;  %1679 = vmatprep.subr.bf16.mxu0 %v1830_v50  ;;  %v1856_v49 = vld [vmem:[%s2368_s1 + $0x1f8] sm:$0xff]   ;;  %v1483_v50 = vcombine.low %v85_v32, %v89_v33  ;;  %v1489_v58 = vcombine.low %v92_v42, %v96_v43  ;;  %v90_v31 = vld [vmem:[%s2369_s0 + $0x170] sm:$0xff] }
  0x27   :  { %1737 = vmatprep.subr.bf16.mxu1 %v1832_v54  ;;  %v46_v54 = vld [vmem:[%s2369_s0 + $0x10] sm:$0xff]  ;;  %v87_v32 = vld [vmem:[%s2369_s0 + $0x158] sm:$0xff] }
  0x28   :  { %1680 = vmatpush3.bf16.msra.mxu0 %v1831_v52  ;;  %v1857_v52 = vld [vmem:[%s2368_s1 + $0x1b8] sm:$0xff]  }
  0x29   :  { %1738 = vmatpush3.bf16.msra.mxu1 %v1833_v55  ;;  %1681 = vmatprep.subr.bf16.mxu0 %v1834_v56  ;;  %v50_v55 = vld [vmem:[%s2369_s0 + $0x30] sm:$0xff]  ;;  %v47_v56 = vld [vmem:[%s2369_s0 + $0x18] sm:$0xff] }
  0x2a   :  { %1739 = vmatprep.subr.bf16.mxu1 %v1836_v0  ;;  %v1446_v60 = vcombine.high %v46_v54, %v50_v55  ;;  %v55_v0 = vld [vmem:[%s2369_s0 + $0x58] sm:$0xff] }
  0x2b   :  { %933 = vmatmul.mubr.bf16.gmra.mrb[4].mxu0 %v1449_v51  ;;  %v1490_v51 = vcombine.high %v92_v42, %v96_v43  ;;  %v91_v33 = vld [vmem:[%s2369_s0 + $0x178] sm:$0xff]  ;;  %v1485_v42 = vcombine.low %v86_v30, %v90_v31 }
  0x2c   :  { %1022 = vmatmul.mubr.bf16.gmra.mrb[4].mxu1 %v1451_v53  ;;  %940 = vmatprep.mubr.bf16.mxu0 %v1458_v61  ;;  %v1492_v53 = vcombine.high %v93_v44, %v97_v45  ;;  %v1448_v61 = vcombine.high %v47_v56, %v51_v57  ;;  %v1487_v43 = vcombine.low %v87_v32, %v91_v33 }
  0x2d   :  { %1029 = vmatprep.mubr.bf16.mxu1 %v1460_v62  ;;  %1682 = vmatpush3.bf16.msra.mxu0 %v1835_v63  ;;  %v54_v62 = vld [vmem:[%s2369_s0 + $0x50] sm:$0xff] }
  0x2e   :  { %1740 = vmatpush3.bf16.msra.mxu1 %v1837_v1  ;;  %1683 = vmatprep.subr.bf16.mxu0 %v1838_v3  ;;  %v58_v63 = vld [vmem:[%s2369_s0 + $0x70] sm:$0xff]  ;;  %v59_v1 = vld [vmem:[%s2369_s0 + $0x78] sm:$0xff]  ;;  %v1447_v3 = vcombine.low %v47_v56, %v51_v57 }
  0x2f   :  { %1741 = vmatprep.subr.bf16.mxu1 %v1840_v12  ;;  %v1453_v10 = vcombine.low %v54_v62, %v58_v63  ;;  %v1462_v12 = vcombine.high %v62_v6, %v66_v7 }
  0x31   :  { %1684 = vmatpush3.bf16.msra.mxu0 %v1839_v5  ;;  %v1456_v5 = vcombine.high %v55_v0, %v59_v1 }
  0x32   :  { %1742 = vmatpush3.bf16.msra.mxu1 %v1841_v13  ;;  %1685 = vmatprep.subr.bf16.mxu0 %v1842_v14  ;;  %v70_v14 = vld [vmem:[%s2369_s0 + $0xd0] sm:$0xff] }
  0x33   :  { %941 = vmatmul.mubr.bf16.gmra.mrb[8].mxu0 %v1457_v2  ;;  %1743 = vmatprep.subr.bf16.mxu1 %v1844_v17  ;;  %v1445_v2 = vcombine.low %v46_v54, %v50_v55  ;;  %v75_v17 = vld [vmem:[%s2369_s0 + $0xf8] sm:$0xff] }
  0x34   :  { %1030 = vmatmul.mubr.bf16.gmra.mrb[8].mxu1 %v1459_v4  ;;  %948 = vmatprep.mubr.bf16.mxu0 %v1466_v9  ;;  %v1454_v4 = vcombine.high %v54_v62, %v58_v63  ;;  %v67_v9 = vld [vmem:[%s2369_s0 + $0xb8] sm:$0xff] }
  0x35   :  { %1037 = vmatprep.mubr.bf16.mxu1 %v1468_v11  ;;  %1686 = vmatpush3.bf16.msra.mxu0 %v1843_v15  ;;  %v1455_v11 = vcombine.low %v55_v0, %v59_v1  ;;  %v1464_v13 = vcombine.high %v63_v8, %v67_v9  ;;  %v74_v15 = vld [vmem:[%s2369_s0 + $0xf0] sm:$0xff]  ;;  %v1463_v19 = vcombine.low %v63_v8, %v67_v9 }
  0x36   :  { %1744 = vmatpush3.bf16.msra.mxu1 %v1845_v25  ;;  %1687 = vmatprep.subr.bf16.mxu0 %v1846_v26  ;;  %v83_v25 = vld [vmem:[%s2369_s0 + $0x138] sm:$0xff]  ;;  %v1469_v26 = vcombine.low %v70_v14, %v74_v15 }
  0x37   :  { %1745 = vmatprep.subr.bf16.mxu1 %v1848_v28  ;;  %v1478_v28 = vcombine.high %v78_v22, %v82_v23 }
  0x39   :  { %1688 = vmatpush3.bf16.msra.mxu0 %v1847_v27 }
  0x3a   :  { %1746 = vmatpush3.bf16.msra.mxu1 %v1849_v29  ;;  %1689 = vmatprep.subr.bf16.mxu0 %v1850_v35 }
  0x3b   :  { %949 = vmatmul.mubr.bf16.gmra.mrb[12].mxu0 %v1465_v16  ;;  %1747 = vmatprep.subr.bf16.mxu1 %v1852_v40  ;;  %v71_v16 = vld [vmem:[%s2369_s0 + $0xd8] sm:$0xff] }
  0x3c   :  { %1038 = vmatmul.mubr.bf16.gmra.mrb[12].mxu1 %v1467_v20  ;;  %956 = vmatprep.mubr.bf16.mxu0 %v1474_v21  ;;  %v1470_v20 = vcombine.high %v70_v14, %v74_v15  ;;  %v1472_v21 = vcombine.high %v71_v16, %v75_v17  ;;  %v1471_v27 = vcombine.low %v71_v16, %v75_v17  ;;  %v95_v40 = vld [vmem:[%s2369_s0 + $0x198] sm:$0xff] }
  0x3d   :  { %1045 = vmatprep.mubr.bf16.mxu1 %v1476_v24  ;;  %1690 = vmatpush3.bf16.msra.mxu0 %v1851_v38  ;;  %v79_v24 = vld [vmem:[%s2369_s0 + $0x118] sm:$0xff]  ;;  %v94_v38 = vld [vmem:[%s2369_s0 + $0x190] sm:$0xff] }
  0x3e   :  { %1748 = vmatpush3.bf16.msra.mxu1 %v1853_v41  ;;  %1691 = vmatprep.subr.bf16.mxu0 %v1854_v46  ;;  %v1480_v29 = vcombine.high %v79_v24, %v83_v25  ;;  %v1479_v35 = vcombine.low %v79_v24, %v83_v25  ;;  %v99_v41 = vld [vmem:[%s2369_s0 + $0x1b8] sm:$0x33] }
  0x3f   :  { %1749 = vmatprep.subr.bf16.mxu1 %v1856_v49  ;;  %v1496_v45 = vcombine.high %v95_v40, %v99_v41 }
  0x41   :  { %1692 = vmatpush3.bf16.msra.mxu0 %v1855_v47  ;;  %v1495_v47 = vcombine.low %v95_v40, %v99_v41 }
  0x42   :  { %1750 = vmatpush3.bf16.msra.mxu1 %v1857_v52 }
  0x43   :  { %957 = vmatmul.mubr.bf16.gmra.mrb[16].mxu0 %v1473_v34  ;;  %v1477_v34 = vcombine.low %v78_v22, %v82_v23 }
  0x44   :  { %1046 = vmatmul.mubr.bf16.gmra.mrb[16].mxu1 %v1475_v36  ;;  %964 = vmatprep.mubr.bf16.mxu0 %v1482_v37  ;;  %v1486_v36 = vcombine.high %v86_v30, %v90_v31  ;;  %v1488_v37 = vcombine.high %v87_v32, %v91_v33 }
  0x45   :  { %1053 = vmatprep.mubr.bf16.mxu1 %v1484_v39  ;;  %v98_v39 = vld [vmem:[%s2369_s0 + $0x1b0] sm:$0x33] }
  0x46   :  { %v1494_v44 = vcombine.high %v94_v38, %v98_v39  ;;  %v1493_v46 = vcombine.low %v94_v38, %v98_v39 }
  0x4b   :  { %965 = vmatmul.mubr.bf16.gmra.mrb[20].mxu0 %v1481_v48  ;;  %v1860_v48 = vmov 0.0  }
  0x4c   :  { %1054 = vmatmul.mubr.bf16.gmra.mrb[20].mxu1 %v1483_v50  ;;  %972 = vmatprep.mubr.bf16.mxu0 %v1490_v51  ;;  %29 = vst [vmem:[#allocation2 + $0x68] sm:$0xf] %v1860_v48 }
  0x4d   :  { %1061 = vmatprep.mubr.bf16.mxu1 %v1492_v53 }
  0x53   :  { %973 = vmatmul.mubr.bf16.gmra.mrb[24].mxu0 %v1489_v58 }
  0x54   :  { %1062 = vmatmul.mubr.bf16.gmra.mrb[24].mxu1 %v1491_v59  ;;  %1102 = vmatprep.mubr.bf16.mxu0 %v1446_v60 }
  0x55   :  { %1191 = vmatprep.mubr.bf16.mxu1 %v1448_v61 }
  0x5b   :  { %1103 = vmatmul.mubr.bf16.vlgmr.msra.gmra.mrb[28].mxu0 %v1445_v2 }
  0x5c   :  { %1192 = vmatmul.mubr.bf16.vlgmr.msra.gmra.mrb[28].mxu1 %v1447_v3  ;;  %1110 = vmatprep.mubr.bf16.mxu0 %v1454_v4 }
  0x5d   :  { %1199 = vmatprep.mubr.bf16.mxu1 %v1456_v5 }
  0x63   :  { %1111 = vmatmul.mubr.bf16.gmra.mrb[32].mxu0 %v1453_v10 }
  0x64   :  { %1200 = vmatmul.mubr.bf16.gmra.mrb[32].mxu1 %v1455_v11  ;;  %1118 = vmatprep.mubr.bf16.mxu0 %v1462_v12 }
  0x65   :  { %1207 = vmatprep.mubr.bf16.mxu1 %v1464_v13 }
  0x6b   :  { %1119 = vmatmul.mubr.bf16.gmra.mrb[36].mxu0 %v1461_v18 }
  0x6c   :  { %1208 = vmatmul.mubr.bf16.gmra.mrb[36].mxu1 %v1463_v19  ;;  %1126 = vmatprep.mubr.bf16.mxu0 %v1470_v20 }
  0x6d   :  { %1215 = vmatprep.mubr.bf16.mxu1 %v1472_v21 }
  0x73   :  { %1127 = vmatmul.mubr.bf16.gmra.mrb[40].mxu0 %v1469_v26 }
  0x74   :  { %1216 = vmatmul.mubr.bf16.gmra.mrb[40].mxu1 %v1471_v27  ;;  %1134 = vmatprep.mubr.bf16.mxu0 %v1478_v28 }
  0x75   :  { %1223 = vmatprep.mubr.bf16.mxu1 %v1480_v29 }
  0x7b   :  { %1135 = vmatmul.mubr.bf16.gmra.mrb[44].mxu0 %v1477_v34 }
  0x7c   :  { %1224 = vmatmul.mubr.bf16.gmra.mrb[44].mxu1 %v1479_v35  ;;  %1142 = vmatprep.mubr.bf16.mxu0 %v1486_v36 }
  0x7d   :  { %1231 = vmatprep.mubr.bf16.mxu1 %v1488_v37 }
  0x83   :  { %1143 = vmatmul.mubr.bf16.gmra.mrb[48].mxu0 %v1485_v42 }
  0x84   :  { %1232 = vmatmul.mubr.bf16.gmra.mrb[48].mxu1 %v1487_v43  ;;  %1150 = vmatprep.mubr.bf16.mxu0 %v1494_v44 }
  0x85   :  { %1239 = vmatprep.mubr.bf16.mxu1 %v1496_v45 }
  0x8b   :  { %1151 = vmatmul.mubr.bf16.gmra.mrb[52].mxu0 %v1493_v46 }
  0x8c   :  { %1240 = vmatmul.mubr.bf16.gmra.mrb[52].mxu1 %v1495_v47 }
  0xf6   :  { %v1577_v49 = vpop.f32.mrb[0].mxu0 }
  0xf7   :  { %v1635_v50 = vpop.f32.mrb[0].mxu1  ;;  %v1578_v51 = vpop.f32.mrb[1].mxu0 }
  0xf8   :  { %v1579_v52 = vadd.f32 %v1578_v51, %v1577_v49  ;;  %v1636_v53 = vpop.f32.mrb[1].mxu1  ;;  %v1580_v54 = vpop.f32.mrb[2].mxu0 }
  0xf9   :  { %v1637_v55 = vadd.f32 %v1636_v53, %v1635_v50  ;;  %v1638_v56 = vpop.f32.mrb[2].mxu1  ;;  %v1581_v57 = vpop.f32.mrb[3].mxu0 }
  0xfa   :  { %v1582_v58 = vadd.f32 %v1581_v57, %v1580_v54  ;;  %v1639_v59 = vpop.f32.mrb[3].mxu1 }
  0xfb   :  { %v2236_v60 = vadd.f32 %v1637_v55, %v1579_v52  ;;  %v1640_v61 = vadd.f32 %v1639_v59, %v1638_v56 }
  0xfd   :  { %v2238_v62 = vadd.f32 %v1640_v61, %v1582_v58 }
  0xfe   :  { %v1583_v63 = vpop.f32.mrb[4].mxu0 }
  0xff   :  { %v1641_v0 = vpop.f32.mrb[4].mxu1  ;;  %v1584_v1 = vpop.f32.mrb[5].mxu0 }
 0x100   :  { %v1585_v2 = vadd.f32 %v1584_v1, %v1583_v63  ;;  %v1642_v3 = vpop.f32.mrb[5].mxu1  ;;  %v1586_v4 = vpop.f32.mrb[6].mxu0 }
 0x101   :  { %v1643_v5 = vadd.f32 %v1642_v3, %v1641_v0  ;;  %v1644_v6 = vpop.f32.mrb[6].mxu1  ;;  %v1587_v7 = vpop.f32.mrb[7].mxu0 }
 0x102   :  { %v1588_v8 = vadd.f32 %v1587_v7, %v1586_v4  ;;  %v1645_v9 = vpop.f32.mrb[7].mxu1 }
 0x103   :  { %v2240_v10 = vadd.f32 %v1643_v5, %v1585_v2  ;;  %v1646_v11 = vadd.f32 %v1645_v9, %v1644_v6 }
 0x105   :  { %v2242_v12 = vadd.f32 %v1646_v11, %v1588_v8 }
 0x106   :  { %v1589_v13 = vpop.f32.mrb[8].mxu0 }
 0x107   :  { %v1647_v14 = vpop.f32.mrb[8].mxu1  ;;  %v1590_v15 = vpop.f32.mrb[9].mxu0 }
 0x108   :  { %v1591_v16 = vadd.f32 %v1590_v15, %v1589_v13  ;;  %v1648_v17 = vpop.f32.mrb[9].mxu1  ;;  %v1592_v18 = vpop.f32.mrb[10].mxu0 }
 0x109   :  { %v1649_v19 = vadd.f32 %v1648_v17, %v1647_v14  ;;  %v1650_v20 = vpop.f32.mrb[10].mxu1  ;;  %v1593_v21 = vpop.f32.mrb[11].mxu0 }
 0x10a   :  { %v1594_v22 = vadd.f32 %v1593_v21, %v1592_v18  ;;  %v1651_v23 = vpop.f32.mrb[11].mxu1 }
 0x10b   :  { %v2244_v24 = vadd.f32 %v1649_v19, %v1591_v16  ;;  %v1652_v25 = vadd.f32 %v1651_v23, %v1650_v20 }
 0x10d   :  { %v2246_v26 = vadd.f32 %v1652_v25, %v1594_v22 }
 0x10e   :  { %v1595_v27 = vpop.f32.mrb[12].mxu0 }
 0x10f   :  { %v1653_v28 = vpop.f32.mrb[12].mxu1  ;;  %v1596_v29 = vpop.f32.mrb[13].mxu0 }
 0x110   :  { %v1597_v30 = vadd.f32 %v1596_v29, %v1595_v27  ;;  %v1654_v31 = vpop.f32.mrb[13].mxu1  ;;  %v1598_v32 = vpop.f32.mrb[14].mxu0 }
 0x111   :  { %v1655_v33 = vadd.f32 %v1654_v31, %v1653_v28  ;;  %v1656_v34 = vpop.f32.mrb[14].mxu1  ;;  %v1599_v35 = vpop.f32.mrb[15].mxu0 }
 0x112   :  { %v1600_v36 = vadd.f32 %v1599_v35, %v1598_v32  ;;  %v1657_v37 = vpop.f32.mrb[15].mxu1 }
 0x113   :  { %v2248_v38 = vadd.f32 %v1655_v33, %v1597_v30  ;;  %v1658_v39 = vadd.f32 %v1657_v37, %v1656_v34 }
 0x115   :  { %v2250_v40 = vadd.f32 %v1658_v39, %v1600_v36 }
 0x116   :  { %v1601_v41 = vpop.f32.mrb[16].mxu0 }
 0x117   :  { %v1659_v42 = vpop.f32.mrb[16].mxu1  ;;  %v1602_v43 = vpop.f32.mrb[17].mxu0 }
 0x118   :  { %v1603_v44 = vadd.f32 %v1602_v43, %v1601_v41  ;;  %v1660_v45 = vpop.f32.mrb[17].mxu1  ;;  %v1604_v46 = vpop.f32.mrb[18].mxu0 }
 0x119   :  { %v1661_v47 = vadd.f32 %v1660_v45, %v1659_v42  ;;  %v1662_v48 = vpop.f32.mrb[18].mxu1  ;;  %v1605_v49 = vpop.f32.mrb[19].mxu0 }
 0x11a   :  { %v1606_v50 = vadd.f32 %v1605_v49, %v1604_v46  ;;  %v1663_v51 = vpop.f32.mrb[19].mxu1 }
 0x11b   :  { %v2252_v52 = vadd.f32 %v1661_v47, %v1603_v44  ;;  %v1664_v53 = vadd.f32 %v1663_v51, %v1662_v48 }
 0x11d   :  { %v2254_v54 = vadd.f32 %v1664_v53, %v1606_v50 }
 0x11e   :  { %v1607_v55 = vpop.f32.mrb[20].mxu0 }
 0x11f   :  { %v1665_v56 = vpop.f32.mrb[20].mxu1  ;;  %v1608_v57 = vpop.f32.mrb[21].mxu0 }
 0x120   :  { %v1609_v58 = vadd.f32 %v1608_v57, %v1607_v55  ;;  %v1666_v59 = vpop.f32.mrb[21].mxu1  ;;  %v1610_v61 = vpop.f32.mrb[22].mxu0 }
 0x121   :  { %v1667_v63 = vadd.f32 %v1666_v59, %v1665_v56  ;;  %v1668_v0 = vpop.f32.mrb[22].mxu1  ;;  %v1611_v1 = vpop.f32.mrb[23].mxu0 }
 0x122   :  { %v1612_v2 = vadd.f32 %v1611_v1, %v1610_v61  ;;  %v1669_v3 = vpop.f32.mrb[23].mxu1 }
 0x123   :  { %v2256_v4 = vadd.f32 %v1667_v63, %v1609_v58  ;;  %v1670_v5 = vadd.f32 %v1669_v3, %v1668_v0 }
 0x125   :  { %v2258_v6 = vadd.f32 %v1670_v5, %v1612_v2 }
 0x126   :  { %v1613_v7 = vpop.f32.mrb[24].mxu0 }
 0x127   :  { %v1671_v8 = vpop.f32.mrb[24].mxu1  ;;  %v1614_v9 = vpop.f32.mrb[25].mxu0 }
 0x128   :  { %v1615_v11 = vadd.f32 %v1614_v9, %v1613_v7  ;;  %v1672_v13 = vpop.f32.mrb[25].mxu1  ;;  %v1616_v14 = vpop.f32.mrb[26].mxu0 }
 0x129   :  { %v1673_v15 = vadd.f32 %v1672_v13, %v1671_v8  ;;  %v1674_v16 = vpop.f32.mrb[26].mxu1  ;;  %v1617_v17 = vpop.f32.mrb[27].mxu0 }
 0x12a   :  { %v1618_v18 = vadd.f32 %v1617_v17, %v1616_v14  ;;  %v1675_v19 = vpop.f32.mrb[27].mxu1 }
 0x12b   :  { %v2260_v20 = vadd.f32 %v1673_v15, %v1615_v11  ;;  %v1676_v21 = vadd.f32 %v1675_v19, %v1674_v16 }
 0x12d   :  { %v2262_v22 = vadd.f32 %v1676_v21, %v1618_v18 }
 0x12e   :  { %v1693_v23 = vpop.f32.mrb[28].mxu0 }
 0x12f   :  { %v1751_v25 = vpop.f32.mrb[28].mxu1  ;;  %v1694_v27 = vpop.f32.mrb[29].mxu0 }
 0x130   :  { %v1695_v28 = vadd.f32 %v1694_v27, %v1693_v23  ;;  %v1752_v29 = vpop.f32.mrb[29].mxu1  ;;  %v1696_v30 = vpop.f32.mrb[30].mxu0 }
 0x131   :  { %v1753_v31 = vadd.f32 %v1752_v29, %v1751_v25  ;;  %v1754_v32 = vpop.f32.mrb[30].mxu1  ;;  %v1697_v33 = vpop.f32.mrb[31].mxu0 }
 0x132   :  { %v1105_v34 = vadd.f32 %v1695_v28, %v2236_v60  ;;  %v1698_v35 = vadd.f32 %v1697_v33, %v1696_v30  ;;  %v1755_v36 = vpop.f32.mrb[31].mxu1 }
 0x133   :  { %v1756_v37 = vadd.f32 %v1755_v36, %v1754_v32 }
 0x134   :  { %v2265_v39 = vadd.f32 %v1753_v31, %v1105_v34  ;;  %v1108_v41 = vadd.f32 %v1698_v35, %v2238_v62 }
 0x136   :  { %v2268_v42 = vadd.f32 %v1756_v37, %v1108_v41  ;;  %v1699_v43 = vpop.f32.mrb[32].mxu0 }
 0x137   :  { %v1757_v44 = vpop.f32.mrb[32].mxu1  ;;  %v1700_v45 = vpop.f32.mrb[33].mxu0 }
 0x138   :  { %v1701_v46 = vadd.f32 %v1700_v45, %v1699_v43  ;;  %v1758_v47 = vpop.f32.mrb[33].mxu1  ;;  %v1702_v48 = vpop.f32.mrb[34].mxu0  ;;  %v1293_v0 = vadd.f32 %v2268_v42, %v2265_v39 }
 0x139   :  { %v1759_v49 = vadd.f32 %v1758_v47, %v1757_v44  ;;  %v1760_v50 = vpop.f32.mrb[34].mxu1  ;;  %v1703_v51 = vpop.f32.mrb[35].mxu0 }
 0x13a   :  { %v1113_v60 = vadd.f32 %v1701_v46, %v2240_v10  ;;  %v1704_v53 = vadd.f32 %v1703_v51, %v1702_v48  ;;  %v1761_v55 = vpop.f32.mrb[35].mxu1 }
 0x13b   :  { %v1762_v56 = vadd.f32 %v1761_v55, %v1760_v50 }
 0x13c   :  { %v2271_v57 = vadd.f32 %v1759_v49, %v1113_v60  ;;  %v1116_v62 = vadd.f32 %v1704_v53, %v2242_v12 }
 0x13e   :  { %v2274_v58 = vadd.f32 %v1762_v56, %v1116_v62  ;;  %v1705_v59 = vpop.f32.mrb[36].mxu0  ;;  %v1294_v8 = vadd.f32 %v1293_v0, %v2271_v57 }
 0x13f   :  { %v1763_v61 = vpop.f32.mrb[36].mxu1  ;;  %v1706_v63 = vpop.f32.mrb[37].mxu0 }
 0x140   :  { %v1707_v1 = vadd.f32 %v1706_v63, %v1705_v59  ;;  %v1764_v2 = vpop.f32.mrb[37].mxu1  ;;  %v1708_v3 = vpop.f32.mrb[38].mxu0  ;;  %v1295_v16 = vadd.f32 %v1294_v8, %v2274_v58 }
 0x141   :  { %v1765_v5 = vadd.f32 %v1764_v2, %v1763_v61  ;;  %v1766_v10 = vpop.f32.mrb[38].mxu1  ;;  %v1709_v7 = vpop.f32.mrb[39].mxu0 }
 0x142   :  { %v1121_v9 = vadd.f32 %v1707_v1, %v2244_v24  ;;  %v1710_v11 = vadd.f32 %v1709_v7, %v1708_v3  ;;  %v1767_v12 = vpop.f32.mrb[39].mxu1 }
 0x143   :  { %v1768_v13 = vadd.f32 %v1767_v12, %v1766_v10 }
 0x144   :  { %v2280_v14 = vadd.f32 %v1765_v5, %v1121_v9  ;;  %v1124_v15 = vadd.f32 %v1710_v11, %v2246_v26 }
 0x146   :  { %v2284_v17 = vadd.f32 %v1768_v13, %v1124_v15  ;;  %v1711_v18 = vpop.f32.mrb[40].mxu0  ;;  %v1296_v23 = vadd.f32 %v1295_v16, %v2280_v14 }
 0x147   :  { %v1769_v19 = vpop.f32.mrb[40].mxu1  ;;  %v1712_v21 = vpop.f32.mrb[41].mxu0 }
 0x148   :  { %v1713_v25 = vadd.f32 %v1712_v21, %v1711_v18  ;;  %v1770_v27 = vpop.f32.mrb[41].mxu1  ;;  %v1714_v28 = vpop.f32.mrb[42].mxu0  ;;  %v1297_v31 = vadd.f32 %v1296_v23, %v2284_v17 }
 0x149   :  { %v1771_v24 = vadd.f32 %v1770_v27, %v1769_v19  ;;  %v1772_v29 = vpop.f32.mrb[42].mxu1  ;;  %v1715_v30 = vpop.f32.mrb[43].mxu0 }
 0x14a   :  { %v1129_v32 = vadd.f32 %v1713_v25, %v2248_v38  ;;  %v1716_v26 = vadd.f32 %v1715_v30, %v1714_v28  ;;  %v1773_v33 = vpop.f32.mrb[43].mxu1 }
 0x14b   :  { %v1774_v34 = vadd.f32 %v1773_v33, %v1772_v29 }
 0x14c   :  { %v2289_v35 = vadd.f32 %v1771_v24, %v1129_v32  ;;  %v1132_v36 = vadd.f32 %v1716_v26, %v2250_v40 }
 0x14e   :  { %v2292_v37 = vadd.f32 %v1774_v34, %v1132_v36  ;;  %v1717_v41 = vpop.f32.mrb[44].mxu0  ;;  %v1298_v45 = vadd.f32 %v1297_v31, %v2289_v35  ;;  %v43_v36 = vld [vmem:[#allocation2 + $0x68] sm:$0xf] }
 0x14f   :  { %v1775_v43 = vpop.f32.mrb[44].mxu1  ;;  %v1718_v44 = vpop.f32.mrb[45].mxu0 }
 0x150   :  { %v1719_v46 = vadd.f32 %v1718_v44, %v1717_v41  ;;  %v1776_v47 = vpop.f32.mrb[45].mxu1  ;;  %v1720_v48 = vpop.f32.mrb[46].mxu0  ;;  %v1299_v51 = vadd.f32 %v1298_v45, %v2292_v37 }
 0x151   :  { %v1777_v49 = vadd.f32 %v1776_v47, %v1775_v43  ;;  %v1778_v50 = vpop.f32.mrb[46].mxu1  ;;  %v1721_v38 = vpop.f32.mrb[47].mxu0 }
 0x152   :  { %v1137_v60 = vadd.f32 %v1719_v46, %v2252_v52  ;;  %v1722_v53 = vadd.f32 %v1721_v38, %v1720_v48  ;;  %v1779_v55 = vpop.f32.mrb[47].mxu1 }
 0x153   :  { %v1780_v40 = vadd.f32 %v1779_v55, %v1778_v50 }
 0x154   :  { %v1226_v56 = vadd.f32 %v1777_v49, %v1137_v60  ;;  %v1140_v62 = vadd.f32 %v1722_v53, %v2254_v54 }
 0x156   :  { %v1229_v59 = vadd.f32 %v1780_v40, %v1140_v62  ;;  %v1723_v61 = vpop.f32.mrb[48].mxu0  ;;  %v1300_v1 = vadd.f32 %v1299_v51, %v1226_v56 }
 0x157   :  { %v1781_v63 = vpop.f32.mrb[48].mxu1  ;;  %v1724_v0 = vpop.f32.mrb[49].mxu0 }
 0x158   :  { %v1725_v2 = vadd.f32 %v1724_v0, %v1723_v61  ;;  %v1782_v3 = vpop.f32.mrb[49].mxu1  ;;  %v1726_v5 = vpop.f32.mrb[50].mxu0  ;;  %v1301_v9 = vadd.f32 %v1300_v1, %v1229_v59 }
 0x159   :  { %v1783_v10 = vadd.f32 %v1782_v3, %v1781_v63  ;;  %v1784_v7 = vpop.f32.mrb[50].mxu1  ;;  %v1727_v8 = vpop.f32.mrb[51].mxu0 }
 0x15a   :  { %v1145_v52 = vadd.f32 %v1725_v2, %v2256_v4  ;;  %v1728_v11 = vadd.f32 %v1727_v8, %v1726_v5  ;;  %v1785_v12 = vpop.f32.mrb[51].mxu1 }
 0x15b   :  { %v1786_v13 = vadd.f32 %v1785_v12, %v1784_v7 }
 0x15c   :  { %v1234_v15 = vadd.f32 %v1783_v10, %v1145_v52  ;;  %v1148_v54 = vadd.f32 %v1728_v11, %v2258_v6 }
 0x15e   :  { %v1237_v16 = vadd.f32 %v1786_v13, %v1148_v54  ;;  %v1729_v18 = vpop.f32.mrb[52].mxu0  ;;  %v1302_v23 = vadd.f32 %v1301_v9, %v1234_v15 }
 0x15f   :  { %v1787_v19 = vpop.f32.mrb[52].mxu1  ;;  %v1730_v21 = vpop.f32.mrb[53].mxu0 }
 0x160   :  { %v1731_v25 = vadd.f32 %v1730_v21, %v1729_v18  ;;  %v1788_v27 = vpop.f32.mrb[53].mxu1  ;;  %v1732_v28 = vpop.f32.mrb[54].mxu0  ;;  %v1303_v31 = vadd.f32 %v1302_v23, %v1237_v16 }
 0x161   :  { %v1789_v24 = vadd.f32 %v1788_v27, %v1787_v19  ;;  %v1790_v29 = vpop.f32.mrb[54].mxu1  ;;  %v1733_v30 = vpop.f32.mrb[55].mxu0 }
 0x162   :  { %v1153_v4 = vadd.f32 %v1731_v25, %v2260_v20  ;;  %v1734_v32 = vadd.f32 %v1733_v30, %v1732_v28  ;;  %v1791_v26 = vpop.f32.mrb[55].mxu1 }
 0x163   :  { %v1792_v33 = vadd.f32 %v1791_v26, %v1790_v29 }
 0x164   :  { %v1242_v34 = vadd.f32 %v1789_v24, %v1153_v4  ;;  %v1156_v6 = vadd.f32 %v1734_v32, %v2262_v22 }
 0x166   :  { %v1245_v41 = vadd.f32 %v1792_v33, %v1156_v6  ;;  %v1304_v43 = vadd.f32 %v1303_v31, %v1242_v34 }
 0x168   :  { %v1261_v44 = vadd.f32 %v1245_v41, %v43_v36 }
 0x16a   :  { %1275 = vst [vmem:[#allocation2 + $0x68] sm:$0xf] %v1261_v44 }
 0x171   :  { %v1292_v45 = vld [vmem:[#allocation2 + $0x68] sm:$0xf] }
 0x172   :  { %v1306_v46 = vsel %vm1305_vm0, %v1292_v45, 0.0 }
 0x173   :  { %v1307_v47 = vadd.f32 %v1306_v46, %v1304_v43 }
 0x175   :  { %v1308_v48 = vrot.slane %v1307_v47, 4 }
 0x177   :  { %v1309_v49 = vadd.f32 %v1308_v48, %v1307_v47 }
 0x179   :  { %v1310_v50 = vrot.slane %v1309_v49, 2 }
 0x17b   :  { %v1311_v20 = vadd.f32 %v1310_v50, %v1309_v49 }
 0x17d   :  { %v1312_v38 = vrot.slane %v1311_v20, 1 }
 0x17f   :  { %v1313_v51 = vadd.f32 %v1312_v38, %v1311_v20 }
 0x181   :  { %v1315_v60 = vmul.f32 0.009259259, %v1313_v51 }
 0x183   :  { %v1316_v53 = vsub.f32 %v2265_v39, %v1315_v60  ;;  %v1317_v22 = vsub.f32 %v2268_v42, %v1315_v60  ;;  %v1320_v55 = vsub.f32 %v2280_v14, %v1315_v60  ;;  %v1321_v40 = vsub.f32 %v2284_v17, %v1315_v60 }
 0x184   :  { %v1322_v62 = vsub.f32 %v2289_v35, %v1315_v60  ;;  %v1323_v61 = vsub.f32 %v2292_v37, %v1315_v60  ;;  %v1324_v63 = vsub.f32 %v1226_v56, %v1315_v60  ;;  %v1325_v0 = vsub.f32 %v1229_v59, %v1315_v60 }
 0x185   :  { %v1326_v1 = vsub.f32 %v1234_v15, %v1315_v60  ;;  %v1327_v2 = vsub.f32 %v1237_v16, %v1315_v60  ;;  %v1318_v3 = vsub.f32 %v2271_v57, %v1315_v60  ;;  %v1328_v5 = vsub.f32 %v1242_v34, %v1315_v60 }
 0x186   :  { %v1330_v10 = vmul.f32 %v1316_v53, %v1316_v53  ;;  %v1331_v7 = vmul.f32 %v1317_v22, %v1317_v22  ;;  %v1319_v39 = vsub.f32 %v2274_v58, %v1315_v60  ;;  %v1334_v17 = vmul.f32 %v1320_v55, %v1320_v55 }
 0x187   :  { %v1332_v42 = vmul.f32 %v1318_v3, %v1318_v3  ;;  %v1335_v35 = vmul.f32 %v1321_v40, %v1321_v40  ;;  %v1336_v37 = vmul.f32 %v1322_v62, %v1322_v62  ;;  %v1337_v59 = vmul.f32 %v1323_v61, %v1323_v61 }
 0x188   :  { %v1344_v8 = vadd.f32 %v1331_v7, %v1330_v10  ;;  %v1333_v14 = vmul.f32 %v1319_v39, %v1319_v39  ;;  %v1338_v13 = vmul.f32 %v1324_v63, %v1324_v63  ;;  %v1339_v57 = vmul.f32 %v1325_v0, %v1325_v0 }
 0x189   :  { %v1329_v16 = vsub.f32 %v1292_v45, %v1315_v60  ;;  %v1340_v18 = vmul.f32 %v1326_v1, %v1326_v1  ;;  %v1341_v58 = vmul.f32 %v1327_v2, %v1327_v2  ;;  %v1342_v25 = vmul.f32 %v1328_v5, %v1328_v5 }
 0x18a   :  { %v1345_v9 = vadd.f32 %v1344_v8, %v1332_v42 }
 0x18b   :  { %v1343_v23 = vmul.f32 %v1329_v16, %v1329_v16 }
 0x18c   :  { %v1346_v52 = vadd.f32 %v1345_v9, %v1333_v14 }
 0x18d   :  { %v1356_v24 = vsel %vm1305_vm0, %v1343_v23, 0.0 }
 0x18e   :  { %v1347_v11 = vadd.f32 %v1346_v52, %v1334_v17 }
 0x190   :  { %v1348_v56 = vadd.f32 %v1347_v11, %v1335_v35 }
 0x192   :  { %v1349_v12 = vadd.f32 %v1348_v56, %v1336_v37 }
 0x194   :  { %v1350_v15 = vadd.f32 %v1349_v12, %v1337_v59 }
 0x196   :  { %v1351_v54 = vadd.f32 %v1350_v15, %v1338_v13 }
 0x198   :  { %v1352_v19 = vadd.f32 %v1351_v54, %v1339_v57 }
 0x19a   :  { %v1353_v21 = vadd.f32 %v1352_v19, %v1340_v18 }
 0x19c   :  { %v1354_v27 = vadd.f32 %v1353_v21, %v1341_v58 }
 0x19e   :  { %v1355_v28 = vadd.f32 %v1354_v27, %v1342_v25 }
 0x1a0   :  { %v1357_v29 = vadd.f32 %v1356_v24, %v1355_v28 }
 0x1a2   :  { %v1358_v30 = vrot.slane %v1357_v29, 4 }
 0x1a4   :  { %v1359_v31 = vadd.f32 %v1358_v30, %v1357_v29 }
 0x1a6   :  { %v1360_v4 = vrot.slane %v1359_v31, 2 }
 0x1a8   :  { %v1361_v32 = vadd.f32 %v1360_v4, %v1359_v31 }
 0x1aa   :  { %v1362_v26 = vrot.slane %v1361_v32, 1 }
 0x1ac   :  { %v1363_v33 = vadd.f32 %v1362_v26, %v1361_v32 }
 0x1ae   :  { %v1364_v34 = vmul.f32 0.009259259, %v1363_v33 }
 0x1b0   :  { %v1365_v6 = vadd.f32 1e-05, %v1364_v34 }
 0x1b2   :  { %1858 = vrsqrt.f32 %v1365_v6 }
 0x1bc   :  { %v1859_v36 = vpop.eup %1858 }
 0x1bd   :  { %v1367_v41 = vmul.f32 %v1859_v36, %v1316_v53  ;;  %v1368_v43 = vmul.f32 %v1859_v36, %v1317_v22  ;;  %v1369_v44 = vmul.f32 %v1859_v36, %v1318_v3  ;;  %v1370_v45 = vmul.f32 %v1859_v36, %v1319_v39 }
 0x1be   :  { %v1371_v46 = vmul.f32 %v1859_v36, %v1320_v55  ;;  %v1372_v47 = vmul.f32 %v1859_v36, %v1321_v40  ;;  %v1373_v48 = vmul.f32 %v1859_v36, %v1322_v62  ;;  %v1374_v49 = vmul.f32 %v1859_v36, %v1323_v61 }
 0x1bf   :  { %v1375_v50 = vmul.f32 %v1859_v36, %v1324_v63  ;;  %v1376_v20 = vmul.f32 %v1859_v36, %v1325_v0  ;;  %v1377_v38 = vmul.f32 %v1859_v36, %v1326_v1  ;;  %v1378_v51 = vmul.f32 %v1859_v36, %v1327_v2 }
 0x1c0   :  { %v1379_v60 = vmul.f32 %v1859_v36, %v1328_v5  ;;  %v1380_v10 = vmul.f32 %v1859_v36, %v1329_v16  ;;  %vm1381_vm1 = vcmp.gt.f32.partialorder %v1367_v41, 0.0  ;;  %vm1382_vm2 = vcmp.gt.f32.partialorder %v1368_v43, 0.0 }
 0x1c1   :  { %vm1383_vm3 = vcmp.gt.f32.partialorder %v1369_v44, 0.0  ;;  %vm1384_vm4 = vcmp.gt.f32.partialorder %v1370_v45, 0.0  ;;  %vm1385_vm5 = vcmp.gt.f32.partialorder %v1371_v46, 0.0  ;;  %vm1386_vm6 = vcmp.gt.f32.partialorder %v1372_v47, 0.0 }
 0x1c2   :  { %vm1387_vm7 = vcmp.gt.f32.partialorder %v1373_v48, 0.0  ;;  %vm1388_vm8 = vcmp.gt.f32.partialorder %v1374_v49, 0.0  ;;  %vm1389_vm9 = vcmp.gt.f32.partialorder %v1375_v50, 0.0  ;;  %vm1390_vm10 = vcmp.gt.f32.partialorder %v1376_v20, 0.0 }
 0x1c3   :  { %vm1391_vm11 = vcmp.gt.f32.partialorder %v1377_v38, 0.0  ;;  %vm1392_vm12 = vcmp.gt.f32.partialorder %v1378_v51, 0.0  ;;  %vm1393_vm13 = vcmp.gt.f32.partialorder %v1379_v60, 0.0  ;;  %vm1394_vm14 = vcmp.gt.f32.partialorder %v1380_v10, 0.0 }
 0x1c4   :  { %v1395_v53 = vmul.f32 0.0, %v1367_v41  ;;  %v1396_v22 = vmul.f32 0.0, %v1368_v43  ;;  %v1397_v55 = vmul.f32 0.0, %v1369_v44  ;;  %v1398_v40 = vmul.f32 0.0, %v1370_v45 }
 0x1c5   :  { %v1399_v62 = vmul.f32 0.0, %v1371_v46  ;;  %v1400_v61 = vmul.f32 0.0, %v1372_v47  ;;  %v1401_v63 = vmul.f32 0.0, %v1373_v48  ;;  %v1402_v0 = vmul.f32 0.0, %v1374_v49 }
 0x1c6   :  { %v1403_v1 = vmul.f32 0.0, %v1375_v50  ;;  %v1404_v2 = vmul.f32 0.0, %v1376_v20  ;;  %v1405_v3 = vmul.f32 0.0, %v1377_v38  ;;  %v1406_v5 = vmul.f32 0.0, %v1378_v51 }
 0x1c7   :  { %v1407_v7 = vmul.f32 0.0, %v1379_v60  ;;  %v1408_v39 = vmul.f32 0.0, %v1380_v10  ;;  %v1409_v42 = vsel %vm1381_vm1, %v1367_v41, %v1395_v53  ;;  %v1410_v8 = vsel %vm1382_vm2, %v1368_v43, %v1396_v22 }
 0x1c8   :  { %v1411_v14 = vsel %vm1383_vm3, %v1369_v44, %v1397_v55  ;;  %v1412_v9 = vsel %vm1384_vm4, %v1370_v45, %v1398_v40  ;;  %v1413_v17 = vsel %vm1385_vm5, %v1371_v46, %v1399_v62  ;;  %v1414_v52 = vsel %vm1386_vm6, %v1372_v47, %v1400_v61  ;;  %1423 = vst [vmem:[%s2370_s2] sm:$0xff] %v1409_v42 }
 0x1c9   :  { %1424 = vst [vmem:[%s2370_s2 + $0x8] sm:$0xff] %v1410_v8  ;;  %v1415_v35 = vsel %vm1387_vm7, %v1373_v48, %v1401_v63  ;;  %v1416_v11 = vsel %vm1388_vm8, %v1374_v49, %v1402_v0  ;;  %v1417_v37 = vsel %vm1389_vm9, %v1375_v50, %v1403_v1  ;;  %v1418_v56 = vsel %vm1390_vm10, %v1376_v20, %v1404_v2 }
 0x1ca   :  { %1425 = vst [vmem:[%s2370_s2 + $0x10] sm:$0xff] %v1411_v14  ;;  %1426 = vst [vmem:[%s2370_s2 + $0x18] sm:$0xff] %v1412_v9  ;;  %v1419_v59 = vsel %vm1391_vm11, %v1377_v38, %v1405_v3  ;;  %v1420_v12 = vsel %vm1392_vm12, %v1378_v51, %v1406_v5  ;;  %v1421_v13 = vsel %vm1393_vm13, %v1379_v60, %v1407_v7 }
 0x1cb   :  { %1427 = vst [vmem:[%s2370_s2 + $0x20] sm:$0xff] %v1413_v17  ;;  %1428 = vst [vmem:[%s2370_s2 + $0x28] sm:$0xff] %v1414_v52  ;;  %v1422_v15 = vsel %vm1394_vm14, %v1380_v10, %v1408_v39 }
 0x1cc   :  { %1429 = vst [vmem:[%s2370_s2 + $0x30] sm:$0xff] %v1415_v35  ;;  %1430 = vst [vmem:[%s2370_s2 + $0x38] sm:$0xff] %v1416_v11 }
 0x1cd   :  { %1431 = vst [vmem:[%s2370_s2 + $0x40] sm:$0xff] %v1417_v37  ;;  %1432 = vst [vmem:[%s2370_s2 + $0x48] sm:$0xff] %v1418_v56 }
 0x1ce   :  { %1433 = vst [vmem:[%s2370_s2 + $0x50] sm:$0xff] %v1419_v59  ;;  %1434 = vst [vmem:[%s2370_s2 + $0x58] sm:$0xff] %v1420_v12 }
 0x1cf   :  { %1435 = vst [vmem:[%s2370_s2 + $0x60] sm:$0xff] %v1421_v13  ;;  %1436 = vst [vmem:[%s2370_s2 + $0x68] sm:$0xf] %v1422_v15 }

// kernel: combined_generator.16
= control target key start
LH: loop header
LB: loop body
LE: loop exit
PB: predicated region body
PF: predicated region fallthrough
CT: control target
= control target key end

     0   :  { %vm2663_vm0 = vcmask 523264   ;;  %s2660_s1 = inlined_call_operand.vmem [shape: bf16[512,64], index: 1, kind: input, shape index: {}]   ;;  %s2661_s0 = inlined_call_operand.vmem [shape: bf16[216,512], index: 0, kind: input, shape index: {}]   ;;  %s2662_s2 = inlined_call_operand.vmem [shape: f32[216,64], index: 2, kind: output, shape index: {}]  }
   0x1   :  { %v1633_v0 = vld [vmem:[%s2660_s1 + $0x40] sm:$0xff]   ;;  %v1637_v4 = vld [vmem:[%s2660_s1 + $0x48] sm:$0xff]   ;;  %v1641_v8 = vld [vmem:[%s2660_s1 + $0x50] sm:$0xff]  }
   0x2   :  { %v1634_v1 = vld [vmem:[%s2660_s1 + $0xc0] sm:$0xff]   ;;  %1432 = vmatprep.subr.bf16.mxu0 %v1633_v0  ;;  %v1638_v5 = vld [vmem:[%s2660_s1 + $0xc8] sm:$0xff]   ;;  %v1642_v9 = vld [vmem:[%s2660_s1 + $0xd0] sm:$0xff]  }
   0x3   :  { %v1635_v2 = vld [vmem:[%s2660_s1] sm:$0xff]   ;;  %1532 = vmatprep.subr.bf16.mxu1 %v1634_v1  ;;  %v1639_v6 = vld [vmem:[%s2660_s1 + $0x8] sm:$0xff]   ;;  %v1643_v10 = vld [vmem:[%s2660_s1 + $0x10] sm:$0xff]  }
   0x4   :  { %v1636_v3 = vld [vmem:[%s2660_s1 + $0x80] sm:$0xff]   ;;  %1433 = vmatpush3.bf16.msra.mxu0 %v1635_v2  ;;  %v1640_v7 = vld [vmem:[%s2660_s1 + $0x88] sm:$0xff]   ;;  %v1644_v11 = vld [vmem:[%s2660_s1 + $0x90] sm:$0xff]  }
   0x5   :  { %1533 = vmatpush3.bf16.msra.mxu1 %v1636_v3  ;;  %1434 = vmatprep.subr.bf16.mxu0 %v1637_v4  ;;  %v1645_v12 = vld [vmem:[%s2660_s1 + $0x58] sm:$0xff]   ;;  %v1649_v16 = vld [vmem:[%s2660_s1 + $0x60] sm:$0xff]   ;;  %v1653_v20 = vld [vmem:[%s2660_s1 + $0x68] sm:$0xff]  }
   0x6   :  { %1534 = vmatprep.subr.bf16.mxu1 %v1638_v5  ;;  %v1646_v13 = vld [vmem:[%s2660_s1 + $0xd8] sm:$0xff]   ;;  %v1650_v17 = vld [vmem:[%s2660_s1 + $0xe0] sm:$0xff]   ;;  %v1654_v21 = vld [vmem:[%s2660_s1 + $0xe8] sm:$0xff]  }
   0x7   :  { %v1647_v14 = vld [vmem:[%s2660_s1 + $0x18] sm:$0xff]   ;;  %v1651_v18 = vld [vmem:[%s2660_s1 + $0x20] sm:$0xff]   ;;  %v1655_v22 = vld [vmem:[%s2660_s1 + $0x28] sm:$0xff]  }
   0x8   :  { %1435 = vmatpush3.bf16.msra.mxu0 %v1639_v6  ;;  %v1648_v15 = vld [vmem:[%s2660_s1 + $0x98] sm:$0xff]   ;;  %v1652_v19 = vld [vmem:[%s2660_s1 + $0xa0] sm:$0xff]   ;;  %v1656_v23 = vld [vmem:[%s2660_s1 + $0xa8] sm:$0xff]  }
   0x9   :  { %1535 = vmatpush3.bf16.msra.mxu1 %v1640_v7  ;;  %1436 = vmatprep.subr.bf16.mxu0 %v1641_v8  ;;  %v1657_v24 = vld [vmem:[%s2660_s1 + $0x70] sm:$0xff]   ;;  %v1661_v28 = vld [vmem:[%s2660_s1 + $0x78] sm:$0xff]  }
   0xa   :  { %1536 = vmatprep.subr.bf16.mxu1 %v1642_v9  ;;  %v1658_v25 = vld [vmem:[%s2660_s1 + $0xf0] sm:$0xff]   ;;  %v1662_v29 = vld [vmem:[%s2660_s1 + $0xf8] sm:$0xff]  }
   0xb   :  { %v1659_v26 = vld [vmem:[%s2660_s1 + $0x30] sm:$0xff]   ;;  %v1663_v30 = vld [vmem:[%s2660_s1 + $0x38] sm:$0xff]  }
   0xc   :  { %1437 = vmatpush3.bf16.msra.mxu0 %v1643_v10  ;;  %v1660_v27 = vld [vmem:[%s2660_s1 + $0xb0] sm:$0xff]   ;;  %v1664_v31 = vld [vmem:[%s2660_s1 + $0xb8] sm:$0xff]  }
   0xd   :  { %1537 = vmatpush3.bf16.msra.mxu1 %v1644_v11  ;;  %1438 = vmatprep.subr.bf16.mxu0 %v1645_v12  ;;  %v1665_v32 = vld [vmem:[%s2661_s0] ss:$16 sps:$4 sm:$0xff]   ;;  %v1667_v33 = vld [vmem:[%s2661_s0 + $0x4] ss:$16 sps:$4 sm:$0xff]   ;;  %v1668_v34 = vld [vmem:[%s2661_s0 + $0x8] ss:$16 sps:$4 sm:$0xff]  }
   0xe   :  { %1538 = vmatprep.subr.bf16.mxu1 %v1646_v13  ;;  %v1670_v35 = vld [vmem:[%s2661_s0 + $0xc] ss:$16 sps:$4 sm:$0xff]   ;;  %687 = vmatprep.mubr.bf16.mxu0 %v1667_v33  ;;  %v1671_v36 = vld [vmem:[%s2661_s0 + $0x24] ss:$16 sps:$4 sm:$0xff]   ;;  %v1675_v38 = vld [vmem:[%s2661_s0 + $0x20] ss:$16 sps:$4 sm:$0xff]  }
   0xf   :  { %831 = vmatprep.mubr.bf16.mxu1 %v1670_v35  ;;  %v1673_v37 = vld [vmem:[%s2661_s0 + $0x2c] ss:$16 sps:$4 sm:$0xff]   ;;  %v1676_v39 = vld [vmem:[%s2661_s0 + $0x28] ss:$16 sps:$4 sm:$0xff]   ;;  %v1677_v40 = vld [vmem:[%s2661_s0 + $0x44] ss:$16 sps:$4 sm:$0xff]  }
  0x10   :  { %1439 = vmatpush3.bf16.msra.mxu0 %v1647_v14  ;;  %v1679_v41 = vld [vmem:[%s2661_s0 + $0x4c] ss:$16 sps:$4 sm:$0xff]   ;;  %v1681_v42 = vld [vmem:[%s2661_s0 + $0x40] ss:$16 sps:$4 sm:$0xff]   ;;  %v1682_v43 = vld [vmem:[%s2661_s0 + $0x48] ss:$16 sps:$4 sm:$0xff]  }
  0x11   :  { %1539 = vmatpush3.bf16.msra.mxu1 %v1648_v15  ;;  %1440 = vmatprep.subr.bf16.mxu0 %v1649_v16  ;;  %v1683_v44 = vld [vmem:[%s2661_s0 + $0x64] ss:$16 sps:$4 sm:$0xff]   ;;  %v1685_v45 = vld [vmem:[%s2661_s0 + $0x6c] ss:$16 sps:$4 sm:$0xff]   ;;  %v1687_v46 = vld [vmem:[%s2661_s0 + $0x60] ss:$16 sps:$4 sm:$0xff]  }
  0x12   :  { %1540 = vmatprep.subr.bf16.mxu1 %v1650_v17  ;;  %v1688_v47 = vld [vmem:[%s2661_s0 + $0x68] ss:$16 sps:$4 sm:$0xff]   ;;  %v1689_v48 = vld [vmem:[%s2661_s0 + $0x84] ss:$16 sps:$4 sm:$0xff]   ;;  %v1691_v49 = vld [vmem:[%s2661_s0 + $0x8c] ss:$16 sps:$4 sm:$0xff]  }
  0x13   :  { %v1693_v50 = vld [vmem:[%s2661_s0 + $0x80] ss:$16 sps:$4 sm:$0xff]   ;;  %v1694_v51 = vld [vmem:[%s2661_s0 + $0x88] ss:$16 sps:$4 sm:$0xff]   ;;  %v1695_v52 = vld [vmem:[%s2661_s0 + $0xa4] ss:$16 sps:$4 sm:$0xff]  }
  0x14   :  { %1441 = vmatpush3.bf16.msra.mxu0 %v1651_v18  ;;  %v1697_v53 = vld [vmem:[%s2661_s0 + $0xac] ss:$16 sps:$4 sm:$0xff]   ;;  %v1699_v54 = vld [vmem:[%s2661_s0 + $0xa0] ss:$16 sps:$4 sm:$0xff]   ;;  %v1700_v55 = vld [vmem:[%s2661_s0 + $0xa8] ss:$16 sps:$4 sm:$0xff]  }
  0x15   :  { %1541 = vmatpush3.bf16.msra.mxu1 %v1652_v19  ;;  %1442 = vmatprep.subr.bf16.mxu0 %v1653_v20  ;;  %v1701_v56 = vld [vmem:[%s2661_s0 + $0xc4] ss:$16 sps:$4 sm:$0xff]   ;;  %v1703_v57 = vld [vmem:[%s2661_s0 + $0xcc] ss:$16 sps:$4 sm:$0xff]   ;;  %v1705_v58 = vld [vmem:[%s2661_s0 + $0xc0] ss:$16 sps:$4 sm:$0xff]  }
  0x16   :  { %1542 = vmatprep.subr.bf16.mxu1 %v1654_v21  ;;  %v1706_v59 = vld [vmem:[%s2661_s0 + $0xc8] ss:$16 sps:$4 sm:$0xff]   ;;  %v1707_v60 = vld [vmem:[%s2661_s0 + $0xe4] ss:$16 sps:$4 sm:$0xff]   ;;  %v1709_v61 = vld [vmem:[%s2661_s0 + $0xec] ss:$16 sps:$4 sm:$0xff]  }
  0x17   :  { %v1711_v62 = vld [vmem:[%s2661_s0 + $0xe0] ss:$16 sps:$4 sm:$0xff]   ;;  %v1712_v63 = vld [vmem:[%s2661_s0 + $0xe8] ss:$16 sps:$4 sm:$0xff]   ;;  %v1713_v0 = vld [vmem:[%s2661_s0 + $0x104] ss:$16 sps:$4 sm:$0xff]  }
  0x18   :  { %1443 = vmatpush3.bf16.msra.mxu0 %v1655_v22  ;;  %v1715_v1 = vld [vmem:[%s2661_s0 + $0x10c] ss:$16 sps:$4 sm:$0xff]   ;;  %v1717_v2 = vld [vmem:[%s2661_s0 + $0x100] ss:$16 sps:$4 sm:$0xff]   ;;  %v1718_v3 = vld [vmem:[%s2661_s0 + $0x108] ss:$16 sps:$4 sm:$0xff]  }
  0x19   :  { %1543 = vmatpush3.bf16.msra.mxu1 %v1656_v23  ;;  %1444 = vmatprep.subr.bf16.mxu0 %v1657_v24  ;;  %v1719_v4 = vld [vmem:[%s2661_s0 + $0x124] ss:$16 sps:$4 sm:$0xff]   ;;  %v1721_v5 = vld [vmem:[%s2661_s0 + $0x12c] ss:$16 sps:$4 sm:$0xff]   ;;  %v1723_v6 = vld [vmem:[%s2661_s0 + $0x120] ss:$16 sps:$4 sm:$0xff]  }
  0x1a   :  { %1544 = vmatprep.subr.bf16.mxu1 %v1658_v25  ;;  %v1724_v7 = vld [vmem:[%s2661_s0 + $0x128] ss:$16 sps:$4 sm:$0xff]   ;;  %v1725_v8 = vld [vmem:[%s2661_s0 + $0x144] ss:$16 sps:$4 sm:$0xff]   ;;  %v1727_v9 = vld [vmem:[%s2661_s0 + $0x14c] ss:$16 sps:$4 sm:$0xff]  }
  0x1b   :  { %v1729_v10 = vld [vmem:[%s2661_s0 + $0x140] ss:$16 sps:$4 sm:$0xff]   ;;  %v1730_v11 = vld [vmem:[%s2661_s0 + $0x148] ss:$16 sps:$4 sm:$0xff]   ;;  %v1731_v12 = vld [vmem:[%s2661_s0 + $0x164] ss:$16 sps:$4 sm:$0xff]  }
  0x1c   :  { %1445 = vmatpush3.bf16.msra.mxu0 %v1659_v26  ;;  %v1733_v13 = vld [vmem:[%s2661_s0 + $0x16c] ss:$16 sps:$4 sm:$0xff]   ;;  %v1749_v14 = vmov 0.0   ;;  %v1735_v15 = vld [vmem:[%s2661_s0 + $0x160] ss:$16 sps:$4 sm:$0xff]  }
  0x1d   :  { %1545 = vmatpush3.bf16.msra.mxu1 %v1660_v27  ;;  %1446 = vmatprep.subr.bf16.mxu0 %v1661_v28  ;;  %17 = vst.msk [vmem:[#allocation2] sm:$0xff] %vm2663_vm0, %v1749_v14  ;;  %18 = vst.msk [vmem:[#allocation2 + $0x8] sm:$0xff] %vm2663_vm0, %v1749_v14  ;;  %v1736_v16 = vld [vmem:[%s2661_s0 + $0x168] ss:$16 sps:$4 sm:$0xff]   ;;  %v1737_v17 = vld [vmem:[%s2661_s0 + $0x184] ss:$16 sps:$4 sm:$0xff]  }
  0x1e   :  { %1546 = vmatprep.subr.bf16.mxu1 %v1662_v29  ;;  %19 = vst.msk [vmem:[#allocation2 + $0x10] sm:$0xff] %vm2663_vm0, %v1749_v14  ;;  %20 = vst.msk [vmem:[#allocation2 + $0x18] sm:$0xff] %vm2663_vm0, %v1749_v14  ;;  %v1739_v18 = vld [vmem:[%s2661_s0 + $0x18c] ss:$16 sps:$4 sm:$0xff]   ;;  %v123_v19 = vld [vmem:[%s2661_s0 + $0x1a0] sm:$0xff] }
  0x1f   :  { %21 = vst.msk [vmem:[#allocation2 + $0x20] sm:$0xff] %vm2663_vm0, %v1749_v14  ;;  %22 = vst.msk [vmem:[#allocation2 + $0x28] sm:$0xff] %vm2663_vm0, %v1749_v14  ;;  %v124_v20 = vld [vmem:[%s2661_s0 + $0x1a8] sm:$0xff]  ;;  %v1741_v21 = vld [vmem:[%s2661_s0 + $0x180] ss:$16 sps:$4 sm:$0xff]   ;;  %v1397_v23 = vcombine.high %v123_v19, %v123_v19  ;;  %v1396_v25 = vcombine.low %v123_v19, %v123_v19 }
  0x20   :  { %1447 = vmatpush3.bf16.msra.mxu0 %v1663_v30  ;;  %23 = vst.msk [vmem:[#allocation2 + $0x30] sm:$0xff] %vm2663_vm0, %v1749_v14  ;;  %24 = vst.msk [vmem:[#allocation2 + $0x38] sm:$0xff] %vm2663_vm0, %v1749_v14  ;;  %v1742_v22 = vld [vmem:[%s2661_s0 + $0x188] ss:$16 sps:$4 sm:$0xff]   ;;  %v1399_v24 = vcombine.high %v124_v20, %v124_v20  ;;  %v1398_v26 = vcombine.low %v124_v20, %v124_v20 }
  0x21   :  { %1547 = vmatpush3.bf16.msra.mxu1 %v1664_v31  ;;  %25 = vst.msk [vmem:[#allocation2 + $0x40] sm:$0xff] %vm2663_vm0, %v1749_v14  ;;  %26 = vst.msk [vmem:[#allocation2 + $0x48] sm:$0xff] %vm2663_vm0, %v1749_v14 }
  0x22   :  { %27 = vst.msk [vmem:[#allocation2 + $0x50] sm:$0xff] %vm2663_vm0, %v1749_v14  ;;  %28 = vst.msk [vmem:[#allocation2 + $0x58] sm:$0xff] %vm2663_vm0, %v1749_v14 }
  0x23   :  { %688 = vmatmul.mubr.bf16.vlgmr.msra.gmra.mrb[0].mxu0 %v1665_v32  ;;  %29 = vst.msk [vmem:[#allocation2 + $0x60] sm:$0xff] %vm2663_vm0, %v1749_v14  ;;  %30 = vst.msk [vmem:[#allocation2 + $0x68] sm:$0xff] %vm2663_vm0, %v1749_v14 }
  0x24   :  { %832 = vmatmul.mubr.bf16.vlgmr.msra.gmra.mrb[0].mxu1 %v1668_v34  ;;  %695 = vmatprep.mubr.bf16.mxu0 %v1671_v36  ;;  %31 = vst.msk [vmem:[#allocation2 + $0x70] sm:$0xff] %vm2663_vm0, %v1749_v14  ;;  %32 = vst.msk [vmem:[#allocation2 + $0x78] sm:$0xff] %vm2663_vm0, %v1749_v14  ;;  %v44_v36 = vld [vmem:[#allocation2] sm:$0xff] }
  0x25   :  { %839 = vmatprep.mubr.bf16.mxu1 %v1673_v37  ;;  %33 = vst.msk [vmem:[#allocation2 + $0x80] sm:$0xff] %vm2663_vm0, %v1749_v14  ;;  %34 = vst.msk [vmem:[#allocation2 + $0x88] sm:$0xff] %vm2663_vm0, %v1749_v14 }
  0x26   :  { %35 = vst.msk [vmem:[#allocation2 + $0x90] sm:$0xff] %vm2663_vm0, %v1749_v14  ;;  %36 = vst.msk [vmem:[#allocation2 + $0x98] sm:$0xff] %vm2663_vm0, %v1749_v14 }
  0x27   :  { %37 = vst.msk [vmem:[#allocation2 + $0xa0] sm:$0xff] %vm2663_vm0, %v1749_v14  ;;  %38 = vst.msk [vmem:[#allocation2 + $0xa8] sm:$0xff] %vm2663_vm0, %v1749_v14 }
  0x28   :  { %39 = vst.msk [vmem:[#allocation2 + $0xb0] sm:$0xff] %vm2663_vm0, %v1749_v14  ;;  %40 = vst.msk [vmem:[#allocation2 + $0xb8] sm:$0xff] %vm2663_vm0, %v1749_v14 }
  0x29   :  { %41 = vst.msk [vmem:[#allocation2 + $0xc0] sm:$0xff] %vm2663_vm0, %v1749_v14  ;;  %42 = vst.msk [vmem:[#allocation2 + $0xc8] sm:$0xff] %vm2663_vm0, %v1749_v14 }
  0x2a   :  { %43 = vst.msk [vmem:[#allocation2 + $0xd0] sm:$0xff] %vm2663_vm0, %v1749_v14 }
  0x2b   :  { %696 = vmatmul.mubr.bf16.gmra.mrb[4].mxu0 %v1675_v38 }
  0x2c   :  { %840 = vmatmul.mubr.bf16.gmra.mrb[4].mxu1 %v1676_v39  ;;  %703 = vmatprep.mubr.bf16.mxu0 %v1677_v40 }
  0x2d   :  { %847 = vmatprep.mubr.bf16.mxu1 %v1679_v41  ;;  %v45_v41 = vld [vmem:[#allocation2 + $0x8] sm:$0xff] }
  0x33   :  { %704 = vmatmul.mubr.bf16.gmra.mrb[8].mxu0 %v1681_v42 }
  0x34   :  { %848 = vmatmul.mubr.bf16.gmra.mrb[8].mxu1 %v1682_v43  ;;  %711 = vmatprep.mubr.bf16.mxu0 %v1683_v44 }
  0x35   :  { %855 = vmatprep.mubr.bf16.mxu1 %v1685_v45 }
  0x3b   :  { %712 = vmatmul.mubr.bf16.gmra.mrb[12].mxu0 %v1687_v46 }
  0x3c   :  { %856 = vmatmul.mubr.bf16.gmra.mrb[12].mxu1 %v1688_v47  ;;  %719 = vmatprep.mubr.bf16.mxu0 %v1689_v48 }
  0x3d   :  { %863 = vmatprep.mubr.bf16.mxu1 %v1691_v49 }
  0x43   :  { %720 = vmatmul.mubr.bf16.gmra.mrb[16].mxu0 %v1693_v50 }
  0x44   :  { %864 = vmatmul.mubr.bf16.gmra.mrb[16].mxu1 %v1694_v51  ;;  %727 = vmatprep.mubr.bf16.mxu0 %v1695_v52 }
  0x45   :  { %871 = vmatprep.mubr.bf16.mxu1 %v1697_v53 }
  0x4b   :  { %728 = vmatmul.mubr.bf16.gmra.mrb[20].mxu0 %v1699_v54  ;;  %v46_v54 = vld [vmem:[#allocation2 + $0x10] sm:$0xff] }
  0x4c   :  { %872 = vmatmul.mubr.bf16.gmra.mrb[20].mxu1 %v1700_v55  ;;  %735 = vmatprep.mubr.bf16.mxu0 %v1701_v56 }
  0x4d   :  { %879 = vmatprep.mubr.bf16.mxu1 %v1703_v57 }
  0x53   :  { %736 = vmatmul.mubr.bf16.gmra.mrb[24].mxu0 %v1705_v58 }
  0x54   :  { %880 = vmatmul.mubr.bf16.gmra.mrb[24].mxu1 %v1706_v59  ;;  %743 = vmatprep.mubr.bf16.mxu0 %v1707_v60  ;;  %v47_v59 = vld [vmem:[#allocation2 + $0x18] sm:$0xff] }
  0x55   :  { %887 = vmatprep.mubr.bf16.mxu1 %v1709_v61 }
  0x5b   :  { %744 = vmatmul.mubr.bf16.gmra.mrb[28].mxu0 %v1711_v62 }
  0x5c   :  { %888 = vmatmul.mubr.bf16.gmra.mrb[28].mxu1 %v1712_v63  ;;  %751 = vmatprep.mubr.bf16.mxu0 %v1713_v0 }
  0x5d   :  { %895 = vmatprep.mubr.bf16.mxu1 %v1715_v1 }
  0x63   :  { %752 = vmatmul.mubr.bf16.gmra.mrb[32].mxu0 %v1717_v2 }
  0x64   :  { %896 = vmatmul.mubr.bf16.gmra.mrb[32].mxu1 %v1718_v3  ;;  %759 = vmatprep.mubr.bf16.mxu0 %v1719_v4 }
  0x65   :  { %903 = vmatprep.mubr.bf16.mxu1 %v1721_v5 }
  0x6b   :  { %760 = vmatmul.mubr.bf16.gmra.mrb[36].mxu0 %v1723_v6 }
  0x6c   :  { %904 = vmatmul.mubr.bf16.gmra.mrb[36].mxu1 %v1724_v7  ;;  %767 = vmatprep.mubr.bf16.mxu0 %v1725_v8  ;;  %v48_v8 = vld [vmem:[#allocation2 + $0x20] sm:$0xff] }
  0x6d   :  { %911 = vmatprep.mubr.bf16.mxu1 %v1727_v9 }
  0x73   :  { %768 = vmatmul.mubr.bf16.gmra.mrb[40].mxu0 %v1729_v10 }
  0x74   :  { %912 = vmatmul.mubr.bf16.gmra.mrb[40].mxu1 %v1730_v11  ;;  %775 = vmatprep.mubr.bf16.mxu0 %v1731_v12 }
  0x75   :  { %919 = vmatprep.mubr.bf16.mxu1 %v1733_v13  ;;  %v49_v13 = vld [vmem:[#allocation2 + $0x28] sm:$0xff] }
  0x7b   :  { %776 = vmatmul.mubr.bf16.gmra.mrb[44].mxu0 %v1735_v15 }
  0x7c   :  { %920 = vmatmul.mubr.bf16.gmra.mrb[44].mxu1 %v1736_v16  ;;  %783 = vmatprep.mubr.bf16.mxu0 %v1737_v17 }
  0x7d   :  { %927 = vmatprep.mubr.bf16.mxu1 %v1739_v18 }
  0x83   :  { %784 = vmatmul.mubr.bf16.gmra.mrb[48].mxu0 %v1741_v21 }
  0x84   :  { %928 = vmatmul.mubr.bf16.gmra.mrb[48].mxu1 %v1742_v22  ;;  %791 = vmatprep.mubr.bf16.mxu0 %v1397_v23 }
  0x85   :  { %935 = vmatprep.mubr.bf16.mxu1 %v1399_v24 }
  0x8b   :  { %792 = vmatmul.mubr.bf16.gmra.mrb[52].mxu0 %v1396_v25 }
  0x8c   :  { %936 = vmatmul.mubr.bf16.gmra.mrb[52].mxu1 %v1398_v26  ;;  %v50_v26 = vld [vmem:[#allocation2 + $0x30] sm:$0xff] }
  0xf6   :  { %v1448_v27 = vpop.f32.mrb[0].mxu0 }
  0xf7   :  { %v1548_v28 = vpop.f32.mrb[0].mxu1  ;;  %v1449_v29 = vpop.f32.mrb[1].mxu0 }
  0xf8   :  { %v1450_v30 = vadd.f32 %v1449_v29, %v1448_v27  ;;  %v1549_v31 = vpop.f32.mrb[1].mxu1  ;;  %v1451_v32 = vpop.f32.mrb[2].mxu0 }
  0xf9   :  { %v1550_v33 = vadd.f32 %v1549_v31, %v1548_v28  ;;  %v1551_v34 = vpop.f32.mrb[2].mxu1  ;;  %v1452_v35 = vpop.f32.mrb[3].mxu0  ;;  %v51_v31 = vld [vmem:[#allocation2 + $0x38] sm:$0xff] }
  0xfa   :  { %v1453_v37 = vadd.f32 %v1452_v35, %v1451_v32  ;;  %v1552_v38 = vpop.f32.mrb[3].mxu1 }
  0xfb   :  { %v834_v39 = vadd.f32 %v1550_v33, %v1450_v30  ;;  %v1553_v40 = vadd.f32 %v1552_v38, %v1551_v34 }
  0xfd   :  { %v943_v42 = vadd.f32 %v834_v39, %v44_v36  ;;  %v837_v43 = vadd.f32 %v1553_v40, %v1453_v37 }
  0xfe   :  { %v1454_v44 = vpop.f32.mrb[4].mxu0 }
  0xff   :  { %971 = vst.msk [vmem:[#allocation2] sm:$0xff] %vm2663_vm0, %v943_v42  ;;  %v944_v45 = vadd.f32 %v837_v43, %v45_v41  ;;  %v1554_v46 = vpop.f32.mrb[4].mxu1  ;;  %v1455_v47 = vpop.f32.mrb[5].mxu0 }
 0x100   :  { %v1456_v48 = vadd.f32 %v1455_v47, %v1454_v44  ;;  %v1555_v49 = vpop.f32.mrb[5].mxu1  ;;  %v1457_v50 = vpop.f32.mrb[6].mxu0  ;;  %v52_v44 = vld [vmem:[#allocation2 + $0x40] sm:$0xff] }
 0x101   :  { %972 = vst.msk [vmem:[#allocation2 + $0x8] sm:$0xff] %vm2663_vm0, %v944_v45  ;;  %v1556_v51 = vadd.f32 %v1555_v49, %v1554_v46  ;;  %v1557_v52 = vpop.f32.mrb[6].mxu1  ;;  %v1458_v53 = vpop.f32.mrb[7].mxu0  ;;  %v53_v49 = vld [vmem:[#allocation2 + $0x48] sm:$0xff] }
 0x102   :  { %v1459_v55 = vadd.f32 %v1458_v53, %v1457_v50  ;;  %v1558_v56 = vpop.f32.mrb[7].mxu1 }
 0x103   :  { %v842_v57 = vadd.f32 %v1556_v51, %v1456_v48  ;;  %v1559_v58 = vadd.f32 %v1558_v56, %v1557_v52 }
 0x105   :  { %v945_v60 = vadd.f32 %v842_v57, %v46_v54  ;;  %v845_v61 = vadd.f32 %v1559_v58, %v1459_v55 }
 0x106   :  { %v1460_v62 = vpop.f32.mrb[8].mxu0 }
 0x107   :  { %973 = vst.msk [vmem:[#allocation2 + $0x10] sm:$0xff] %vm2663_vm0, %v945_v60  ;;  %v946_v63 = vadd.f32 %v845_v61, %v47_v59  ;;  %v1560_v0 = vpop.f32.mrb[8].mxu1  ;;  %v1461_v1 = vpop.f32.mrb[9].mxu0 }
 0x108   :  { %v1462_v2 = vadd.f32 %v1461_v1, %v1460_v62  ;;  %v1561_v3 = vpop.f32.mrb[9].mxu1  ;;  %v1463_v4 = vpop.f32.mrb[10].mxu0  ;;  %v2059_v56 = vld [vmem:[#allocation2 + $0x8] sm:$0xff]  ;;  %v54_v1 = vld [vmem:[#allocation2 + $0x50] sm:$0xff] }
 0x109   :  { %974 = vst.msk [vmem:[#allocation2 + $0x18] sm:$0xff] %vm2663_vm0, %v946_v63  ;;  %v1562_v5 = vadd.f32 %v1561_v3, %v1560_v0  ;;  %v1563_v6 = vpop.f32.mrb[10].mxu1  ;;  %v1464_v7 = vpop.f32.mrb[11].mxu0  ;;  %v2062_v63 = vld [vmem:[#allocation2] sm:$0xff] }
 0x10a   :  { %v1465_v9 = vadd.f32 %v1464_v7, %v1463_v4  ;;  %v1564_v10 = vpop.f32.mrb[11].mxu1  ;;  %v1029_v4 = vsel %vm2663_vm0, %v2059_v56, 0.0  ;;  %v55_v7 = vld [vmem:[#allocation2 + $0x58] sm:$0xff] }
 0x10b   :  { %v850_v11 = vadd.f32 %v1562_v5, %v1462_v2  ;;  %v1565_v12 = vadd.f32 %v1564_v10, %v1563_v6 }
 0x10d   :  { %v947_v14 = vadd.f32 %v850_v11, %v48_v8  ;;  %v853_v15 = vadd.f32 %v1565_v12, %v1465_v9  ;;  %v1028_v8 = vsel %vm2663_vm0, %v2062_v63, 0.0 }
 0x10e   :  { %v1466_v16 = vpop.f32.mrb[12].mxu0  ;;  %v2064_v0 = vld [vmem:[#allocation2 + $0x10] sm:$0xff]  ;;  %v1030_v12 = vadd.f32 %v1029_v4, %v1028_v8 }
 0x10f   :  { %975 = vst.msk [vmem:[#allocation2 + $0x20] sm:$0xff] %vm2663_vm0, %v947_v14  ;;  %v948_v17 = vadd.f32 %v853_v15, %v49_v13  ;;  %v1566_v18 = vpop.f32.mrb[12].mxu1  ;;  %v1467_v19 = vpop.f32.mrb[13].mxu0  ;;  %v1031_v9 = vsel %vm2663_vm0, %v2064_v0, 0.0 }
 0x110   :  { %v1468_v20 = vadd.f32 %v1467_v19, %v1466_v16  ;;  %v1567_v21 = vpop.f32.mrb[13].mxu1  ;;  %v1469_v22 = vpop.f32.mrb[14].mxu0  ;;  %v2072_v13 = vld [vmem:[#allocation2 + $0x18] sm:$0xff] }
 0x111   :  { %976 = vst.msk [vmem:[#allocation2 + $0x28] sm:$0xff] %vm2663_vm0, %v948_v17  ;;  %v1568_v23 = vadd.f32 %v1567_v21, %v1566_v18  ;;  %v1569_v24 = vpop.f32.mrb[14].mxu1  ;;  %v1470_v25 = vpop.f32.mrb[15].mxu0  ;;  %v1032_v18 = vadd.f32 %v1031_v9, %v1030_v12 }
 0x112   :  { %v1471_v27 = vadd.f32 %v1470_v25, %v1469_v22  ;;  %v1570_v28 = vpop.f32.mrb[15].mxu1 }
 0x113   :  { %v858_v29 = vadd.f32 %v1568_v23, %v1468_v20  ;;  %v1571_v30 = vadd.f32 %v1570_v28, %v1569_v24  ;;  %v1033_v23 = vsel %vm2663_vm0, %v2072_v13, 0.0 }
 0x115   :  { %v949_v32 = vadd.f32 %v858_v29, %v50_v26  ;;  %v861_v33 = vadd.f32 %v1571_v30, %v1471_v27  ;;  %v56_v27 = vld [vmem:[#allocation2 + $0x60] sm:$0xff] }
 0x116   :  { %v1472_v34 = vpop.f32.mrb[16].mxu0  ;;  %v2075_v19 = vld [vmem:[#allocation2 + $0x20] sm:$0xff] }
 0x117   :  { %977 = vst.msk [vmem:[#allocation2 + $0x30] sm:$0xff] %vm2663_vm0, %v949_v32  ;;  %v950_v35 = vadd.f32 %v861_v33, %v51_v31  ;;  %v1572_v36 = vpop.f32.mrb[16].mxu1  ;;  %v1473_v37 = vpop.f32.mrb[17].mxu0  ;;  %v1035_v30 = vsel %vm2663_vm0, %v2075_v19, 0.0  ;;  %v1034_v33 = vadd.f32 %v1033_v23, %v1032_v18 }
 0x118   :  { %v1474_v38 = vadd.f32 %v1473_v37, %v1472_v34  ;;  %v1573_v39 = vpop.f32.mrb[17].mxu1  ;;  %v1475_v40 = vpop.f32.mrb[18].mxu0  ;;  %v2082_v34 = vld [vmem:[#allocation2 + $0x28] sm:$0xff] }
 0x119   :  { %978 = vst.msk [vmem:[#allocation2 + $0x38] sm:$0xff] %vm2663_vm0, %v950_v35  ;;  %v1574_v41 = vadd.f32 %v1573_v39, %v1572_v36  ;;  %v1575_v42 = vpop.f32.mrb[18].mxu1  ;;  %v1476_v43 = vpop.f32.mrb[19].mxu0  ;;  %v57_v35 = vld [vmem:[#allocation2 + $0x68] sm:$0xff] }
 0x11a   :  { %v1477_v45 = vadd.f32 %v1476_v43, %v1475_v40  ;;  %v1576_v46 = vpop.f32.mrb[19].mxu1 }
 0x11b   :  { %v866_v47 = vadd.f32 %v1574_v41, %v1474_v38  ;;  %v1577_v48 = vadd.f32 %v1576_v46, %v1575_v42  ;;  %v1036_v38 = vadd.f32 %v1035_v30, %v1034_v33  ;;  %v1037_v41 = vsel %vm2663_vm0, %v2082_v34, 0.0 }
 0x11d   :  { %v951_v50 = vadd.f32 %v866_v47, %v52_v44  ;;  %v869_v51 = vadd.f32 %v1577_v48, %v1477_v45 }
 0x11e   :  { %v1478_v52 = vpop.f32.mrb[20].mxu0  ;;  %v2084_v39 = vld [vmem:[#allocation2 + $0x30] sm:$0xff] }
 0x11f   :  { %979 = vst.msk [vmem:[#allocation2 + $0x40] sm:$0xff] %vm2663_vm0, %v951_v50  ;;  %v952_v53 = vadd.f32 %v869_v51, %v53_v49  ;;  %v1578_v54 = vpop.f32.mrb[20].mxu1  ;;  %v1479_v55 = vpop.f32.mrb[21].mxu0  ;;  %v1039_v48 = vsel %vm2663_vm0, %v2084_v39, 0.0 }
 0x120   :  { %v1480_v57 = vadd.f32 %v1479_v55, %v1478_v52  ;;  %v1579_v58 = vpop.f32.mrb[21].mxu1  ;;  %v1481_v59 = vpop.f32.mrb[22].mxu0  ;;  %v1038_v52 = vadd.f32 %v1037_v41, %v1036_v38 }
 0x121   :  { %980 = vst.msk [vmem:[#allocation2 + $0x48] sm:$0xff] %vm2663_vm0, %v952_v53  ;;  %v1580_v60 = vadd.f32 %v1579_v58, %v1578_v54  ;;  %v1581_v61 = vpop.f32.mrb[22].mxu1  ;;  %v1482_v62 = vpop.f32.mrb[23].mxu0  ;;  %v2092_v53 = vld [vmem:[#allocation2 + $0x38] sm:$0xff]  ;;  %v58_v54 = vld [vmem:[#allocation2 + $0x70] sm:$0xff] }
 0x122   :  { %v1483_v2 = vadd.f32 %v1482_v62, %v1481_v59  ;;  %v1582_v3 = vpop.f32.mrb[23].mxu1  ;;  %v59_v62 = vld [vmem:[#allocation2 + $0x78] sm:$0xff] }
 0x123   :  { %v874_v5 = vadd.f32 %v1580_v60, %v1480_v57  ;;  %v1583_v6 = vadd.f32 %v1582_v3, %v1581_v61  ;;  %v1040_v60 = vadd.f32 %v1039_v48, %v1038_v52  ;;  %v62_v48 = vld [vmem:[#allocation2 + $0x90] sm:$0xff] }
 0x125   :  { %v953_v10 = vadd.f32 %v874_v5, %v54_v1  ;;  %v877_v11 = vadd.f32 %v1583_v6, %v1483_v2  ;;  %v1041_v1 = vsel %vm2663_vm0, %v2092_v53, 0.0 }
 0x126   :  { %v1484_v14 = vpop.f32.mrb[24].mxu0  ;;  %v2094_v61 = vld [vmem:[#allocation2 + $0x40] sm:$0xff]  ;;  %v1042_v9 = vadd.f32 %v1041_v1, %v1040_v60 }
 0x127   :  { %981 = vst.msk [vmem:[#allocation2 + $0x50] sm:$0xff] %vm2663_vm0, %v953_v10  ;;  %v954_v15 = vadd.f32 %v877_v11, %v55_v7  ;;  %v1584_v16 = vpop.f32.mrb[24].mxu1  ;;  %v1485_v17 = vpop.f32.mrb[25].mxu0  ;;  %v1043_v5 = vsel %vm2663_vm0, %v2094_v61, 0.0 }
 0x128   :  { %v1486_v20 = vadd.f32 %v1485_v17, %v1484_v14  ;;  %v1585_v21 = vpop.f32.mrb[25].mxu1  ;;  %v1487_v22 = vpop.f32.mrb[26].mxu0  ;;  %v2101_v10 = vld [vmem:[#allocation2 + $0x48] sm:$0xff]  ;;  %v1044_v18 = vadd.f32 %v1043_v5, %v1042_v9 }
 0x129   :  { %982 = vst.msk [vmem:[#allocation2 + $0x58] sm:$0xff] %vm2663_vm0, %v954_v15  ;;  %v1586_v24 = vadd.f32 %v1585_v21, %v1584_v16  ;;  %v1587_v25 = vpop.f32.mrb[26].mxu1  ;;  %v1488_v26 = vpop.f32.mrb[27].mxu0  ;;  %v60_v21 = vld [vmem:[#allocation2 + $0x80] sm:$0xff] }
 0x12a   :  { %v1489_v28 = vadd.f32 %v1488_v26, %v1487_v22  ;;  %v1588_v29 = vpop.f32.mrb[27].mxu1 }
 0x12b   :  { %v882_v31 = vadd.f32 %v1586_v24, %v1486_v20  ;;  %v1589_v32 = vadd.f32 %v1588_v29, %v1587_v25  ;;  %v1045_v24 = vsel %vm2663_vm0, %v2101_v10, 0.0 }
 0x12d   :  { %v955_v36 = vadd.f32 %v882_v31, %v56_v27  ;;  %v885_v37 = vadd.f32 %v1589_v32, %v1489_v28  ;;  %v61_v27 = vld [vmem:[#allocation2 + $0x88] sm:$0xff]  ;;  %v1046_v31 = vadd.f32 %v1045_v24, %v1044_v18  ;;  %v64_v18 = vld [vmem:[#allocation2 + $0xa0] sm:$0xff] }
 0x12e   :  { %v1490_v40 = vpop.f32.mrb[28].mxu0  ;;  %v2104_v20 = vld [vmem:[#allocation2 + $0x50] sm:$0xff] }
 0x12f   :  { %983 = vst.msk [vmem:[#allocation2 + $0x60] sm:$0xff] %vm2663_vm0, %v955_v36  ;;  %v956_v42 = vadd.f32 %v885_v37, %v57_v35  ;;  %v1590_v43 = vpop.f32.mrb[28].mxu1  ;;  %v1491_v44 = vpop.f32.mrb[29].mxu0  ;;  %v1047_v28 = vsel %vm2663_vm0, %v2104_v20, 0.0 }
 0x130   :  { %v1492_v45 = vadd.f32 %v1491_v44, %v1490_v40  ;;  %v1591_v46 = vpop.f32.mrb[29].mxu1  ;;  %v1493_v47 = vpop.f32.mrb[30].mxu0  ;;  %v2110_v32 = vld [vmem:[#allocation2 + $0x58] sm:$0xff]  ;;  %v1048_v38 = vadd.f32 %v1047_v28, %v1046_v31 }
 0x131   :  { %984 = vst.msk [vmem:[#allocation2 + $0x68] sm:$0xff] %vm2663_vm0, %v956_v42  ;;  %v1592_v49 = vadd.f32 %v1591_v46, %v1590_v43  ;;  %v1593_v50 = vpop.f32.mrb[30].mxu1  ;;  %v1494_v51 = vpop.f32.mrb[31].mxu0  ;;  %v1049_v44 = vsel %vm2663_vm0, %v2110_v32, 0.0 }
 0x132   :  { %v1495_v55 = vadd.f32 %v1494_v51, %v1493_v47  ;;  %v1594_v57 = vpop.f32.mrb[31].mxu1 }
 0x133   :  { %v890_v58 = vadd.f32 %v1592_v49, %v1492_v45  ;;  %v1595_v59 = vadd.f32 %v1594_v57, %v1593_v50 }
 0x135   :  { %v957_v2 = vadd.f32 %v890_v58, %v58_v54  ;;  %v893_v3 = vadd.f32 %v1595_v59, %v1495_v55  ;;  %v1050_v55 = vadd.f32 %v1049_v44, %v1048_v38  ;;  %v63_v58 = vld [vmem:[#allocation2 + $0x98] sm:$0xff] }
 0x136   :  { %v1496_v4 = vpop.f32.mrb[32].mxu0  ;;  %v2113_v40 = vld [vmem:[#allocation2 + $0x60] sm:$0xff] }
 0x137   :  { %985 = vst.msk [vmem:[#allocation2 + $0x70] sm:$0xff] %vm2663_vm0, %v957_v2  ;;  %v958_v6 = vadd.f32 %v893_v3, %v59_v62  ;;  %v1596_v7 = vpop.f32.mrb[32].mxu1  ;;  %v1497_v8 = vpop.f32.mrb[33].mxu0  ;;  %v1051_v51 = vsel %vm2663_vm0, %v2113_v40, 0.0 }
 0x138   :  { %v1498_v11 = vadd.f32 %v1497_v8, %v1496_v4  ;;  %v1597_v12 = vpop.f32.mrb[33].mxu1  ;;  %v1499_v14 = vpop.f32.mrb[34].mxu0  ;;  %v2120_v57 = vld [vmem:[#allocation2 + $0x68] sm:$0xff]  ;;  %v1052_v62 = vadd.f32 %v1051_v51, %v1050_v55 }
 0x139   :  { %986 = vst.msk [vmem:[#allocation2 + $0x78] sm:$0xff] %vm2663_vm0, %v958_v6  ;;  %v1598_v15 = vadd.f32 %v1597_v12, %v1596_v7  ;;  %v1599_v16 = vpop.f32.mrb[34].mxu1  ;;  %v1500_v17 = vpop.f32.mrb[35].mxu0  ;;  %v1053_v3 = vsel %vm2663_vm0, %v2120_v57, 0.0 }
 0x13a   :  { %v1501_v22 = vadd.f32 %v1500_v17, %v1499_v14  ;;  %v1600_v23 = vpop.f32.mrb[35].mxu1 }
 0x13b   :  { %v898_v25 = vadd.f32 %v1598_v15, %v1498_v11  ;;  %v1601_v26 = vadd.f32 %v1600_v23, %v1599_v16  ;;  %v1054_v16 = vadd.f32 %v1053_v3, %v1052_v62 }
 0x13d   :  { %v959_v29 = vadd.f32 %v898_v25, %v60_v21  ;;  %v901_v30 = vadd.f32 %v1601_v26, %v1501_v22 }
 0x13e   :  { %v1502_v33 = vpop.f32.mrb[36].mxu0  ;;  %v2122_v1 = vld [vmem:[#allocation2 + $0x70] sm:$0xff] }
 0x13f   :  { %987 = vst.msk [vmem:[#allocation2 + $0x80] sm:$0xff] %vm2663_vm0, %v959_v29  ;;  %v960_v35 = vadd.f32 %v901_v30, %v61_v27  ;;  %v1602_v36 = vpop.f32.mrb[36].mxu1  ;;  %v1503_v37 = vpop.f32.mrb[37].mxu0  ;;  %v1055_v11 = vsel %vm2663_vm0, %v2122_v1, 0.0  ;;  %v65_v27 = vld [vmem:[#allocation2 + $0xa8] sm:$0xff] }
 0x140   :  { %v1504_v41 = vadd.f32 %v1503_v37, %v1502_v33  ;;  %v1603_v42 = vpop.f32.mrb[37].mxu1  ;;  %v1505_v43 = vpop.f32.mrb[38].mxu0  ;;  %v2130_v17 = vld [vmem:[#allocation2 + $0x78] sm:$0xff]  ;;  %v1056_v25 = vadd.f32 %v1055_v11, %v1054_v16 }
 0x141   :  { %988 = vst.msk [vmem:[#allocation2 + $0x88] sm:$0xff] %vm2663_vm0, %v960_v35  ;;  %v1604_v45 = vadd.f32 %v1603_v42, %v1602_v36  ;;  %v1605_v46 = vpop.f32.mrb[38].mxu1  ;;  %v1506_v47 = vpop.f32.mrb[39].mxu0  ;;  %v1057_v28 = vsel %vm2663_vm0, %v2130_v17, 0.0 }
 0x142   :  { %v1507_v49 = vadd.f32 %v1506_v47, %v1505_v43  ;;  %v1606_v50 = vpop.f32.mrb[39].mxu1  ;;  %v1058_v38 = vadd.f32 %v1057_v28, %v1056_v25 }
 0x143   :  { %v906_v52 = vadd.f32 %v1604_v45, %v1504_v41  ;;  %v1607_v54 = vadd.f32 %v1606_v50, %v1605_v46  ;;  %v66_v50 = vld [vmem:[#allocation2 + $0xb0] sm:$0xff] }
 0x145   :  { %v961_v59 = vadd.f32 %v906_v52, %v62_v48  ;;  %v909_v60 = vadd.f32 %v1607_v54, %v1507_v49 }
 0x146   :  { %v1508_v2 = vpop.f32.mrb[40].mxu0  ;;  %v2132_v26 = vld [vmem:[#allocation2 + $0x80] sm:$0xff] }
 0x147   :  { %989 = vst.msk [vmem:[#allocation2 + $0x90] sm:$0xff] %vm2663_vm0, %v961_v59  ;;  %v962_v4 = vadd.f32 %v909_v60, %v63_v58  ;;  %v1608_v5 = vpop.f32.mrb[40].mxu1  ;;  %v1509_v6 = vpop.f32.mrb[41].mxu0  ;;  %v1059_v33 = vsel %vm2663_vm0, %v2132_v26, 0.0  ;;  %v67_v59 = vld [vmem:[#allocation2 + $0xb8] sm:$0xff] }
 0x148   :  { %v1510_v7 = vadd.f32 %v1509_v6, %v1508_v2  ;;  %v1609_v8 = vpop.f32.mrb[41].mxu1  ;;  %v1511_v9 = vpop.f32.mrb[42].mxu0  ;;  %v2139_v41 = vld [vmem:[#allocation2 + $0x88] sm:$0xff]  ;;  %v1060_v48 = vadd.f32 %v1059_v33, %v1058_v38 }
 0x149   :  { %990 = vst.msk [vmem:[#allocation2 + $0x98] sm:$0xff] %vm2663_vm0, %v962_v4  ;;  %v1610_v12 = vadd.f32 %v1609_v8, %v1608_v5  ;;  %v1611_v14 = vpop.f32.mrb[42].mxu1  ;;  %v1512_v15 = vpop.f32.mrb[43].mxu0  ;;  %v1061_v54 = vsel %vm2663_vm0, %v2139_v41, 0.0  ;;  %v69_v33 = vld [vmem:[#allocation2 + $0xc8] sm:$0xff] }
 0x14a   :  { %v1513_v21 = vadd.f32 %v1512_v15, %v1511_v9  ;;  %v1612_v22 = vpop.f32.mrb[43].mxu1  ;;  %v1062_v3 = vadd.f32 %v1061_v54, %v1060_v48 }
 0x14b   :  { %v914_v23 = vadd.f32 %v1610_v12, %v1510_v7  ;;  %v1613_v24 = vadd.f32 %v1612_v22, %v1611_v14 }
 0x14d   :  { %v963_v29 = vadd.f32 %v914_v23, %v64_v18  ;;  %v917_v30 = vadd.f32 %v1613_v24, %v1513_v21  ;;  %v68_v23 = vld [vmem:[#allocation2 + $0xc0] sm:$0xff] }
 0x14e   :  { %v1514_v31 = vpop.f32.mrb[44].mxu0  ;;  %v2142_v49 = vld [vmem:[#allocation2 + $0x90] sm:$0xff] }
 0x14f   :  { %991 = vst.msk [vmem:[#allocation2 + $0xa0] sm:$0xff] %vm2663_vm0, %v963_v29  ;;  %v964_v35 = vadd.f32 %v917_v30, %v65_v27  ;;  %v1614_v36 = vpop.f32.mrb[44].mxu1  ;;  %v1515_v37 = vpop.f32.mrb[45].mxu0  ;;  %v1063_v60 = vsel %vm2663_vm0, %v2142_v49, 0.0 }
 0x150   :  { %v1516_v42 = vadd.f32 %v1515_v37, %v1514_v31  ;;  %v1615_v43 = vpop.f32.mrb[45].mxu1  ;;  %v1517_v44 = vpop.f32.mrb[46].mxu0  ;;  %v2148_v4 = vld [vmem:[#allocation2 + $0x98] sm:$0xff]  ;;  %v1064_v9 = vadd.f32 %v1063_v60, %v1062_v3  ;;  %v70_v60 = vld [vmem:[#allocation2 + $0xd0] sm:$0xff] }
 0x151   :  { %992 = vst.msk [vmem:[#allocation2 + $0xa8] sm:$0xff] %vm2663_vm0, %v964_v35  ;;  %v1616_v45 = vadd.f32 %v1615_v43, %v1614_v36  ;;  %v1617_v46 = vpop.f32.mrb[46].mxu1  ;;  %v1518_v47 = vpop.f32.mrb[47].mxu0  ;;  %v1065_v16 = vsel %vm2663_vm0, %v2148_v4, 0.0 }
 0x152   :  { %v1519_v51 = vadd.f32 %v1518_v47, %v1517_v44  ;;  %v1618_v52 = vpop.f32.mrb[47].mxu1  ;;  %v1066_v30 = vadd.f32 %v1065_v16, %v1064_v9 }
 0x153   :  { %v922_v55 = vadd.f32 %v1616_v45, %v1516_v42  ;;  %v1619_v58 = vadd.f32 %v1618_v52, %v1617_v46 }
 0x155   :  { %v965_v62 = vadd.f32 %v922_v55, %v66_v50  ;;  %v925_v2 = vadd.f32 %v1619_v58, %v1519_v51 }
 0x156   :  { %v1520_v5 = vpop.f32.mrb[48].mxu0  ;;  %v2151_v11 = vld [vmem:[#allocation2 + $0xa0] sm:$0xff] }
 0x157   :  { %993 = vst.msk [vmem:[#allocation2 + $0xb0] sm:$0xff] %vm2663_vm0, %v965_v62  ;;  %v966_v6 = vadd.f32 %v925_v2, %v67_v59  ;;  %v1620_v7 = vpop.f32.mrb[48].mxu1  ;;  %v1521_v8 = vpop.f32.mrb[49].mxu0  ;;  %v1067_v27 = vsel %vm2663_vm0, %v2151_v11, 0.0 }
 0x158   :  { %v1522_v12 = vadd.f32 %v1521_v8, %v1520_v5  ;;  %v1621_v14 = vpop.f32.mrb[49].mxu1  ;;  %v1523_v15 = vpop.f32.mrb[50].mxu0  ;;  %v2158_v31 = vld [vmem:[#allocation2 + $0xa8] sm:$0xff]  ;;  %v1068_v37 = vadd.f32 %v1067_v27, %v1066_v30 }
 0x159   :  { %994 = vst.msk [vmem:[#allocation2 + $0xb8] sm:$0xff] %vm2663_vm0, %v966_v6  ;;  %v1622_v18 = vadd.f32 %v1621_v14, %v1620_v7  ;;  %v1623_v21 = vpop.f32.mrb[50].mxu1  ;;  %v1524_v22 = vpop.f32.mrb[51].mxu0  ;;  %v1069_v43 = vsel %vm2663_vm0, %v2158_v31, 0.0 }
 0x15a   :  { %v1525_v24 = vadd.f32 %v1524_v22, %v1523_v15  ;;  %v1624_v25 = vpop.f32.mrb[51].mxu1  ;;  %v1070_v58 = vadd.f32 %v1069_v43, %v1068_v37 }
 0x15b   :  { %v930_v28 = vadd.f32 %v1622_v18, %v1522_v12  ;;  %v1625_v29 = vadd.f32 %v1624_v25, %v1623_v21 }
 0x15d   :  { %v967_v35 = vadd.f32 %v930_v28, %v68_v23  ;;  %v933_v36 = vadd.f32 %v1625_v29, %v1525_v24 }
 0x15e   :  { %v2160_v38 = vld [vmem:[#allocation2 + $0xb0] sm:$0xff]  ;;  %v1526_v42 = vpop.f32.mrb[52].mxu0 }
 0x15f   :  { %995 = vst.msk [vmem:[#allocation2 + $0xc0] sm:$0xff] %vm2663_vm0, %v967_v35  ;;  %v968_v44 = vadd.f32 %v933_v36, %v69_v33  ;;  %v1626_v45 = vpop.f32.mrb[52].mxu1  ;;  %v1527_v46 = vpop.f32.mrb[53].mxu0  ;;  %v1071_v51 = vsel %vm2663_vm0, %v2160_v38, 0.0 }
 0x160   :  { %v1528_v47 = vadd.f32 %v1527_v46, %v1526_v42  ;;  %v1627_v48 = vpop.f32.mrb[53].mxu1  ;;  %v1529_v50 = vpop.f32.mrb[54].mxu0  ;;  %v2168_v59 = vld [vmem:[#allocation2 + $0xb8] sm:$0xff]  ;;  %v1072_v3 = vadd.f32 %v1071_v51, %v1070_v58 }
 0x161   :  { %996 = vst.msk [vmem:[#allocation2 + $0xc8] sm:$0xff] %vm2663_vm0, %v968_v44  ;;  %v1628_v52 = vadd.f32 %v1627_v48, %v1626_v45  ;;  %v1629_v54 = vpop.f32.mrb[54].mxu1  ;;  %v1530_v55 = vpop.f32.mrb[55].mxu0  ;;  %v1073_v5 = vsel %vm2663_vm0, %v2168_v59, 0.0 }
 0x162   :  { %v1630_v62 = vpop.f32.mrb[55].mxu1  ;;  %v1074_v9 = vadd.f32 %v1073_v5, %v1072_v3 }
 0x163   :  { %v938_v2 = vadd.f32 %v1628_v52, %v1528_v47 }
 0x165   :  { %v969_v6 = vadd.f32 %v938_v2, %v70_v60 }
 0x166   :  { %v2172_v7 = vld [vmem:[#allocation2 + $0xc0] sm:$0xff] }
 0x167   :  { %v1075_v8 = vsel %vm2663_vm0, %v2172_v7, 0.0  ;;  %997 = vst.msk [vmem:[#allocation2 + $0xd0] sm:$0xff] %vm2663_vm0, %v969_v6 }
 0x168   :  { %v2177_v12 = vld [vmem:[#allocation2 + $0xc8] sm:$0xff]  ;;  %v1076_v14 = vadd.f32 %v1075_v8, %v1074_v9 }
 0x169   :  { %v1077_v15 = vsel %vm2663_vm0, %v2177_v12, 0.0 }
 0x16a   :  { %v1078_v16 = vadd.f32 %v1077_v15, %v1076_v14 }
 0x16e   :  { %v2181_v18 = vld [vmem:[#allocation2 + $0xd0] sm:$0xff] }
 0x16f   :  { %v1079_v21 = vsel %vm2663_vm0, %v2181_v18, 0.0 }
 0x170   :  { %v1080_v22 = vadd.f32 %v1079_v21, %v1078_v16 }
 0x172   :  { %v1081_v23 = vrot.slane %v1080_v22, 4 }
 0x174   :  { %v1082_v24 = vadd.f32 %v1081_v23, %v1080_v22 }
 0x176   :  { %v1083_v25 = vrot.slane %v1082_v24, 2 }
 0x178   :  { %v1084_v27 = vadd.f32 %v1083_v25, %v1082_v24 }
 0x17a   :  { %v1085_v28 = vrot.slane %v1084_v27, 1 }
 0x17c   :  { %v1086_v29 = vadd.f32 %v1085_v28, %v1084_v27 }
 0x17e   :  { %v2185_v30 = vmul.f32 0.0046296297, %v1086_v29 }
 0x180   :  { %v2189_v33 = vsub.f32 %v2062_v63, %v2185_v30  ;;  %v2193_v35 = vsub.f32 %v2059_v56, %v2185_v30  ;;  %v2197_v36 = vsub.f32 %v2064_v0, %v2185_v30  ;;  %v2201_v37 = vsub.f32 %v2072_v13, %v2185_v30 }
 0x181   :  { %v2209_v63 = vsub.f32 %v2075_v19, %v2185_v30  ;;  %v2215_v0 = vsub.f32 %v2082_v34, %v2185_v30  ;;  %v2223_v47 = vsub.f32 %v2084_v39, %v2185_v30  ;;  %v2230_v34 = vsub.f32 %v2092_v53, %v2185_v30 }
 0x182   :  { %v1116_v42 = vmul.f32 %v2189_v33, %v2189_v33  ;;  %v1117_v43 = vmul.f32 %v2193_v35, %v2193_v35  ;;  %v1118_v56 = vmul.f32 %v2197_v36, %v2197_v36  ;;  %v1119_v13 = vmul.f32 %v2201_v37, %v2201_v37 }
 0x183   :  { %v1120_v19 = vmul.f32 %v2209_v63, %v2209_v63  ;;  %v1121_v51 = vmul.f32 %v2215_v0, %v2215_v0  ;;  %v2237_v39 = vsub.f32 %v2094_v61, %v2185_v30  ;;  %v1122_v55 = vmul.f32 %v2223_v47, %v2223_v47 }
 0x184   :  { %v1143_v44 = vsel %vm2663_vm0, %v1116_v42, 0.0  ;;  %v1144_v45 = vsel %vm2663_vm0, %v1117_v43, 0.0  ;;  %v1146_v48 = vsel %vm2663_vm0, %v1118_v56, 0.0  ;;  %v1148_v52 = vsel %vm2663_vm0, %v1119_v13, 0.0 }
 0x185   :  { %v1145_v46 = vadd.f32 %v1144_v45, %v1143_v44  ;;  %v1150_v58 = vsel %vm2663_vm0, %v1120_v19, 0.0  ;;  %v2244_v53 = vsub.f32 %v2101_v10, %v2185_v30  ;;  %v1123_v62 = vmul.f32 %v2230_v34, %v2230_v34 }
 0x186   :  { %v1152_v2 = vsel %vm2663_vm0, %v1121_v51, 0.0  ;;  %v2251_v61 = vsub.f32 %v2104_v20, %v2185_v30  ;;  %v1124_v5 = vmul.f32 %v2237_v39, %v2237_v39  ;;  %v1154_v6 = vsel %vm2663_vm0, %v1122_v55, 0.0 }
 0x187   :  { %v1147_v50 = vadd.f32 %v1146_v48, %v1145_v46  ;;  %v2258_v10 = vsub.f32 %v2110_v32, %v2185_v30  ;;  %v1125_v9 = vmul.f32 %v2244_v53, %v2244_v53  ;;  %v1156_v14 = vsel %vm2663_vm0, %v1123_v62, 0.0 }
 0x188   :  { %v2265_v20 = vsub.f32 %v2113_v40, %v2185_v30  ;;  %v1126_v16 = vmul.f32 %v2251_v61, %v2251_v61  ;;  %v1158_v21 = vsel %vm2663_vm0, %v1124_v5, 0.0  ;;  %v2272_v32 = vsub.f32 %v2120_v57, %v2185_v30 }
 0x189   :  { %v1149_v54 = vadd.f32 %v1148_v52, %v1147_v50  ;;  %v1127_v23 = vmul.f32 %v2258_v10, %v2258_v10  ;;  %v1160_v24 = vsel %vm2663_vm0, %v1125_v9, 0.0  ;;  %v2279_v40 = vsub.f32 %v2122_v1, %v2185_v30 }
 0x18a   :  { %v1128_v27 = vmul.f32 %v2265_v20, %v2265_v20  ;;  %v1162_v28 = vsel %vm2663_vm0, %v1126_v16, 0.0  ;;  %v2286_v57 = vsub.f32 %v2130_v17, %v2185_v30  ;;  %v1129_v42 = vmul.f32 %v2272_v32, %v2272_v32 }
 0x18b   :  { %v1151_v60 = vadd.f32 %v1150_v58, %v1149_v54  ;;  %v1164_v43 = vsel %vm2663_vm0, %v1127_v23, 0.0  ;;  %v2293_v1 = vsub.f32 %v2132_v26, %v2185_v30  ;;  %v1130_v13 = vmul.f32 %v2279_v40, %v2279_v40 }
 0x18c   :  { %v1166_v44 = vsel %vm2663_vm0, %v1128_v27, 0.0  ;;  %v2300_v17 = vsub.f32 %v2139_v41, %v2185_v30  ;;  %v1131_v46 = vmul.f32 %v2286_v57, %v2286_v57  ;;  %v1168_v19 = vsel %vm2663_vm0, %v1129_v42, 0.0 }
 0x18d   :  { %v1153_v3 = vadd.f32 %v1152_v2, %v1151_v60  ;;  %v2307_v26 = vsub.f32 %v2142_v49, %v2185_v30  ;;  %v1132_v50 = vmul.f32 %v2293_v1, %v2293_v1  ;;  %v1170_v51 = vsel %vm2663_vm0, %v1130_v13, 0.0 }
 0x18e   :  { %v1108_v41 = vsub.f32 %v2148_v4, %v2185_v30  ;;  %v1133_v54 = vmul.f32 %v2300_v17, %v2300_v17  ;;  %v1172_v55 = vsel %vm2663_vm0, %v1131_v46, 0.0  ;;  %v1109_v60 = vsub.f32 %v2151_v11, %v2185_v30 }
 0x18f   :  { %v1155_v8 = vadd.f32 %v1154_v6, %v1153_v3  ;;  %v1134_v49 = vmul.f32 %v2307_v26, %v2307_v26  ;;  %v1174_v62 = vsel %vm2663_vm0, %v1132_v50, 0.0  ;;  %v1110_v3 = vsub.f32 %v2158_v31, %v2185_v30 }
 0x190   :  { %v1135_v5 = vmul.f32 %v1108_v41, %v1108_v41  ;;  %v1176_v4 = vsel %vm2663_vm0, %v1133_v54, 0.0  ;;  %v1136_v9 = vmul.f32 %v1109_v60, %v1109_v60  ;;  %v1113_v31 = vsub.f32 %v2172_v7, %v2185_v30 }
 0x191   :  { %v1157_v15 = vadd.f32 %v1156_v14, %v1155_v8  ;;  %v1111_v8 = vsub.f32 %v2160_v38, %v2185_v30  ;;  %v1178_v14 = vsel %vm2663_vm0, %v1134_v49, 0.0  ;;  %v1137_v16 = vmul.f32 %v1110_v3, %v1110_v3 }
 0x192   :  { %v1114_v38 = vsub.f32 %v2177_v12, %v2185_v30  ;;  %v1140_v42 = vmul.f32 %v1113_v31, %v1113_v31 }
 0x193   :  { %v1159_v22 = vadd.f32 %v1158_v21, %v1157_v15  ;;  %v1112_v15 = vsub.f32 %v2168_v59, %v2185_v30  ;;  %v1180_v21 = vsel %vm2663_vm0, %v1135_v5, 0.0  ;;  %v1138_v23 = vmul.f32 %v1111_v8, %v1111_v8 }
 0x194   :  { %v1115_v59 = vsub.f32 %v2181_v18, %v2185_v30  ;;  %v1141_v13 = vmul.f32 %v1114_v38, %v1114_v38  ;;  %v1190_v46 = vsel %vm2663_vm0, %v1140_v42, 0.0 }
 0x195   :  { %v1161_v25 = vadd.f32 %v1160_v24, %v1159_v22  ;;  %v1182_v24 = vsel %vm2663_vm0, %v1136_v9, 0.0  ;;  %v1139_v27 = vmul.f32 %v1112_v15, %v1112_v15 }
 0x196   :  { %v1192_v12 = vsel %vm2663_vm0, %v1141_v13, 0.0 }
 0x197   :  { %v1163_v29 = vadd.f32 %v1162_v28, %v1161_v25  ;;  %v1184_v28 = vsel %vm2663_vm0, %v1137_v16, 0.0  ;;  %v1188_v7 = vsel %vm2663_vm0, %v1139_v27, 0.0 }
 0x199   :  { %v1165_v56 = vadd.f32 %v1164_v43, %v1163_v29  ;;  %v1186_v43 = vsel %vm2663_vm0, %v1138_v23, 0.0 }
 0x19b   :  { %v1167_v45 = vadd.f32 %v1166_v44, %v1165_v56 }
 0x19d   :  { %v1169_v48 = vadd.f32 %v1168_v19, %v1167_v45  ;;  %v1142_v45 = vmul.f32 %v1115_v59, %v1115_v59 }
 0x19f   :  { %v1171_v52 = vadd.f32 %v1170_v51, %v1169_v48  ;;  %v1194_v50 = vsel %vm2663_vm0, %v1142_v45, 0.0 }
 0x1a1   :  { %v1173_v58 = vadd.f32 %v1172_v55, %v1171_v52 }
 0x1a3   :  { %v1175_v2 = vadd.f32 %v1174_v62, %v1173_v58 }
 0x1a5   :  { %v1177_v6 = vadd.f32 %v1176_v4, %v1175_v2 }
 0x1a7   :  { %v1179_v11 = vadd.f32 %v1178_v14, %v1177_v6 }
 0x1a9   :  { %v1181_v22 = vadd.f32 %v1180_v21, %v1179_v11 }
 0x1ab   :  { %v1183_v25 = vadd.f32 %v1182_v24, %v1181_v22 }
 0x1ad   :  { %v1185_v29 = vadd.f32 %v1184_v28, %v1183_v25 }
 0x1af   :  { %v1187_v56 = vadd.f32 %v1186_v43, %v1185_v29 }
 0x1b1   :  { %v1189_v44 = vadd.f32 %v1188_v7, %v1187_v56 }
 0x1b3   :  { %v1191_v19 = vadd.f32 %v1190_v46, %v1189_v44 }
 0x1b5   :  { %v1193_v48 = vadd.f32 %v1192_v12, %v1191_v19 }
 0x1b7   :  { %v1195_v51 = vadd.f32 %v1194_v50, %v1193_v48 }
 0x1b9   :  { %v1196_v52 = vrot.slane %v1195_v51, 4 }
 0x1bb   :  { %v1197_v18 = vadd.f32 %v1196_v52, %v1195_v51 }
 0x1bd   :  { %v1198_v30 = vrot.slane %v1197_v18, 2 }
 0x1bf   :  { %v1199_v54 = vadd.f32 %v1198_v30, %v1197_v18 }
 0x1c1   :  { %v1200_v55 = vrot.slane %v1199_v54, 1 }
 0x1c3   :  { %v1201_v58 = vadd.f32 %v1200_v55, %v1199_v54 }
 0x1c5   :  { %v1202_v49 = vmul.f32 0.0046296297, %v1201_v58 }
 0x1c7   :  { %v1203_v62 = vadd.f32 1e-05, %v1202_v49 }
 0x1c9   :  { %1747 = vrsqrt.f32 %v1203_v62 }
 0x1d3   :  { %v1748_v2 = vpop.eup %1747 }
 0x1d4   :  { %v2345_v5 = vmul.f32 %v1748_v2, %v2189_v33  ;;  %v2348_v4 = vmul.f32 %v1748_v2, %v2193_v35  ;;  %v2351_v6 = vmul.f32 %v1748_v2, %v2197_v36  ;;  %v2354_v9 = vmul.f32 %v1748_v2, %v2201_v37 }
 0x1d5   :  { %v2357_v14 = vmul.f32 %v1748_v2, %v2209_v63  ;;  %v2360_v11 = vmul.f32 %v1748_v2, %v2215_v0  ;;  %v2363_v16 = vmul.f32 %v1748_v2, %v2265_v20  ;;  %v2366_v33 = vmul.f32 %v1748_v2, %v2293_v1 }
 0x1d6   :  { %v2369_v35 = vmul.f32 %v1748_v2, %v2300_v17  ;;  %v2372_v36 = vmul.f32 %v1748_v2, %v2307_v26  ;;  %v2374_v37 = vmul.f32 %v1748_v2, %v1108_v41  ;;  %v2376_v21 = vmul.f32 %v1748_v2, %v1109_v60 }
 0x1d7   :  { %v2378_v63 = vmul.f32 %v1748_v2, %v1110_v3  ;;  %v2380_v0 = vmul.f32 %v1748_v2, %v1111_v8  ;;  %v2382_v22 = vmul.f32 %v1748_v2, %v1112_v15  ;;  %v2385_v20 = vmul.f32 %v1748_v2, %v2223_v47 }
 0x1d8   :  { %v2387_v1 = vmul.f32 %v1748_v2, %v1113_v31  ;;  %v2389_v17 = vmul.f32 %v1748_v2, %v1114_v38  ;;  %v2391_v23 = vmul.f32 %v1748_v2, %v1115_v59  ;;  %v2394_v26 = vmul.f32 %v1748_v2, %v2230_v34 }
 0x1d9   :  { %v2397_v41 = vmul.f32 %v1748_v2, %v2237_v39  ;;  %v2400_v60 = vmul.f32 %v1748_v2, %v2244_v53  ;;  %v2403_v3 = vmul.f32 %v1748_v2, %v2251_v61  ;;  %v2406_v47 = vmul.f32 %v1748_v2, %v2258_v10 }
 0x1da   :  { %v2409_v8 = vmul.f32 %v1748_v2, %v2272_v32  ;;  %v2412_v15 = vmul.f32 %v1748_v2, %v2279_v40  ;;  %v2415_v34 = vmul.f32 %v1748_v2, %v2286_v57  ;;  %vm1232_vm1 = vcmp.gt.f32.partialorder %v2345_v5, 0.0 }
 0x1db   :  { %vm1233_vm2 = vcmp.gt.f32.partialorder %v2348_v4, 0.0  ;;  %vm1234_vm3 = vcmp.gt.f32.partialorder %v2351_v6, 0.0  ;;  %vm1235_vm4 = vcmp.gt.f32.partialorder %v2354_v9, 0.0  ;;  %vm1236_vm5 = vcmp.gt.f32.partialorder %v2357_v14, 0.0 }
 0x1dc   :  { %vm1237_vm6 = vcmp.gt.f32.partialorder %v2360_v11, 0.0  ;;  %vm1241_vm10 = vcmp.gt.f32.partialorder %v2400_v60, 0.0  ;;  %vm1242_vm11 = vcmp.gt.f32.partialorder %v2403_v3, 0.0  ;;  %vm1247_vm0 = vcmp.gt.f32.partialorder %v2415_v34, 0.0 }
 0x1dd   :  { %vm1248_vm7 = vcmp.gt.f32.partialorder %v2366_v33, 0.0  ;;  %v1259_v39 = vmul.f32 0.0, %v2345_v5  ;;  %v1260_v53 = vmul.f32 0.0, %v2348_v4  ;;  %vm1253_vm14 = vcmp.gt.f32.partialorder %v2378_v63, 0.0 }
 0x1de   :  { %vm1254_vm15 = vcmp.gt.f32.partialorder %v2380_v0, 0.0  ;;  %v1261_v61 = vmul.f32 0.0, %v2351_v6  ;;  %v1262_v10 = vmul.f32 0.0, %v2354_v9  ;;  %v1263_v32 = vmul.f32 0.0, %v2357_v14 }
 0x1df   :  { %v1264_v40 = vmul.f32 0.0, %v2360_v11  ;;  %vm1255_vm9 = vcmp.gt.f32.partialorder %v2382_v22, 0.0  ;;  %vm1256_vm8 = vcmp.gt.f32.partialorder %v2387_v1, 0.0  ;;  %vm1257_vm12 = vcmp.gt.f32.partialorder %v2389_v17, 0.0 }
 0x1e0   :  { %vm1258_vm13 = vcmp.gt.f32.partialorder %v2391_v23, 0.0  ;;  %v1265_v57 = vmul.f32 0.0, %v2385_v20  ;;  %v1266_v31 = vmul.f32 0.0, %v2394_v26  ;;  %v1267_v24 = vmul.f32 0.0, %v2397_v41 }
 0x1e1   :  { %v1268_v25 = vmul.f32 0.0, %v2400_v60  ;;  %v1269_v38 = vmul.f32 0.0, %v2403_v3  ;;  %v1270_v27 = vmul.f32 0.0, %v2406_v47  ;;  %v1271_v28 = vmul.f32 0.0, %v2363_v16 }
 0x1e2   :  { %v1272_v29 = vmul.f32 0.0, %v2409_v8  ;;  %v1273_v59 = vmul.f32 0.0, %v2412_v15  ;;  %v1274_v42 = vmul.f32 0.0, %v2415_v34  ;;  %v1275_v43 = vmul.f32 0.0, %v2366_v33 }
 0x1e3   :  { %v1276_v56 = vmul.f32 0.0, %v2369_v35  ;;  %v1277_v13 = vmul.f32 0.0, %v2372_v36  ;;  %v1278_v7 = vmul.f32 0.0, %v2374_v37  ;;  %v1279_v44 = vmul.f32 0.0, %v2376_v21 }
 0x1e4   :  { %v1280_v45 = vmul.f32 0.0, %v2378_v63  ;;  %v1281_v46 = vmul.f32 0.0, %v2380_v0  ;;  %v1282_v19 = vmul.f32 0.0, %v2382_v22  ;;  %v1283_v12 = vmul.f32 0.0, %v2387_v1 }
 0x1e5   :  { %v1284_v48 = vmul.f32 0.0, %v2389_v17  ;;  %v1285_v50 = vmul.f32 0.0, %v2391_v23  ;;  %v1286_v51 = vsel %vm1232_vm1, %v2345_v5, %v1259_v39  ;;  %v1287_v52 = vsel %vm1233_vm2, %v2348_v4, %v1260_v53 }
 0x1e6   :  { %v1288_v18 = vsel %vm1234_vm3, %v2351_v6, %v1261_v61  ;;  %v1289_v30 = vsel %vm1235_vm4, %v2354_v9, %v1262_v10  ;;  %v1290_v54 = vsel %vm1236_vm5, %v2357_v14, %v1263_v32  ;;  %v1291_v55 = vsel %vm1237_vm6, %v2360_v11, %v1264_v40 }
 0x1e7   :  { %vm2664_vm1 = vcmp.gt.f32.partialorder %v2385_v20, 0.0  ;;  %vm2665_vm2 = vcmask 523264   ;;  %vm2668_vm5 = vcmp.gt.f32.partialorder %v2394_v26, 0.0  ;;  %vm2669_vm6 = vcmp.gt.f32.partialorder %v2397_v41, 0.0 }
 0x1e8   :  { %v1292_v58 = vsel %vm2664_vm1, %v2385_v20, %v1265_v57  ;;  %1313 = vst.msk [vmem:[%s2662_s2] sm:$0xff] %vm2665_vm2, %v1286_v51  ;;  %vm2666_vm3 = vmmov %vm2665_vm2  ;;  %v1293_v49 = vsel %vm2668_vm5, %v2394_v26, %v1266_v31  ;;  %v1294_v62 = vsel %vm2669_vm6, %v2397_v41, %v1267_v24  ;;  %v1295_v2 = vsel %vm1241_vm10, %v2400_v60, %v1268_v25 }
 0x1e9   :  { %1314 = vst.msk [vmem:[%s2662_s2 + $0x8] sm:$0xff] %vm2666_vm3, %v1287_v52  ;;  %vm2667_vm4 = vmmov %vm2665_vm2  ;;  %v1296_v5 = vsel %vm1242_vm11, %v2403_v3, %v1269_v38  ;;  %vm2674_vm11 = vcmp.gt.f32.partialorder %v2406_v47, 0.0  ;;  %vm2676_vm5 = vcmp.gt.f32.partialorder %v2409_v8, 0.0  ;;  %vm2677_vm6 = vcmp.gt.f32.partialorder %v2412_v15, 0.0 }
 0x1ea   :  { %1315 = vst.msk [vmem:[%s2662_s2 + $0x10] sm:$0xff] %vm2667_vm4, %v1288_v18  ;;  %vm2670_vm1 = vmmov %vm2665_vm2  ;;  %v1297_v4 = vsel %vm2674_vm11, %v2406_v47, %v1270_v27  ;;  %vm2675_vm4 = vcmp.gt.f32.partialorder %v2363_v16, 0.0  ;;  %v1299_v9 = vsel %vm2676_vm5, %v2409_v8, %v1272_v29  ;;  %v1300_v14 = vsel %vm2677_vm6, %v2412_v15, %v1273_v59 }
 0x1eb   :  { %1316 = vst.msk [vmem:[%s2662_s2 + $0x18] sm:$0xff] %vm2670_vm1, %v1289_v30  ;;  %vm2671_vm2 = vmmov %vm2670_vm1  ;;  %v1298_v6 = vsel %vm2675_vm4, %v2363_v16, %v1271_v28  ;;  %v1301_v11 = vsel %vm1247_vm0, %v2415_v34, %v1274_v42  ;;  %v1302_v16 = vsel %vm1248_vm7, %v2366_v33, %v1275_v43  ;;  %vm2681_vm11 = vcmp.gt.f32.partialorder %v2369_v35, 0.0 }
 0x1ec   :  { %1317 = vst.msk [vmem:[%s2662_s2 + $0x20] sm:$0xff] %vm2671_vm2, %v1290_v54  ;;  %vm2672_vm3 = vmmov %vm2670_vm1  ;;  %v1303_v20 = vsel %vm2681_vm11, %v2369_v35, %v1276_v56  ;;  %vm2682_vm4 = vcmp.gt.f32.partialorder %v2372_v36, 0.0  ;;  %v1308_v41 = vsel %vm1254_vm15, %v2380_v0, %v1281_v46  ;;  %v1312_v0 = vsel %vm1258_vm13, %v2391_v23, %v1285_v50 }
 0x1ed   :  { %1318 = vst.msk [vmem:[%s2662_s2 + $0x28] sm:$0xff] %vm2672_vm3, %v1291_v55  ;;  %vm2673_vm10 = vmmov %vm2670_vm1  ;;  %v1304_v26 = vsel %vm2682_vm4, %v2372_v36, %v1277_v13  ;;  %v1307_v36 = vsel %vm1253_vm14, %v2378_v63, %v1280_v45  ;;  %v1311_v63 = vsel %vm1257_vm12, %v2389_v17, %v1284_v48 }
 0x1ee   :  { %1319 = vst.msk [vmem:[%s2662_s2 + $0x30] sm:$0xff] %vm2673_vm10, %v1292_v58  ;;  %vm2678_vm2 = vmmov %vm2670_vm1 }
 0x1ef   :  { %1320 = vst.msk [vmem:[%s2662_s2 + $0x38] sm:$0xff] %vm2670_vm1, %v1293_v49  ;;  %vm2679_vm3 = vmmov %vm2670_vm1 }
 0x1f0   :  { %1321 = vst.msk [vmem:[%s2662_s2 + $0x40] sm:$0xff] %vm2678_vm2, %v1294_v62  ;;  %vm2680_vm10 = vmmov %vm2670_vm1  ;;  %vm2688_vm2 = vcmp.gt.f32.partialorder %v2376_v21, 0.0 }
 0x1f1   :  { %1322 = vst.msk [vmem:[%s2662_s2 + $0x48] sm:$0xff] %vm2679_vm3, %v1295_v2  ;;  %vm2683_vm5 = vmmov %vm2670_vm1  ;;  %v1306_v35 = vsel %vm2688_vm2, %v2376_v21, %v1279_v44  ;;  %v1310_v21 = vsel %vm1256_vm8, %v2387_v1, %v1283_v12 }
 0x1f2   :  { %1323 = vst.msk [vmem:[%s2662_s2 + $0x50] sm:$0xff] %vm2680_vm10, %v1296_v5  ;;  %vm2684_vm6 = vmmov %vm2670_vm1 }
 0x1f3   :  { %1324 = vst.msk [vmem:[%s2662_s2 + $0x58] sm:$0xff] %vm2683_vm5, %v1297_v4  ;;  %vm2685_vm0 = vmmov %vm2670_vm1  ;;  %vm2687_vm1 = vcmp.gt.f32.partialorder %v2374_v37, 0.0 }
 0x1f4   :  { %1325 = vst.msk [vmem:[%s2662_s2 + $0x60] sm:$0xff] %vm2684_vm6, %v1298_v6  ;;  %vm2686_vm7 = vmmov %vm2685_vm0  ;;  %v1305_v33 = vsel %vm2687_vm1, %v2374_v37, %v1278_v7  ;;  %v1309_v37 = vsel %vm1255_vm9, %v2382_v22, %v1282_v19 }
 0x1f5   :  { %1326 = vst.msk [vmem:[%s2662_s2 + $0x68] sm:$0xff] %vm2685_vm0, %v1299_v9  ;;  %vm2689_vm3 = vmmov %vm2685_vm0 }
 0x1f6   :  { %1327 = vst.msk [vmem:[%s2662_s2 + $0x70] sm:$0xff] %vm2686_vm7, %v1300_v14  ;;  %vm2690_vm10 = vmmov %vm2685_vm0 }
 0x1f7   :  { %1328 = vst.msk [vmem:[%s2662_s2 + $0x78] sm:$0xff] %vm2689_vm3, %v1301_v11  ;;  %vm2691_vm11 = vmmov %vm2685_vm0 }
 0x1f8   :  { %1329 = vst.msk [vmem:[%s2662_s2 + $0x80] sm:$0xff] %vm2690_vm10, %v1302_v16  ;;  %vm2692_vm14 = vmmov %vm2685_vm0 }
 0x1f9   :  { %1330 = vst.msk [vmem:[%s2662_s2 + $0x88] sm:$0xff] %vm2691_vm11, %v1303_v20  ;;  %vm2693_vm15 = vmmov %vm2685_vm0 }
 0x1fa   :  { %1331 = vst.msk [vmem:[%s2662_s2 + $0x90] sm:$0xff] %vm2692_vm14, %v1304_v26  ;;  %vm2694_vm4 = vmmov %vm2685_vm0 }
 0x1fb   :  { %1332 = vst.msk [vmem:[%s2662_s2 + $0x98] sm:$0xff] %vm2693_vm15, %v1305_v33  ;;  %vm2695_vm9 = vmmov %vm2685_vm0 }
 0x1fc   :  { %1333 = vst.msk [vmem:[%s2662_s2 + $0xa0] sm:$0xff] %vm2694_vm4, %v1306_v35  ;;  %vm2696_vm8 = vmmov %vm2685_vm0 }
 0x1fd   :  { %1334 = vst.msk [vmem:[%s2662_s2 + $0xa8] sm:$0xff] %vm2695_vm9, %v1307_v36  ;;  %vm2697_vm12 = vmmov %vm2685_vm0 }
 0x1fe   :  { %1335 = vst.msk [vmem:[%s2662_s2 + $0xb0] sm:$0xff] %vm2696_vm8, %v1308_v41  ;;  %vm2698_vm13 = vmmov %vm2685_vm0 }
 0x1ff   :  { %1336 = vst.msk [vmem:[%s2662_s2 + $0xb8] sm:$0xff] %vm2697_vm12, %v1309_v37  ;;  %vm2699_vm5 = vmmov %vm2685_vm0 }
 0x200   :  { %1337 = vst.msk [vmem:[%s2662_s2 + $0xc0] sm:$0xff] %vm2698_vm13, %v1310_v21  ;;  %vm2700_vm6 = vmmov %vm2685_vm0 }
 0x201   :  { %1338 = vst.msk [vmem:[%s2662_s2 + $0xc8] sm:$0xff] %vm2699_vm5, %v1311_v63 }
 0x202   :  { %1339 = vst.msk [vmem:[%s2662_s2 + $0xd0] sm:$0xff] %vm2700_vm6, %v1312_v0 }

// kernel: combined_generator.9
= control target key start
LH: loop header
LB: loop body
LE: loop exit
PB: predicated region body
PF: predicated region fallthrough
CT: control target
= control target key end

     0   :  { %vm15_vm0 = vcmask 197632   ;;  %v182_v0 = vmov 0.0|0.0   ;;  %v183_v4 = vmov 0.0   ;;  %vm184_vm1 = vmmov 0   ;;  %s232_s1 = inlined_call_operand.vmem [shape: f32[50,25], index: 1, kind: input, shape index: {}]   ;;  %s233_s0 = inlined_call_operand.vmem [shape: f32[2,50], index: 0, kind: input, shape index: {}]   ;;  %s234_s2 = inlined_call_operand.vmem [shape: f32[2,25], index: 2, kind: output, shape index: {}]  }
   0x1   :  { %168 = vmatprep.subr.bf16.mxu0 %v182_v0  ;;  %v19_v1 = vld [vmem:[%s232_s1] sm:$0xff]  ;;  %v20_v2 = vld [vmem:[%s232_s1 + $0x8] sm:$0xff]  ;;  %v21_v3 = vld [vmem:[%s232_s1 + $0x10] sm:$0xff]  ;;  %16 = vst.msk [vmem:[#allocation2] sm:$0x3] %vm15_vm0, %v183_v4  ;;  %165 = vmatprep.mubr.msk.f32.mxu0 %vm184_vm1, %v183_v4  ;;  %vm30_vm2 = vcmask 1041408  }
   0x2   :  { %v169_v5 = vpack.c.bf16 %v20_v2, %v19_v1  ;;  %v22_v6 = vld [vmem:[%s232_s1 + $0x18] sm:$0xff]  ;;  %v23_v8 = vld [vmem:[%s232_s1 + $0x20] sm:$0xff]  ;;  %v24_v9 = vld [vmem:[%s232_s1 + $0x28] sm:$0xff]  ;;  %vm26_vm3 = vcmask 408576  }
   0x3   :  { %v172_v7 = vpack.c.bf16 %v22_v6, %v21_v3  ;;  %v175_v10 = vpack.c.bf16 %v24_v9, %v23_v8  ;;  %v25_v11 = vld [vmem:[%s232_s1 + $0x30] sm:$0x3]  ;;  %v18_v12 = vld [vmem:[%s233_s0] sm:$0x3] }
   0x4   :  { %170 = vmatpush3.bf16.msra.mxu0 %v169_v5 }
   0x5   :  { %171 = vmatprep.subr.bf16.mxu0 %v182_v0 }
   0x8   :  { %173 = vmatpush3.bf16.msra.mxu0 %v172_v7  ;;  %v17_v13 = vld [vmem:[#allocation2] sm:$0x3] }
   0x9   :  { %174 = vmatprep.subr.bf16.mxu0 %v182_v0 }
   0xc   :  { %176 = vmatpush3.bf16.msra.mxu0 %v175_v10 }
   0xd   :  { %163 = vmatprep.subr.mxu0 %v183_v4 }
  0x10   :  { %164 = vmatpush3.msk.msra.mxu0 %vm30_vm2, %v25_v11 }
  0x11   :  { %166 = vmatmul.mubr.msk.f32.vlgmr.msra.gmra.mrb[0].mxu0 %vm26_vm3, %v18_v12 }
  0xe4   :  { %v100_v14 = vpop.f32.mrb[0].mxu0 }
  0xe5   :  { %v104_v15 = vadd.f32 %v100_v14, %v17_v13  ;;  %v167_v16 = vpop.f32.mrb[1].mxu0 }
  0xe7   :  { %106 = vst.msk [vmem:[#allocation2] sm:$0x3] %vm15_vm0, %v104_v15 }
  0xee   :  { %v110_v17 = vld [vmem:[#allocation2] sm:$0x3] }
  0xef   :  { %v111_v18 = vsel %vm15_vm0, %v110_v17, 0.0 }
  0xf0   :  { %v112_v19 = vrot.slane %v111_v18, 4 }
  0xf2   :  { %v113_v20 = vadd.f32 %v112_v19, %v111_v18 }
  0xf4   :  { %v114_v21 = vrot.slane %v113_v20, 2 }
  0xf6   :  { %v115_v22 = vadd.f32 %v114_v21, %v113_v20 }
  0xf8   :  { %v116_v23 = vrot.slane %v115_v22, 1 }
  0xfa   :  { %v117_v24 = vadd.f32 %v116_v23, %v115_v22 }
  0xfc   :  { %v119_v25 = vmul.f32 0.5, %v117_v24 }
  0xfe   :  { %v120_v26 = vsub.f32 %v110_v17, %v119_v25 }
 0x100   :  { %v121_v27 = vmul.f32 %v120_v26, %v120_v26 }
 0x102   :  { %v122_v28 = vsel %vm15_vm0, %v121_v27, 0.0 }
 0x103   :  { %v123_v29 = vrot.slane %v122_v28, 4 }
 0x105   :  { %v124_v30 = vadd.f32 %v123_v29, %v122_v28 }
 0x107   :  { %v125_v31 = vrot.slane %v124_v30, 2 }
 0x109   :  { %v126_v32 = vadd.f32 %v125_v31, %v124_v30 }
 0x10b   :  { %v127_v33 = vrot.slane %v126_v32, 1 }
 0x10d   :  { %v128_v34 = vadd.f32 %v127_v33, %v126_v32 }
 0x10f   :  { %v129_v35 = vmul.f32 0.5, %v128_v34 }
 0x111   :  { %v130_v36 = vadd.f32 1e-05, %v129_v35 }
 0x113   :  { %180 = vrsqrt.f32 %v130_v36 }
 0x11d   :  { %v181_v37 = vpop.eup %180 }
 0x11e   :  { %v132_v38 = vmul.f32 %v181_v37, %v120_v26 }
 0x120   :  { %vm133_vm4 = vcmp.gt.f32.partialorder %v132_v38, 0.0  ;;  %v134_v39 = vmul.f32 0.01, %v132_v38 }
 0x122   :  { %v135_v40 = vsel %vm133_vm4, %v132_v38, %v134_v39 }
 0x123   :  { %136 = vst.msk [vmem:[%s234_s2] sm:$0x3] %vm15_vm0, %v135_v40 }

// kernel: combined_generator.10
= control target key start
LH: loop header
LB: loop body
LE: loop exit
PB: predicated region body
PF: predicated region fallthrough
CT: control target
= control target key end

     0   :  { %v928_v0 = vmov 0.0|0.0   ;;  %vm42_vm0 = vcmask 1040384   ;;  %vm929_vm1 = vmmov 0   ;;  %v930_v6 = vmov 0.0   ;;  %s1541_s1 = inlined_call_operand.vmem [shape: f32[25,15], index: 1, kind: input, shape index: {}]   ;;  %s1542_s0 = inlined_call_operand.vmem [shape: f32[2,25], index: 0, kind: input, shape index: {}]   ;;  %s1543_s2 = inlined_call_operand.vmem [shape: f32[1,15], index: 2, kind: input, shape index: {}]   ;;  %s1544_s3 = inlined_call_operand.vmem [shape: f32[1,15], index: 3, kind: input, shape index: {}]   ;;  %s1545_s6 = inlined_call_operand.vmem [shape: f32[216,216], index: 6, kind: input, shape index: {}]   ;;  %s1546_s4 = inlined_call_operand.vmem [shape: f32[2,1], index: 4, kind: input, shape index: {}]   ;;  %s1547_s5 = inlined_call_operand.vmem [shape: f32[1,216], index: 5, kind: input, shape index: {}]   ;;  %s1548_s7 = inlined_call_operand.vmem [shape: f32[2,216], index: 7, kind: output, shape index: {}]  }
   0x1   :  { %776 = vmatprep.subr.bf16.mxu0 %v928_v0  ;;  %v27_v1 = vld [vmem:[%s1541_s1] sm:$0xff]  ;;  %v28_v2 = vld [vmem:[%s1541_s1 + $0x8] sm:$0xff]  ;;  %v29_v3 = vld [vmem:[%s1541_s1 + $0x10] sm:$0xff]  ;;  %773 = vmatprep.mubr.msk.f32.mxu0 %vm929_vm1, %v930_v6  ;;  %vm931_vm2 = vmmov 1   ;;  %vm38_vm4 = vcmask 203776   ;;  %v932_v9 = vmov 8   ;;  %v131_v16 = vlaneseq }
   0x2   :  { %v777_v4 = vpack.c.bf16 %v28_v2, %v27_v1  ;;  %v30_v5 = vld [vmem:[%s1541_s1 + $0x18] sm:$0x1]  ;;  %vm781_vm3 = vmpackc.low %vm42_vm0, %vm931_vm2  ;;  %v26_v8 = vld [vmem:[%s1542_s0] sm:$0x3]  ;;  %871 = vset.pattern.permute.xlu1 %v932_v9  ;;  %v933_v10 = vmov 2   ;;  %v934_v44 = vmov 11  }
   0x3   :  { %v780_v7 = vpack.c.bf16 %v30_v5, %v29_v3  ;;  %869 = vset.pattern.permute.xlu0 %v933_v10  ;;  %v746_v11 = vld [vmem:[%s1543_s2] ss:$0 sm:$0xff]  ;;  %v132_v17 = vand.u32 127, %v131_v16  ;;  %v595_v36 = vld [vmem:[%s1545_s6 + $0x8] sm:$0xff]  ;;  %v597_v37 = vld [vmem:[%s1545_s6 + $0x18] sm:$0xff]  ;;  %v935_v45 = vmov 5  }
   0x4   :  { %778 = vmatpush3.bf16.msra.mxu0 %v777_v4  ;;  %v750_v29 = vld [vmem:[%s1544_s3] ss:$0 sm:$0xff]  ;;  %v783_v38 = vpack.c.bf16 %v597_v37, %v595_v36  ;;  %v596_v40 = vld [vmem:[%s1545_s6 + $0x10] sm:$0xff]  ;;  %v599_v47 = vld [vmem:[%s1545_s6 + $0x28] sm:$0xff]  ;;  %v936_v55 = vmov 14   ;;  %v937_v56 = vmov 4  }
   0x5   :  { %779 = vmatprep.subr.bf16.mxu0 %v928_v0  ;;  %v133_v18 = vadd.s32 128, %v132_v17  ;;  %v134_v19 = vcvt.s32.f32 %v132_v17  ;;  %v594_v39 = vld [vmem:[%s1545_s6] sm:$0xff]  ;;  %v601_v48 = vld [vmem:[%s1545_s6 + $0x38] sm:$0xff]  ;;  %v600_v52 = vld [vmem:[%s1545_s6 + $0x30] sm:$0xff]  ;;  %v938_v1 = vmov 1   ;;  %v939_v2 = vmov 10  }
   0x6   :  { %v785_v41 = vpack.c.bf16 %v596_v40, %v594_v39  ;;  %784 = vmatprep.subr.bf16.mxu1 %v783_v38  ;;  %v787_v50 = vpack.c.bf16 %v601_v48, %v599_v47  ;;  %v598_v51 = vld [vmem:[%s1545_s6 + $0x20] sm:$0xff]  ;;  %v603_v58 = vld [vmem:[%s1545_s6 + $0x48] sm:$0xff]  ;;  %v605_v59 = vld [vmem:[%s1545_s6 + $0x58] sm:$0xff]  ;;  %v941_v17 = vmov 7   ;;  %v946_v38 = vmov 1326507024  }
   0x7   :  { %v135_v22 = vcvt.s32.f32 %v133_v18  ;;  %v1013_v23 = vmul.f32 0.0046296297, %v134_v19  ;;  %v789_v54 = vpack.c.bf16 %v600_v52, %v598_v51  ;;  %v791_v60 = vpack.c.bf16 %v605_v59, %v603_v58  ;;  %v602_v61 = vld [vmem:[%s1545_s6 + $0x40] sm:$0xff]  ;;  %v604_v62 = vld [vmem:[%s1545_s6 + $0x50] sm:$0xff]  ;;  %v607_v4 = vld [vmem:[%s1545_s6 + $0x68] sm:$0xff] }
   0x8   :  { %782 = vmatpush3.bf16.msk.msra.mxu0 %vm781_vm3, %v780_v7  ;;  %786 = vmatpush1.bf16.msra.mxu1 %v785_v41  ;;  %v793_v63 = vpack.c.bf16 %v604_v62, %v602_v61  ;;  %v609_v5 = vld [vmem:[%s1545_s6 + $0x78] sm:$0xff]  ;;  %v606_v7 = vld [vmem:[%s1545_s6 + $0x60] sm:$0xff]  ;;  %v611_v9 = vld [vmem:[%s1545_s6 + $0x88] sm:$0xff] }
   0x9   :  { %v1015_v24 = vmul.f32 0.0046296297, %v135_v22  ;;  %v1018_v25 = vmul.f32 1.5707964, %v1013_v23  ;;  %788 = vmatprep.subr.bf16.mxu1 %v787_v50  ;;  %v795_v6 = vpack.c.bf16 %v609_v5, %v607_v4  ;;  %v613_v10 = vld [vmem:[%s1545_s6 + $0x98] sm:$0xff]  ;;  %v610_v18 = vld [vmem:[%s1545_s6 + $0x80] sm:$0xff] }
   0xa   :  { %v612_v19 = vld [vmem:[%s1545_s6 + $0x90] sm:$0xff]  ;;  %v614_v41 = vld [vmem:[%s1545_s6 + $0xa0] sm:$0xff] }
   0xb   :  { %774 = vmatmul.mubr.msk.f32.vlgmr.msra.gmra.mrb[0].mxu0 %vm38_vm4, %v26_v8  ;;  %v1021_v26 = vmul.f32 1.5707964, %v1015_v24  ;;  %v158_v27 = vand.u32 2139095040, %v1018_v25  ;;  %v608_v8 = vld [vmem:[%s1545_s6 + $0x70] sm:$0xff]  ;;  %vm157_vm3 = vcmp.lt.s32.totalorder %v1018_v25, 0 }
   0xc   :  { %790 = vmatpush1.bf16.msra.mxu1 %v789_v54  ;;  %v620_v61 = vld [vmem:[%s1545_s6 + $0xd0] sm:$0xff] }
   0xd   :  { %v159_v30 = vshrl.u32 %v158_v27, 23  ;;  %v262_v31 = vand.u32 2139095040, %v1021_v26  ;;  %792 = vmatprep.subr.bf16.mxu1 %v791_v60  ;;  %v943_v27 = vmov 2475754826   ;;  %v618_v60 = vld [vmem:[%s1545_s6 + $0xc0] sm:$0xff]  ;;  %vm261_vm4 = vcmp.lt.s32.totalorder %v1021_v26, 0 }
   0xe   :  { %v259_v62 = vand.u32 2147483647, %v1021_v26 }
   0xf   :  { %v751_v34 = vadd.s32 4294967169, %v159_v30  ;;  %v263_v35 = vshrl.u32 %v262_v31, 23  ;;  %v801_v31 = vpack.c.bf16 %v612_v19, %v610_v18 }
  0x10   :  { %794 = vmatpush1.bf16.msra.mxu1 %v793_v63 }
  0x11   :  { %v165_v42 = vadd.s32 1, %v751_v34  ;;  %v755_v43 = vadd.s32 4294967169, %v263_v35  ;;  %796 = vmatprep.subr.bf16.mxu1 %v795_v6  ;;  %v617_v34 = vld [vmem:[%s1545_s6 + $0xb8] sm:$0xff]  ;;  %v945_v35 = vmov 920167782   ;;  %v950_v6 = vmov 0  }
  0x13   :  { %vm166_vm5 = vcmp.gt.s32.totalorder %v165_v42, 0  ;;  %v269_v49 = vadd.s32 1, %v755_v43 }
  0x14   :  { %v1064_v57 = vsel %vm166_vm5, %v165_v42, 0  ;;  %v616_v42 = vld [vmem:[%s1545_s6 + $0xb0] sm:$0xff] }
  0x15   :  { %vm270_vm6 = vcmp.gt.s32.totalorder %v269_v49, 0  ;;  %v169_v0 = vand.u32 31, %v1064_v57  ;;  %v1145_v48 = vshrl.u32 %v1064_v57, 5  ;;  %v805_v54 = vpack.c.bf16 %v616_v42, %v614_v41 }
  0x16   :  { %v1079_v3 = vsel %vm270_vm6, %v269_v49, 0  ;;  %v949_v49 = vmov 2131351028   ;;  %vm1415_vm6 = vcmp.le.f32.partialorder %v259_v62, 0.7853982 }
  0x17   :  { %v1124_v37 = vshll.u32 %v945_v35, %v169_v0  ;;  %v175_v47 = vshll.u32 %v943_v27, %v169_v0  ;;  %v178_v51 = vshll.u32 %v949_v49, %v169_v0  ;;  %vm190_vm7 = vcmp.lt.s32.totalorder %v1145_v48, 4 }
  0x18   :  { %vm187_vm8 = vcmp.lt.s32.totalorder %v1145_v48, 1  ;;  %vm188_vm10 = vcmp.lt.s32.totalorder %v1145_v48, 2  ;;  %vm189_vm11 = vcmp.lt.s32.totalorder %v1145_v48, 3 }
  0xde   :  { %v112_v12 = vpop.f32.mrb[0].mxu0 }
  0xdf   :  { %v113_v13 = vadd.f32 %v746_v11, %v112_v12  ;;  %v775_v14 = vpop.f32.mrb[1].mxu0  ;;  %v1102_v11 = vand.u32 31, %v1079_v3  ;;  %v797_v12 = vpack.c.bf16 %v608_v8, %v606_v7 }
  0xe0   :  { %v799_v14 = vpack.c.bf16 %v613_v10, %v611_v9 }
  0xe1   :  { %v749_v15 = vmul.f32 -1.442695, %v113_v13  ;;  %v1104_v13 = vsub.s32 32, %v169_v0  ;;  %798 = vmatpush1.bf16.msra.mxu1 %v797_v12  ;;  %v1136_v43 = vsub.s32 32, %v1102_v11  ;;  %v288_v4 = vshll.u32 %v945_v35, %v1102_v11 }
  0xe2   :  { %800 = vmatprep.subr.bf16.mxu1 %v799_v14  ;;  %v279_v9 = vshll.u32 %v943_v27, %v1102_v11  ;;  %v282_v12 = vshll.u32 %v949_v49, %v1102_v11 }
  0xe3   :  { %886 = vpow2.f32 %v749_v15  ;;  %v940_v15 = vmov 3   ;;  %v182_v36 = vshrl.u32 %v945_v35, %v1104_v13  ;;  %v1127_v39 = vshrl.u32 %v946_v38, %v1104_v13 }
  0xe4   :  { %v176_v50 = vshrl.u32 %v949_v49, %v1104_v13  ;;  %v289_v5 = vshrl.u32 %v946_v38, %v1136_v43  ;;  %v277_v8 = vshrl.u32 %v943_v27, %v1136_v43  ;;  %v280_v10 = vshrl.u32 %v949_v49, %v1136_v43 }
  0xe5   :  { %802 = vmatpush1.bf16.msra.mxu1 %v801_v31  ;;  %v186_v58 = vor.u32 %v1127_v39, %v1124_v37  ;;  %v627_v39 = vld [vmem:[%s1545_s6 + $0x108] sm:$0xff] }
  0xe6   :  { %v1193_v18 = vor.u32 %v176_v50, %v175_v47 }
  0xed   :  { %v887_v20 = vpop.eup %886 }
  0xee   :  { %v119_v21 = vadd.f32 1.0, %v887_v20  ;;  %v155_v20 = vand.u32 2147483647, %v1018_v25 }
  0xf0   :  { %888 = vrcp.f32 %v119_v21  ;;  %v942_v21 = vmov 683565275   ;;  %vm1400_vm5 = vcmp.le.f32.partialorder %v155_v20, 0.7853982 }
  0xf1   :  { %v172_v22 = vshll.u32 %v942_v21, %v169_v0 }
  0xfa   :  { %v889_v28 = vpop.eup %888 }
  0xfb   :  { %v122_v32 = vmul.f32 0.1, %v889_v28  ;;  %v173_v28 = vshrl.u32 %v943_v27, %v1104_v13  ;;  %v624_v27 = vld [vmem:[%s1545_s6 + $0xf0] sm:$0xff] }
  0xfd   :  { %v1028_v33 = vadd.f32 %v750_v29, %v122_v32  ;;  %v944_v29 = vmov 2102212464   ;;  %v615_v32 = vld [vmem:[%s1545_s6 + $0xa8] sm:$0xff] }
  0xfe   :  { %v181_v30 = vshll.u32 %v944_v29, %v169_v0  ;;  %v803_v40 = vpack.c.bf16 %v617_v34, %v615_v32  ;;  %v179_v52 = vshrl.u32 %v944_v29, %v1104_v13  ;;  %v285_v63 = vshll.u32 %v944_v29, %v1102_v11 }
  0xff   :  { %452 = vperm.xlu1 %871, %v1028_v33   ;;  %367 = vperm.xlu0 %869, %v1028_v33   ;;  %v392_v46 = vmul.f32 2.0, %v1028_v33  ;;  %v286_v0 = vshrl.u32 %v945_v35, %v1136_v43  ;;  %v283_v14 = vshrl.u32 %v944_v29, %v1136_v43  ;;  %v290_v29 = vor.u32 %v289_v5, %v288_v4 }
 0x100   :  { %v1157_v57 = vor.u32 %v182_v36, %v181_v30  ;;  %804 = vmatprep.subr.bf16.mxu1 %v803_v40  ;;  %v180_v19 = vor.u32 %v179_v52, %v178_v51  ;;  %v951_v34 = vmov 6   ;;  %v200_v35 = vsel %vm190_vm7, %v186_v58, 1326507024  ;;  %v629_v40 = vld [vmem:[%s1545_s6 + $0x118] sm:$0xff] }
 0x101   :  { %v1060_v53 = vmul.f32 %v392_v46, %v1028_v33  ;;  %v1140_v46 = vand.u32 8388607, %v155_v20  ;;  %806 = vmatpush1.bf16.msra.mxu1 %v805_v54  ;;  %v1214_v36 = vor.u32 %v280_v10, %v279_v9  ;;  %v284_v37 = vor.u32 %v283_v14, %v282_v12  ;;  %v630_v14 = vld [vmem:[%s1545_s6 + $0x120] sm:$0xff] }
 0x102   :  { %v196_v31 = vsel %vm190_vm7, %v1157_v57, 920167782  ;;  %v815_v47 = vpack.c.bf16 %v629_v40, %v627_v39  ;;  %v199_v49 = vsel %vm187_vm8, %v1193_v18, %v180_v19  ;;  %v201_v50 = vsel %vm189_vm11, %v1157_v57, %v200_v35  ;;  %v636_v35 = vld [vmem:[%s1545_s6 + $0x150] sm:$0xff]  ;;  %v639_v40 = vld [vmem:[%s1545_s6 + $0x168] sm:$0xff] }
 0x103   :  { %872 = vset.pattern.permute.xlu1 %v934_v44  ;;  %870 = vset.pattern.permute.xlu0 %v935_v45  ;;  %v947_v44 = vmov 12   ;;  %v948_v45 = vmov 13   ;;  %v163_v7 = vor.u32 8388608, %v1140_v46  ;;  %v171_v9 = vshrl.u32 %v942_v21, %v1104_v13 }
 0x104   :  { %493 = vperm.xlu1 %872, %v1028_v33   ;;  %411 = vperm.xlu0 %870, %v1028_v33  }
 0x105   :  { %v1241_v51 = vshll.u32 %v163_v7, 8 }
 0x108   :  { %873 = vset.pattern.permute.xlu1 %v936_v55  ;;  %875 = vset.pattern.permute.xlu0 %v937_v56  ;;  %v619_v55 = vld [vmem:[%s1545_s6 + $0xc8] sm:$0xff]  ;;  %v621_v56 = vld [vmem:[%s1545_s6 + $0xd8] sm:$0xff] }
 0x109   :  { %534 = vperm.xlu1 %873, %v1028_v33   ;;  %437 = vperm.xlu0 %875, %v1060_v53   ;;  %v807_v59 = vpack.c.bf16 %v621_v56, %v619_v55  ;;  %v952_v55 = vmov 9  }
 0x10b   :  { %808 = vmatprep.subr.bf16.mxu1 %v807_v59  ;;  %v626_v59 = vld [vmem:[%s1545_s6 + $0x100] sm:$0xff] }
 0x10d   :  { %874 = vset.pattern.permute.xlu1 %v938_v1  ;;  %877 = vset.pattern.permute.xlu0 %v939_v2  ;;  %v1171_v1 = vshrl.u32 %v1079_v3, 5  ;;  %v276_v2 = vshll.u32 %v942_v21, %v1102_v11  ;;  %v809_v3 = vpack.c.bf16 %v620_v61, %v618_v60  ;;  %v622_v11 = vld [vmem:[%s1545_s6 + $0xe0] sm:$0xff]  ;;  %v628_v60 = vld [vmem:[%s1545_s6 + $0x110] sm:$0xff]  ;;  %v202_v61 = vsel %vm188_vm10, %v199_v49, %v201_v50 }
 0x10e   :  { %519 = vperm.xlu0 %877, %v1060_v53   ;;  %396 = vperm.xlu1 %874, %v1060_v53   ;;  %v813_v38 = vpack.c.bf16 %v624_v27, %v622_v11  ;;  %v275_v27 = vshrl.u32 %v942_v21, %v1136_v43  ;;  %v642_v50 = vld [vmem:[%s1545_s6 + $0x180] sm:$0xff] }
 0x10f   :  { %vm294_vm9 = vcmp.lt.s32.totalorder %v1171_v1, 4  ;;  %v1210_v32 = vor.u32 %v277_v8, %v276_v2  ;;  %810 = vmatpush1.bf16.msra.mxu1 %v809_v3  ;;  %vm291_vm12 = vcmp.lt.s32.totalorder %v1171_v1, 1  ;;  %vm293_vm13 = vcmp.lt.s32.totalorder %v1171_v1, 3  ;;  %v633_v8 = vld [vmem:[%s1545_s6 + $0x138] sm:$0xff] }
 0x110   :  { %v304_v46 = vsel %vm294_vm9, %v290_v29, 1326507024  ;;  %vm292_vm14 = vcmp.lt.s32.totalorder %v1171_v1, 2  ;;  %v303_v57 = vsel %vm291_vm12, %v1214_v36, %v284_v37  ;;  %v817_v2 = vpack.c.bf16 %v628_v60, %v626_v59  ;;  %v647_v59 = vld [vmem:[%s1545_s6 + $0x1a8] sm:$0xff] }
 0x111   :  { %v299_v52 = vsel %vm291_vm12, %v1210_v32, %v1214_v36  ;;  %v1286_v10 = vmul.u32.u64.low %v1241_v51, %v202_v61  ;;  %v1287_v3 = vmul.u32.u64.high %v1241_v51, %v202_v61, %v1286_v10  ;;  %v646_v61 = vld [vmem:[%s1545_s6 + $0x1a0] sm:$0xff] }
 0x112   :  { %880 = vset.pattern.permute.xlu0 %v940_v15  ;;  %876 = vset.pattern.permute.xlu1 %v941_v17  ;;  %v623_v15 = vld [vmem:[%s1545_s6 + $0xe8] sm:$0xff]  ;;  %v625_v17 = vld [vmem:[%s1545_s6 + $0xf8] sm:$0xff] }
 0x113   :  { %427 = vperm.xlu0 %880, %v1028_v33   ;;  %478 = vperm.xlu1 %876, %v1060_v53   ;;  %v811_v30 = vpack.c.bf16 %v625_v17, %v623_v15  ;;  %v632_v15 = vld [vmem:[%s1545_s6 + $0x130] sm:$0xff]  ;;  %v192_v17 = vsel %vm190_vm7, %v180_v19, 2102212464 }
 0x114   :  { %v821_v11 = vpack.c.bf16 %v632_v15, %v630_v14  ;;  %v193_v43 = vsel %vm189_vm11, %v1193_v18, %v192_v17 }
 0x115   :  { %812 = vmatprep.subr.bf16.mxu1 %v811_v30  ;;  %v296_v30 = vsel %vm294_vm9, %v284_v37, 2102212464 }
 0x116   :  { %814 = vmatpush1.bf16.msra.mxu1 %v813_v38  ;;  %v295_v38 = vsel %vm291_vm12, %v275_v27, %v1210_v32  ;;  %v638_v32 = vld [vmem:[%s1545_s6 + $0x160] sm:$0xff] }
 0x117   :  { %883 = vset.pattern.permute.xlu0 %v947_v44  ;;  %878 = vset.pattern.permute.xlu1 %v948_v45  ;;  %v197_v44 = vsel %vm189_vm11, %v180_v19, %v196_v31  ;;  %v635_v19 = vld [vmem:[%s1545_s6 + $0x148] sm:$0xff]  ;;  %v637_v31 = vld [vmem:[%s1545_s6 + $0x158] sm:$0xff] }
 0x118   :  { %550 = vperm.xlu0 %883, %v1028_v33   ;;  %560 = vperm.xlu1 %878, %v1060_v53   ;;  %v1155_v53 = vor.u32 %v173_v28, %v172_v22  ;;  %v287_v22 = vor.u32 %v286_v0, %v285_v63  ;;  %v266_v28 = vand.u32 8388607, %v259_v62 }
 0x119   :  { %816 = vmatprep.subr.bf16.mxu1 %v815_v47 }
 0x11a   :  { %v195_v41 = vsel %vm187_vm8, %v1155_v53, %v1193_v18  ;;  %v300_v42 = vsel %vm294_vm9, %v287_v22, 920167782  ;;  %v267_v45 = vor.u32 8388608, %v266_v28  ;;  %v305_v58 = vsel %vm293_vm13, %v287_v22, %v304_v46  ;;  %818 = vmatpush1.bf16.msra.mxu1 %v817_v2 }
 0x11b   :  { %v301_v54 = vsel %vm293_vm13, %v284_v37, %v300_v42  ;;  %v198_v56 = vsel %vm188_vm10, %v195_v41, %v197_v44  ;;  %v306_v7 = vsel %vm292_vm14, %v303_v57, %v305_v58  ;;  %v191_v21 = vsel %vm187_vm8, %v171_v9, %v1155_v53  ;;  %v641_v41 = vld [vmem:[%s1545_s6 + $0x178] sm:$0xff]  ;;  %v643_v42 = vld [vmem:[%s1545_s6 + $0x188] sm:$0xff] }
 0x11c   :  { %879 = vset.pattern.permute.xlu1 %v950_v6  ;;  %885 = vset.pattern.permute.xlu0 %v950_v6  ;;  %v1266_v63 = vshll.u32 %v267_v45, 8  ;;  %v302_v0 = vsel %vm292_vm14, %v299_v52, %v301_v54  ;;  %v1271_v4 = vmul.u32.u64.low %v1241_v51, %v198_v56  ;;  %v1272_v5 = vmul.u32.u64.high %v1241_v51, %v198_v56, %v1271_v4  ;;  %v645_v44 = vld [vmem:[%s1545_s6 + $0x198] sm:$0xff]  ;;  %v644_v52 = vld [vmem:[%s1545_s6 + $0x190] sm:$0xff] }
 0x11d   :  { %383 = vperm.xlu1 %879, %v1028_v33   ;;  %v297_v53 = vsel %vm293_vm13, %v1214_v36, %v296_v30  ;;  %v194_v18 = vsel %vm188_vm10, %v191_v21, %v193_v43  ;;  %v827_v48 = vpack.c.bf16 %v641_v41, %v639_v40  ;;  %v640_v36 = vld [vmem:[%s1545_s6 + $0x170] sm:$0xff]  ;;  %v831_v49 = vpack.c.bf16 %v645_v44, %v643_v42 }
 0x11e   :  { %v1298_v22 = vmul.u32.u64.low %v1266_v63, %v302_v0  ;;  %v1299_v13 = vmul.u32.u64.high %v1266_v63, %v302_v0, %v1298_v22  ;;  %v1306_v28 = vmul.u32.u64.low %v1266_v63, %v306_v7  ;;  %v1307_v29 = vmul.u32.u64.high %v1266_v63, %v306_v7, %v1306_v28 }
 0x11f   :  { %v213_v39 = vadd.s32 1, %v1272_v5  ;;  %vm212_vm15 = vc.u32 %v1287_v3, %v1271_v4  ;;  %v298_v45 = vsel %vm292_vm14, %v295_v38, %v297_v53  ;;  %v829_v47 = vpack.c.bf16 %v640_v36, %v638_v32 }
 0x120   :  { %v317_v46 = vadd.s32 1, %v1299_v13  ;;  %v210_v54 = vmul.u32 %v1241_v51, %v194_v18  ;;  %vm316_vm0 = vc.u32 %v1307_v29, %v1298_v22  ;;  %v833_v56 = vpack.c.bf16 %v644_v52, %v642_v50  ;;  %v574_v51 = vld [vmem:[%s1546_s4] sm:$0x3] }
 0x121   :  { %881 = vset.pattern.permute.xlu1 %v951_v34  ;;  %v634_v34 = vld [vmem:[%s1545_s6 + $0x140] sm:$0xff]  ;;  %v214_v1 = vsel %vm212_vm15, %v213_v39, %v1272_v5  ;;  %v139_v21 = vmul.f32 6.2831855, %v1015_v24  ;;  %v315_v53 = vadd.s32 %v1298_v22, %v1307_v29  ;;  %vm247_vm13 = vweird.f32 %v1018_v25 }
 0x122   :  { %468 = vperm.xlu1 %881, %v1028_v33   ;;  %v825_v37 = vpack.c.bf16 %v636_v35, %v634_v34  ;;  %v318_v57 = vsel %vm316_vm0, %v317_v46, %v1299_v13  ;;  %v215_v58 = vadd.s32 %v214_v1, %v210_v54  ;;  %vm351_vm14 = vweird.f32 %v1021_v26 }
 0x123   :  { %v141_v38 = vadd.f32 -2.0017645, %v139_v21  ;;  %vm648_vm15 = vcmask 719872   ;;  %vm738_vm0 = vcmask 1041408  }
 0x126   :  { %882 = vset.pattern.permute.xlu1 %v952_v55  ;;  %v314_v55 = vmul.u32 %v1266_v63, %v298_v45  ;;  %v216_v63 = vadd.s32 536870912, %v215_v58 }
 0x127   :  { %509 = vperm.xlu1 %882, %v1028_v33   ;;  %v631_v33 = vld [vmem:[%s1545_s6 + $0x128] sm:$0xff] }
 0x128   :  { %v819_v12 = vpack.c.bf16 %v633_v8, %v631_v33  ;;  %v319_v60 = vadd.s32 %v318_v57, %v314_v55  ;;  %v1382_v2 = vshrl.u32 %v216_v63, 30 }
 0x12a   :  { %820 = vmatprep.subr.bf16.mxu1 %v819_v12  ;;  %v320_v0 = vadd.s32 536870912, %v319_v60  ;;  %v218_v7 = vshll.u32 %v1382_v2, 30 }
 0x12b   :  { %884 = vset.pattern.permute.xlu1 %v950_v6  ;;  %822 = vmatpush1.bf16.msra.mxu1 %v821_v11  ;;  %v823_v6 = vpack.c.bf16 %v637_v31, %v635_v19  ;;  %v138_v31 = vmul.f32 6.2831855, %v1013_v23  ;;  %v143_v23 = vadd.f32 3.1415927, %v141_v38 }
 0x12c   :  { %578 = vperm.xlu1 %884, %v574_v51   ;;  %v1384_v5 = vshrl.u32 %v320_v0, 30  ;;  %v219_v8 = vsub.s32 %v215_v58, %v218_v7 }
 0x12d   :  { %824 = vmatprep.subr.bf16.mxu1 %v823_v6  ;;  %v211_v6 = vadd.s32 %v1271_v4, %v1287_v3  ;;  %v146_v3 = vmul.f32 0.15915494, %v143_v23 }
 0x12e   :  { %v322_v33 = vshll.u32 %v1384_v5, 30  ;;  %v221_v10 = vsub.s32 0, %v219_v8  ;;  %v345_v63 = vsub.s32 4, %v1384_v5 }
 0x12f   :  { %826 = vmatpush1.bf16.msra.mxu1 %v825_v37  ;;  %v140_v37 = vadd.f32 -2.0017645, %v138_v31  ;;  %v148_v22 = vfloor.f32 %v146_v3 }
 0x130   :  { %828 = vmatprep.subr.bf16.mxu1 %v827_v48  ;;  %v323_v9 = vsub.s32 %v319_v60, %v322_v33  ;;  %v752_v14 = vmin.u32 %v221_v10, %v219_v8 }
 0x131   :  { %v142_v48 = vadd.f32 3.1415927, %v140_v37 }
 0x132   :  { %v325_v12 = vsub.s32 0, %v323_v9  ;;  %v223_v17 = vclz %v752_v14 }
 0x133   :  { %830 = vmatpush1.bf16.msra.mxu1 %v829_v47  ;;  %v145_v4 = vmul.f32 0.15915494, %v142_v48 }
 0x134   :  { %832 = vmatprep.subr.bf16.mxu1 %v831_v49  ;;  %v756_v15 = vmin.u32 %v325_v12, %v323_v9  ;;  %v753_v11 = vadd.s32 4294967294, %v223_v17 }
 0x135   :  { %v147_v52 = vfloor.f32 %v145_v4 }
 0x136   :  { %v327_v13 = vclz %v756_v15  ;;  %vm754_vm1 = vcmp.lt.s32.totalorder %v753_v11, 0 }
 0x137   :  { %834 = vmatpush1.bf16.msra.mxu1 %v833_v56  ;;  %v226_v28 = vsel %vm754_vm1, 0, %v753_v11  ;;  %v149_v55 = vmul.f32 6.2831855, %v147_v52  ;;  %v150_v56 = vmul.f32 6.2831855, %v148_v22  ;;  %vm739_vm1 = vcmask 715778  }
 0x138   :  { %704 = vmatprep.subr.mxu1 %v647_v59  ;;  %v757_v27 = vadd.s32 4294967294, %v327_v13  ;;  %v231_v19 = vsub.s32 4294967266, %v226_v28  ;;  %v227_v34 = vsub.s32 32, %v226_v28  ;;  %v228_v40 = vshll.u32 %v219_v8, %v226_v28 }
 0x139   :  { %v241_v59 = vsub.s32 4, %v1382_v2  ;;  %v151_v60 = vsub.f32 %v140_v37, %v149_v55  ;;  %v152_v51 = vsub.f32 %v141_v38, %v150_v56  ;;  %v346_v13 = vsel %vm261_vm4, %v345_v63, %v1384_v5 }
 0x13a   :  { %vm758_vm2 = vcmp.lt.s32.totalorder %v757_v27, 0  ;;  %v232_v35 = vadd.s32 127, %v231_v19  ;;  %v229_v41 = vshrl.u32 %v211_v6, %v227_v34  ;;  %v348_v6 = vsel %vm1415_vm6, 0, %v346_v13 }
 0x13b   :  { %705 = vmatpush1.msra.mxu1 %v646_v61  ;;  %v330_v30 = vsel %vm758_vm2, 0, %v757_v27  ;;  %v352_v23 = vadd.s32 3, %v348_v6  ;;  %vm740_vm2 = vmor %vm739_vm1, %vm738_vm0 }
 0x13c   :  { %v335_v43 = vsub.s32 4294967266, %v330_v30  ;;  %v331_v18 = vsub.s32 32, %v330_v30  ;;  %v233_v32 = vshll.u32 %v232_v35, 23  ;;  %v332_v36 = vshll.u32 %v323_v9, %v330_v30 }
 0x13d   :  { %v230_v44 = vor.u32 %v229_v41, %v228_v40  ;;  %v242_v9 = vsel %vm157_vm3, %v241_v59, %v1382_v2 }
 0x13e   :  { %v336_v39 = vadd.s32 127, %v335_v43  ;;  %v333_v24 = vshrl.u32 %v315_v53, %v331_v18  ;;  %v234_v45 = vor.u32 4788187, %v233_v32  ;;  %v244_v62 = vsel %vm1400_vm5, 0, %v242_v9 }
 0x13f   :  { %v237_v50 = vcvt.s32.f32 %v230_v44  ;;  %v248_v48 = vadd.s32 3, %v244_v62 }
 0x140   :  { %v337_v42 = vshll.u32 %v336_v39, 23  ;;  %v334_v46 = vor.u32 %v333_v24, %v332_v36  ;;  %v235_v49 = vand.u32 2147483647, %v234_v45 }
 0x142   :  { %v338_v47 = vor.u32 4788187, %v337_v42  ;;  %v341_v54 = vcvt.s32.f32 %v334_v46  ;;  %v238_v1 = vmul.f32 %v237_v50, %v235_v49 }
 0x144   :  { %v339_v29 = vand.u32 2147483647, %v338_v47  ;;  %v239_v58 = vxor.u32 2147483648, %v238_v1 }
 0x146   :  { %v342_v57 = vmul.f32 %v341_v54, %v339_v29  ;;  %v240_v8 = vsel %vm157_vm3, %v239_v58, %v238_v1  ;;  %v1443_v58 = vand.u32 3, %v248_v48 }
 0x147   :  { %v243_v30 = vsel %vm1400_vm5, %v1018_v25, %v240_v8 }
 0x148   :  { %v343_v61 = vxor.u32 2147483648, %v342_v57  ;;  %890 = vcosq.f32 %v243_v30  ;;  %vm254_vm7 = vcmp.eq.s32.totalorder %v1443_v58, 2  ;;  %vm251_vm8 = vcmp.eq.s32.totalorder %v1443_v58, 0 }
 0x149   :  { %892 = vsinq.f32 %v243_v30  ;;  %vm250_vm11 = vcmp.lt.s32.totalorder %v1443_v58, 2 }
 0x14a   :  { %v344_v20 = vsel %vm261_vm4, %v343_v61, %v342_v57 }
 0x14b   :  { %v347_v5 = vsel %vm1415_vm6, %v1021_v26, %v344_v20 }
 0x14c   :  { %894 = vcosq.f32 %v347_v5 }
 0x152   :  { %v1445_v8 = vpop.eup %890 }
 0x153   :  { %v1447_v13 = vpop.eup %892 }
 0x156   :  { %v1459_v30 = vpop.eup %894 }
 0x17e   :  { %v453_v0 = vpop.permute.xlu1 %452  ;;  %v368_v7 = vpop.permute.xlu0 %367 }
 0x17f   :  { %v1405_v10 = vsub.f32 %v151_v60, %v453_v0  ;;  %v1407_v12 = vsub.f32 %v152_v51, %v453_v0  ;;  %v1409_v14 = vsub.f32 %v151_v60, %v368_v7  ;;  %v1411_v15 = vsub.f32 %v152_v51, %v368_v7 }
 0x181   :  { %v457_v11 = vadd.f32 3.1415927, %v1405_v10  ;;  %v458_v2 = vadd.f32 3.1415927, %v1407_v12  ;;  %v372_v27 = vadd.f32 3.1415927, %v1409_v14 }
 0x182   :  { %v373_v28 = vadd.f32 3.1415927, %v1411_v15 }
 0x183   :  { %v459_v19 = vmul.f32 0.15915494, %v457_v11  ;;  %v374_v31 = vmul.f32 0.15915494, %v372_v27  ;;  %v494_v21 = vpop.permute.xlu1 %493  ;;  %v412_v43 = vpop.permute.xlu0 %411  ;;  %v460_v53 = vmul.f32 0.15915494, %v458_v2 }
 0x184   :  { %v375_v34 = vmul.f32 0.15915494, %v373_v28  ;;  %v496_v35 = vsub.f32 %v151_v60, %v494_v21  ;;  %v1434_v37 = vsub.f32 %v152_v51, %v494_v21  ;;  %v414_v38 = vsub.f32 %v151_v60, %v412_v43 }
 0x185   :  { %v415_v18 = vsub.f32 %v152_v51, %v412_v43  ;;  %v461_v32 = vfloor.f32 %v459_v19  ;;  %v376_v36 = vfloor.f32 %v374_v31  ;;  %v462_v50 = vfloor.f32 %v460_v53 }
 0x186   :  { %v498_v39 = vadd.f32 3.1415927, %v496_v35  ;;  %v499_v40 = vadd.f32 3.1415927, %v1434_v37  ;;  %v416_v41 = vadd.f32 3.1415927, %v414_v38  ;;  %v377_v24 = vfloor.f32 %v375_v34 }
 0x187   :  { %v417_v3 = vadd.f32 3.1415927, %v415_v18  ;;  %v378_v56 = vmul.f32 6.2831855, %v376_v36  ;;  %v463_v9 = vmul.f32 6.2831855, %v461_v32 }
 0x188   :  { %v500_v42 = vmul.f32 0.15915494, %v498_v39  ;;  %v501_v44 = vmul.f32 0.15915494, %v499_v40  ;;  %v535_v45 = vpop.permute.xlu1 %534  ;;  %v438_v4 = vpop.permute.xlu0 %437  ;;  %v418_v46 = vmul.f32 0.15915494, %v416_v41 }
 0x189   :  { %v1437_v47 = vsub.f32 %v151_v60, %v535_v45  ;;  %v1439_v49 = vsub.f32 %v152_v51, %v535_v45  ;;  %896 = vrcp.f32 %v438_v4  ;;  %v419_v29 = vmul.f32 0.15915494, %v417_v3 }
 0x18a   :  { %v502_v52 = vfloor.f32 %v500_v42  ;;  %v503_v22 = vfloor.f32 %v501_v44  ;;  %v420_v54 = vfloor.f32 %v418_v46  ;;  %v379_v57 = vmul.f32 6.2831855, %v377_v24 }
 0x18b   :  { %v539_v1 = vadd.f32 3.1415927, %v1437_v47  ;;  %v540_v55 = vadd.f32 3.1415927, %v1439_v49  ;;  %898 = vsinq.f32 %v347_v5  ;;  %v421_v60 = vfloor.f32 %v419_v29 }
 0x18c   :  { %v504_v59 = vmul.f32 6.2831855, %v502_v52  ;;  %v422_v61 = vmul.f32 6.2831855, %v420_v54  ;;  %v505_v7 = vmul.f32 6.2831855, %v503_v22  ;;  %v1454_v27 = vsub.f32 %v1409_v14, %v378_v56 }
 0x18d   :  { %v541_v51 = vmul.f32 0.15915494, %v539_v1  ;;  %v520_v63 = vpop.permute.xlu0 %519  ;;  %v397_v0 = vpop.permute.xlu1 %396  ;;  %v542_v33 = vmul.f32 0.15915494, %v540_v55  ;;  %v464_v17 = vmul.f32 6.2831855, %v462_v50  ;;  %v1457_v28 = vsub.f32 %v1411_v15, %v379_v57 }
 0x18e   :  { %900 = vrcp.f32 %v520_v63  ;;  %v423_v20 = vmul.f32 6.2831855, %v421_v60  ;;  %v1449_v11 = vsub.f32 %v414_v38, %v422_v61  ;;  %v1451_v2 = vand.u32 3, %v352_v23 }
 0x18f   :  { %902 = vrcp.f32 %v397_v0  ;;  %v543_v62 = vfloor.f32 %v541_v51  ;;  %v1464_v31 = vsub.f32 %v496_v35, %v504_v59  ;;  %v544_v21 = vfloor.f32 %v542_v33 }
 0x190   :  { %v1461_v19 = vsub.f32 %v415_v18, %v423_v20  ;;  %v432_v43 = vmul.f32 %v1449_v11, %v1449_v11  ;;  %v255_v14 = vxor.u32 2147483648, %v1445_v8  ;;  %v1471_v15 = vsub.f32 %v1434_v37, %v505_v7 }
 0x191   :  { %v1476_v34 = vsub.f32 %v1405_v10, %v463_v9  ;;  %v1479_v35 = vsub.f32 %v1407_v12, %v464_v17  ;;  %vm355_vm9 = vcmp.eq.s32.totalorder %v1451_v2, 0  ;;  %vm358_vm10 = vcmp.eq.s32.totalorder %v1451_v2, 2 }
 0x192   :  { %v479_v5 = vpop.permute.xlu1 %478  ;;  %v433_v6 = vmul.f32 %v1461_v19, %v1461_v19  ;;  %v434_v53 = vsub.f32 0.0, %v432_v43  ;;  %v388_v37 = vmul.f32 %v1454_v27, %v1454_v27  ;;  %v389_v18 = vmul.f32 %v1457_v28, %v1457_v28 }
 0x193   :  { %904 = vrcp.f32 %v479_v5  ;;  %v897_v38 = vpop.eup %896  ;;  %v545_v40 = vmul.f32 6.2831855, %v543_v62  ;;  %v514_v10 = vmul.f32 %v1464_v31, %v1464_v31  ;;  %v515_v12 = vmul.f32 %v1471_v15, %v1471_v15 }
 0x194   :  { %v435_v39 = vsub.f32 0.0, %v433_v6  ;;  %v441_v32 = vmul.f32 %v897_v38, %v434_v53  ;;  %v546_v48 = vmul.f32 6.2831855, %v544_v21  ;;  %v252_v23 = vxor.u32 2147483648, %v1447_v13 }
 0x195   :  { %v899_v41 = vpop.eup %898  ;;  %v256_v36 = vsel %vm254_vm7, %v255_v14, %v1447_v13  ;;  %v473_v44 = vmul.f32 %v1476_v34, %v1476_v34  ;;  %v474_v45 = vmul.f32 %v1479_v35, %v1479_v35  ;;  %v516_v4 = vsub.f32 0.0, %v514_v10 }
 0x196   :  { %v442_v24 = vmul.f32 %v897_v38, %v435_v39  ;;  %v443_v46 = vmul.f32 1.442695, %v441_v32  ;;  %v390_v50 = vsub.f32 0.0, %v388_v37  ;;  %v391_v52 = vsub.f32 0.0, %v389_v18  ;;  %v428_v32 = vpop.permute.xlu0 %427 }
 0x197   :  { %v561_v42 = vpop.permute.xlu1 %560  ;;  %v517_v22 = vsub.f32 0.0, %v515_v12  ;;  %v1501_v1 = vsub.f32 %v1437_v47, %v545_v40  ;;  %v1504_v56 = vsub.f32 %v1439_v49, %v546_v48  ;;  %v356_v61 = vxor.u32 2147483648, %v899_v41 }
 0x198   :  { %v901_v3 = vpop.eup %900  ;;  %v445_v54 = vmul.f32 1.442695, %v442_v24  ;;  %906 = vrcp.f32 %v561_v42  ;;  %v359_v51 = vxor.u32 2147483648, %v1459_v30  ;;  %v475_v63 = vsub.f32 0.0, %v473_v44 }
 0x199   :  { %v903_v29 = vpop.eup %902  ;;  %v523_v55 = vmul.f32 %v901_v3, %v516_v4  ;;  %v524_v60 = vmul.f32 %v901_v3, %v517_v22  ;;  %v476_v0 = vsub.f32 0.0, %v474_v45  ;;  %908 = vpow2.f32 %v443_v46 }
 0x19a   :  { %v400_v57 = vmul.f32 %v903_v29, %v390_v50  ;;  %v401_v59 = vmul.f32 %v903_v29, %v391_v52  ;;  %910 = vpow2.f32 %v445_v54  ;;  %v555_v20 = vmul.f32 %v1501_v1, %v1501_v1 }
 0x19b   :  { %v525_v17 = vmul.f32 1.442695, %v523_v55  ;;  %v253_v49 = vsel %vm251_vm8, %v1445_v8, %v252_v23  ;;  %v527_v13 = vmul.f32 1.442695, %v524_v60  ;;  %v556_v62 = vmul.f32 %v1504_v56, %v1504_v56 }
 0x19c   :  { %v402_v7 = vmul.f32 1.442695, %v400_v57  ;;  %v404_v33 = vmul.f32 1.442695, %v401_v59  ;;  %v384_v9 = vpop.permute.xlu1 %383  ;;  %vm354_vm12 = vcmp.lt.s32.totalorder %v1451_v2, 2  ;;  %v357_v5 = vsel %vm355_vm9, %v1459_v30, %v356_v61 }
 0x19d   :  { %v905_v47 = vpop.eup %904  ;;  %v360_v14 = vsel %vm358_vm10, %v359_v51, %v899_v41  ;;  %v257_v8 = vsel %vm250_vm11, %v253_v49, %v256_v36  ;;  %v557_v53 = vsub.f32 0.0, %v555_v20  ;;  %v558_v37 = vsub.f32 0.0, %v556_v62 }
 0x19e   :  { %912 = vpow2.f32 %v402_v7  ;;  %v482_v21 = vmul.f32 %v905_v47, %v475_v63  ;;  %v483_v43 = vmul.f32 %v905_v47, %v476_v0  ;;  %v361_v18 = vsel %vm354_vm12, %v357_v5, %v360_v14  ;;  %v551_v0 = vpop.permute.xlu0 %550 }
 0x19f   :  { %914 = vpow2.f32 %v404_v33  ;;  %v258_v10 = vsel %vm247_vm13, nan, %v257_v8  ;;  %v362_v12 = vsel %vm351_vm14, nan, %v361_v18  ;;  %v386_v26 = vmul.f32 %v384_v9, %v1454_v27 }
 0x1a0   :  { %v484_v6 = vmul.f32 1.442695, %v482_v21  ;;  %v486_v38 = vmul.f32 1.442695, %v483_v43  ;;  %916 = vpow2.f32 %v525_v17  ;;  %v363_v23 = vmul.f32 0.005, %v258_v10 }
 0x1a1   :  { %918 = vpow2.f32 %v527_v13  ;;  %v469_v30 = vpop.permute.xlu1 %468  ;;  %v364_v24 = vmul.f32 0.005, %v362_v12  ;;  %v387_v42 = vmul.f32 %v384_v9, %v1457_v28  ;;  %v430_v4 = vmul.f32 %v428_v32, %v1449_v11 }
 0x1a2   :  { %920 = vpow2.f32 %v484_v6  ;;  %v907_v39 = vpop.eup %906  ;;  %v431_v50 = vmul.f32 %v428_v32, %v1461_v19  ;;  %v471_v27 = vmul.f32 %v469_v30, %v1476_v34  ;;  %v472_v60 = vmul.f32 %v469_v30, %v1479_v35 }
 0x1a3   :  { %922 = vpow2.f32 %v486_v38  ;;  %v564_v2 = vmul.f32 %v907_v39, %v557_v53  ;;  %v565_v40 = vmul.f32 %v907_v39, %v558_v37  ;;  %v909_v41 = vpop.eup %908  ;;  %v553_v34 = vmul.f32 %v551_v0, %v1501_v1  ;;  %v575_v1 = vld [vmem:[%s1547_s5] sm:$0x3] }
 0x1a4   :  { %v911_v58 = vpop.eup %910  ;;  %v447_v29 = vmul.f32 %v909_v41, %v430_v4  ;;  %v554_v49 = vmul.f32 %v551_v0, %v1504_v56  ;;  %v583_v5 = vshrl.u32 %v131_v16, 7  ;;  %v953_v53 = vmov 1983009808  }
 0x1a5   :  { %v566_v25 = vmul.f32 1.442695, %v564_v2  ;;  %v568_v48 = vmul.f32 1.442695, %v565_v40  ;;  %v448_v59 = vmul.f32 %v911_v58, %v431_v50  ;;  %v731_v37 = vunpack.c.l.s4 %v953_v53 }
 0x1a6   :  { %v510_v44 = vpop.permute.xlu1 %509  ;;  %v584_v14 = vsub.s32 0, %v583_v5  ;;  %v588_v6 = vsub.s32 1, %v583_v5 }
 0x1a7   :  { %924 = vpow2.f32 %v566_v25  ;;  %v512_v55 = vmul.f32 %v510_v44, %v1464_v31  ;;  %v513_v11 = vmul.f32 %v510_v44, %v1471_v15  ;;  %v732_v2 = vunpack.c.0.s8 %v731_v37 }
 0x1a8   :  { %v913_v36 = vpop.eup %912  ;;  %926 = vpow2.f32 %v568_v48  ;;  %v585_v38 = vrot.slane %v575_v1, %v584_v14  ;;  %v589_v8 = vrot.slane %v575_v1, %v588_v6 }
 0x1a9   :  { %v915_v45 = vpop.eup %914  ;;  %v406_v3 = vmul.f32 %v913_v36, %v386_v26  ;;  %v735_v32 = vsub.s32 %v732_v2, %v583_v5 }
 0x1aa   :  { %v917_v46 = vpop.eup %916  ;;  %v407_v52 = vmul.f32 %v915_v45, %v387_v42 }
 0x1ab   :  { %v919_v22 = vpop.eup %918  ;;  %v408_v54 = vsub.f32 %v363_v23, %v406_v3  ;;  %v529_v9 = vmul.f32 %v917_v46, %v512_v55  ;;  %v579_v56 = vpop.permute.xlu1 %578 }
 0x1ac   :  { %v921_v57 = vpop.eup %920  ;;  %v409_v28 = vsub.f32 %v364_v24, %v407_v52  ;;  %v530_v17 = vmul.f32 %v919_v22, %v513_v11  ;;  %v592_v18 = vmul.f32 %v585_v38, %v579_v56  ;;  %v593_v39 = vmul.f32 %v589_v8, %v579_v56 }
 0x1ad   :  { %v923_v61 = vpop.eup %922  ;;  %v449_v51 = vsub.f32 %v408_v54, %v447_v29  ;;  %v488_v63 = vmul.f32 %v921_v57, %v471_v27 }
 0x1ae   :  { %v489_v19 = vmul.f32 %v923_v61, %v472_v60  ;;  %v450_v7 = vsub.f32 %v409_v28, %v448_v59 }
 0x1af   :  { %v490_v33 = vsub.f32 %v449_v51, %v488_v63 }
 0x1b0   :  { %v491_v47 = vsub.f32 %v450_v7, %v489_v19 }
 0x1b1   :  { %v531_v31 = vsub.f32 %v490_v33, %v529_v9  ;;  %v925_v20 = vpop.eup %924 }
 0x1b2   :  { %v532_v13 = vsub.f32 %v491_v47, %v530_v17  ;;  %v927_v35 = vpop.eup %926  ;;  %v570_v62 = vmul.f32 %v925_v20, %v553_v34 }
 0x1b3   :  { %v571_v15 = vmul.f32 %v927_v35, %v554_v49 }
 0x1b4   :  { %v572_v21 = vsub.f32 %v531_v31, %v570_v62 }
 0x1b5   :  { %v573_v43 = vsub.f32 %v532_v13, %v571_v15 }
 0x1b7   :  { %759 = vmatprep.mubr.msk.f32.mxu1 %vm648_vm15, %v573_v43 }
 0x1b8   :  { %717 = vmatmul.mubr.f32.vlgmr.msra.gmra.mrb[0].mxu1 %v572_v21 }
 0x28b   :  { %v718_v30 = vpop.f32.mrb[0].mxu1 }
 0x28c   :  { %v723_v40 = vmul.f32 0.0046296297, %v718_v30  ;;  %v720_v10 = vpop.f32.mrb[1].mxu1 }
 0x28d   :  { %v724_v12 = vmul.f32 0.0046296297, %v720_v10 }
 0x28e   :  { %v725_v41 = vadd.f32 %v723_v40, %v592_v18 }
 0x28f   :  { %v726_v16 = vadd.f32 %v724_v12, %v593_v39 }
 0x291   :  { %v729_v25 = vcombine.low %v725_v41, %v726_v16 }
 0x293   :  { %v736_v48 = vrot.slane %v729_v25, %v735_v32 }
 0x295   :  { %741 = vst.msk [vmem:[%s1548_s7] sm:$0xf] %vm740_vm2, %v736_v48 }

// kernel: combined_generator.17
= control target key start
LH: loop header
LB: loop body
LE: loop exit
PB: predicated region body
PF: predicated region fallthrough
CT: control target
= control target key end

     0   :  { %v860_v38 = vmov 1966171168   ;;  %v60_v40 = vlaneseq  ;;  %s1110_s0 = inlined_call_operand.vmem [shape: bf16[2,256,216], index: 0, kind: input, shape index: {}]   ;;  %s1111_s1 = inlined_call_operand.vmem [shape: bf16[1,256], index: 1, kind: input, shape index: {}]   ;;  %s1112_s2 = inlined_call_operand.vmem [shape: f32[2,216], index: 2, kind: input, shape index: {}]   ;;  %s1113_s3 = inlined_call_operand.hbm [shape: f32[2,216], index: 3, kind: output, shape index: {}]  }
   0x1   :  { %v736_v0 = vld [vmem:[%s1110_s0 + $0x4] ss:$8 sps:$4 sm:$0xff]   ;;  %v740_v2 = vld [vmem:[%s1110_s0] ss:$8 sps:$4 sm:$0xff]   ;;  %v742_v4 = vld [vmem:[%s1110_s0 + $0x14] ss:$8 sps:$4 sm:$0xff]   ;;  %v58_v39 = vunpack.c.l.s4 %v860_v38 }
   0x2   :  { %v738_v1 = vld [vmem:[%s1110_s0 + $0x104] ss:$8 sps:$4 sm:$0xff]   ;;  %233 = vmatprep.subr.bf16.mxu0 %v736_v0  ;;  %v741_v3 = vld [vmem:[%s1110_s0 + $0x100] ss:$8 sps:$4 sm:$0xff]   ;;  %v744_v5 = vld [vmem:[%s1110_s0 + $0x114] ss:$8 sps:$4 sm:$0xff]  }
   0x3   :  { %526 = vmatprep.subr.bf16.mxu1 %v738_v1  ;;  %234 = vmatpush1.bf16.msra.mxu0 %v740_v2  ;;  %v746_v6 = vld [vmem:[%s1110_s0 + $0x10] ss:$8 sps:$4 sm:$0xff]   ;;  %v748_v8 = vld [vmem:[%s1110_s0 + $0x24] ss:$8 sps:$4 sm:$0xff]   ;;  %v752_v10 = vld [vmem:[%s1110_s0 + $0x20] ss:$8 sps:$4 sm:$0xff]   ;;  %v59_v45 = vunpack.c.0.s8 %v58_v39 }
   0x4   :  { %527 = vmatpush1.bf16.msra.mxu1 %v741_v3  ;;  %235 = vmatprep.subr.bf16.mxu0 %v742_v4  ;;  %v747_v7 = vld [vmem:[%s1110_s0 + $0x110] ss:$8 sps:$4 sm:$0xff]   ;;  %v750_v9 = vld [vmem:[%s1110_s0 + $0x124] ss:$8 sps:$4 sm:$0xff]   ;;  %v753_v11 = vld [vmem:[%s1110_s0 + $0x120] ss:$8 sps:$4 sm:$0xff]  }
   0x5   :  { %528 = vmatprep.subr.bf16.mxu1 %v744_v5  ;;  %v754_v12 = vld [vmem:[%s1110_s0 + $0x34] ss:$8 sps:$4 sm:$0xff]   ;;  %v758_v14 = vld [vmem:[%s1110_s0 + $0x30] ss:$8 sps:$4 sm:$0xff]   ;;  %v760_v16 = vld [vmem:[%s1110_s0 + $0x44] ss:$8 sps:$4 sm:$0xff]  }
   0x6   :  { %v756_v13 = vld [vmem:[%s1110_s0 + $0x134] ss:$8 sps:$4 sm:$0xff]   ;;  %v759_v15 = vld [vmem:[%s1110_s0 + $0x130] ss:$8 sps:$4 sm:$0xff]   ;;  %v762_v17 = vld [vmem:[%s1110_s0 + $0x144] ss:$8 sps:$4 sm:$0xff]  }
   0x7   :  { %236 = vmatpush1.bf16.msra.mxu0 %v746_v6  ;;  %v764_v18 = vld [vmem:[%s1110_s0 + $0x40] ss:$8 sps:$4 sm:$0xff]   ;;  %v766_v20 = vld [vmem:[%s1110_s0 + $0x54] ss:$8 sps:$4 sm:$0xff]   ;;  %v770_v22 = vld [vmem:[%s1110_s0 + $0x50] ss:$8 sps:$4 sm:$0xff]  }
   0x8   :  { %529 = vmatpush1.bf16.msra.mxu1 %v747_v7  ;;  %237 = vmatprep.subr.bf16.mxu0 %v748_v8  ;;  %v765_v19 = vld [vmem:[%s1110_s0 + $0x140] ss:$8 sps:$4 sm:$0xff]   ;;  %v768_v21 = vld [vmem:[%s1110_s0 + $0x154] ss:$8 sps:$4 sm:$0xff]   ;;  %v771_v23 = vld [vmem:[%s1110_s0 + $0x150] ss:$8 sps:$4 sm:$0xff]  }
   0x9   :  { %530 = vmatprep.subr.bf16.mxu1 %v750_v9  ;;  %v772_v24 = vld [vmem:[%s1110_s0 + $0x64] ss:$8 sps:$4 sm:$0xff]   ;;  %v776_v26 = vld [vmem:[%s1110_s0 + $0x60] ss:$8 sps:$4 sm:$0xff]   ;;  %v778_v28 = vld [vmem:[%s1110_s0 + $0x74] ss:$8 sps:$4 sm:$0xff]  }
   0xa   :  { %v774_v25 = vld [vmem:[%s1110_s0 + $0x164] ss:$8 sps:$4 sm:$0xff]   ;;  %v777_v27 = vld [vmem:[%s1110_s0 + $0x160] ss:$8 sps:$4 sm:$0xff]   ;;  %v780_v29 = vld [vmem:[%s1110_s0 + $0x174] ss:$8 sps:$4 sm:$0xff]  }
   0xb   :  { %238 = vmatpush1.bf16.msra.mxu0 %v752_v10  ;;  %v782_v30 = vld [vmem:[%s1110_s0 + $0x70] ss:$8 sps:$4 sm:$0xff]   ;;  %v784_v32 = vld [vmem:[%s1110_s0 + $0x84] ss:$8 sps:$4 sm:$0xff]   ;;  %v788_v34 = vld [vmem:[%s1110_s0 + $0x80] ss:$8 sps:$4 sm:$0xff]  }
   0xc   :  { %531 = vmatpush1.bf16.msra.mxu1 %v753_v11  ;;  %239 = vmatprep.subr.bf16.mxu0 %v754_v12  ;;  %v783_v31 = vld [vmem:[%s1110_s0 + $0x170] ss:$8 sps:$4 sm:$0xff]   ;;  %v786_v33 = vld [vmem:[%s1110_s0 + $0x184] ss:$8 sps:$4 sm:$0xff]   ;;  %v789_v35 = vld [vmem:[%s1110_s0 + $0x180] ss:$8 sps:$4 sm:$0xff]  }
   0xd   :  { %532 = vmatprep.subr.bf16.mxu1 %v756_v13  ;;  %v790_v36 = vld [vmem:[%s1110_s0 + $0x94] ss:$8 sps:$4 sm:$0xff]   ;;  %v794_v41 = vld [vmem:[%s1110_s0 + $0x90] ss:$8 sps:$4 sm:$0xff]   ;;  %v796_v43 = vld [vmem:[%s1110_s0 + $0xa4] ss:$8 sps:$4 sm:$0xff]  }
   0xe   :  { %v792_v37 = vld [vmem:[%s1110_s0 + $0x194] ss:$8 sps:$4 sm:$0xff]   ;;  %v795_v42 = vld [vmem:[%s1110_s0 + $0x190] ss:$8 sps:$4 sm:$0xff]   ;;  %v798_v44 = vld [vmem:[%s1110_s0 + $0x1a4] ss:$8 sps:$4 sm:$0xff]  }
   0xf   :  { %240 = vmatpush1.bf16.msra.mxu0 %v758_v14  ;;  %v1009_v46 = vshrl.u32 %v60_v40, 7  ;;  %v800_v47 = vld [vmem:[%s1110_s0 + $0xa0] ss:$8 sps:$4 sm:$0xff]   ;;  %v802_v49 = vld [vmem:[%s1110_s0 + $0xb4] ss:$8 sps:$4 sm:$0xff]  }
  0x10   :  { %533 = vmatpush1.bf16.msra.mxu1 %v759_v15  ;;  %241 = vmatprep.subr.bf16.mxu0 %v760_v16  ;;  %v801_v48 = vld [vmem:[%s1110_s0 + $0x1a0] ss:$8 sps:$4 sm:$0xff]   ;;  %v804_v50 = vld [vmem:[%s1110_s0 + $0x1b4] ss:$8 sps:$4 sm:$0xff]  }
  0x11   :  { %534 = vmatprep.subr.bf16.mxu1 %v762_v17  ;;  %v1024_v51 = vsub.s32 %v59_v45, %v1009_v46 }
  0x13   :  { %242 = vmatpush1.bf16.msra.mxu0 %v764_v18 }
  0x14   :  { %535 = vmatpush1.bf16.msra.mxu1 %v765_v19  ;;  %243 = vmatprep.subr.bf16.mxu0 %v766_v20 }
  0x15   :  { %536 = vmatprep.subr.bf16.mxu1 %v768_v21 }
  0x17   :  { %244 = vmatpush1.bf16.msra.mxu0 %v770_v22 }
  0x18   :  { %537 = vmatpush1.bf16.msra.mxu1 %v771_v23  ;;  %245 = vmatprep.subr.bf16.mxu0 %v772_v24 }
  0x19   :  { %538 = vmatprep.subr.bf16.mxu1 %v774_v25 }
  0x1b   :  { %246 = vmatpush1.bf16.msra.mxu0 %v776_v26 }
  0x1c   :  { %539 = vmatpush1.bf16.msra.mxu1 %v777_v27  ;;  %247 = vmatprep.subr.bf16.mxu0 %v778_v28 }
  0x1d   :  { %540 = vmatprep.subr.bf16.mxu1 %v780_v29 }
  0x1f   :  { %248 = vmatpush1.bf16.msra.mxu0 %v782_v30 }
  0x20   :  { %541 = vmatpush1.bf16.msra.mxu1 %v783_v31  ;;  %249 = vmatprep.subr.bf16.mxu0 %v784_v32 }
  0x21   :  { %542 = vmatprep.subr.bf16.mxu1 %v786_v33 }
  0x23   :  { %250 = vmatpush1.bf16.msra.mxu0 %v788_v34 }
  0x24   :  { %543 = vmatpush1.bf16.msra.mxu1 %v789_v35  ;;  %251 = vmatprep.subr.bf16.mxu0 %v790_v36 }
  0x25   :  { %544 = vmatprep.subr.bf16.mxu1 %v792_v37 }
  0x27   :  { %252 = vmatpush1.bf16.msra.mxu0 %v794_v41 }
  0x28   :  { %545 = vmatpush1.bf16.msra.mxu1 %v795_v42  ;;  %253 = vmatprep.subr.bf16.mxu0 %v796_v43 }
  0x29   :  { %546 = vmatprep.subr.bf16.mxu1 %v798_v44 }
  0x2a   :  { %8 = vsyncpa [#allocation3], 0  ;;  %v636_v52 = vld.sshfl [vmem:[%s1111_s1] sm:$0x11 pattern:$0x75316420] }
  0x2b   :  { %254 = vmatpush1.bf16.msra.mxu0 %v800_v47  ;;  %v806_v53 = vld [vmem:[%s1110_s0 + $0xb0] ss:$8 sps:$4 sm:$0xff]   ;;  %v56_v55 = vcombine.high %v636_v52, %v636_v52  ;;  %v808_v56 = vld [vmem:[%s1110_s0 + $0xc4] ss:$8 sps:$4 sm:$0xff]   ;;  %v812_v59 = vld [vmem:[%s1110_s0 + $0xc0] ss:$8 sps:$4 sm:$0xff]   ;;  %v63_v9 = vrot.slane %v636_v52, %v1024_v51 }
  0x2c   :  { %547 = vmatpush1.bf16.msra.mxu1 %v801_v48  ;;  %v807_v54 = vld [vmem:[%s1110_s0 + $0x1b0] ss:$8 sps:$4 sm:$0xff]   ;;  %255 = vmatprep.subr.bf16.mxu0 %v802_v49  ;;  %v810_v57 = vld [vmem:[%s1110_s0 + $0x1c4] ss:$8 sps:$4 sm:$0xff]   ;;  %v813_v60 = vld [vmem:[%s1110_s0 + $0x1c0] ss:$8 sps:$4 sm:$0xff]  }
  0x2d   :  { %548 = vmatprep.subr.bf16.mxu1 %v804_v50  ;;  %v70_v58 = vrot.slane %v56_v55, %v1024_v51  ;;  %v814_v61 = vld [vmem:[%s1110_s0 + $0xd4] ss:$8 sps:$4 sm:$0xff]   ;;  %v818_v63 = vld [vmem:[%s1110_s0 + $0xd0] ss:$8 sps:$4 sm:$0xff]   ;;  %v820_v1 = vld [vmem:[%s1110_s0 + $0xe4] ss:$8 sps:$4 sm:$0xff]  }
  0x2e   :  { %v816_v62 = vld [vmem:[%s1110_s0 + $0x1d4] ss:$8 sps:$4 sm:$0xff]   ;;  %v819_v0 = vld [vmem:[%s1110_s0 + $0x1d0] ss:$8 sps:$4 sm:$0xff]   ;;  %v822_v2 = vld [vmem:[%s1110_s0 + $0x1e4] ss:$8 sps:$4 sm:$0xff]  }
  0x2f   :  { %256 = vmatpush1.bf16.msra.mxu0 %v806_v53  ;;  %265 = vmatprep.mubr.bf16.mxu0 %v70_v58  ;;  %v824_v3 = vld [vmem:[%s1110_s0 + $0xe0] ss:$8 sps:$4 sm:$0xff]   ;;  %v826_v5 = vld [vmem:[%s1110_s0 + $0xf4] ss:$8 sps:$4 sm:$0xff]   ;;  %v830_v7 = vld [vmem:[%s1110_s0 + $0xf0] ss:$8 sps:$4 sm:$0xff]  }
  0x30   :  { %549 = vmatpush1.bf16.msra.mxu1 %v807_v54  ;;  %257 = vmatprep.subr.bf16.mxu0 %v808_v56  ;;  %v825_v4 = vld [vmem:[%s1110_s0 + $0x1e0] ss:$8 sps:$4 sm:$0xff]   ;;  %v828_v6 = vld [vmem:[%s1110_s0 + $0x1f4] ss:$8 sps:$4 sm:$0xff]   ;;  %v831_v8 = vld [vmem:[%s1110_s0 + $0x1f0] ss:$8 sps:$4 sm:$0xff]  }
  0x31   :  { %550 = vmatprep.subr.bf16.mxu1 %v810_v57  ;;  %558 = vmatprep.mubr.bf16.mxu1 %v70_v58  ;;  %vm274_vm0 = vcmask 1040384   ;;  %vm276_vm1 = vcmask 712704   ;;  %v300_v41 = vsub.s32 0, %v1009_v46  ;;  %v304_v42 = vsub.s32 1, %v1009_v46 }
  0x32   :  { %v296_v43 = vld [vmem:[%s1112_s2] ss:$2 sm:$0x3]  ;;  %v733_v44 = vld [vmem:[%s1112_s2 + $0x1] ss:$2 sm:$0x3] }
  0x33   :  { %258 = vmatpush1.bf16.msra.mxu0 %v812_v59  ;;  %v593_v55 = vrot.slane %v733_v44, %v300_v41  ;;  %v597_v56 = vrot.slane %v733_v44, %v304_v42  ;;  %v301_v58 = vrot.slane %v296_v43, %v300_v41  ;;  %v305_v59 = vrot.slane %v296_v43, %v304_v42  ;;  %s861_s2 = smov [#allocation2]  }
  0x34   :  { %551 = vmatpush1.bf16.msra.mxu1 %v813_v60  ;;  %259 = vmatprep.subr.bf16.mxu0 %v814_v61  ;;  %s628_s8 = sshll.u32 %s861_s2, 4  ;;  %vm330_vm2 = vcmp.lt.s32.totalorder %v60_v40, 216  ;;  %s629_s8 = int_to_ptr.vmem [resolvable:$true] %s628_s8 }
  0x35   :  { %552 = vmatprep.subr.bf16.mxu1 %v816_v62  ;;  %s836_s9 = scalar_lea.vmem %s629_s8, 64  ;;  %p841_p1 = scmp.lt.s32.totalorder %s629_s8, %s629_s8 }
  0x36   :  { %p837_p0 = scmp.ne.s32.totalorder %s629_s8, %s836_s9  ;;  %p842_p2 = scmp.lt.s32.totalorder %s836_s9, %s836_s9 }
  0x37   :  { %260 = vmatpush1.bf16.msra.mxu0 %v818_v63 }
  0x38   :  { %553 = vmatpush1.bf16.msra.mxu1 %v819_v0  ;;  %261 = vmatprep.subr.bf16.mxu0 %v820_v1  ;;  %p843_p3 = por %p842_p2, %p841_p1 }
  0x39   :  { %554 = vmatprep.subr.bf16.mxu1 %v822_v2 }
  0x3a   :  { %p844_p4 = pnand %p843_p3, %p837_p0 }
  0x3b   :  { %262 = vmatpush1.bf16.msra.mxu0 %v824_v3 }
  0x3c   :  { %555 = vmatpush1.bf16.msra.mxu1 %v825_v4  ;;  %263 = vmatprep.subr.bf16.mxu0 %v826_v5 }
  0x3d   :  { %556 = vmatprep.subr.bf16.mxu1 %v828_v6 }
  0x3f   :  { %264 = vmatpush1.bf16.msra.mxu0 %v830_v7 }
  0x40   :  { %557 = vmatpush1.bf16.msra.mxu1 %v831_v8 }
  0x42   :  { %266 = vmatmul.mubr.bf16.vlgmr.msra.gmra.mrb[0].mxu0 %v63_v9 }
  0x43   :  { %559 = vmatmul.mubr.bf16.vlgmr.msra.gmra.mrb[0].mxu1 %v63_v9 }
 0x115   :  { %v267_v10 = vpop.f32.mrb[0].mxu0 }
 0x116   :  { %v560_v11 = vpop.f32.mrb[0].mxu1  ;;  %v269_v12 = vpop.f32.mrb[1].mxu0  ;;  %v275_v15 = vsel %vm274_vm0, %v267_v10, inf  ;;  %v281_v17 = vsel %vm274_vm0, %v267_v10, -inf }
 0x117   :  { %v562_v13 = vpop.f32.mrb[1].mxu1  ;;  %v567_v14 = vsel %vm274_vm0, %v560_v11, inf  ;;  %v572_v16 = vsel %vm274_vm0, %v560_v11, -inf  ;;  %v271_v18 = vpop.f32.mrb[2].mxu0  ;;  %v277_v21 = vsel %vm276_vm1, %v269_v12, inf  ;;  %v282_v23 = vsel %vm276_vm1, %v269_v12, -inf }
 0x118   :  { %v564_v19 = vpop.f32.mrb[2].mxu1  ;;  %v568_v20 = vsel %vm276_vm1, %v562_v13, inf  ;;  %v573_v22 = vsel %vm276_vm1, %v562_v13, -inf  ;;  %v272_v24 = vpop.f32.mrb[3].mxu0  ;;  %v278_v27 = vmin.f32 %v275_v15, %v277_v21  ;;  %v283_v29 = vmax.f32 %v281_v17, %v282_v23 }
 0x119   :  { %v565_v25 = vpop.f32.mrb[3].mxu1  ;;  %v569_v26 = vmin.f32 %v567_v14, %v568_v20  ;;  %v574_v28 = vmax.f32 %v572_v16, %v573_v22 }
 0x11a   :  { %279 = vmin.xlane.f32.xlu0 %v278_v27 }
 0x11b   :  { %570 = vmin.xlane.f32.xlu1 %v569_v26 }
 0x11e   :  { %284 = vmax.xlane.f32.xlu0 %v283_v29 }
 0x11f   :  { %575 = vmax.xlane.f32.xlu1 %v574_v28 }
 0x1a7   :  { %v280_v31 = vpop.xlane.xlu0 %279 }
 0x1a8   :  { %v571_v30 = vpop.xlane.xlu1 %570  ;;  %v286_v38 = vsub.f32 %v267_v10, %v280_v31  ;;  %v287_v39 = vsub.f32 %v269_v12, %v280_v31 }
 0x1a9   :  { %v577_v36 = vsub.f32 %v560_v11, %v571_v30  ;;  %v578_v37 = vsub.f32 %v562_v13, %v571_v30 }
 0x1aa   :  { %v288_v49 = vmul.f32 0.042557, %v286_v38  ;;  %v289_v50 = vmul.f32 0.042557, %v287_v39 }
 0x1ab   :  { %v285_v33 = vpop.xlane.xlu0 %284  ;;  %v579_v45 = vmul.f32 0.042557, %v577_v36  ;;  %v580_v47 = vmul.f32 0.042557, %v578_v37 }
 0x1ac   :  { %v576_v32 = vpop.xlane.xlu1 %575  ;;  %v290_v35 = vsub.f32 %v285_v33, %v280_v31 }
 0x1ad   :  { %v581_v34 = vsub.f32 %v576_v32, %v571_v30 }
 0x1af   :  { %832 = vrcp.f32 %v581_v34 }
 0x1b0   :  { %834 = vrcp.f32 %v290_v35 }
 0x1b9   :  { %v833_v48 = vpop.eup %832 }
 0x1ba   :  { %v835_v52 = vpop.eup %834  ;;  %v583_v53 = vmul.f32 %v833_v48, %v579_v45  ;;  %v584_v54 = vmul.f32 %v833_v48, %v580_v47 }
 0x1bb   :  { %v292_v57 = vmul.f32 %v835_v52, %v288_v49  ;;  %v293_v46 = vmul.f32 %v835_v52, %v289_v50 }
 0x1bc   :  { %v585_v60 = vadd.f32 -0.01563, %v583_v53  ;;  %v586_v61 = vadd.f32 -0.01563, %v584_v54 }
 0x1bd   :  { %v294_v62 = vadd.f32 -0.01563, %v292_v57  ;;  %v295_v63 = vadd.f32 -0.01563, %v293_v46 }
 0x1be   :  { %v600_v0 = vadd.f32 %v593_v55, %v585_v60  ;;  %v601_v1 = vadd.f32 %v597_v56, %v586_v61 }
 0x1bf   :  { %v308_v2 = vadd.f32 %v301_v58, %v294_v62  ;;  %v309_v3 = vadd.f32 %v305_v59, %v295_v63 }
 0x1c0   :  { %v604_v4 = vcombine.low %v600_v0, %v601_v1 }
 0x1c1   :  { %v312_v5 = vcombine.low %v308_v2, %v309_v3 }
 0x1c2   :  { %v611_v6 = vrot.slane %v604_v4, %v1024_v51 }
 0x1c3   :  { %v319_v7 = vrot.slane %v312_v5, %v1024_v51 }
 0x1c4   :  { %v618_v8 = vrot.slane %v611_v6, %v1024_v51 }
 0x1c5   :  { %v326_v9 = vrot.slane %v319_v7, %v1024_v51 }
 0x1c6   :  { %621 = vst.msk [vmem:[#allocation2 + $0x1] ss:$2 sm:$0x3] %vm330_vm2, %v618_v8 }
 0x1c7   :  { %332 = vst.msk [vmem:[#allocation2] ss:$2 sm:$0x3] %vm330_vm2, %v326_v9 }
 0x1c8   :  { %847 = shalt.err (!%p844_p4)
}
 0x1c9   :  { %s848_s12 = scalar_lea.hbm %s1113_s3, 64 }
 0x1ca   :  { %p849_p5 = scmp.ne.s32.totalorder %s1113_s3, %s848_s12  ;;  %p852_p6 = scmp.lt.u32.totalorder %s848_s12, %s1113_s3 }
 0x1cc   :  { %p854_p7 = pnand %p852_p6, %p849_p5 }
 0x1ce   :  { %857 = shalt.err (!%p854_p7)
}
 0x1cf   :  { %631 = dma.vmem_to_hbm [thread:$0]  %s629_s8, 64, %s1113_s3, [#allocation3]  }
 0x1d0   :  { %858 = dma.done.wait [#allocation3], 64  }
 0x1d1   :  { %859 = vsyncadd [#allocation3], 4294967232 }
 0x1d2   :  { %635 = vsyncpa [#allocation3], 1 }

</bundles_post_ra>
